<compile_context>
chip_gen: v5e
topology: v5e:2x2
jax: 0.10.0
libtpu: 0.0.40
codegen_flags: <defaults>
</compile_context>

<pallas_src>
import jax
import jax.numpy as jnp
from jax.experimental import pallas as pl
from jax.experimental.pallas import tpu as pltpu


def gelu_linear_kernel(x_ref, w_ref, b_ref, o_ref):
    # x_ref: (M, tk)   f32   activation K-slice
    # w_ref: (Cout, tk) bf16 torch-layout weight K-slice
    # b_ref: (1, Cout) f32   bias
    # o_ref: (M, Cout) f32   output, used as the accumulator across K steps
    k = pl.program_id(0)

    @pl.when(k == 0)
    def _():
        o_ref[...] = jnp.zeros_like(o_ref)

    x = x_ref[...].astype(jnp.float32)
    # Exact GELU (approximate='none'): 0.5 * x * (1 + erf(x / sqrt(2)))
    g = 0.5 * x * (1.0 + jax.lax.erf(x * jnp.float32(0.7071067811865476)))

    # (M, tk) x (Cout, tk) contracting on dim 1 of both -> (M, Cout).
    # bf16 operands, f32 accumulation on the MXU.
    o_ref[...] += jax.lax.dot_general(
        g.astype(jnp.bfloat16),
        w_ref[...],
        dimension_numbers=(((1,), (1,)), ((), ())),
        preferred_element_type=jnp.float32,
    )

    @pl.when(k == pl.num_programs(0) - 1)
    def _():
        o_ref[...] = o_ref[...] + b_ref[...].astype(jnp.float32)


def gelu_linear(x_nhwc, weight, bias, *, tk=512):
    """x_nhwc: (N, H, W, Cin); weight: (Cout, Cin) torch-style; bias: (Cout,)."""
    N, H, W, Cin = x_nhwc.shape
    Cout = weight.shape[0]
    M = N * H * W
    assert Cin % tk == 0, (Cin, tk)
    n_k = Cin // tk

    x2d = x_nhwc.reshape(M, Cin)
    # Halve the dominant (weight) DMA; ideally the weight is already stored bf16.
    w_bf16 = weight.astype(jnp.bfloat16)
    b2d = bias.reshape(1, Cout).astype(jnp.float32)

    bytes_accessed = (
        M * Cin * x2d.dtype.itemsize      # activations
        + Cout * Cin * 2                  # bf16 weight
        + Cout * 4                        # bias
        + M * Cout * 4                    # output
    )
    cost = pl.CostEstimate(
        flops=2 * M * Cin * Cout,
        transcendentals=M * Cin,
        bytes_accessed=bytes_accessed,
    )

    out2d = pl.pallas_call(
        gelu_linear_kernel,
        out_shape=jax.ShapeDtypeStruct((M, Cout), x_nhwc.dtype),
        grid=(n_k,),
        in_specs=[
            pl.BlockSpec((M, tk), lambda k: (0, k)),       # x K-slice
            pl.BlockSpec((Cout, tk), lambda k: (0, k)),    # torch-layout weight K-slice
            pl.BlockSpec((1, Cout), lambda k: (0, 0)),     # bias (resident)
        ],
        out_specs=pl.BlockSpec((M, Cout), lambda k: (0, 0)),  # resident accumulator
        compiler_params=pltpu.CompilerParams(
            dimension_semantics=("arbitrary",)),
        cost_estimate=cost,
    )(x2d, w_bf16, b2d)

    return out2d.reshape(N, H, W, Cout)


def reference(x_nhwc, weight, bias):
    x = x_nhwc.astype(jnp.float32)
    g = 0.5 * x * (1.0 + jax.lax.erf(x / jnp.sqrt(2.0).astype(jnp.float32)))
    return jnp.einsum("nhwc,oc->nhwo", g, weight.astype(jnp.float32)) + bias


if __name__ == "__main__":
    key = jax.random.PRNGKey(0)
    kx, kw, kb = jax.random.split(key, 3)

    N, H, W, Cin, Cout = 1, 14, 14, 1536, 384

    x = jax.random.normal(kx, (N, H, W, Cin), dtype=jnp.float32)
    # Deterministic param init (roughly torch's default uniform init scale)
    bound = 1.0 / jnp.sqrt(jnp.float32(Cin))
    weight = jax.random.uniform(kw, (Cout, Cin), jnp.float32, -bound, bound)
    bias = jax.random.uniform(kb, (Cout,), jnp.float32, -bound, bound)

    out = gelu_linear(x, weight, bias)
    out = jax.block_until_ready(out)

    ref = reference(x, weight, bias)
    assert out.shape == (N, H, W, Cout), out.shape
    # bf16 MXU operands -> loosened tolerance vs the pure-f32 reference.
    assert jnp.allclose(out, ref, atol=2e-2, rtol=2e-2), float(
        jnp.max(jnp.abs(out - ref)))

    print("KERNEL_OK")
</pallas_src>

<mosaic_0001>
module attributes {stable_mosaic.version = 11 : i64} {
  func.func @gelu_linear_kernel(%arg0: i32, %arg1: memref<196x512xf32, #tpu.memory_space<vmem>>, %arg2: memref<384x512xbf16, #tpu.memory_space<vmem>>, %arg3: memref<1x384xf32, #tpu.memory_space<vmem>>, %arg4: memref<196x384xf32, #tpu.memory_space<vmem>>) attributes {dimension_semantics = [#tpu.dimension_semantics<arbitrary>], iteration_bounds = array<i64: 3>, scalar_prefetch = 0 : i64, scratch_operands = 0 : i64, tpu.core_type = #tpu.core_type<tc>, window_params = [{transform_indices = @transform_0, window_bounds = array<i64: 196, 512>}, {transform_indices = @transform_1, window_bounds = array<i64: 384, 512>}, {pipeline_mode = #tpu.pipeline_mode<synchronous>, transform_indices = @transform_2, window_bounds = array<i64: 1, 384>}, {pipeline_mode = #tpu.pipeline_mode<synchronous>, transform_indices = @transform_3, window_bounds = array<i64: 196, 384>}]} {
    %c0_i32 = arith.constant 0 : i32
    %0 = arith.cmpi eq, %arg0, %c0_i32 : i32
    %1 = arith.extui %0 : i1 to i32
    %c0_i32_0 = arith.constant 0 : i32
    %2 = arith.cmpi ne, %1, %c0_i32_0 : i32
    scf.if %2 {
      %cst_12 = arith.constant 0.000000e+00 : f32
      %21 = vector.broadcast %cst_12 : f32 to vector<196x384xf32>
      %c0_13 = arith.constant 0 : index
      %c0_14 = arith.constant 0 : index
      %22 = vector.load %arg4[%c0_13, %c0_14] : memref<196x384xf32, #tpu.memory_space<vmem>>, vector<196x384xf32>
      tpu.vector_store %arg4[%c0_13, %c0_14], %21 {strides = array<i32>} : memref<196x384xf32, #tpu.memory_space<vmem>>, vector<196x384xf32>,
    } else {
    }
    %c0 = arith.constant 0 : index
    %c0_1 = arith.constant 0 : index
    %3 = vector.load %arg1[%c0, %c0_1] : memref<196x512xf32, #tpu.memory_space<vmem>>, vector<196x512xf32>
    %cst = arith.constant 5.000000e-01 : f32
    %4 = vector.broadcast %cst : f32 to vector<196x512xf32>
    %5 = arith.mulf %4, %3 : vector<196x512xf32>
    %cst_2 = arith.constant 0.707106769 : f32
    %6 = vector.broadcast %cst_2 : f32 to vector<196x512xf32>
    %7 = arith.mulf %3, %6 : vector<196x512xf32>
    %8 = math.erf %7 : vector<196x512xf32>
    %cst_3 = arith.constant 1.000000e+00 : f32
    %9 = vector.broadcast %cst_3 : f32 to vector<196x512xf32>
    %10 = arith.addf %9, %8 : vector<196x512xf32>
    %11 = arith.mulf %5, %10 : vector<196x512xf32>
    %c0_4 = arith.constant 0 : index
    %c0_5 = arith.constant 0 : index
    %12 = vector.load %arg4[%c0_4, %c0_5] : memref<196x384xf32, #tpu.memory_space<vmem>>, vector<196x384xf32>
    %13 = arith.truncf %11 : vector<196x512xf32> to vector<196x512xbf16>
    %c0_6 = arith.constant 0 : index
    %c0_7 = arith.constant 0 : index
    %14 = vector.load %arg2[%c0_6, %c0_7] : memref<384x512xbf16, #tpu.memory_space<vmem>>, vector<384x512xbf16>
    %cst_8 = arith.constant dense<0.000000e+00> : vector<196x384xf32>
    %15 = tpu.matmul %13, %14, %cst_8 {dimension_numbers = #tpu.dot_dimension_numbers<[1], [1], [0], [0], [0, 0, 1, 0], [], []>} : vector<196x512xbf16>, vector<384x512xbf16>, vector<196x384xf32> -> vector<196x384xf32>
    %16 = arith.addf %12, %15 : vector<196x384xf32>
    %c0_9 = arith.constant 0 : index
    %c0_10 = arith.constant 0 : index
    %17 = vector.load %arg4[%c0_9, %c0_10] : memref<196x384xf32, #tpu.memory_space<vmem>>, vector<196x384xf32>
    tpu.vector_store %arg4[%c0_9, %c0_10], %16 {strides = array<i32>} : memref<196x384xf32, #tpu.memory_space<vmem>>, vector<196x384xf32>,
    %c2_i32 = arith.constant 2 : i32
    %18 = arith.cmpi eq, %arg0, %c2_i32 : i32
    %19 = arith.extui %18 : i1 to i32
    %c0_i32_11 = arith.constant 0 : i32
    %20 = arith.cmpi ne, %19, %c0_i32_11 : i32
    scf.if %20 {
      %c0_12 = arith.constant 0 : index
      %c0_13 = arith.constant 0 : index
      %21 = vector.load %arg4[%c0_12, %c0_13] : memref<196x384xf32, #tpu.memory_space<vmem>>, vector<196x384xf32>
      %c0_14 = arith.constant 0 : index
      %c0_15 = arith.constant 0 : index
      %22 = vector.load %arg3[%c0_14, %c0_15] : memref<1x384xf32, #tpu.memory_space<vmem>>, vector<1x384xf32>
      %23 = vector.broadcast %22 : vector<1x384xf32> to vector<196x384xf32>
      %24 = arith.addf %21, %23 : vector<196x384xf32>
      %c0_16 = arith.constant 0 : index
      %c0_17 = arith.constant 0 : index
      %25 = vector.load %arg4[%c0_16, %c0_17] : memref<196x384xf32, #tpu.memory_space<vmem>>, vector<196x384xf32>
      tpu.vector_store %arg4[%c0_16, %c0_17], %24 {strides = array<i32>} : memref<196x384xf32, #tpu.memory_space<vmem>>, vector<196x384xf32>,
    } else {
    }
    return
  }
  func.func @transform_0(%arg0: i32) -> (i32, i32) {
    %c0_i32 = arith.constant 0 : i32
    %c0_i32_0 = arith.constant 0 : i32
    return %c0_i32, %arg0 : i32, i32
  }
  func.func @transform_1(%arg0: i32) -> (i32, i32) {
    %c0_i32 = arith.constant 0 : i32
    %c0_i32_0 = arith.constant 0 : i32
    return %c0_i32, %arg0 : i32, i32
  }
  func.func @transform_2(%arg0: i32) -> (i32, i32) {
    %c0_i32 = arith.constant 0 : i32
    %c0_i32_0 = arith.constant 0 : i32
    %c0_i32_1 = arith.constant 0 : i32
    return %c0_i32, %c0_i32_0 : i32, i32
  }
  func.func @transform_3(%arg0: i32) -> (i32, i32) {
    %c0_i32 = arith.constant 0 : i32
    %c0_i32_0 = arith.constant 0 : i32
    %c0_i32_1 = arith.constant 0 : i32
    return %c0_i32, %c0_i32_0 : i32, i32
  }
}

</mosaic_0001>

<bundles_post_ra>
// kernel: tpu_custom_call.1
= control target key start
LH: loop header
LB: loop body
LE: loop exit
PB: predicated region body
PF: predicated region fallthrough
CT: control target
= control target key end

     0   :  { %s12790_s0 = inlined_call_operand.hbm [shape: f32[196,1536], index: 0, kind: input, shape index: {}]   ;;  %s12791_s1 = inlined_call_operand.hbm [shape: bf16[384,1536], index: 1, kind: input, shape index: {}]   ;;  %s12792_s2 = inlined_call_operand.hbm [shape: f32[1,384], index: 2, kind: input, shape index: {}]   ;;  %s12793_s3 = inlined_call_operand.hbm [shape: f32[196,384], index: 3, kind: output, shape index: {}]  }
   0x1   :  { %12848 = sst [smem:[#allocation41_spill]] %s12790_s0 }
   0x2   :  { %8 = vsyncpa [#allocation3], 0 }
   0x3   :  { %10 = vsyncpa [#allocation3 + $0x1], 0 }
   0x4   :  { %11 = vsyncpa [#allocation6], 0 }
   0x5   :  { %13 = vsyncpa [#allocation6 + $0x1], 0 }
   0x6   :  { %14 = vsyncpa [#allocation4], 0  ;;  %s7945_s12 = smov 0   ;;  %s7947_s13 = smov 0  }
   0x7   :  { %s7949_s14 = smov 0   ;;  %s7951_s15 = smov 0  }
   0x8 LB: > { %s7964_s16 = sadd.s32 4294967295, %s7912_s15   ;;  %s7967_s17 = sadd.s32 1, %s7912_s15   ;;  %s7912_s15 = sphi %s7951_s15, %s13265_s15   ;;  %s7908_s14 = sphi %s7949_s14, %s13264_s14   ;;  %s7904_s13 = sphi %s7947_s13, %s13263_s13   ;;  %s7900_s12 = sphi %s7945_s12, %s13262_s12  }
   0x9   : > { %s24_s18 = ssub.s32 %s7912_s15, %s7967_s17  ;;  %s27_s19 = sadd.s32 1, %s7908_s14 }
   0xa   : > { %p25_p0 = scmp.eq.s32.totalorder %s24_s18, 0  ;;  %p34_p1 = scmp.ne.s32.totalorder %s7908_s14, %s7904_s13 }
   0xb   : > { %p35_p2 = scmp.eq.s32.totalorder %s7912_s15, 0  ;;  %p40_p3 = scmp.ne.s32.totalorder %s7904_s13, %s7900_s12 }
   0xc   : > { %s7977_s20 = scalar_select %p25_p0, %s7908_s14, %s27_s19  }
   0xd   : > { %p7979_p4 = por %p35_p2, %p34_p1  ;;  %p41_p5 = scmp.eq.s32.totalorder %s7964_s16, 0 }
   0xe   : > { %p6876_p6 = scmp.ge.s32.totalorder %s7912_s15, 1  ;;  %p119_p7 = scmp.lt.s32.totalorder %s7912_s15, 4 }
   0xf   : > { %p7988_p8 = por %p41_p5, %p40_p3  ;;  %p6877_p9 = scmp.ne.s32.totalorder %s7964_s16, 0 }
  0x10   : > { %p7993_p10 = pnand %p6876_p6, %p119_p7  ;;  %s131_s26 = sshll.u32 %s12792_s2, 4  ;;  %s132_s26 = int_to_ptr.hbm [resolvable:$true] %s131_s26 }
  0x11   : > { %s7914_s27 = smov [#allocation7]   ;;  %p7501_p13 = scmp.lt.s32.totalorder %s7912_s15, 3 }
  0x12   : > { %p7489_p11 = pneg %p7993_p10  ;;  %s133_s28 = sshll.u32 %s7914_s27, 4  ;;  %s134_s28 = int_to_ptr.vmem [resolvable:$true] %s133_s28 }
  0x13   : > { %s8006_s29 = sand.u32 1, %s7908_s14   ;;  %s7375_s30 = sshll.u32 %s7912_s15, 5 }
  0x14   : > { %p7490_p12 = pnand %p7489_p11, %p41_p5  ;;  %p8011_p0 = pnand %p7501_p13, %p7979_p4 }
  0x15   : > { %s7473_s5 = smul.u32 800, %s8006_s29  ;;  %s12853_s0 = sld [smem:[#allocation41_spill]] }
  0x16   : > { %7492 = dma.hbm_to_vmem [thread:$0]  (!%p7490_p12), %s132_s26, 48, %s134_s28, [#allocation6]  }
  0x17   : > { %s148_s10 = scalar_lea.vmem [#allocation2], %s7473_s5  ;;  %s145_s12 = scalar_lea.sflag [#allocation3], %s8006_s29 }
  0x18   : > { %s156_s11 = sshll.u32 %s148_s10, 4  ;;  %p7782_p2 = pneg %p8011_p0  ;;  %s157_s11 = int_to_ptr.vmem [resolvable:$true] %s156_s11 }
  0x1b   : > { %s153_s8 = scalar_lea.hbm %s12853_s0, %s7375_s30  ;;  %s7785_s25 = scalar_lea.hbm %s12853_s0, 2400 }
  0x1c   : > { %s154_s9 = sshll.u32 %s153_s8, 4  ;;  %s155_s9 = int_to_ptr.hbm [resolvable:$true] %s154_s9 }
  0x1d   : > { %s7778_s18 = sshra.s32 %s155_s9, 4  ;;  %s7779_s18 = int_to_ptr.hbm [resolvable:$true] %s7778_s18 }
  0x1e   : > { %s7780_s19 = scalar_lea.hbm %s7779_s18, 800  ;;  %p7786_p6 = scmp.lt.s32.totalorder %s7779_s18, %s12853_s0 }
  0x1f   : > { %p7781_p1 = scmp.ne.s32.totalorder %s7779_s18, %s7780_s19  ;;  %p7787_p7 = scmp.lt.s32.totalorder %s7785_s25, %s7780_s19 }
  0x21   : > { %p7783_p3 = pnand %p7782_p2, %p7781_p1  ;;  %p7788_p11 = por %p7787_p7, %p7786_p6 }
  0x23   : > { %p7784_p4 = pneg %p7783_p3 }
  0x25   : > { %p7789_p12 = pnand %p7788_p11, %p7784_p4 }
  0x27   : > { %7792 = shalt.err (!%p7789_p12)
}
  0x28   : > { %s7915_s28 = smov 1536   ;;  %s7916_s30 = smov 512  }
  0x29   : > { %s7917_s5 = smov 32   ;;  %s7474_s6 = smul.u32 768, %s8006_s29 }
  0x2a   : > { %7496 = dma.hbm_to_vmem [thread:$0]  (!%p8011_p0), %s155_s9, 12800, %s157_s11, %s145_s12, %s7915_s28, %s7916_s30, %s7917_s5  }
  0x2b   : > { %s166_s7 = sand.u32 1, %s7912_s15   ;;  %s7376_s8 = sshll.u32 %s7912_s15, 4 }
  0x2c   : > { %s175_s18 = scalar_lea.hbm %s12791_s1, %s7376_s8  ;;  %s170_s24 = scalar_lea.vmem [#allocation5], %s7474_s6 }
  0x2d   : > { %s176_s19 = sshll.u32 %s175_s18, 4  ;;  %s178_s25 = sshll.u32 %s170_s24, 4  ;;  %s177_s19 = int_to_ptr.hbm [resolvable:$true] %s176_s19  ;;  %s179_s25 = int_to_ptr.vmem [resolvable:$true] %s178_s25 }
  0x2e   : > { %s167_s26 = scalar_lea.sflag [#allocation6], %s166_s7  ;;  %s7808_s27 = sshra.s32 %s177_s19, 4  ;;  %s7809_s27 = int_to_ptr.hbm [resolvable:$true] %s7808_s27 }
  0x2f   : > { %s7810_s0 = scalar_lea.hbm %s7809_s27, 768  ;;  %s7815_s9 = scalar_lea.hbm %s12791_s1, 2304 }
  0x30   : > { %p7811_p13 = scmp.ne.s32.totalorder %s7809_s27, %s7810_s0  ;;  %p7816_p4 = scmp.lt.s32.totalorder %s7809_s27, %s12791_s1 }
  0x31   : > { %p7817_p6 = scmp.lt.s32.totalorder %s7815_s9, %s7810_s0 }
  0x32   : > { %p7813_p1 = pnand %p7811_p13, %p7782_p2 }
  0x33   : > { %p7818_p7 = por %p7817_p6, %p7816_p4 }
  0x34   : > { %p7814_p3 = pneg %p7813_p1 }
  0x36   : > { %p7819_p11 = pnand %p7818_p7, %p7814_p3 }
  0x38   : > { %7822 = shalt.err (!%p7819_p11)
}
  0x39   : > { %s7918_s28 = smov 768   ;;  %s7919_s30 = smov 256  }
  0x3a   : > { %s7920_s5 = smov 16   ;;  %190 = sbr.rel (%p7993_p10) target bundleno = 1924 (0x784), region = 32 }
  0x3b   : > { %7499 = dma.hbm_to_vmem [thread:$0]  (!%p8011_p0), %s177_s19, 12288, %s179_s25, %s167_s26, %s7918_s28, %s7919_s30, %s7920_s5  }
  0x3f   : > { %s192_s6 = sand.u32 1, %s7904_s13  }
  0x40   : > { %s7475_s7 = smul.u32 800, %s192_s6  ;;  %s193_s8 = scalar_lea.sflag [#allocation3], %s192_s6 }
  0x42   : > { %s8053_s10 = scalar_lea.vmem [#allocation2], %s7475_s7 }
  0x43   : > { %7883 = dma.done.wait (%p7988_p8), %s193_s8, 12800  }
  0x44   : > { %7885 = vsyncadd (%p7988_p8), %s193_s8, 4294954496  ;;  %s202_s0 = sand.u32 1, %s7964_s16   ;;  %s7476_s4 = smul.u32 768, %s192_s6 }
  0x45   : > { %s203_s21 = scalar_lea.sflag [#allocation6], %s202_s0 }
  0x46   : > { %s8060_s18 = scalar_lea.vmem [#allocation5], %s7476_s4 }
  0x47   : > { %7887 = dma.done.wait (%p7988_p8), %s203_s21, 12288  }
  0x48   : > { %7889 = vsyncadd (%p7988_p8), %s203_s21, 4294955008 }
  0x49   : > { %7891 = dma.done.wait (%p41_p5), [#allocation6], 48  }
  0x4a   : > { %7893 = vsyncadd (%p41_p5), [#allocation6], 4294967248  ;;  %240 = sbr.rel (%p6877_p9) target bundleno = 155 (0x9b), region = 48 }
  0x4f   : > { %v7921_v0 = vmov 0.0  }
  0x50   : > { %241 = vst [vmem:[#allocation8] sm:$0xff] %v7921_v0 }
  0x51   : > { %242 = vst [vmem:[#allocation8 + $0x8] sm:$0xff] %v7921_v0 }
  0x52   : > { %243 = vst [vmem:[#allocation8 + $0x10] sm:$0xff] %v7921_v0 }
  0x53   : > { %244 = vst [vmem:[#allocation8 + $0x18] sm:$0xff] %v7921_v0 }
  0x54   : > { %245 = vst [vmem:[#allocation8 + $0x20] sm:$0xff] %v7921_v0 }
  0x55   : > { %246 = vst [vmem:[#allocation8 + $0x28] sm:$0xff] %v7921_v0 }
  0x56   : > { %247 = vst [vmem:[#allocation8 + $0x30] sm:$0xff] %v7921_v0 }
  0x57   : > { %248 = vst [vmem:[#allocation8 + $0x38] sm:$0xff] %v7921_v0 }
  0x58   : > { %249 = vst [vmem:[#allocation8 + $0x40] sm:$0xff] %v7921_v0 }
  0x59   : > { %250 = vst [vmem:[#allocation8 + $0x48] sm:$0xff] %v7921_v0 }
  0x5a   : > { %251 = vst [vmem:[#allocation8 + $0x50] sm:$0xff] %v7921_v0 }
  0x5b   : > { %252 = vst [vmem:[#allocation8 + $0x58] sm:$0xff] %v7921_v0 }
  0x5c   : > { %253 = vst [vmem:[#allocation8 + $0x60] sm:$0xff] %v7921_v0 }
  0x5d   : > { %254 = vst [vmem:[#allocation8 + $0x68] sm:$0xff] %v7921_v0 }
  0x5e   : > { %255 = vst [vmem:[#allocation8 + $0x70] sm:$0xff] %v7921_v0 }
  0x5f   : > { %256 = vst [vmem:[#allocation8 + $0x78] sm:$0xff] %v7921_v0 }
  0x60   : > { %257 = vst [vmem:[#allocation8 + $0x80] sm:$0xff] %v7921_v0 }
  0x61   : > { %258 = vst [vmem:[#allocation8 + $0x88] sm:$0xff] %v7921_v0 }
  0x62   : > { %259 = vst [vmem:[#allocation8 + $0x90] sm:$0xff] %v7921_v0 }
  0x63   : > { %260 = vst [vmem:[#allocation8 + $0x98] sm:$0xff] %v7921_v0 }
  0x64   : > { %261 = vst [vmem:[#allocation8 + $0xa0] sm:$0xff] %v7921_v0 }
  0x65   : > { %262 = vst [vmem:[#allocation8 + $0xa8] sm:$0xff] %v7921_v0 }
  0x66   : > { %263 = vst [vmem:[#allocation8 + $0xb0] sm:$0xff] %v7921_v0 }
  0x67   : > { %264 = vst [vmem:[#allocation8 + $0xb8] sm:$0xff] %v7921_v0 }
  0x68   : > { %265 = vst [vmem:[#allocation8 + $0xc0] sm:$0xff] %v7921_v0 }
  0x69   : > { %266 = vst [vmem:[#allocation8 + $0xc8] sm:$0xff] %v7921_v0 }
  0x6a   : > { %267 = vst [vmem:[#allocation8 + $0xd0] sm:$0xff] %v7921_v0 }
  0x6b   : > { %268 = vst [vmem:[#allocation8 + $0xd8] sm:$0xff] %v7921_v0 }
  0x6c   : > { %269 = vst [vmem:[#allocation8 + $0xe0] sm:$0xff] %v7921_v0 }
  0x6d   : > { %270 = vst [vmem:[#allocation8 + $0xe8] sm:$0xff] %v7921_v0 }
  0x6e   : > { %271 = vst [vmem:[#allocation8 + $0xf0] sm:$0xff] %v7921_v0 }
  0x6f   : > { %272 = vst [vmem:[#allocation8 + $0xf8] sm:$0xff] %v7921_v0 }
  0x70   : > { %273 = vst [vmem:[#allocation8 + $0x100] sm:$0xff] %v7921_v0 }
  0x71   : > { %274 = vst [vmem:[#allocation8 + $0x108] sm:$0xff] %v7921_v0 }
  0x72   : > { %275 = vst [vmem:[#allocation8 + $0x110] sm:$0xff] %v7921_v0 }
  0x73   : > { %276 = vst [vmem:[#allocation8 + $0x118] sm:$0xff] %v7921_v0 }
  0x74   : > { %277 = vst [vmem:[#allocation8 + $0x120] sm:$0xff] %v7921_v0 }
  0x75   : > { %278 = vst [vmem:[#allocation8 + $0x128] sm:$0xff] %v7921_v0 }
  0x76   : > { %279 = vst [vmem:[#allocation8 + $0x130] sm:$0xff] %v7921_v0 }
  0x77   : > { %280 = vst [vmem:[#allocation8 + $0x138] sm:$0xff] %v7921_v0 }
  0x78   : > { %281 = vst [vmem:[#allocation8 + $0x140] sm:$0xff] %v7921_v0 }
  0x79   : > { %282 = vst [vmem:[#allocation8 + $0x148] sm:$0xff] %v7921_v0 }
  0x7a   : > { %283 = vst [vmem:[#allocation8 + $0x150] sm:$0xff] %v7921_v0 }
  0x7b   : > { %284 = vst [vmem:[#allocation8 + $0x158] sm:$0xff] %v7921_v0 }
  0x7c   : > { %285 = vst [vmem:[#allocation8 + $0x160] sm:$0xff] %v7921_v0 }
  0x7d   : > { %286 = vst [vmem:[#allocation8 + $0x168] sm:$0xff] %v7921_v0 }
  0x7e   : > { %287 = vst [vmem:[#allocation8 + $0x170] sm:$0xff] %v7921_v0 }
  0x7f   : > { %288 = vst [vmem:[#allocation8 + $0x178] sm:$0xff] %v7921_v0 }
  0x80   : > { %289 = vst [vmem:[#allocation8 + $0x180] sm:$0xff] %v7921_v0 }
  0x81   : > { %290 = vst [vmem:[#allocation8 + $0x188] sm:$0xff] %v7921_v0 }
  0x82   : > { %291 = vst [vmem:[#allocation8 + $0x190] sm:$0xff] %v7921_v0 }
  0x83   : > { %292 = vst [vmem:[#allocation8 + $0x198] sm:$0xff] %v7921_v0 }
  0x84   : > { %293 = vst [vmem:[#allocation8 + $0x1a0] sm:$0xff] %v7921_v0 }
  0x85   : > { %294 = vst [vmem:[#allocation8 + $0x1a8] sm:$0xff] %v7921_v0 }
  0x86   : > { %295 = vst [vmem:[#allocation8 + $0x1b0] sm:$0xff] %v7921_v0 }
  0x87   : > { %296 = vst [vmem:[#allocation8 + $0x1b8] sm:$0xff] %v7921_v0 }
  0x88   : > { %297 = vst [vmem:[#allocation8 + $0x1c0] sm:$0xff] %v7921_v0 }
  0x89   : > { %298 = vst [vmem:[#allocation8 + $0x1c8] sm:$0xff] %v7921_v0 }
  0x8a   : > { %299 = vst [vmem:[#allocation8 + $0x1d0] sm:$0xff] %v7921_v0 }
  0x8b   : > { %300 = vst [vmem:[#allocation8 + $0x1d8] sm:$0xff] %v7921_v0 }
  0x8c   : > { %301 = vst [vmem:[#allocation8 + $0x1e0] sm:$0xff] %v7921_v0 }
  0x8d   : > { %302 = vst [vmem:[#allocation8 + $0x1e8] sm:$0xff] %v7921_v0 }
  0x8e   : > { %303 = vst [vmem:[#allocation8 + $0x1f0] sm:$0xff] %v7921_v0 }
  0x8f   : > { %304 = vst [vmem:[#allocation8 + $0x1f8] sm:$0xff] %v7921_v0 }
  0x90   : > { %305 = vst [vmem:[#allocation8 + $0x200] sm:$0xff] %v7921_v0 }
  0x91   : > { %306 = vst [vmem:[#allocation8 + $0x208] sm:$0xff] %v7921_v0 }
  0x92   : > { %307 = vst [vmem:[#allocation8 + $0x210] sm:$0xff] %v7921_v0 }
  0x93   : > { %308 = vst [vmem:[#allocation8 + $0x218] sm:$0xff] %v7921_v0 }
  0x94   : > { %309 = vst [vmem:[#allocation8 + $0x220] sm:$0xff] %v7921_v0 }
  0x95   : > { %310 = vst [vmem:[#allocation8 + $0x228] sm:$0xff] %v7921_v0 }
  0x96   : > { %311 = vst [vmem:[#allocation8 + $0x230] sm:$0xff] %v7921_v0 }
  0x97   : > { %312 = vst [vmem:[#allocation8 + $0x238] sm:$0xff] %v7921_v0 }
  0x98   : > { %313 = vst [vmem:[#allocation8 + $0x240] sm:$0xf] %v7921_v0 }
  0x99   : > { %314 = vst [vmem:[#allocation8 + $0x248] sm:$0xf] %v7921_v0 }
  0x9a   : > { %315 = vst [vmem:[#allocation8 + $0x250] sm:$0xf] %v7921_v0 }
  0x9b PF: > { %v7100_v1 = vld [vmem:[%s8060_s18 + $0xe0] sm:$0xf]  ;;  %v7407_v2 = vld [vmem:[%s8060_s18 + $0xec] sm:$0xf0]  ;;  %v7405_v3 = vld [vmem:[%s8060_s18 + $0xe4] sm:$0xf] }
  0x9c   : > { %v7101_v4 = vor.u32 %v7407_v2, %v7100_v1  ;;  %v7102_v5 = vld [vmem:[%s8060_s18 + $0xf0] sm:$0xf0]  ;;  %v7108_v6 = vld [vmem:[%s8060_s18 + $0xe8] sm:$0xf]  ;;  %v7408_v7 = vld [vmem:[%s8060_s18 + $0xf4] sm:$0xf0] }
  0x9d   : > { %v7105_v8 = vor.u32 %v7405_v3, %v7102_v5  ;;  %v7109_v9 = vor.u32 %v7408_v7, %v7108_v6  ;;  %v7406_v10 = vld [vmem:[%s8060_s18 + $0xec] sm:$0xf]  ;;  %v7110_v11 = vld [vmem:[%s8060_s18 + $0xf8] sm:$0xf0]  ;;  %v7084_v13 = vld [vmem:[%s8060_s18 + $0xc0] sm:$0xf] }
  0x9e   : > { %5519 = vmatpush.bf16.xpose.msra.mxu0 %v7101_v4  ;;  %v7113_v12 = vor.u32 %v7406_v10, %v7110_v11  ;;  %v7403_v14 = vld [vmem:[%s8060_s18 + $0xcc] sm:$0xf0]  ;;  %v7401_v15 = vld [vmem:[%s8060_s18 + $0xc4] sm:$0xf]  ;;  %v7086_v16 = vld [vmem:[%s8060_s18 + $0xd0] sm:$0xf0] }
  0x9f   : > { %5592 = vmatpush.bf16.xpose.msra.mxu1 %v7105_v8  ;;  %5665 = vmatpush.bf16.xpose.msra.mxu2 %v7109_v9  ;;  %v7092_v17 = vld [vmem:[%s8060_s18 + $0xc8] sm:$0xf]  ;;  %v7404_v18 = vld [vmem:[%s8060_s18 + $0xd4] sm:$0xf0]  ;;  %v7402_v19 = vld [vmem:[%s8060_s18 + $0xcc] sm:$0xf]  ;;  %v7085_v21 = vor.u32 %v7403_v14, %v7084_v13  ;;  %v7089_v22 = vor.u32 %v7401_v15, %v7086_v16 }
  0xa0   : > { %5738 = vmatpush.bf16.xpose.msra.mxu3 %v7113_v12  ;;  %v7094_v20 = vld [vmem:[%s8060_s18 + $0xd8] sm:$0xf0]  ;;  %v7093_v23 = vor.u32 %v7404_v18, %v7092_v17  ;;  %v7068_v25 = vld [vmem:[%s8060_s18 + $0xa0] sm:$0xf]  ;;  %v7399_v26 = vld [vmem:[%s8060_s18 + $0xac] sm:$0xf0] }
  0xa1   : > { %v7097_v24 = vor.u32 %v7402_v19, %v7094_v20  ;;  %v7397_v27 = vld [vmem:[%s8060_s18 + $0xa4] sm:$0xf]  ;;  %v7070_v28 = vld [vmem:[%s8060_s18 + $0xb0] sm:$0xf0]  ;;  %v7076_v29 = vld [vmem:[%s8060_s18 + $0xa8] sm:$0xf]  ;;  %v7069_v33 = vor.u32 %v7399_v26, %v7068_v25 }
  0xa2   : > { %v7400_v30 = vld [vmem:[%s8060_s18 + $0xb4] sm:$0xf0]  ;;  %v7398_v31 = vld [vmem:[%s8060_s18 + $0xac] sm:$0xf]  ;;  %v7078_v32 = vld [vmem:[%s8060_s18 + $0xb8] sm:$0xf0]  ;;  %v7073_v34 = vor.u32 %v7397_v27, %v7070_v28 }
  0xa3   : > { %v7077_v35 = vor.u32 %v7400_v30, %v7076_v29  ;;  %v8172_v36 = vld [vmem:[%s8060_s18 + $0x80] sm:$0xf]  ;;  %v8175_v37 = vld [vmem:[%s8060_s18 + $0x8c] sm:$0xf0]  ;;  %v7081_v39 = vor.u32 %v7398_v31, %v7078_v32  ;;  %v8181_v40 = vld [vmem:[%s8060_s18 + $0x84] sm:$0xf] }
  0xa4   : > { %v8178_v38 = vld [vmem:[%s8053_s10] sm:$0xff]  ;;  %v8184_v41 = vld [vmem:[%s8060_s18 + $0x90] sm:$0xf0]  ;;  %v8187_v42 = vld [vmem:[%s8060_s18 + $0x88] sm:$0xf]  ;;  %v7053_v63 = vor.u32 %v8175_v37, %v8172_v36  ;;  %p7370_p5 = scmp.ne.s32.totalorder %s7964_s16, 2 }
  0xa5   : > { %v8190_v43 = vld [vmem:[%s8053_s10 + $0x20] sm:$0xff]  ;;  %v8193_v44 = vmul.f32 0.70710677, %v8178_v38  ;;  %v8196_v45 = vld [vmem:[%s8053_s10 + $0x8] sm:$0xff]  ;;  %v8199_v46 = vld [vmem:[%s8060_s18 + $0x94] sm:$0xf0]  ;;  %v7057_v6 = vor.u32 %v8181_v40, %v8184_v41 }
  0xa6   : > { %5520 = vmatpush.bf16.xpose.msra.mxu0 %v7085_v21  ;;  %v8202_v47 = vld [vmem:[%s8060_s18 + $0x8c] sm:$0xf]  ;;  %v8205_v48 = vld [vmem:[%s8060_s18 + $0x98] sm:$0xf0]  ;;  %v8208_v49 = vld [vmem:[%s8060_s18 + $0x60] sm:$0xf]  ;;  %v7061_v7 = vor.u32 %v8199_v46, %v8187_v42 }
  0xa7   : > { %5593 = vmatpush.bf16.xpose.msra.mxu1 %v7089_v22  ;;  %5666 = vmatpush.bf16.xpose.msra.mxu2 %v7093_v23  ;;  %v8211_v50 = vld [vmem:[%s8060_s18 + $0x6c] sm:$0xf0]  ;;  %v8214_v51 = vld [vmem:[%s8060_s18 + $0x64] sm:$0xf]  ;;  %v8217_v52 = vld [vmem:[%s8060_s18 + $0x70] sm:$0xf0]  ;;  %v616_v55 = vmul.f32 %v8193_v44, %v8193_v44  ;;  %v7065_v8 = vor.u32 %v8202_v47, %v8205_v48 }
  0xa8   : > { %5739 = vmatpush.bf16.xpose.msra.mxu3 %v7097_v24  ;;  %v8220_v53 = vld [vmem:[%s8060_s18 + $0x68] sm:$0xf]  ;;  %v8223_v54 = vld [vmem:[%s8060_s18 + $0x74] sm:$0xf0]  ;;  %v8228_v56 = vld [vmem:[%s8060_s18 + $0x6c] sm:$0xf]  ;;  %v7037_v19 = vor.u32 %v8211_v50, %v8208_v49  ;;  %v7041_v20 = vor.u32 %v8214_v51, %v8217_v52 }
  0xa9   : > { %v8231_v57 = vld [vmem:[%s8060_s18 + $0x78] sm:$0xf0]  ;;  %v8234_v58 = vld [vmem:[%s8060_s18 + $0x40] sm:$0xf]  ;;  %v8237_v59 = vld [vmem:[%s8060_s18 + $0x4c] sm:$0xf0]  ;;  %v7045_v21 = vor.u32 %v8223_v54, %v8220_v53 }
  0xaa   : > { %v8240_v60 = vmul.f32 0.70710677, %v8190_v43  ;;  %v8243_v61 = vld [vmem:[%s8053_s10 + $0x28] sm:$0xff]  ;;  %v8246_v62 = vmul.f32 0.70710677, %v8196_v45  ;;  %v8265_v5 = vmin.f32 %v616_v55, 16.0  ;;  %v7049_v25 = vor.u32 %v8228_v56, %v8231_v57 }
  0xab   : > { %v8251_v0 = vld [vmem:[%s8060_s18 + $0x44] sm:$0xf]  ;;  %v8254_v1 = vld [vmem:[%s8060_s18 + $0x50] sm:$0xf0]  ;;  %v8257_v2 = vld [vmem:[%s8060_s18 + $0x48] sm:$0xf]  ;;  %v7021_v26 = vor.u32 %v8237_v59, %v8234_v58 }
  0xac   : > { %v8260_v3 = vld [vmem:[%s8060_s18 + $0x54] sm:$0xf0]  ;;  %v8263_v4 = vld [vmem:[%s8060_s18 + $0x4c] sm:$0xf]  ;;  %v8274_v9 = vld [vmem:[%s8060_s18 + $0x58] sm:$0xf0]  ;;  %v776_v12 = vmul.f32 %v8240_v60, %v8240_v60  ;;  %v656_v18 = vmul.f32 %v8246_v62, %v8246_v62  ;;  %v7025_v30 = vor.u32 %v8251_v0, %v8254_v1 }
  0xad   : > { %v8277_v10 = vld [vmem:[%s8060_s18 + $0x20] sm:$0xf]  ;;  %v8280_v11 = vld [vmem:[%s8060_s18 + $0x2c] sm:$0xf0]  ;;  %v8285_v13 = vld [vmem:[%s8060_s18 + $0x24] sm:$0xf]  ;;  %v7029_v31 = vor.u32 %v8260_v3, %v8257_v2 }
  0xae   : > { %5521 = vmatpush.bf16.xpose.msra.mxu0 %v7069_v33  ;;  %v8288_v14 = vld [vmem:[%s8060_s18 + $0x30] sm:$0xf0]  ;;  %v618_v15 = vmul.f32 2.1237322e-06, %v8265_v5  ;;  %v629_v16 = vmul.f32 3.8918573e-05, %v8265_v5 }
  0xaf   : > { %5594 = vmatpush.bf16.xpose.msra.mxu1 %v7073_v34  ;;  %5667 = vmatpush.bf16.xpose.msra.mxu2 %v7077_v35  ;;  %v8293_v17 = vmul.f32 0.70710677, %v8243_v61  ;;  %v8304_v22 = vld [vmem:[%s8060_s18 + $0x28] sm:$0xf]  ;;  %v8307_v23 = vld [vmem:[%s8060_s18 + $0x34] sm:$0xf0] }
  0xb0   : > { %5740 = vmatpush.bf16.xpose.msra.mxu3 %v7081_v39  ;;  %v8309_v24 = vmin.f32 %v776_v12, 16.0  ;;  %v619_v27 = vadd.f32 0.00028619796, %v618_v15  ;;  %v630_v28 = vadd.f32 0.001143296, %v629_v16  ;;  %v8316_v29 = vld [vmem:[%s8053_s10 + $0x10] sm:$0xff] }
  0xb1   : > { %v8327_v34 = vld [vmem:[%s8060_s18 + $0x2c] sm:$0xf]  ;;  %v8330_v35 = vld [vmem:[%s8060_s18 + $0x38] sm:$0xf0]  ;;  %v8333_v36 = vld [vmem:[%s8053_s10 + $0x30] sm:$0xff]  ;;  %v8343_v42 = vmin.f32 %v656_v18, 16.0  ;;  %v816_v46 = vmul.f32 %v8293_v17, %v8293_v17 }
  0xb2   : > { %v8336_v37 = vld [vmem:[%s8060_s18] sm:$0xf]  ;;  %v8339_v39 = vld [vmem:[%s8060_s18 + $0xc] sm:$0xf0]  ;;  %v620_v40 = vmul.f32 %v619_v27, %v8265_v5  ;;  %v631_v41 = vmul.f32 %v630_v28, %v8265_v5  ;;  %v778_v48 = vmul.f32 2.1237322e-06, %v8309_v24 }
  0xb3   : > { %v789_v49 = vmul.f32 3.8918573e-05, %v8309_v24  ;;  %v8352_v50 = vmul.f32 0.70710677, %v8316_v29  ;;  %v8357_v54 = vmul.f32 0.70710677, %v8333_v36 }
  0xb4   : > { %v621_v52 = vadd.f32 0.0036580483, %v620_v40  ;;  %v632_v53 = vadd.f32 0.014752088, %v631_v41  ;;  %v8365_v16 = vmin.f32 %v816_v46, 16.0  ;;  %v8448_v2 = vmul.f32 0.5, %v8190_v43 }
  0xb5   : > { %v8370_v27 = vld [vmem:[%s8060_s18 + $0x4] sm:$0xf]  ;;  %v8373_v28 = vld [vmem:[%s8060_s18 + $0x10] sm:$0xf0]  ;;  %v8379_v46 = vmul.f32 %v8352_v50, %v8352_v50 }
  0xb6   : > { %5522 = vmatpush.bf16.xpose.msra.mxu0 %v7053_v63  ;;  %v779_v63 = vadd.f32 0.00028619796, %v778_v48  ;;  %v622_v12 = vmul.f32 %v621_v52, %v8265_v5  ;;  %v633_v15 = vmul.f32 %v632_v53, %v8265_v5  ;;  %v818_v47 = vmul.f32 2.1237322e-06, %v8365_v16 }
  0xb7   : > { %5595 = vmatpush.bf16.xpose.msra.mxu1 %v7057_v6  ;;  %5668 = vmatpush.bf16.xpose.msra.mxu2 %v7061_v7  ;;  %v790_v6 = vadd.f32 0.001143296, %v789_v49  ;;  %v658_v7 = vmul.f32 2.1237322e-06, %v8343_v42 }
  0xb8   : > { %5741 = vmatpush.bf16.xpose.msra.mxu3 %v7065_v8  ;;  %v669_v8 = vmul.f32 3.8918573e-05, %v8343_v42  ;;  %v780_v40 = vmul.f32 %v779_v63, %v8309_v24  ;;  %v623_v49 = vadd.f32 0.05243302, %v622_v12  ;;  %v634_v52 = vadd.f32 0.112945676, %v633_v15 }
  0xb9   : > { %v791_v41 = vmul.f32 %v790_v6, %v8309_v24  ;;  %v659_v48 = vadd.f32 0.00028619796, %v658_v7  ;;  %v829_v12 = vmul.f32 3.8918573e-05, %v8365_v16  ;;  %v8388_v15 = vld [vmem:[%s8060_s18 + $0x8] sm:$0xf] }
  0xba   : > { %v670_v53 = vadd.f32 0.001143296, %v669_v8  ;;  %v781_v55 = vadd.f32 0.0036580483, %v780_v40  ;;  %v624_v63 = vmul.f32 %v623_v49, %v8265_v5  ;;  %v635_v6 = vmul.f32 %v634_v52, %v8265_v5  ;;  %v8398_v49 = vld [vmem:[%s8060_s18 + $0x14] sm:$0xf0] }
  0xbb   : > { %v792_v51 = vadd.f32 0.014752088, %v791_v41  ;;  %v660_v18 = vmul.f32 %v659_v48, %v8343_v42  ;;  %v819_v48 = vadd.f32 0.00028619796, %v818_v47 }
  0xbc   : > { %v671_v7 = vmul.f32 %v670_v53, %v8343_v42  ;;  %v782_v8 = vmul.f32 %v781_v55, %v8309_v24  ;;  %v8402_v55 = vmul.f32 %v8357_v54, %v8357_v54  ;;  %v830_v53 = vadd.f32 0.001143296, %v829_v12 }
  0xbd   : > { %v793_v40 = vmul.f32 %v792_v51, %v8309_v24  ;;  %v661_v41 = vadd.f32 0.0036580483, %v660_v18 }
  0xbe   : > { %5523 = vmatpush.bf16.xpose.msra.mxu0 %v7037_v19  ;;  %v783_v51 = vadd.f32 0.05243302, %v782_v8  ;;  %v672_v52 = vadd.f32 0.014752088, %v671_v7  ;;  %v8409_v19 = vld [vmem:[%s8060_s18 + $0xc] sm:$0xf]  ;;  %v6997_v7 = vor.u32 %v8398_v49, %v8388_v15 }
  0xbf   : > { %5596 = vmatpush.bf16.xpose.msra.mxu1 %v7041_v20  ;;  %5669 = vmatpush.bf16.xpose.msra.mxu2 %v7045_v21  ;;  %v625_v20 = vadd.f32 0.18741608, %v624_v63  ;;  %v636_v21 = vadd.f32 0.4994258, %v635_v6  ;;  %v794_v18 = vadd.f32 0.112945676, %v793_v40  ;;  %v662_v47 = vmul.f32 %v661_v41, %v8343_v42 }
  0xc0   : > { %5742 = vmatpush.bf16.xpose.msra.mxu3 %v7049_v25  ;;  %v820_v25 = vmul.f32 %v819_v48, %v8365_v16  ;;  %v8412_v63 = vld [vmem:[%s8060_s18 + $0x18] sm:$0xf0]  ;;  %v784_v6 = vmul.f32 %v783_v51, %v8309_v24  ;;  %v673_v40 = vmul.f32 %v672_v52, %v8343_v42  ;;  %v831_v48 = vmul.f32 %v830_v53, %v8365_v16 }
  0xc1   : > { %v626_v56 = vmul.f32 %v625_v20, %v8265_v5  ;;  %v637_v57 = vmul.f32 %v636_v21, %v8265_v5  ;;  %v795_v33 = vmul.f32 %v794_v18, %v8309_v24  ;;  %v663_v8 = vadd.f32 0.05243302, %v662_v47 }
  0xc2   : > { %v821_v5 = vadd.f32 0.0036580483, %v820_v25  ;;  %v785_v12 = vadd.f32 0.18741608, %v784_v6  ;;  %v674_v32 = vadd.f32 0.112945676, %v673_v40  ;;  %v7001_v51 = vor.u32 %v8409_v19, %v8412_v63 }
  0xc3   : > { %v8419_v41 = vadd.f32 1.0, %v637_v57  ;;  %v796_v20 = vadd.f32 0.4994258, %v795_v33  ;;  %v664_v21 = vmul.f32 %v663_v8, %v8343_v42  ;;  %v8429_v18 = vmul.f32 0.5, %v8178_v38 }
  0xc4   : > { %v627_v47 = vadd.f32 1.1283791, %v626_v56  ;;  %v786_v59 = vmul.f32 %v785_v12, %v8309_v24  ;;  %v12854_v38 = vor.u32 %v8263_v4, %v8274_v9  ;;  %v675_v0 = vmul.f32 %v674_v32, %v8343_v42 }
  0xc5   : > { %7548 = vrcp.f32 %v8419_v41  ;;  %v648_v58 = vand.u32 2147483647, %v8419_v41  ;;  %v665_v33 = vadd.f32 0.18741608, %v664_v21  ;;  %v650_v52 = vand.u32 2147483648, %v8419_v41 }
  0xc6   : > { %5524 = vmatpush.bf16.xpose.msra.mxu0 %v7021_v26  ;;  %v797_v26 = vmul.f32 %v796_v20, %v8309_v24  ;;  %v822_v1 = vmul.f32 %v821_v5, %v8365_v16  ;;  %v787_v3 = vadd.f32 1.1283791, %v786_v59  ;;  %v8453_v24 = vmin.f32 %v8379_v46, 16.0 }
  0xc7   : > { %5597 = vmatpush.bf16.xpose.msra.mxu1 %v7025_v30  ;;  %5670 = vmatpush.bf16.xpose.msra.mxu2 %v7029_v31  ;;  %v832_v30 = vadd.f32 0.014752088, %v831_v48  ;;  %v666_v56 = vmul.f32 %v665_v33, %v8343_v42  ;;  %v676_v4 = vadd.f32 0.4994258, %v675_v0  ;;  %v628_v32 = vmul.f32 %v627_v47, %v8193_v44 }
  0xc8   : > { %5743 = vmatpush.bf16.xpose.msra.mxu3 %v12854_v38  ;;  %v8450_v31 = vadd.f32 1.0, %v797_v26  ;;  %v823_v9 = vadd.f32 0.05243302, %v822_v1  ;;  %vm644_vm0 = vweird.f32 %v8419_v41  ;;  %vm8459_vm1 = vcmp.eq.f32.partialorder %v648_v58, 8.507059e+37 }
  0xc9   : > { %v833_v57 = vmul.f32 %v832_v30, %v8365_v16  ;;  %v651_v53 = vor.u32 1.1754944e-38, %v650_v52  ;;  %v677_v6 = vmul.f32 %v676_v4, %v8343_v42  ;;  %v8469_v44 = vmul.f32 %v787_v3, %v8240_v60  ;;  %v8511_v4 = vld [vmem:[%s8053_s10 + $0x18] sm:$0xff] }
  0xca   : > { %7550 = vrcp.f32 %v8450_v31  ;;  %v808_v46 = vand.u32 2147483647, %v8450_v31  ;;  %v824_v8 = vmul.f32 %v823_v9, %v8365_v16  ;;  %v698_v48 = vmul.f32 2.1237322e-06, %v8453_v24 }
  0xcb   : > { %v7549_v43 = vpop.eup %7548  ;;  %v834_v5 = vadd.f32 0.112945676, %v833_v57  ;;  %v12857_v12 = vor.u32 %v8280_v11, %v8277_v10  ;;  %v810_v20 = vand.u32 2147483648, %v8450_v31  ;;  %v667_v21 = vadd.f32 1.1283791, %v666_v56 }
  0xcc   : > { %v640_v40 = vmul.f32 %v7549_v43, %v8419_v41  ;;  %v8476_v47 = vadd.f32 1.0, %v677_v6  ;;  %v825_v42 = vadd.f32 0.18741608, %v824_v8  ;;  %v12858_v58 = vor.u32 %v8285_v13, %v8288_v14 }
  0xcd   : > { %v12859_v60 = vor.u32 %v8307_v23, %v8304_v22  ;;  %vm645_vm2 = vweird.f32 %v7549_v43  ;;  %vm804_vm3 = vweird.f32 %v8450_v31  ;;  %v835_v10 = vmul.f32 %v834_v5, %v8365_v16 }
  0xce   : > { %5525 = vmatpush.bf16.xpose.msra.mxu0 %v12857_v12  ;;  %v641_v59 = vsub.f32 1.0, %v640_v40  ;;  %v12860_v11 = vor.u32 %v8327_v34, %v8330_v35  ;;  %vm8489_vm4 = vcmp.eq.f32.partialorder %v808_v46, 8.507059e+37  ;;  %7552 = vrcp.f32 %v8476_v47  ;;  %vm8499_vm5 = vmor %vm644_vm0, %vm645_vm2  ;;  %v8583_v34 = vld [vmem:[%s8053_s10 + $0x38] sm:$0xff] }
  0xcf   : > { %5598 = vmatpush.bf16.xpose.msra.mxu1 %v12858_v58  ;;  %5671 = vmatpush.bf16.xpose.msra.mxu2 %v12859_v60  ;;  %v688_v13 = vand.u32 2147483647, %v8476_v47  ;;  %v690_v14 = vand.u32 2147483648, %v8476_v47  ;;  %v826_v33 = vmul.f32 %v825_v42, %v8365_v16  ;;  %v836_v38 = vadd.f32 0.4994258, %v835_v10 }
  0xd0   : > { %5744 = vmatpush.bf16.xpose.msra.mxu3 %v12860_v11  ;;  %v7551_v22 = vpop.eup %7550  ;;  %v642_v23 = vmul.f32 %v7549_v43, %v641_v59  ;;  %v699_v52 = vadd.f32 0.00028619796, %v698_v48  ;;  %v811_v0 = vor.u32 1.1754944e-38, %v810_v20  ;;  %v8505_v1 = vmul.f32 %v667_v21, %v8246_v62 }
  0xd1   : > { %v800_v35 = vmul.f32 %v7551_v22, %v8450_v31  ;;  %vm684_vm6 = vweird.f32 %v8476_v47  ;;  %vm805_vm7 = vweird.f32 %v7551_v22  ;;  %v837_v3 = vmul.f32 %v836_v38, %v8365_v16 }
  0xd2   : > { %v643_v30 = vadd.f32 %v7549_v43, %v642_v23  ;;  %v700_v56 = vmul.f32 %v699_v52, %v8453_v24  ;;  %v827_v9 = vadd.f32 1.1283791, %v826_v33  ;;  %v709_v57 = vmul.f32 3.8918573e-05, %v8453_v24  ;;  %vm8540_vm9 = vmor %vm804_vm3, %vm805_vm7 }
  0xd3   : > { %v801_v41 = vsub.f32 1.0, %v800_v35  ;;  %v8515_v46 = vmin.f32 %v8402_v55, 16.0  ;;  %vm8519_vm8 = vcmp.eq.f32.partialorder %v688_v13, 8.507059e+37  ;;  %v691_v8 = vor.u32 1.1754944e-38, %v690_v14 }
  0xd4   : > { %v647_v62 = vsel %vm8499_vm5, %v7549_v43, %v643_v30  ;;  %v8523_v16 = vadd.f32 1.0, %v837_v3  ;;  %v701_v40 = vadd.f32 0.0036580483, %v700_v56  ;;  %v7553_v5 = vpop.eup %7552  ;;  %v12867_v48 = vor.u32 %v8339_v39, %v8336_v37 }
  0xd5   : > { %v652_v55 = vsel %vm8459_vm1, %v651_v53, %v647_v62  ;;  %v802_v12 = vmul.f32 %v7551_v22, %v801_v41  ;;  %v710_v20 = vadd.f32 0.001143296, %v709_v57  ;;  %v858_v43 = vmul.f32 2.1237322e-06, %v8515_v46 }
  0xd6   : > { %5526 = vmatpush.bf16.xpose.msra.mxu0 %v12867_v48  ;;  %v12868_v21 = vor.u32 %v8370_v27, %v8373_v28  ;;  %v653_v42 = vmul.f32 %v652_v55, %v628_v32  ;;  %v680_v39 = vmul.f32 %v7553_v5, %v8476_v47  ;;  %7554 = vrcp.f32 %v8523_v16 }
  0xd7   : > { %5672 = vmatpush.bf16.xpose.msra.mxu2 %v6997_v7  ;;  %v8547_v25 = vmul.f32 0.70710677, %v8511_v4  ;;  %v803_v27 = vadd.f32 %v7551_v22, %v802_v12  ;;  %vm685_vm10 = vweird.f32 %v7553_v5  ;;  %v8553_v28 = vmul.f32 %v827_v9, %v8293_v17 }
  0xd8   : > { %5599 = vmatpush.bf16.xpose.msra.mxu1 %v12868_v21  ;;  %5745 = vmatpush.bf16.xpose.msra.mxu3 %v7001_v51  ;;  %v848_v15 = vand.u32 2147483647, %v8523_v16  ;;  %v6886_v49 = vclamps-f32 %v653_v42, 1.0  ;;  %v681_v7 = vsub.f32 1.0, %v680_v39  ;;  %v702_v31 = vmul.f32 %v701_v40, %v8453_v24  ;;  %vm8568_vm12 = vmor %vm684_vm6, %vm685_vm10 }
  0xd9   : > { %v711_v32 = vmul.f32 %v710_v20, %v8453_v24  ;;  %v807_v53 = vsel %vm8540_vm9, %v7551_v22, %v803_v27  ;;  %vm844_vm11 = vweird.f32 %v8523_v16  ;;  %v850_v19 = vand.u32 2147483648, %v8523_v16 }
  0xda   : > { %v859_v63 = vadd.f32 0.00028619796, %v858_v43  ;;  %v812_v17 = vsel %vm8489_vm4, %v811_v0, %v807_v53  ;;  %v4616_v51 = vadd.f32 1.0, %v6886_v49  ;;  %v682_v58 = vmul.f32 %v7553_v5, %v681_v7 }
  0xdb   : > { %v703_v60 = vadd.f32 0.05243302, %v702_v31  ;;  %v813_v59 = vmul.f32 %v812_v17, %v8469_v44  ;;  %v712_v11 = vadd.f32 0.014752088, %v711_v32  ;;  %v869_v14 = vmul.f32 3.8918573e-05, %v8515_v46 }
  0xdc   : > { %v860_v13 = vmul.f32 %v859_v63, %v8515_v46  ;;  %v7555_v26 = vpop.eup %7554  ;;  %v4716_v22 = vmul.f32 %v4616_v51, %v8429_v18  ;;  %v683_v23 = vadd.f32 %v7553_v5, %v682_v58  ;;  %vm8575_vm13 = vcmp.eq.f32.partialorder %v848_v15, 8.507059e+37 }
  0xdd   : > { %v704_v44 = vmul.f32 %v703_v60, %v8453_v24  ;;  %v6890_v47 = vclamps-f32 %v813_v59, 1.0  ;;  %v840_v38 = vmul.f32 %v7555_v26, %v8523_v16  ;;  %vm845_vm14 = vweird.f32 %v7555_v26 }
  0xde   : > { %v713_v52 = vmul.f32 %v712_v11, %v8453_v24  ;;  %v687_v35 = vsel %vm8568_vm12, %v7553_v5, %v683_v23  ;;  %v861_v18 = vadd.f32 0.0036580483, %v860_v13  ;;  %v870_v30 = vadd.f32 0.001143296, %v869_v14  ;;  %vm8602_vm15 = vmor %vm844_vm11, %vm845_vm14 }
  0xdf   : > { %v705_v0 = vadd.f32 0.18741608, %v704_v44  ;;  %v4620_v3 = vadd.f32 1.0, %v6890_v47  ;;  %v692_v56 = vsel %vm8519_vm8, %v691_v8, %v687_v35  ;;  %v841_v41 = vsub.f32 1.0, %v840_v38 }
  0xe0   : > { %v714_v9 = vadd.f32 0.112945676, %v713_v52  ;;  %v693_v57 = vmul.f32 %v692_v56, %v8505_v1  ;;  %v862_v62 = vmul.f32 %v861_v18, %v8515_v46  ;;  %v871_v40 = vmul.f32 %v870_v30, %v8515_v46 }
  0xe1   : > { %v8593_v48 = vmul.f32 0.70710677, %v8583_v34  ;;  %v4720_v5 = vmul.f32 %v4620_v3, %v8448_v2  ;;  %v842_v55 = vmul.f32 %v7555_v26, %v841_v41  ;;  %v736_v6 = vmul.f32 %v8547_v25, %v8547_v25 }
  0xe2   : > { %v715_v12 = vmul.f32 %v714_v9, %v8453_v24  ;;  %v6887_v8 = vclamps-f32 %v693_v57, 1.0  ;;  %v851_v20 = vor.u32 1.1754944e-38, %v850_v19  ;;  %v706_v43 = vmul.f32 %v705_v0, %v8453_v24 }
  0xe3   : > { %v863_v21 = vadd.f32 0.05243302, %v862_v62  ;;  %v8607_v42 = vpack.c.bf16 %v4720_v5, %v4716_v22  ;;  %v843_v2 = vadd.f32 %v7555_v26, %v842_v55  ;;  %v872_v39 = vadd.f32 0.014752088, %v871_v40 }
  0xe4   : > { %v716_v37 = vadd.f32 0.4994258, %v715_v12  ;;  %v8610_v15 = vmin.f32 %v736_v6, 16.0  ;;  %v896_v31 = vmul.f32 %v8593_v48, %v8593_v48  ;;  %v417_v32 = vmul.f32 0.5, %v8196_v45 }
  0xe5   : > { %v864_v27 = vmul.f32 %v863_v21, %v8515_v46  ;;  %5527 = vmatmul.bf16.vlgmr.msra.gmra.mxu0 %v8607_v42  ;;  %v847_v16 = vsel %vm8602_vm15, %v7555_v26, %v843_v2  ;;  %v873_v7 = vmul.f32 %v872_v39, %v8515_v46  ;;  %v707_v19 = vadd.f32 1.1283791, %v706_v43 }
  0xe6   : > { %v717_v49 = vmul.f32 %v716_v37, %v8453_v24  ;;  %v852_v53 = vsel %vm8575_vm13, %v851_v20, %v847_v16  ;;  %v738_v63 = vmul.f32 2.1237322e-06, %v8610_v15  ;;  %v4617_v51 = vadd.f32 1.0, %v6887_v8 }
  0xe7   : > { %v853_v17 = vmul.f32 %v852_v53, %v8553_v28  ;;  %v874_v60 = vadd.f32 0.112945676, %v873_v7  ;;  %v865_v24 = vadd.f32 0.18741608, %v864_v27  ;;  %v749_v10 = vmul.f32 3.8918573e-05, %v8610_v15 }
  0xe8   : > { %v718_v58 = vadd.f32 1.0, %v717_v49  ;;  %v739_v59 = vadd.f32 0.00028619796, %v738_v63  ;;  %v421_v11 = vmul.f32 0.5, %v8243_v61  ;;  %v8626_v45 = vmin.f32 %v896_v31, 16.0  ;;  %v8638_v61 = vld [vmem:[%s8053_s10 + $0x40] sm:$0xff] }
  0xe9   : > { %v6891_v13 = vclamps-f32 %v853_v17, 1.0  ;;  %v8629_v14 = vmul.f32 0.5, %v8316_v29  ;;  %v8632_v26 = vmul.f32 0.5, %v8333_v36  ;;  %v875_v28 = vmul.f32 %v874_v60, %v8515_v46  ;;  %v8664_v31 = vld [vmem:[%s8053_s10 + $0x60] sm:$0xff]  ;;  %v7438_v49 = vld [vmem:[%s8060_s18 + $0x1ec] sm:$0xf] }
  0xea   : > { %7556 = vrcp.f32 %v718_v58  ;;  %v740_v22 = vmul.f32 %v739_v59, %v8610_v15  ;;  %v4717_v33 = vmul.f32 %v4617_v51, %v417_v32  ;;  %v750_v44 = vadd.f32 0.001143296, %v749_v10 }
  0xeb   : > { %v4621_v23 = vadd.f32 1.0, %v6891_v13  ;;  %v898_v47 = vmul.f32 2.1237322e-06, %v8626_v45  ;;  %v708_v38 = vmul.f32 %v707_v19, %v8352_v50  ;;  %v866_v52 = vmul.f32 %v865_v24, %v8515_v46 }
  0xec   : > { %v876_v29 = vadd.f32 0.4994258, %v875_v28  ;;  %v741_v35 = vadd.f32 0.0036580483, %v740_v22  ;;  %v751_v36 = vmul.f32 %v750_v44, %v8610_v15  ;;  %v909_v30 = vmul.f32 3.8918573e-05, %v8626_v45 }
  0xed   : > { %v4721_v0 = vmul.f32 %v4621_v23, %v421_v11  ;;  %v899_v18 = vadd.f32 0.00028619796, %v898_v47  ;;  %v728_v3 = vand.u32 2147483647, %v718_v58  ;;  %v8647_v9 = vmul.f32 0.70710677, %v8638_v61 }
  0xee   : > { %v877_v56 = vmul.f32 %v876_v29, %v8515_v46  ;;  %v742_v41 = vmul.f32 %v741_v35, %v8610_v15  ;;  %v752_v62 = vadd.f32 0.014752088, %v751_v36  ;;  %v910_v5 = vadd.f32 0.001143296, %v909_v30 }
  0xef   : > { %v8649_v50 = vpack.c.bf16 %v4721_v0, %v4717_v33  ;;  %v900_v40 = vmul.f32 %v899_v18, %v8626_v45  ;;  %v730_v12 = vand.u32 2147483648, %v718_v58  ;;  %v936_v43 = vmul.f32 %v8647_v9, %v8647_v9 }
  0xf0   : > { %v7557_v57 = vpop.eup %7556  ;;  %v878_v6 = vadd.f32 1.0, %v877_v56  ;;  %v743_v8 = vadd.f32 0.05243302, %v742_v41  ;;  %v753_v46 = vmul.f32 %v752_v62, %v8610_v15  ;;  %v911_v20 = vmul.f32 %v910_v5, %v8626_v45 }
  0xf1   : > { %v720_v55 = vmul.f32 %v7557_v57, %v718_v58  ;;  %5600 = vmatmul.bf16.vlgmr.msra.gmra.mxu1 %v8649_v50  ;;  %v901_v1 = vadd.f32 0.0036580483, %v900_v40  ;;  %vm724_vm0 = vweird.f32 %v718_v58  ;;  %vm725_vm1 = vweird.f32 %v7557_v57 }
  0xf2   : > { %7558 = vrcp.f32 %v878_v6  ;;  %v867_v2 = vadd.f32 1.1283791, %v866_v52  ;;  %v744_v37 = vmul.f32 %v743_v8, %v8610_v15  ;;  %v754_v39 = vadd.f32 0.112945676, %v753_v46  ;;  %vm8668_vm3 = vmor %vm724_vm0, %vm725_vm1 }
  0xf3   : > { %v721_v21 = vsub.f32 1.0, %v720_v55  ;;  %v902_v27 = vmul.f32 %v901_v1, %v8626_v45  ;;  %vm8659_vm2 = vcmp.eq.f32.partialorder %v728_v3, 8.507059e+37  ;;  %v912_v7 = vadd.f32 0.014752088, %v911_v20  ;;  %v7236_v1 = vld [vmem:[%s8060_s18 + $0x1e8] sm:$0xf] }
  0xf4   : > { %v8666_v32 = vmin.f32 %v936_v43, 16.0  ;;  %v731_v19 = vor.u32 1.1754944e-38, %v730_v12  ;;  %v745_v63 = vadd.f32 0.18741608, %v744_v37  ;;  %v755_v17 = vmul.f32 %v754_v39, %v8610_v15 }
  0xf5   : > { %v722_v16 = vmul.f32 %v7557_v57, %v721_v21  ;;  %v903_v51 = vadd.f32 0.05243302, %v902_v27  ;;  %v913_v60 = vmul.f32 %v912_v7, %v8626_v45  ;;  %vm884_vm4 = vweird.f32 %v878_v6  ;;  %v7238_v7 = vld [vmem:[%s8060_s18 + $0x1f8] sm:$0xf0] }
  0xf6   : > { %v938_v24 = vmul.f32 2.1237322e-06, %v8666_v32  ;;  %v949_v59 = vmul.f32 3.8918573e-05, %v8666_v32  ;;  %v756_v10 = vadd.f32 0.4994258, %v755_v17  ;;  %v746_v35 = vmul.f32 %v745_v63, %v8610_v15 }
  0xf7   : > { %v723_v58 = vadd.f32 %v7557_v57, %v722_v16  ;;  %v904_v11 = vmul.f32 %v903_v51, %v8626_v45  ;;  %v8678_v13 = vmul.f32 0.70710677, %v8664_v31  ;;  %v914_v23 = vadd.f32 0.112945676, %v913_v60  ;;  %v7228_v51 = vld [vmem:[%s8060_s18 + $0x1e0] sm:$0xf] }
  0xf8   : > { %v7559_v28 = vpop.eup %7558  ;;  %v939_v33 = vadd.f32 0.00028619796, %v938_v24  ;;  %v950_v44 = vadd.f32 0.001143296, %v949_v59  ;;  %v888_v29 = vand.u32 2147483647, %v878_v6  ;;  %v757_v18 = vmul.f32 %v756_v10, %v8610_v15 }
  0xf9   : > { %v727_v22 = vsel %vm8668_vm3, %v7557_v57, %v723_v58  ;;  %v880_v52 = vmul.f32 %v7559_v28, %v878_v6  ;;  %v890_v36 = vand.u32 2147483648, %v878_v6  ;;  %v915_v30 = vmul.f32 %v914_v23, %v8626_v45  ;;  %v7440_v6 = vld [vmem:[%s8060_s18 + $0x1f4] sm:$0xf0]  ;;  %v7439_v58 = vld [vmem:[%s8060_s18 + $0x1ec] sm:$0xf0] }
  0xfa   : > { %v732_v47 = vsel %vm8659_vm2, %v731_v19, %v727_v22  ;;  %vm885_vm5 = vweird.f32 %v7559_v28  ;;  %v940_v56 = vmul.f32 %v939_v33, %v8666_v32  ;;  %v951_v41 = vmul.f32 %v950_v44, %v8666_v32  ;;  %v7437_v59 = vld [vmem:[%s8060_s18 + $0x1e4] sm:$0xf]  ;;  %v7230_v10 = vld [vmem:[%s8060_s18 + $0x1f0] sm:$0xf0] }
  0xfb   : > { %v733_v0 = vmul.f32 %v732_v47, %v708_v38  ;;  %v881_v3 = vsub.f32 1.0, %v880_v52  ;;  %v8689_v62 = vadd.f32 1.0, %v757_v18  ;;  %v905_v40 = vadd.f32 0.18741608, %v904_v11  ;;  %vm8697_vm7 = vmor %vm884_vm4, %vm885_vm5 }
  0xfc   : > { %v916_v5 = vadd.f32 0.4994258, %v915_v30  ;;  %v868_v38 = vmul.f32 %v867_v2, %v8357_v54  ;;  %vm8692_vm6 = vcmp.eq.f32.partialorder %v888_v29, 8.507059e+37  ;;  %v747_v12 = vadd.f32 1.1283791, %v746_v35 }
  0xfd   : > { %v6888_v57 = vclamps-f32 %v733_v0, 1.0  ;;  %v882_v55 = vmul.f32 %v7559_v28, %v881_v3  ;;  %v891_v46 = vor.u32 1.1754944e-38, %v890_v36  ;;  %7560 = vrcp.f32 %v8689_v62  ;;  %v8738_v0 = vld [vmem:[%s8053_s10 + $0x48] sm:$0xff] }
  0xfe   : > { %v941_v20 = vadd.f32 0.0036580483, %v940_v56  ;;  %v1096_v54 = vmul.f32 %v8678_v13, %v8678_v13  ;;  %v917_v2 = vmul.f32 %v916_v5, %v8626_v45  ;;  %v952_v37 = vadd.f32 0.014752088, %v951_v41 }
  0xff   : > { %v883_v43 = vadd.f32 %v7559_v28, %v882_v55  ;;  %v4618_v21 = vadd.f32 1.0, %v6888_v57  ;;  %v768_v39 = vand.u32 2147483647, %v8689_v62  ;;  %v906_v27 = vmul.f32 %v905_v40, %v8626_v45 }
 0x100   : > { %v7237_v16 = vor.u32 %v7440_v6, %v7236_v1  ;;  %v8714_v19 = vmul.f32 %v747_v12, %v8547_v25  ;;  %v770_v63 = vand.u32 2147483648, %v8689_v62  ;;  %v8717_v17 = vadd.f32 1.0, %v917_v2  ;;  %v8751_v1 = vld [vmem:[%s8053_s10 + $0x68] sm:$0xff] }
 0x101   : > { %v887_v53 = vsel %vm8697_vm7, %v7559_v28, %v883_v43  ;;  %v7241_v45 = vor.u32 %v7438_v49, %v7238_v7  ;;  %v7229_v24 = vor.u32 %v7439_v58, %v7228_v51  ;;  %v8725_v11 = vmin.f32 %v1096_v54, 16.0 }
 0x102   : > { %v892_v60 = vsel %vm8692_vm6, %v891_v46, %v887_v53  ;;  %5957 = vmatpush.bf16.xpose.msrb.mxu2 %v7237_v16  ;;  %v4718_v25 = vmul.f32 %v4618_v21, %v8629_v14  ;;  %vm764_vm8 = vweird.f32 %v8689_v62  ;;  %7562 = vrcp.f32 %v8717_v17 }
 0x103   : > { %v893_v28 = vmul.f32 %v892_v60, %v868_v38  ;;  %v7561_v22 = vpop.eup %7560  ;;  %v907_v23 = vadd.f32 1.1283791, %v906_v27  ;;  %6030 = vmatpush.bf16.xpose.msrb.mxu3 %v7241_v45  ;;  %5811 = vmatpush.bf16.xpose.msrb.mxu0 %v7229_v24  ;;  %v7233_v33 = vor.u32 %v7437_v59, %v7230_v10  ;;  %v942_v44 = vmul.f32 %v941_v20, %v8666_v32 }
 0x104   : > { %v953_v47 = vmul.f32 %v952_v37, %v8666_v32  ;;  %v760_v29 = vmul.f32 %v7561_v22, %v8689_v62  ;;  %vm8733_vm9 = vcmp.eq.f32.partialorder %v768_v39, 8.507059e+37  ;;  %v771_v14 = vor.u32 1.1754944e-38, %v770_v63 }
 0x105   : > { %v6892_v52 = vclamps-f32 %v893_v28, 1.0  ;;  %vm765_vm10 = vweird.f32 %v7561_v22  ;;  %vm924_vm11 = vweird.f32 %v8717_v17  ;;  %5884 = vmatpush.bf16.xpose.msrb.mxu1 %v7233_v33  ;;  %v943_v36 = vadd.f32 0.05243302, %v942_v44 }
 0x106   : > { %v954_v18 = vadd.f32 0.112945676, %v953_v47  ;;  %v761_v3 = vsub.f32 1.0, %v760_v29  ;;  %v1098_v56 = vmul.f32 2.1237322e-06, %v8725_v11  ;;  %vm8756_vm12 = vmor %vm764_vm8, %vm765_vm10  ;;  %v930_v43 = vand.u32 2147483648, %v8717_v17 }
 0x107   : > { %v4622_v30 = vadd.f32 1.0, %v6892_v52  ;;  %v1109_v41 = vmul.f32 3.8918573e-05, %v8725_v11  ;;  %v928_v57 = vand.u32 2147483647, %v8717_v17  ;;  %v944_v40 = vmul.f32 %v943_v36, %v8666_v32 }
 0x108   : > { %v955_v5 = vmul.f32 %v954_v18, %v8666_v32  ;;  %v8747_v38 = vmul.f32 0.70710677, %v8738_v0  ;;  %v7563_v55 = vpop.eup %7562  ;;  %v762_v12 = vmul.f32 %v7561_v22, %v761_v3  ;;  %v1099_v8 = vadd.f32 0.00028619796, %v1098_v56 }
 0x109   : > { %v4722_v15 = vmul.f32 %v4622_v30, %v8632_v26  ;;  %v1110_v46 = vadd.f32 0.001143296, %v1109_v41  ;;  %v920_v54 = vmul.f32 %v7563_v55, %v8717_v17  ;;  %v945_v21 = vadd.f32 0.18741608, %v944_v40 }
 0x10a   : > { %v956_v2 = vadd.f32 0.4994258, %v955_v5  ;;  %v763_v26 = vadd.f32 %v7561_v22, %v762_v12  ;;  %v1100_v37 = vmul.f32 %v1099_v8, %v8725_v11  ;;  %vm925_vm13 = vweird.f32 %v7563_v55 }
 0x10b   : > { %v8762_v6 = vpack.c.bf16 %v4722_v15, %v4718_v25  ;;  %v1111_v39 = vmul.f32 %v1110_v46, %v8725_v11  ;;  %v921_v27 = vsub.f32 1.0, %v920_v54  ;;  %v8768_v16 = vmul.f32 0.70710677, %v8751_v1  ;;  %vm8780_vm14 = vmor %vm924_vm11, %vm925_vm13 }
 0x10c   : > { %v957_v62 = vmul.f32 %v956_v2, %v8666_v32  ;;  %v767_v49 = vsel %vm8756_vm12, %v7561_v22, %v763_v26  ;;  %v1101_v7 = vadd.f32 0.0036580483, %v1100_v37  ;;  %v976_v63 = vmul.f32 %v8747_v38, %v8747_v38 }
 0x10d   : > { %5673 = vmatmul.bf16.vlgmr.msra.gmra.mxu2 %v8762_v6  ;;  %v1112_v53 = vadd.f32 0.014752088, %v1111_v39  ;;  %v772_v51 = vsel %vm8733_vm9, %v771_v14, %v767_v49  ;;  %v922_v58 = vmul.f32 %v7563_v55, %v921_v27  ;;  %v931_v60 = vor.u32 1.1754944e-38, %v930_v43 }
 0x10e   : > { %v958_v45 = vadd.f32 1.0, %v957_v62  ;;  %v773_v24 = vmul.f32 %v772_v51, %v8714_v19  ;;  %v946_v10 = vmul.f32 %v945_v21, %v8666_v32  ;;  %v1102_v28 = vmul.f32 %v1101_v7, %v8725_v11 }
 0x10f   : > { %v1113_v25 = vmul.f32 %v1112_v53, %v8725_v11  ;;  %v908_v22 = vmul.f32 %v907_v23, %v8593_v48  ;;  %v923_v33 = vadd.f32 %v7563_v55, %v922_v58  ;;  %vm929_vm15 = vcmp.eq.f32.partialorder %v928_v57, 8.507059e+37 }
 0x110   : > { %7564 = vrcp.f32 %v958_v45  ;;  %v6889_v44 = vclamps-f32 %v773_v24, 1.0  ;;  %v1103_v47 = vadd.f32 0.05243302, %v1102_v28  ;;  %v8788_v19 = vmin.f32 %v976_v63, 16.0 }
 0x111   : > { %v1136_v17 = vmul.f32 %v8768_v16, %v8768_v16  ;;  %v419_v52 = vmul.f32 0.5, %v8511_v4  ;;  %v927_v32 = vsel %vm8780_vm14, %v7563_v55, %v923_v33  ;;  %v1114_v29 = vadd.f32 0.112945676, %v1113_v25 }
 0x112   : > { %v423_v35 = vmul.f32 0.5, %v8583_v34  ;;  %v932_v14 = vsel %vm929_vm15, %v931_v60, %v927_v32  ;;  %v4619_v48 = vadd.f32 1.0, %v6889_v44  ;;  %v947_v23 = vadd.f32 1.1283791, %v946_v10  ;;  %v8823_v10 = vld [vmem:[%s8053_s10 + $0x70] sm:$0xff] }
 0x113   : > { %v933_v36 = vmul.f32 %v932_v14, %v908_v22  ;;  %v1104_v18 = vmul.f32 %v1103_v47, %v8725_v11  ;;  %v1115_v30 = vmul.f32 %v1114_v29, %v8725_v11  ;;  %v978_v3 = vmul.f32 2.1237322e-06, %v8788_v19 }
 0x114   : > { %vm964_vm0 = vweird.f32 %v958_v45  ;;  %v968_v56 = vand.u32 2147483647, %v958_v45  ;;  %v989_v4 = vmul.f32 3.8918573e-05, %v8788_v19  ;;  %v8800_v41 = vmin.f32 %v1136_v17, 16.0 }
 0x115   : > { %v6893_v40 = vclamps-f32 %v933_v36, 1.0  ;;  %v4719_v5 = vmul.f32 %v4619_v48, %v419_v52  ;;  %v970_v34 = vand.u32 2147483648, %v958_v45  ;;  %v1116_v55 = vadd.f32 0.4994258, %v1115_v30 }
 0x116   : > { %v7565_v57 = vpop.eup %7564  ;;  %v1105_v12 = vadd.f32 0.18741608, %v1104_v18  ;;  %v979_v8 = vadd.f32 0.00028619796, %v978_v3  ;;  %v990_v46 = vadd.f32 0.001143296, %v989_v4  ;;  %v948_v60 = vmul.f32 %v947_v23, %v8647_v9 }
 0x117   : > { %v960_v15 = vmul.f32 %v7565_v57, %v958_v45  ;;  %v4623_v20 = vadd.f32 1.0, %v6893_v40  ;;  %vm965_vm1 = vweird.f32 %v7565_v57  ;;  %v1117_v54 = vmul.f32 %v1116_v55, %v8725_v11  ;;  %v8847_v4 = vld [vmem:[%s8053_s10 + $0x58] sm:$0xff] }
 0x118   : > { %v1138_v43 = vmul.f32 2.1237322e-06, %v8800_v41  ;;  %v980_v2 = vmul.f32 %v979_v8, %v8788_v19  ;;  %v991_v26 = vmul.f32 %v990_v46, %v8788_v19  ;;  %v1149_v37 = vmul.f32 3.8918573e-05, %v8800_v41  ;;  %vm8815_vm2 = vmor %vm964_vm0, %vm965_vm1 }
 0x119   : > { %v961_v21 = vsub.f32 1.0, %v960_v15  ;;  %v4723_v39 = vmul.f32 %v4623_v20, %v423_v35  ;;  %v8808_v27 = vmul.f32 0.5, %v8638_v61  ;;  %v1118_v62 = vadd.f32 1.0, %v1117_v54  ;;  %v8820_v61 = vld [vmem:[%s8053_s10 + $0x50] sm:$0xff] }
 0x11a   : > { %v1139_v49 = vadd.f32 0.00028619796, %v1138_v43  ;;  %v981_v53 = vadd.f32 0.0036580483, %v980_v2  ;;  %v992_v63 = vadd.f32 0.014752088, %v991_v26  ;;  %v1106_v25 = vmul.f32 %v1105_v12, %v8725_v11 }
 0x11b   : > { %v962_v7 = vmul.f32 %v7565_v57, %v961_v21  ;;  %v1150_v51 = vadd.f32 0.001143296, %v1149_v37  ;;  %v8810_v58 = vpack.c.bf16 %v4723_v39, %v4719_v5  ;;  %v971_v59 = vor.u32 1.1754944e-38, %v970_v34 }
 0x11c   : > { %7566 = vrcp.f32 %v1118_v62  ;;  %vm969_vm3 = vcmp.eq.f32.partialorder %v968_v56, 8.507059e+37  ;;  %v982_v22 = vmul.f32 %v981_v53, %v8788_v19  ;;  %v8829_v9 = vmul.f32 0.5, %v8664_v31 }
 0x11d   : > { %v963_v28 = vadd.f32 %v7565_v57, %v962_v7  ;;  %5746 = vmatmul.bf16.vlgmr.msra.gmra.mxu3 %v8810_v58  ;;  %v993_v45 = vmul.f32 %v992_v63, %v8788_v19  ;;  %v1140_v33 = vmul.f32 %v1139_v49, %v8800_v41  ;;  %v1151_v44 = vmul.f32 %v1150_v51, %v8800_v41 }
 0x11e   : > { %v983_v17 = vadd.f32 0.05243302, %v982_v22  ;;  %v8837_v11 = vmul.f32 0.70710677, %v8820_v61  ;;  %v8840_v52 = vmul.f32 0.70710677, %v8823_v10  ;;  %vm1124_vm4 = vweird.f32 %v1118_v62 }
 0x11f   : > { %v967_v47 = vsel %vm8815_vm2, %v7565_v57, %v963_v28  ;;  %v994_v31 = vadd.f32 0.112945676, %v993_v45  ;;  %v1141_v29 = vadd.f32 0.0036580483, %v1140_v33  ;;  %v1152_v35 = vadd.f32 0.014752088, %v1151_v44 }
 0x120   : > { %v972_v32 = vsel %vm969_vm3, %v971_v59, %v967_v47  ;;  %v1107_v48 = vadd.f32 1.1283791, %v1106_v25  ;;  %v984_v23 = vmul.f32 %v983_v17, %v8788_v19  ;;  %v1128_v18 = vand.u32 2147483647, %v1118_v62 }
 0x121   : > { %v973_v14 = vmul.f32 %v972_v32, %v948_v60  ;;  %v995_v30 = vmul.f32 %v994_v31, %v8788_v19  ;;  %v1142_v3 = vmul.f32 %v1141_v29, %v8800_v41  ;;  %v1153_v56 = vmul.f32 %v1152_v35, %v8800_v41 }
 0x122   : > { %v7567_v36 = vpop.eup %7566  ;;  %v1130_v40 = vand.u32 2147483648, %v1118_v62  ;;  %v985_v5 = vadd.f32 0.18741608, %v984_v23  ;;  %v1016_v34 = vmul.f32 %v8837_v11, %v8837_v11  ;;  %v1176_v8 = vmul.f32 %v8840_v52, %v8840_v52 }
 0x123   : > { %v1120_v57 = vmul.f32 %v7567_v36, %v1118_v62  ;;  %v996_v55 = vadd.f32 0.4994258, %v995_v30  ;;  %v1143_v15 = vadd.f32 0.05243302, %v1142_v3  ;;  %v1154_v12 = vadd.f32 0.112945676, %v1153_v56 }
 0x124   : > { %v6894_v46 = vclamps-f32 %v973_v14, 1.0  ;;  %vm1125_vm5 = vweird.f32 %v7567_v36  ;;  %v8854_v54 = vmul.f32 0.70710677, %v8847_v4  ;;  %v986_v43 = vmul.f32 %v985_v5, %v8788_v19 }
 0x125   : > { %v1121_v20 = vsub.f32 1.0, %v1120_v57  ;;  %v997_v21 = vmul.f32 %v996_v55, %v8788_v19  ;;  %v1144_v2 = vmul.f32 %v1143_v15, %v8800_v41  ;;  %v1155_v26 = vmul.f32 %v1154_v12, %v8800_v41  ;;  %vm8868_vm7 = vmor %vm1124_vm4, %vm1125_vm5 }
 0x126   : > { %v1108_v37 = vmul.f32 %v1107_v48, %v8678_v13  ;;  %vm8861_vm6 = vcmp.eq.f32.partialorder %v1128_v18, 8.507059e+37  ;;  %v8865_v7 = vmin.f32 %v1016_v34, 16.0  ;;  %v1131_v63 = vor.u32 1.1754944e-38, %v1130_v40 }
 0x127   : > { %v1122_v39 = vmul.f32 %v7567_v36, %v1121_v20  ;;  %v998_v19 = vadd.f32 1.0, %v997_v21  ;;  %v1145_v51 = vadd.f32 0.18741608, %v1144_v2  ;;  %v1156_v60 = vadd.f32 0.4994258, %v1155_v26 }
 0x128   : > { %v1018_v59 = vmul.f32 2.1237322e-06, %v8865_v7  ;;  %v1029_v13 = vmul.f32 3.8918573e-05, %v8865_v7  ;;  %v1056_v28 = vmul.f32 %v8854_v54, %v8854_v54  ;;  %v4624_v25 = vadd.f32 1.0, %v6894_v46 }
 0x129   : > { %v1123_v24 = vadd.f32 %v7567_v36, %v1122_v39  ;;  %v987_v22 = vadd.f32 1.1283791, %v986_v43  ;;  %7568 = vrcp.f32 %v998_v19  ;;  %v8876_v62 = vmin.f32 %v1176_v8, 16.0 }
 0x12a   : > { %v1146_v33 = vmul.f32 %v1145_v51, %v8800_v41  ;;  %v1157_v44 = vmul.f32 %v1156_v60, %v8800_v41  ;;  %v1019_v47 = vadd.f32 0.00028619796, %v1018_v59  ;;  %v1008_v32 = vand.u32 2147483647, %v998_v19 }
 0x12b   : > { %v1127_v45 = vsel %vm8868_vm7, %v7567_v36, %v1123_v24  ;;  %v1010_v31 = vand.u32 2147483648, %v998_v19  ;;  %v1030_v29 = vadd.f32 0.001143296, %v1029_v13  ;;  %v4724_v18 = vmul.f32 %v4624_v25, %v8808_v27 }
 0x12c   : > { %v1132_v17 = vsel %vm8861_vm6, %v1131_v63, %v1127_v45  ;;  %v1147_v14 = vadd.f32 1.1283791, %v1146_v33  ;;  %v8884_v48 = vadd.f32 1.0, %v1157_v44  ;;  %v1020_v23 = vmul.f32 %v1019_v47, %v8865_v7 }
 0x12d   : > { %v1133_v35 = vmul.f32 %v1132_v17, %v1108_v37  ;;  %v988_v36 = vmul.f32 %v987_v22, %v8747_v38  ;;  %v1031_v30 = vmul.f32 %v1030_v29, %v8865_v7  ;;  %v1178_v41 = vmul.f32 2.1237322e-06, %v8876_v62 }
 0x12e   : > { %vm1004_vm8 = vweird.f32 %v998_v19  ;;  %7570 = vrcp.f32 %v8884_v48  ;;  %v1189_v56 = vmul.f32 3.8918573e-05, %v8876_v62  ;;  %vm8893_vm9 = vcmp.eq.f32.partialorder %v1008_v32, 8.507059e+37 }
 0x12f   : > { %v6898_v3 = vclamps-f32 %v1133_v35, 1.0  ;;  %v7569_v57 = vpop.eup %7568  ;;  %v1011_v5 = vor.u32 1.1754944e-38, %v1010_v31  ;;  %v8898_v27 = vmul.f32 %v1147_v14, %v8768_v16  ;;  %v1021_v38 = vadd.f32 0.0036580483, %v1020_v23 }
 0x130   : > { %v1000_v55 = vmul.f32 %v7569_v57, %v998_v19  ;;  %vm1164_vm10 = vweird.f32 %v8884_v48  ;;  %v1032_v15 = vadd.f32 0.014752088, %v1031_v30  ;;  %vm1005_vm11 = vweird.f32 %v7569_v57 }
 0x131   : > { %v4628_v34 = vadd.f32 1.0, %v6898_v3  ;;  %v1022_v12 = vmul.f32 %v1021_v38, %v8865_v7  ;;  %v1179_v8 = vadd.f32 0.00028619796, %v1178_v41  ;;  %v8902_v46 = vmin.f32 %v1056_v28, 16.0  ;;  %vm8914_vm12 = vmor %vm1004_vm8, %vm1005_vm11 }
 0x132   : > { %v1001_v43 = vsub.f32 1.0, %v1000_v55  ;;  %v1033_v21 = vmul.f32 %v1032_v15, %v8865_v7  ;;  %v1190_v2 = vadd.f32 0.001143296, %v1189_v56  ;;  %v1168_v16 = vand.u32 2147483647, %v8884_v48 }
 0x133   : > { %v4728_v20 = vmul.f32 %v4628_v34, %v8829_v9  ;;  %v1023_v26 = vadd.f32 0.05243302, %v1022_v12  ;;  %v1180_v37 = vmul.f32 %v1179_v8, %v8876_v62  ;;  %v1058_v39 = vmul.f32 2.1237322e-06, %v8902_v46 }
 0x134   : > { %v7571_v49 = vpop.eup %7570  ;;  %v1002_v63 = vmul.f32 %v7569_v57, %v1001_v43  ;;  %v1034_v51 = vadd.f32 0.112945676, %v1033_v21  ;;  %v1191_v60 = vmul.f32 %v1190_v2, %v8876_v62  ;;  %v1170_v59 = vand.u32 2147483648, %v8884_v48 }
 0x135   : > { %v8909_v53 = vpack.c.bf16 %v4728_v20, %v4724_v18  ;;  %v1160_v24 = vmul.f32 %v7571_v49, %v8884_v48  ;;  %v1181_v13 = vadd.f32 0.0036580483, %v1180_v37  ;;  %v1069_v28 = vmul.f32 3.8918573e-05, %v8902_v46 }
 0x136   : > { %v1003_v25 = vadd.f32 %v7569_v57, %v1002_v63  ;;  %v1035_v22 = vmul.f32 %v1034_v51, %v8865_v7  ;;  %v1192_v45 = vadd.f32 0.014752088, %v1191_v60  ;;  %v1059_v33 = vadd.f32 0.00028619796, %v1058_v39  ;;  %v8961_v60 = vld [vmem:[%s8053_s10 + $0x80] sm:$0xff] }
 0x137   : > { %5532 = vmatmul.bf16.gmra.mxu0 %v8909_v53  ;;  %v1161_v44 = vsub.f32 1.0, %v1160_v24  ;;  %vm1165_vm13 = vweird.f32 %v7571_v49  ;;  %v1024_v19 = vmul.f32 %v1023_v26, %v8865_v7  ;;  %v1182_v47 = vmul.f32 %v1181_v13, %v8876_v62 }
 0x138   : > { %v1007_v17 = vsel %vm8914_vm12, %v7569_v57, %v1003_v25  ;;  %v1036_v32 = vadd.f32 0.4994258, %v1035_v22  ;;  %v1193_v31 = vmul.f32 %v1192_v45, %v8876_v62  ;;  %v1060_v29 = vmul.f32 %v1059_v33, %v8902_v46  ;;  %vm8933_vm14 = vmor %vm1164_vm10, %vm1165_vm13 }
 0x139   : > { %v1012_v35 = vsel %vm8893_vm9, %v1011_v5, %v1007_v17  ;;  %v1162_v14 = vmul.f32 %v7571_v49, %v1161_v44  ;;  %v1171_v23 = vor.u32 1.1754944e-38, %v1170_v59  ;;  %v1183_v18 = vadd.f32 0.05243302, %v1182_v47  ;;  %v8940_v5 = vld [vmem:[%s8053_s10 + $0x78] sm:$0xff] }
 0x13a   : > { %v1013_v30 = vmul.f32 %v1012_v35, %v988_v36  ;;  %v1037_v3 = vmul.f32 %v1036_v32, %v8865_v7  ;;  %v1194_v56 = vadd.f32 0.112945676, %v1193_v31  ;;  %v1061_v57 = vadd.f32 0.0036580483, %v1060_v29  ;;  %v8981_v31 = vld [vmem:[%s8053_s10 + $0xa0] sm:$0xff] }
 0x13b   : > { %v1163_v38 = vadd.f32 %v7571_v49, %v1162_v14  ;;  %vm1169_vm15 = vcmp.eq.f32.partialorder %v1168_v16, 8.507059e+37  ;;  %v1025_v34 = vadd.f32 0.18741608, %v1024_v19  ;;  %v1184_v40 = vmul.f32 %v1183_v18, %v8876_v62  ;;  %v7214_v32 = vld [vmem:[%s8060_s18 + $0x1d0] sm:$0xf0] }
 0x13c   : > { %v6895_v55 = vclamps-f32 %v1013_v30, 1.0  ;;  %v1038_v15 = vadd.f32 1.0, %v1037_v3  ;;  %v1195_v36 = vmul.f32 %v1194_v56, %v8876_v62  ;;  %v1070_v48 = vadd.f32 0.001143296, %v1069_v28 }
 0x13d   : > { %v425_v12 = vmul.f32 0.5, %v8738_v0  ;;  %v1167_v8 = vsel %vm8933_vm14, %v7571_v49, %v1163_v38  ;;  %v1185_v20 = vadd.f32 0.18741608, %v1184_v40  ;;  %v1062_v43 = vmul.f32 %v1061_v57, %v8902_v46 }
 0x13e   : > { %v429_v21 = vmul.f32 0.5, %v8751_v1  ;;  %v1172_v2 = vsel %vm1169_vm15, %v1171_v23, %v1167_v8  ;;  %7572 = vrcp.f32 %v1038_v15  ;;  %v8949_v16 = vmul.f32 0.70710677, %v8940_v5 }
 0x13f   : > { %v1173_v26 = vmul.f32 %v1172_v2, %v8898_v27  ;;  %v4625_v37 = vadd.f32 1.0, %v6895_v55  ;;  %v8953_v39 = vmul.f32 0.5, %v8820_v61  ;;  %v1026_v0 = vmul.f32 %v1025_v34, %v8865_v7 }
 0x140   : > { %v8957_v49 = vmul.f32 0.5, %v8823_v10  ;;  %v1196_v63 = vadd.f32 0.4994258, %v1195_v36  ;;  %v1063_v51 = vadd.f32 0.05243302, %v1062_v43  ;;  %v1071_v1 = vmul.f32 %v1070_v48, %v8902_v46 }
 0x141   : > { %v6899_v9 = vclamps-f32 %v1173_v26, 1.0  ;;  %v1048_v24 = vand.u32 2147483647, %v1038_v15  ;;  %v1050_v59 = vand.u32 2147483648, %v1038_v15  ;;  %v1186_v27 = vmul.f32 %v1185_v20, %v8876_v62 }
 0x142   : > { %v1197_v13 = vmul.f32 %v1196_v63, %v8876_v62  ;;  %v1064_v61 = vmul.f32 %v1063_v51, %v8902_v46  ;;  %v1072_v7 = vadd.f32 0.014752088, %v1071_v1  ;;  %v1216_v10 = vmul.f32 %v8949_v16, %v8949_v16 }
 0x143   : > { %v4629_v28 = vadd.f32 1.0, %v6899_v9  ;;  %v4725_v25 = vmul.f32 %v4625_v37, %v425_v12  ;;  %v1027_v22 = vadd.f32 1.1283791, %v1026_v0  ;;  %v8969_v45 = vmul.f32 0.70710677, %v8961_v60 }
 0x144   : > { %v7573_v33 = vpop.eup %7572  ;;  %vm1044_vm0 = vweird.f32 %v1038_v15  ;;  %v8971_v44 = vadd.f32 1.0, %v1197_v13  ;;  %v1073_v19 = vmul.f32 %v1072_v7, %v8902_v46  ;;  %v8974_v62 = vmin.f32 %v1216_v10, 16.0 }
 0x145   : > { %v4729_v47 = vmul.f32 %v4629_v28, %v429_v21  ;;  %v1040_v17 = vmul.f32 %v7573_v33, %v1038_v15  ;;  %vm8976_vm1 = vcmp.eq.f32.partialorder %v1048_v24, 8.507059e+37  ;;  %v1256_v29 = vmul.f32 %v8969_v45, %v8969_v45 }
 0x146   : > { %v1051_v35 = vor.u32 1.1754944e-38, %v1050_v59  ;;  %v1187_v14 = vadd.f32 1.1283791, %v1186_v27  ;;  %7574 = vrcp.f32 %v8971_v44  ;;  %v1065_v23 = vadd.f32 0.18741608, %v1064_v61 }
 0x147   : > { %v8986_v18 = vpack.c.bf16 %v4729_v47, %v4725_v25  ;;  %v1041_v30 = vsub.f32 1.0, %v1040_v17  ;;  %vm1045_vm2 = vweird.f32 %v7573_v33  ;;  %v1074_v41 = vadd.f32 0.112945676, %v1073_v19 }
 0x148   : > { %v1028_v3 = vmul.f32 %v1027_v22, %v8837_v11  ;;  %v1218_v56 = vmul.f32 2.1237322e-06, %v8974_v62  ;;  %v1229_v57 = vmul.f32 3.8918573e-05, %v8974_v62  ;;  %v8992_v38 = vmul.f32 0.70710677, %v8981_v31  ;;  %vm9000_vm3 = vmor %vm1044_vm0, %vm1045_vm2 }
 0x149   : > { %5605 = vmatmul.bf16.gmra.mxu1 %v8986_v18  ;;  %v1042_v34 = vmul.f32 %v7573_v33, %v1041_v30  ;;  %v1208_v40 = vand.u32 2147483647, %v8971_v44  ;;  %v1075_v55 = vmul.f32 %v1074_v41, %v8902_v46  ;;  %v8997_v36 = vmin.f32 %v1256_v29, 16.0 }
 0x14a   : > { %vm1204_vm4 = vweird.f32 %v8971_v44  ;;  %v1210_v11 = vand.u32 2147483648, %v8971_v44  ;;  %v1219_v12 = vadd.f32 0.00028619796, %v1218_v56  ;;  %v1230_v8 = vadd.f32 0.001143296, %v1229_v57 }
 0x14b   : > { %v1043_v20 = vadd.f32 %v7573_v33, %v1042_v34  ;;  %v1066_v43 = vmul.f32 %v1065_v23, %v8902_v46  ;;  %v1076_v21 = vadd.f32 0.4994258, %v1075_v55  ;;  %v1258_v2 = vmul.f32 2.1237322e-06, %v8997_v36 }
 0x14c   : > { %v7575_v26 = vpop.eup %7574  ;;  %v1220_v37 = vmul.f32 %v1219_v12, %v8974_v62  ;;  %v1231_v15 = vmul.f32 %v1230_v8, %v8974_v62  ;;  %v1269_v0 = vmul.f32 3.8918573e-05, %v8997_v36  ;;  %v1416_v63 = vmul.f32 %v8992_v38, %v8992_v38 }
 0x14d   : > { %v1047_v51 = vsel %vm9000_vm3, %v7573_v33, %v1043_v20  ;;  %v1200_v1 = vmul.f32 %v7575_v26, %v8971_v44  ;;  %vm1205_vm5 = vweird.f32 %v7575_v26  ;;  %v1077_v9 = vmul.f32 %v1076_v21, %v8902_v46 }
 0x14e   : > { %v1052_v24 = vsel %vm8976_vm1, %v1051_v35, %v1047_v51  ;;  %v1221_v59 = vadd.f32 0.0036580483, %v1220_v37  ;;  %v1232_v27 = vadd.f32 0.014752088, %v1231_v15  ;;  %v1259_v13 = vadd.f32 0.00028619796, %v1258_v2  ;;  %vm9031_vm6 = vmor %vm1204_vm4, %vm1205_vm5 }
 0x14f   : > { %v1053_v61 = vmul.f32 %v1052_v24, %v1028_v3  ;;  %v1201_v7 = vsub.f32 1.0, %v1200_v1  ;;  %v9019_v10 = vadd.f32 1.0, %v1077_v9  ;;  %v1270_v28 = vadd.f32 0.001143296, %v1269_v0  ;;  %v7220_v0 = vld [vmem:[%s8060_s18 + $0x1c8] sm:$0xf] }
 0x150   : > { %v1222_v25 = vmul.f32 %v1221_v59, %v8974_v62  ;;  %v1233_v22 = vmul.f32 %v1232_v27, %v8974_v62  ;;  %v1260_v33 = vmul.f32 %v1259_v13, %v8997_v36  ;;  %v9024_v19 = vmin.f32 %v1416_v63, 16.0  ;;  %v7436_v63 = vld [vmem:[%s8060_s18 + $0x1d4] sm:$0xf0]  ;;  %v7434_v51 = vld [vmem:[%s8060_s18 + $0x1cc] sm:$0xf] }
 0x151   : > { %v6896_v46 = vclamps-f32 %v1053_v61, 1.0  ;;  %v1188_v47 = vmul.f32 %v1187_v14, %v8840_v52  ;;  %v1202_v17 = vmul.f32 %v7575_v26, %v1201_v7  ;;  %7576 = vrcp.f32 %v9019_v10  ;;  %v7222_v13 = vld [vmem:[%s8060_s18 + $0x1d8] sm:$0xf0]  ;;  %v7212_v61 = vld [vmem:[%s8060_s18 + $0x1c0] sm:$0xf] }
 0x152   : > { %v1211_v29 = vor.u32 1.1754944e-38, %v1210_v11  ;;  %v1223_v35 = vadd.f32 0.05243302, %v1222_v25  ;;  %v1271_v23 = vmul.f32 %v1270_v28, %v8997_v36  ;;  %v1418_v30 = vmul.f32 2.1237322e-06, %v9024_v19 }
 0x153   : > { %v1203_v41 = vadd.f32 %v7575_v26, %v1202_v17  ;;  %vm1209_vm7 = vcmp.eq.f32.partialorder %v1208_v40, 8.507059e+37  ;;  %v1234_v3 = vadd.f32 0.112945676, %v1233_v22  ;;  %v1261_v52 = vadd.f32 0.0036580483, %v1260_v33 }
 0x154   : > { %v1067_v14 = vadd.f32 1.1283791, %v1066_v43  ;;  %v1088_v56 = vand.u32 2147483647, %v9019_v10  ;;  %v1224_v57 = vmul.f32 %v1223_v35, %v8974_v62  ;;  %v1272_v44 = vadd.f32 0.014752088, %v1271_v23 }
 0x155   : > { %v1207_v34 = vsel %vm9031_vm6, %v7575_v26, %v1203_v41  ;;  %v4626_v55 = vadd.f32 1.0, %v6896_v46  ;;  %v1235_v48 = vmul.f32 %v1234_v3, %v8974_v62  ;;  %v1262_v11 = vmul.f32 %v1261_v52, %v8997_v36  ;;  %v7435_v25 = vld [vmem:[%s8060_s18 + $0x1cc] sm:$0xf0]  ;;  %v7433_v17 = vld [vmem:[%s8060_s18 + $0x1c4] sm:$0xf]  ;;  %v9064_v41 = vld [vmem:[%s8053_s10 + $0x88] sm:$0xff] }
 0x156   : > { %v1212_v40 = vsel %vm1209_vm7, %v1211_v29, %v1207_v34  ;;  %v1090_v12 = vand.u32 2147483648, %v9019_v10  ;;  %v1225_v8 = vadd.f32 0.18741608, %v1224_v57  ;;  %v1419_v20 = vadd.f32 0.00028619796, %v1418_v30 }
 0x157   : > { %v7577_v43 = vpop.eup %7576  ;;  %v1213_v21 = vmul.f32 %v1212_v40, %v1188_v47  ;;  %v1236_v2 = vadd.f32 0.4994258, %v1235_v48  ;;  %v1263_v37 = vadd.f32 0.05243302, %v1262_v11  ;;  %v1429_v26 = vmul.f32 3.8918573e-05, %v9024_v19 }
 0x158   : > { %v1080_v15 = vmul.f32 %v7577_v43, %v9019_v10  ;;  %vm1084_vm8 = vweird.f32 %v9019_v10  ;;  %v1273_v1 = vmul.f32 %v1272_v44, %v8997_v36  ;;  %v4726_v24 = vmul.f32 %v4626_v55, %v8953_v39  ;;  %v9082_v10 = vld [vmem:[%s8053_s10 + $0xa8] sm:$0xff] }
 0x159   : > { %v6900_v9 = vclamps-f32 %v1213_v21, 1.0  ;;  %v1237_v59 = vmul.f32 %v1236_v2, %v8974_v62  ;;  %v7221_v27 = vor.u32 %v7436_v63, %v7220_v0  ;;  %vm1085_vm9 = vweird.f32 %v7577_v43 }
 0x15a   : > { %v1081_v7 = vsub.f32 1.0, %v1080_v15  ;;  %v7225_v28 = vor.u32 %v7434_v51, %v7222_v13  ;;  %v1420_v22 = vmul.f32 %v1419_v20, %v9024_v19  ;;  %v7213_v47 = vor.u32 %v7435_v25, %v7212_v61  ;;  %vm9070_vm10 = vmor %vm1084_vm8, %vm1085_vm9 }
 0x15b   : > { %v4630_v33 = vadd.f32 1.0, %v6900_v9  ;;  %v9057_v46 = vadd.f32 1.0, %v1237_v59  ;;  %5958 = vmatpush.bf16.xpose.msrb.mxu2 %v7221_v27  ;;  %v1264_v39 = vmul.f32 %v1263_v37, %v8997_v36  ;;  %v1068_v29 = vmul.f32 %v1067_v14, %v8854_v54 }
 0x15c   : > { %v1082_v35 = vmul.f32 %v7577_v43, %v1081_v7  ;;  %6031 = vmatpush.bf16.xpose.msrb.mxu3 %v7225_v28  ;;  %v7217_v23 = vor.u32 %v7433_v17, %v7214_v32  ;;  %v1274_v30 = vadd.f32 0.112945676, %v1273_v1  ;;  %vm9074_vm11 = vcmp.eq.f32.partialorder %v1088_v56, 8.507059e+37  ;;  %5812 = vmatpush.bf16.xpose.msrb.mxu0 %v7213_v47 }
 0x15d   : > { %v4730_v3 = vmul.f32 %v4630_v33, %v8957_v49  ;;  %v1091_v54 = vor.u32 1.1754944e-38, %v1090_v12  ;;  %7578 = vrcp.f32 %v9057_v46  ;;  %v1226_v44 = vmul.f32 %v1225_v8, %v8974_v62 }
 0x15e   : > { %v1083_v14 = vadd.f32 %v7577_v43, %v1082_v35  ;;  %5885 = vmatpush.bf16.xpose.msrb.mxu1 %v7217_v23  ;;  %v1265_v49 = vadd.f32 0.18741608, %v1264_v39  ;;  %v1275_v34 = vmul.f32 %v1274_v30, %v8997_v36  ;;  %v1421_v48 = vadd.f32 0.0036580483, %v1420_v22  ;;  %v9119_v22 = vld [vmem:[%s8053_s10 + $0x90] sm:$0xff] }
 0x15f   : > { %v9084_v55 = vpack.c.bf16 %v4730_v3, %v4726_v24  ;;  %v1430_v56 = vadd.f32 0.001143296, %v1429_v26  ;;  %v9087_v11 = vmul.f32 0.70710677, %v9064_v41  ;;  %v427_v40 = vmul.f32 0.5, %v8847_v4 }
 0x160   : > { %v1087_v12 = vsel %vm9070_vm10, %v7577_v43, %v1083_v14  ;;  %v1266_v62 = vmul.f32 %v1265_v49, %v8997_v36  ;;  %v1276_v8 = vadd.f32 0.4994258, %v1275_v34  ;;  %v1422_v21 = vmul.f32 %v1421_v48, %v9024_v19 }
 0x161   : > { %5678 = vmatmul.bf16.gmra.mxu2 %v9084_v55  ;;  %v1092_v20 = vsel %vm9074_vm11, %v1091_v54, %v1087_v12  ;;  %v1431_v2 = vmul.f32 %v1430_v56, %v9024_v19  ;;  %v9099_v37 = vmul.f32 0.70710677, %v9082_v10  ;;  %v9102_v4 = vmul.f32 0.5, %v8940_v5 }
 0x162   : > { %v1093_v26 = vmul.f32 %v1092_v20, %v1068_v29  ;;  %v1227_v43 = vadd.f32 1.1283791, %v1226_v44  ;;  %v1277_v15 = vmul.f32 %v1276_v8, %v8997_v36  ;;  %v1423_v63 = vadd.f32 0.05243302, %v1422_v21 }
 0x163   : > { %v7579_v0 = vpop.eup %7578  ;;  %v1432_v51 = vadd.f32 0.014752088, %v1431_v2  ;;  %v1296_v1 = vmul.f32 %v9087_v11, %v9087_v11  ;;  %v1456_v9 = vmul.f32 %v9099_v37, %v9099_v37  ;;  %v1248_v59 = vand.u32 2147483647, %v9057_v46 }
 0x164   : > { %v1240_v24 = vmul.f32 %v7579_v0, %v9057_v46  ;;  %v1250_v5 = vand.u32 2147483648, %v9057_v46  ;;  %v9113_v27 = vmul.f32 0.5, %v8961_v60  ;;  %v6897_v36 = vclamps-f32 %v1093_v26, 1.0 }
 0x165   : > { %v1267_v13 = vadd.f32 1.1283791, %v1266_v62  ;;  %v1278_v61 = vadd.f32 1.0, %v1277_v15  ;;  %v1433_v7 = vmul.f32 %v1432_v51, %v9024_v19  ;;  %vm1244_vm12 = vweird.f32 %v9057_v46 }
 0x166   : > { %v1241_v28 = vsub.f32 1.0, %v1240_v24  ;;  %vm1245_vm13 = vweird.f32 %v7579_v0  ;;  %v1424_v25 = vmul.f32 %v1423_v63, %v9024_v19  ;;  %v1228_v33 = vmul.f32 %v1227_v43, %v8949_v16 }
 0x167   : > { %7580 = vrcp.f32 %v1278_v61  ;;  %v9122_v47 = vmin.f32 %v1296_v1, 16.0  ;;  %v9124_v60 = vmin.f32 %v1456_v9, 16.0  ;;  %vm9126_vm14 = vcmp.eq.f32.partialorder %v1248_v59, 8.507059e+37  ;;  %vm9130_vm15 = vmor %vm1244_vm12, %vm1245_vm13 }
 0x168   : > { %v1242_v17 = vmul.f32 %v7579_v0, %v1241_v28  ;;  %v1251_v39 = vor.u32 1.1754944e-38, %v1250_v5  ;;  %v1434_v29 = vadd.f32 0.112945676, %v1433_v7  ;;  %v4627_v35 = vadd.f32 1.0, %v6897_v36  ;;  %v9156_v5 = vld [vmem:[%s8053_s10 + $0xb0] sm:$0xff] }
 0x169   : > { %v9135_v23 = vmul.f32 %v1267_v13, %v8969_v45  ;;  %v1288_v16 = vand.u32 2147483647, %v1278_v61  ;;  %v9138_v30 = vmul.f32 0.70710677, %v9119_v22  ;;  %v1425_v52 = vadd.f32 0.18741608, %v1424_v25 }
 0x16a   : > { %v1243_v3 = vadd.f32 %v7579_v0, %v1242_v17  ;;  %v1435_v57 = vmul.f32 %v1434_v29, %v9024_v19  ;;  %v1298_v54 = vmul.f32 2.1237322e-06, %v9122_v47  ;;  %vm1284_vm0 = vweird.f32 %v1278_v61 }
 0x16b   : > { %v1309_v14 = vmul.f32 3.8918573e-05, %v9122_v47  ;;  %v1458_v44 = vmul.f32 2.1237322e-06, %v9124_v60  ;;  %v1469_v49 = vmul.f32 3.8918573e-05, %v9124_v60  ;;  %v4727_v26 = vmul.f32 %v4627_v35, %v427_v40 }
 0x16c   : > { %v1247_v45 = vsel %vm9130_vm15, %v7579_v0, %v1243_v3  ;;  %v1290_v34 = vand.u32 2147483648, %v1278_v61  ;;  %v1436_v48 = vadd.f32 0.4994258, %v1435_v57  ;;  %v1299_v56 = vadd.f32 0.00028619796, %v1298_v54 }
 0x16d   : > { %v7581_v12 = vpop.eup %7580  ;;  %v1252_v62 = vsel %vm9126_vm14, %v1251_v39, %v1247_v45  ;;  %v1310_v8 = vadd.f32 0.001143296, %v1309_v14  ;;  %v1459_v20 = vadd.f32 0.00028619796, %v1458_v44  ;;  %v1470_v21 = vadd.f32 0.001143296, %v1469_v49 }
 0x16e   : > { %v1253_v2 = vmul.f32 %v1252_v62, %v1228_v33  ;;  %v1280_v43 = vmul.f32 %v7581_v12, %v1278_v61  ;;  %v1426_v15 = vmul.f32 %v1425_v52, %v9024_v19  ;;  %v1437_v63 = vmul.f32 %v1436_v48, %v9024_v19 }
 0x16f   : > { %v1300_v0 = vmul.f32 %v1299_v56, %v9122_v47  ;;  %v1311_v51 = vmul.f32 %v1310_v8, %v9122_v47  ;;  %v1460_v1 = vmul.f32 %v1459_v20, %v9124_v60  ;;  %vm1285_vm1 = vweird.f32 %v7581_v12 }
 0x170   : > { %v6901_v9 = vclamps-f32 %v1253_v2, 1.0  ;;  %v1281_v24 = vsub.f32 1.0, %v1280_v43  ;;  %v1471_v59 = vmul.f32 %v1470_v21, %v9124_v60  ;;  %v9158_v36 = vadd.f32 1.0, %v1437_v63  ;;  %vm9163_vm2 = vmor %vm1284_vm0, %vm1285_vm1 }
 0x171   : > { %v1301_v40 = vadd.f32 0.0036580483, %v1300_v0  ;;  %v1312_v13 = vadd.f32 0.014752088, %v1311_v51  ;;  %v1336_v19 = vmul.f32 %v9138_v30, %v9138_v30  ;;  %v1461_v25 = vadd.f32 0.0036580483, %v1460_v1 }
 0x172   : > { %v4631_v7 = vadd.f32 1.0, %v6901_v9  ;;  %v1282_v28 = vmul.f32 %v7581_v12, %v1281_v24  ;;  %v1472_v33 = vadd.f32 0.014752088, %v1471_v59  ;;  %vm9167_vm3 = vcmp.eq.f32.partialorder %v1288_v16, 8.507059e+37 }
 0x173   : > { %v1291_v39 = vor.u32 1.1754944e-38, %v1290_v34  ;;  %7582 = vrcp.f32 %v9158_v36  ;;  %v9173_v29 = vmul.f32 0.70710677, %v9156_v5  ;;  %v1302_v3 = vmul.f32 %v1301_v40, %v9122_v47 }
 0x174   : > { %v4731_v46 = vmul.f32 %v4631_v7, %v9102_v4  ;;  %v1283_v35 = vadd.f32 %v7581_v12, %v1282_v28  ;;  %v1313_v61 = vmul.f32 %v1312_v13, %v9122_v47  ;;  %v1427_v52 = vadd.f32 1.1283791, %v1426_v15 }
 0x175   : > { %v1462_v57 = vmul.f32 %v1461_v25, %v9124_v60  ;;  %v1473_v16 = vmul.f32 %v1472_v33, %v9124_v60  ;;  %v9180_v54 = vmin.f32 %v1336_v19, 16.0  ;;  %v1303_v49 = vadd.f32 0.05243302, %v1302_v3 }
 0x176   : > { %v9182_v14 = vpack.c.bf16 %v4731_v46, %v4727_v26  ;;  %v1287_v44 = vsel %vm9163_vm2, %v7581_v12, %v1283_v35  ;;  %v1314_v45 = vadd.f32 0.112945676, %v1313_v61  ;;  %v1496_v56 = vmul.f32 %v9173_v29, %v9173_v29 }
 0x177   : > { %v1292_v4 = vsel %vm9167_vm3, %v1291_v39, %v1287_v44  ;;  %v1463_v34 = vadd.f32 0.05243302, %v1462_v57  ;;  %v1474_v48 = vadd.f32 0.112945676, %v1473_v16  ;;  %v1448_v8 = vand.u32 2147483647, %v9158_v36 }
 0x178   : > { %5751 = vmatmul.bf16.gmra.mxu3 %v9182_v14  ;;  %v1293_v62 = vmul.f32 %v1292_v4, %v9135_v23  ;;  %v1304_v20 = vmul.f32 %v1303_v49, %v9122_v47  ;;  %v1315_v12 = vmul.f32 %v1314_v45, %v9122_v47  ;;  %v1338_v43 = vmul.f32 2.1237322e-06, %v9180_v54 }
 0x179   : > { %v7583_v21 = vpop.eup %7582  ;;  %v1464_v2 = vmul.f32 %v1463_v34, %v9124_v60  ;;  %v1475_v26 = vmul.f32 %v1474_v48, %v9124_v60  ;;  %v1349_v15 = vmul.f32 3.8918573e-05, %v9180_v54  ;;  %v1450_v23 = vand.u32 2147483648, %v9158_v36 }
 0x17a   : > { %v6902_v63 = vclamps-f32 %v1293_v62, 1.0  ;;  %v1440_v0 = vmul.f32 %v7583_v21, %v9158_v36  ;;  %v1305_v51 = vadd.f32 0.18741608, %v1304_v20  ;;  %vm1444_vm4 = vweird.f32 %v9158_v36 }
 0x17b   : > { %v1316_v1 = vadd.f32 0.4994258, %v1315_v12  ;;  %v1465_v9 = vadd.f32 0.18741608, %v1464_v2  ;;  %v1476_v24 = vadd.f32 0.4994258, %v1475_v26  ;;  %vm1445_vm5 = vweird.f32 %v7583_v21 }
 0x17c   : > { %v1441_v59 = vsub.f32 1.0, %v1440_v0  ;;  %v1306_v40 = vmul.f32 %v1305_v51, %v9122_v47  ;;  %v1339_v13 = vadd.f32 0.00028619796, %v1338_v43  ;;  %v1350_v25 = vadd.f32 0.001143296, %v1349_v15  ;;  %vm9210_vm6 = vmor %vm1444_vm4, %vm1445_vm5 }
 0x17d   : > { %v1317_v19 = vmul.f32 %v1316_v1, %v9122_v47  ;;  %v1466_v7 = vmul.f32 %v1465_v9, %v9124_v60  ;;  %v1477_v28 = vmul.f32 %v1476_v24, %v9124_v60  ;;  %v1428_v33 = vmul.f32 %v1427_v52, %v8992_v38 }
 0x17e   : > { %v1442_v17 = vmul.f32 %v7583_v21, %v1441_v59  ;;  %v1451_v32 = vor.u32 1.1754944e-38, %v1450_v23  ;;  %v1340_v39 = vmul.f32 %v1339_v13, %v9180_v54  ;;  %v4632_v35 = vadd.f32 1.0, %v6902_v63 }
 0x17f   : > { %v1307_v3 = vadd.f32 1.1283791, %v1306_v40  ;;  %v1318_v47 = vadd.f32 1.0, %v1317_v19  ;;  %v9214_v61 = vadd.f32 1.0, %v1477_v28  ;;  %vm1449_vm7 = vcmp.eq.f32.partialorder %v1448_v8, 8.507059e+37 }
 0x180   : > { %v1443_v57 = vadd.f32 %v7583_v21, %v1442_v17  ;;  %v1341_v60 = vadd.f32 0.0036580483, %v1340_v39  ;;  %v1351_v38 = vmul.f32 %v1350_v25, %v9180_v54  ;;  %v1467_v52 = vadd.f32 1.1283791, %v1466_v7 }
 0x181   : > { %7584 = vrcp.f32 %v1318_v47  ;;  %v9217_v16 = vmin.f32 %v1496_v56, 16.0  ;;  %v436_v36 = vmul.f32 0.5, %v8981_v31  ;;  %v1328_v49 = vand.u32 2147483647, %v1318_v47 }
 0x182   : > { %v1447_v44 = vsel %vm9210_vm6, %v7583_v21, %v1443_v57  ;;  %7586 = vrcp.f32 %v9214_v61  ;;  %v4732_v4 = vmul.f32 %v4632_v35, %v9113_v27  ;;  %v9225_v34 = vmul.f32 %v1307_v3, %v9087_v11  ;;  %v9235_v21 = vld [vmem:[%s8053_s10 + $0x98] sm:$0xff] }
 0x183   : > { %v1452_v45 = vsel %vm1449_vm7, %v1451_v32, %v1447_v44  ;;  %v1330_v48 = vand.u32 2147483648, %v1318_v47  ;;  %vm1324_vm8 = vweird.f32 %v1318_v47  ;;  %v1342_v56 = vmul.f32 %v1341_v60, %v9180_v54  ;;  %v9256_v60 = vld [vmem:[%s8053_s10 + $0xb8] sm:$0xff] }
 0x184   : > { %v1453_v62 = vmul.f32 %v1452_v45, %v1428_v33  ;;  %v1352_v8 = vadd.f32 0.014752088, %v1351_v38  ;;  %v9229_v31 = vmul.f32 %v1467_v52, %v9099_v37  ;;  %vm1484_vm9 = vweird.f32 %v9214_v61 }
 0x185   : > { %v1498_v20 = vmul.f32 2.1237322e-06, %v9217_v16  ;;  %v1509_v12 = vmul.f32 3.8918573e-05, %v9217_v16  ;;  %vm9237_vm10 = vcmp.eq.f32.partialorder %v1328_v49, 8.507059e+37  ;;  %v1331_v15 = vor.u32 1.1754944e-38, %v1330_v48 }
 0x186   : > { %v6906_v27 = vclamps-f32 %v1453_v62, 1.0  ;;  %v1488_v2 = vand.u32 2147483647, %v9214_v61  ;;  %v1343_v26 = vadd.f32 0.05243302, %v1342_v56  ;;  %v1353_v43 = vmul.f32 %v1352_v8, %v9180_v54 }
 0x187   : > { %v7585_v37 = vpop.eup %7584  ;;  %v1490_v63 = vand.u32 2147483648, %v9214_v61  ;;  %v1499_v0 = vadd.f32 0.00028619796, %v1498_v20  ;;  %v1510_v23 = vadd.f32 0.001143296, %v1509_v12 }
 0x188   : > { %v7587_v51 = vpop.eup %7586  ;;  %v4636_v1 = vadd.f32 1.0, %v6906_v27  ;;  %v1320_v9 = vmul.f32 %v7585_v37, %v1318_v47  ;;  %v1344_v24 = vmul.f32 %v1343_v26, %v9180_v54  ;;  %v9246_v59 = vmul.f32 0.70710677, %v9235_v21 }
 0x189   : > { %vm1325_vm11 = vweird.f32 %v7585_v37  ;;  %v1480_v40 = vmul.f32 %v7587_v51, %v9214_v61  ;;  %v1354_v13 = vadd.f32 0.112945676, %v1353_v43  ;;  %v1500_v19 = vmul.f32 %v1499_v0, %v9217_v16 }
 0x18a   : > { %v4736_v7 = vmul.f32 %v4636_v1, %v436_v36  ;;  %v1321_v28 = vsub.f32 1.0, %v1320_v9  ;;  %v1345_v25 = vadd.f32 0.18741608, %v1344_v24  ;;  %v1511_v33 = vmul.f32 %v1510_v23, %v9217_v16  ;;  %vm9260_vm13 = vmor %vm1324_vm8, %vm1325_vm11 }
 0x18b   : > { %v1481_v17 = vsub.f32 1.0, %v1480_v40  ;;  %vm1485_vm12 = vweird.f32 %v7587_v51  ;;  %v1355_v32 = vmul.f32 %v1354_v13, %v9180_v54  ;;  %v1501_v39 = vadd.f32 0.0036580483, %v1500_v19 }
 0x18c   : > { %v9252_v46 = vpack.c.bf16 %v4736_v7, %v4732_v4  ;;  %v1322_v35 = vmul.f32 %v7585_v37, %v1321_v28  ;;  %v1346_v3 = vmul.f32 %v1345_v25, %v9180_v54  ;;  %v1512_v57 = vadd.f32 0.014752088, %v1511_v33  ;;  %vm9273_vm15 = vmor %vm1484_vm9, %vm1485_vm12  ;;  %v9308_v25 = vld [vmem:[%s8053_s10 + $0xc0] sm:$0xff] }
 0x18d   : > { %v1482_v52 = vmul.f32 %v7587_v51, %v1481_v17  ;;  %vm9264_vm14 = vcmp.eq.f32.partialorder %v1488_v2, 8.507059e+37  ;;  %v1356_v44 = vadd.f32 0.4994258, %v1355_v32  ;;  %v1502_v49 = vmul.f32 %v1501_v39, %v9217_v16 }
 0x18e   : > { %5537 = vmatmul.bf16.gmra.mxu0 %v9252_v46  ;;  %v1323_v45 = vadd.f32 %v7585_v37, %v1322_v35  ;;  %v1491_v4 = vor.u32 1.1754944e-38, %v1490_v63  ;;  %v1513_v48 = vmul.f32 %v1512_v57, %v9217_v16  ;;  %v1376_v62 = vmul.f32 %v9246_v59, %v9246_v59 }
 0x18f   : > { %v1483_v56 = vadd.f32 %v7587_v51, %v1482_v52  ;;  %v1357_v8 = vmul.f32 %v1356_v44, %v9180_v54  ;;  %v1503_v20 = vadd.f32 0.05243302, %v1502_v49  ;;  %v9282_v12 = vmul.f32 0.70710677, %v9256_v60 }
 0x190   : > { %v433_v27 = vmul.f32 0.5, %v9064_v41  ;;  %v1327_v61 = vsel %vm9260_vm13, %v7585_v37, %v1323_v45  ;;  %v1347_v2 = vadd.f32 1.1283791, %v1346_v3  ;;  %v1514_v26 = vadd.f32 0.112945676, %v1513_v48 }
 0x191   : > { %v1332_v43 = vsel %vm9237_vm10, %v1331_v15, %v1327_v61  ;;  %v1487_v63 = vsel %vm9273_vm15, %v7587_v51, %v1483_v56  ;;  %v1358_v0 = vadd.f32 1.0, %v1357_v8  ;;  %v1504_v54 = vmul.f32 %v1503_v20, %v9217_v16  ;;  %v9327_v61 = vld [vmem:[%s8053_s10 + $0xe0] sm:$0xff] }
 0x192   : > { %v1333_v23 = vmul.f32 %v1332_v43, %v9225_v34  ;;  %v1492_v41 = vsel %vm9264_vm14, %v1491_v4, %v1487_v63  ;;  %v1515_v1 = vmul.f32 %v1514_v26, %v9217_v16  ;;  %v9296_v37 = vmin.f32 %v1376_v62, 16.0  ;;  %v9405_v4 = vld [vmem:[%s8053_s10 + $0xe8] sm:$0xff] }
 0x193   : > { %v1493_v9 = vmul.f32 %v1492_v41, %v9229_v31  ;;  %7588 = vrcp.f32 %v1358_v0  ;;  %v1368_v11 = vand.u32 2147483647, %v1358_v0  ;;  %v1536_v15 = vmul.f32 %v9282_v12, %v9282_v12 }
 0x194   : > { %v437_v51 = vmul.f32 0.5, %v9082_v10  ;;  %v6903_v24 = vclamps-f32 %v1333_v23, 1.0  ;;  %v1505_v40 = vadd.f32 0.18741608, %v1504_v54  ;;  %v1516_v34 = vadd.f32 0.4994258, %v1515_v1 }
 0x195   : > { %v6907_v13 = vclamps-f32 %v1493_v9, 1.0  ;;  %v9303_v19 = vmul.f32 %v1347_v2, %v9138_v30  ;;  %v1378_v7 = vmul.f32 2.1237322e-06, %v9296_v37  ;;  %v1389_v28 = vmul.f32 3.8918573e-05, %v9296_v37 }
 0x196   : > { %v4633_v31 = vadd.f32 1.0, %v6903_v24  ;;  %v1370_v33 = vand.u32 2147483648, %v1358_v0  ;;  %v1506_v17 = vmul.f32 %v1505_v40, %v9217_v16  ;;  %v1517_v32 = vmul.f32 %v1516_v34, %v9217_v16 }
 0x197   : > { %v4637_v10 = vadd.f32 1.0, %v6907_v13  ;;  %v1379_v39 = vadd.f32 0.00028619796, %v1378_v7  ;;  %v1390_v35 = vadd.f32 0.001143296, %v1389_v28  ;;  %v9312_v3 = vmin.f32 %v1536_v15, 16.0 }
 0x198   : > { %v4733_v57 = vmul.f32 %v4633_v31, %v433_v27  ;;  %v1507_v30 = vadd.f32 1.1283791, %v1506_v17  ;;  %v1518_v38 = vadd.f32 1.0, %v1517_v32  ;;  %v9315_v52 = vmul.f32 0.70710677, %v9308_v25 }
 0x199   : > { %v7589_v36 = vpop.eup %7588  ;;  %v4737_v44 = vmul.f32 %v4637_v10, %v437_v51  ;;  %v1380_v49 = vmul.f32 %v1379_v39, %v9296_v37  ;;  %v1391_v45 = vmul.f32 %v1390_v35, %v9296_v37  ;;  %v1538_v16 = vmul.f32 2.1237322e-06, %v9312_v3 }
 0x19a   : > { %v1360_v47 = vmul.f32 %v7589_v36, %v1358_v0  ;;  %vm1364_vm0 = vweird.f32 %v1358_v0  ;;  %vm9320_vm1 = vcmp.eq.f32.partialorder %v1368_v11, 8.507059e+37  ;;  %7590 = vrcp.f32 %v1518_v38 }
 0x19b   : > { %v9324_v48 = vpack.c.bf16 %v4737_v44, %v4733_v57  ;;  %vm1365_vm2 = vweird.f32 %v7589_v36  ;;  %v1528_v62 = vand.u32 2147483647, %v1518_v38  ;;  %v1530_v56 = vand.u32 2147483648, %v1518_v38 }
 0x19c   : > { %v1361_v8 = vsub.f32 1.0, %v1360_v47  ;;  %v1381_v20 = vadd.f32 0.0036580483, %v1380_v49  ;;  %v1392_v27 = vadd.f32 0.014752088, %v1391_v45  ;;  %v1576_v2 = vmul.f32 %v9315_v52, %v9315_v52  ;;  %vm9338_vm4 = vmor %vm1364_vm0, %vm1365_vm2 }
 0x19d   : > { %5610 = vmatmul.bf16.gmra.mxu1 %v9324_v48  ;;  %v1371_v26 = vor.u32 1.1754944e-38, %v1370_v33  ;;  %v1508_v43 = vmul.f32 %v1507_v30, %v9173_v29  ;;  %v1539_v63 = vadd.f32 0.00028619796, %v1538_v16  ;;  %v1549_v54 = vmul.f32 3.8918573e-05, %v9312_v3 }
 0x19e   : > { %v1362_v23 = vmul.f32 %v7589_v36, %v1361_v8  ;;  %vm1524_vm3 = vweird.f32 %v1518_v38  ;;  %v1382_v41 = vmul.f32 %v1381_v20, %v9296_v37  ;;  %v1393_v1 = vmul.f32 %v1392_v27, %v9296_v37 }
 0x19f   : > { %vm9342_vm5 = vcmp.eq.f32.partialorder %v1528_v62, 8.507059e+37  ;;  %v1531_v29 = vor.u32 1.1754944e-38, %v1530_v56  ;;  %v1540_v15 = vmul.f32 %v1539_v63, %v9312_v3  ;;  %v1550_v51 = vadd.f32 0.001143296, %v1549_v54 }
 0x1a0   : > { %v9348_v24 = vmul.f32 0.70710677, %v9327_v61  ;;  %v7591_v40 = vpop.eup %7590  ;;  %v1363_v34 = vadd.f32 %v7589_v36, %v1362_v23  ;;  %v1383_v13 = vadd.f32 0.05243302, %v1382_v41  ;;  %v1394_v7 = vadd.f32 0.112945676, %v1393_v1 }
 0x1a1   : > { %v9350_v0 = vmin.f32 %v1576_v2, 16.0  ;;  %v1520_v28 = vmul.f32 %v7591_v40, %v1518_v38  ;;  %vm1525_vm6 = vweird.f32 %v7591_v40  ;;  %v1541_v31 = vadd.f32 0.0036580483, %v1540_v15 }
 0x1a2   : > { %v1551_v33 = vmul.f32 %v1550_v51, %v9312_v3  ;;  %v1367_v17 = vsel %vm9338_vm4, %v7589_v36, %v1363_v34  ;;  %v1384_v32 = vmul.f32 %v1383_v13, %v9296_v37  ;;  %v1395_v10 = vmul.f32 %v1394_v7, %v9296_v37  ;;  %vm9366_vm7 = vmor %vm1524_vm3, %vm1525_vm6 }
 0x1a3   : > { %v1578_v39 = vmul.f32 2.1237322e-06, %v9350_v0  ;;  %v1372_v35 = vsel %vm9320_vm1, %v1371_v26, %v1367_v17  ;;  %v1521_v57 = vsub.f32 1.0, %v1520_v28  ;;  %v1542_v30 = vmul.f32 %v1541_v31, %v9312_v3  ;;  %v9383_v28 = vld [vmem:[%s8053_s10 + $0xc8] sm:$0xff] }
 0x1a4   : > { %v1552_v44 = vadd.f32 0.014752088, %v1551_v33  ;;  %v1373_v49 = vmul.f32 %v1372_v35, %v9303_v19  ;;  %v1385_v45 = vadd.f32 0.18741608, %v1384_v32  ;;  %v1396_v16 = vadd.f32 0.4994258, %v1395_v10 }
 0x1a5   : > { %v1579_v47 = vadd.f32 0.00028619796, %v1578_v39  ;;  %v1522_v62 = vmul.f32 %v7591_v40, %v1521_v57  ;;  %v1543_v36 = vadd.f32 0.05243302, %v1542_v30  ;;  %v1589_v8 = vmul.f32 3.8918573e-05, %v9350_v0 }
 0x1a6   : > { %v1553_v56 = vmul.f32 %v1552_v44, %v9312_v3  ;;  %v6904_v20 = vclamps-f32 %v1373_v49, 1.0  ;;  %v1386_v27 = vmul.f32 %v1385_v45, %v9296_v37  ;;  %v1397_v19 = vmul.f32 %v1396_v16, %v9296_v37 }
 0x1a7   : > { %v1580_v2 = vmul.f32 %v1579_v47, %v9350_v0  ;;  %v1523_v26 = vadd.f32 %v7591_v40, %v1522_v62  ;;  %v1544_v63 = vmul.f32 %v1543_v36, %v9312_v3  ;;  %v1590_v23 = vadd.f32 0.001143296, %v1589_v8 }
 0x1a8   : > { %v1554_v54 = vadd.f32 0.112945676, %v1553_v56  ;;  %v434_v41 = vmul.f32 0.5, %v9119_v22  ;;  %v4634_v1 = vadd.f32 1.0, %v6904_v20  ;;  %v1398_v38 = vadd.f32 1.0, %v1397_v19 }
 0x1a9   : > { %v1581_v9 = vadd.f32 0.0036580483, %v1580_v2  ;;  %v1527_v15 = vsel %vm9366_vm7, %v7591_v40, %v1523_v26  ;;  %v1545_v51 = vadd.f32 0.18741608, %v1544_v63  ;;  %v1591_v37 = vmul.f32 %v1590_v23, %v9350_v0 }
 0x1aa   : > { %v1555_v34 = vmul.f32 %v1554_v54, %v9312_v3  ;;  %v438_v13 = vmul.f32 0.5, %v9156_v5  ;;  %v1532_v7 = vsel %vm9342_vm5, %v1531_v29, %v1527_v15  ;;  %7592 = vrcp.f32 %v1398_v38 }
 0x1ab   : > { %v1533_v22 = vmul.f32 %v1532_v7, %v1508_v43  ;;  %v9386_v31 = vmul.f32 0.5, %v9235_v21  ;;  %v1387_v33 = vadd.f32 1.1283791, %v1386_v27  ;;  %v1736_v40 = vmul.f32 %v9348_v24, %v9348_v24 }
 0x1ac   : > { %v1546_v17 = vmul.f32 %v1545_v51, %v9312_v3  ;;  %v1556_v32 = vadd.f32 0.4994258, %v1555_v34  ;;  %v1582_v10 = vmul.f32 %v1581_v9, %v9350_v0  ;;  %v1592_v5 = vadd.f32 0.014752088, %v1591_v37 }
 0x1ad   : > { %v6908_v39 = vclamps-f32 %v1533_v22, 1.0  ;;  %v4734_v11 = vmul.f32 %v4634_v1, %v434_v41  ;;  %v9393_v29 = vmul.f32 0.5, %v9256_v60  ;;  %v9396_v43 = vmul.f32 0.70710677, %v9383_v28 }
 0x1ae   : > { %v1408_v21 = vand.u32 2147483647, %v1398_v38  ;;  %v1410_v35 = vand.u32 2147483648, %v1398_v38  ;;  %v1557_v57 = vmul.f32 %v1556_v32, %v9312_v3  ;;  %v1583_v30 = vadd.f32 0.05243302, %v1582_v10 }
 0x1af   : > { %v4638_v44 = vadd.f32 1.0, %v6908_v39  ;;  %v1388_v49 = vmul.f32 %v1387_v33, %v9246_v59  ;;  %vm1404_vm8 = vweird.f32 %v1398_v38  ;;  %v1593_v45 = vmul.f32 %v1592_v5, %v9350_v0 }
 0x1b0   : > { %v7593_v16 = vpop.eup %7592  ;;  %v1547_v47 = vadd.f32 1.1283791, %v1546_v17  ;;  %v1558_v62 = vadd.f32 1.0, %v1557_v57  ;;  %v1584_v60 = vmul.f32 %v1583_v30, %v9350_v0  ;;  %v9402_v36 = vmin.f32 %v1736_v40, 16.0  ;;  %v9444_v57 = vld [vmem:[%s8053_s10 + $0xd0] sm:$0xff] }
 0x1b1   : > { %v4738_v56 = vmul.f32 %v4638_v44, %v438_v13  ;;  %v1400_v8 = vmul.f32 %v7593_v16, %v1398_v38  ;;  %v1594_v20 = vadd.f32 0.112945676, %v1593_v45  ;;  %v1616_v3 = vmul.f32 %v9396_v43, %v9396_v43 }
 0x1b2   : > { %vm1405_vm9 = vweird.f32 %v7593_v16  ;;  %vm9409_vm10 = vcmp.eq.f32.partialorder %v1408_v21, 8.507059e+37  ;;  %v1411_v27 = vor.u32 1.1754944e-38, %v1410_v35  ;;  %7594 = vrcp.f32 %v1558_v62 }
 0x1b3   : > { %v9413_v19 = vpack.c.bf16 %v4738_v56, %v4734_v11  ;;  %v1401_v2 = vsub.f32 1.0, %v1400_v8  ;;  %v1585_v26 = vadd.f32 0.18741608, %v1584_v60  ;;  %v1595_v63 = vmul.f32 %v1594_v20, %v9350_v0  ;;  %vm9430_vm11 = vmor %vm1404_vm8, %vm1405_vm9 }
 0x1b4   : > { %v9417_v54 = vmul.f32 %v1547_v47, %v9282_v12  ;;  %v1738_v23 = vmul.f32 2.1237322e-06, %v9402_v36  ;;  %v1749_v41 = vmul.f32 3.8918573e-05, %v9402_v36  ;;  %v9422_v1 = vmul.f32 0.70710677, %v9405_v4 }
 0x1b5   : > { %5683 = vmatmul.bf16.gmra.mxu2 %v9413_v19  ;;  %v1402_v9 = vmul.f32 %v7593_v16, %v1401_v2  ;;  %v1586_v15 = vmul.f32 %v1585_v26, %v9350_v0  ;;  %v1596_v51 = vadd.f32 0.4994258, %v1595_v63  ;;  %v9426_v34 = vmin.f32 %v1616_v3, 16.0 }
 0x1b6   : > { %vm1564_vm12 = vweird.f32 %v1558_v62  ;;  %v1568_v37 = vand.u32 2147483647, %v1558_v62  ;;  %v1739_v13 = vadd.f32 0.00028619796, %v1738_v23  ;;  %v1750_v7 = vadd.f32 0.001143296, %v1749_v41 }
 0x1b7   : > { %v1403_v22 = vadd.f32 %v7593_v16, %v1402_v9  ;;  %v1570_v33 = vand.u32 2147483648, %v1558_v62  ;;  %v1597_v40 = vmul.f32 %v1596_v51, %v9350_v0  ;;  %v1618_v17 = vmul.f32 2.1237322e-06, %v9426_v34 }
 0x1b8   : > { %v7595_v32 = vpop.eup %7594  ;;  %v1740_v10 = vmul.f32 %v1739_v13, %v9402_v36  ;;  %v1751_v38 = vmul.f32 %v1750_v7, %v9402_v36  ;;  %v1629_v5 = vmul.f32 3.8918573e-05, %v9426_v34  ;;  %v1776_v39 = vmul.f32 %v9422_v1, %v9422_v1 }
 0x1b9   : > { %v1407_v11 = vsel %vm9430_vm11, %v7593_v16, %v1403_v22  ;;  %v1560_v21 = vmul.f32 %v7595_v32, %v1558_v62  ;;  %vm1565_vm13 = vweird.f32 %v7595_v32  ;;  %v1587_v35 = vadd.f32 1.1283791, %v1586_v15 }
 0x1ba   : > { %v1412_v0 = vsel %vm9409_vm10, %v1411_v27, %v1407_v11  ;;  %v1598_v30 = vadd.f32 1.0, %v1597_v40  ;;  %v1741_v44 = vadd.f32 0.0036580483, %v1740_v10  ;;  %v1752_v45 = vadd.f32 0.014752088, %v1751_v38  ;;  %vm9459_vm15 = vmor %vm1564_vm12, %vm1565_vm13 }
 0x1bb   : > { %v1413_v47 = vmul.f32 %v1412_v0, %v1388_v49  ;;  %v1561_v60 = vsub.f32 1.0, %v1560_v21  ;;  %v1619_v56 = vadd.f32 0.00028619796, %v1618_v17  ;;  %v1630_v8 = vadd.f32 0.001143296, %v1629_v5 }
 0x1bc   : > { %vm9448_vm14 = vcmp.eq.f32.partialorder %v1568_v37, 8.507059e+37  ;;  %v1571_v16 = vor.u32 1.1754944e-38, %v1570_v33  ;;  %7596 = vrcp.f32 %v1598_v30  ;;  %v9453_v3 = vmul.f32 0.70710677, %v9444_v57 }
 0x1bd   : > { %v6905_v2 = vclamps-f32 %v1413_v47, 1.0  ;;  %v1562_v26 = vmul.f32 %v7595_v32, %v1561_v60  ;;  %v1742_v59 = vmul.f32 %v1741_v44, %v9402_v36  ;;  %v1753_v27 = vmul.f32 %v1752_v45, %v9402_v36 }
 0x1be   : > { %v1588_v63 = vmul.f32 %v1587_v35, %v9315_v52  ;;  %v1620_v23 = vmul.f32 %v1619_v56, %v9426_v34  ;;  %v1631_v41 = vmul.f32 %v1630_v8, %v9426_v34  ;;  %v9466_v9 = vmin.f32 %v1776_v39, 16.0 }
 0x1bf   : > { %v1563_v15 = vadd.f32 %v7595_v32, %v1562_v26  ;;  %v1608_v51 = vand.u32 2147483647, %v1598_v30  ;;  %v1743_v12 = vadd.f32 0.05243302, %v1742_v59  ;;  %v1754_v37 = vadd.f32 0.112945676, %v1753_v27 }
 0x1c0   : > { %v4635_v13 = vadd.f32 1.0, %v6905_v2  ;;  %vm1604_vm0 = vweird.f32 %v1598_v30  ;;  %v1621_v7 = vadd.f32 0.0036580483, %v1620_v23  ;;  %v1632_v62 = vadd.f32 0.014752088, %v1631_v41 }
 0x1c1   : > { %v1567_v22 = vsel %vm9459_vm15, %v7595_v32, %v1563_v15  ;;  %v1610_v33 = vand.u32 2147483648, %v1598_v30  ;;  %v1744_v52 = vmul.f32 %v1743_v12, %v9402_v36  ;;  %v1755_v40 = vmul.f32 %v1754_v37, %v9402_v36 }
 0x1c2   : > { %v7597_v17 = vpop.eup %7596  ;;  %v1572_v10 = vsel %vm9448_vm14, %v1571_v16, %v1567_v22  ;;  %v1622_v38 = vmul.f32 %v1621_v7, %v9426_v34  ;;  %v1633_v5 = vmul.f32 %v1632_v62, %v9426_v34  ;;  %v1778_v39 = vmul.f32 2.1237322e-06, %v9466_v9 }
 0x1c3   : > { %v1573_v11 = vmul.f32 %v1572_v10, %v9417_v54  ;;  %v1600_v21 = vmul.f32 %v7597_v17, %v1598_v30  ;;  %vm9478_vm1 = vcmp.eq.f32.partialorder %v1608_v51, 8.507059e+37  ;;  %v1745_v35 = vadd.f32 0.18741608, %v1744_v52 }
 0x1c4   : > { %v4735_v0 = vmul.f32 %v4635_v13, %v9386_v31  ;;  %v1756_v44 = vadd.f32 0.4994258, %v1755_v40  ;;  %v1623_v45 = vadd.f32 0.05243302, %v1622_v38  ;;  %v1634_v47 = vadd.f32 0.112945676, %v1633_v5 }
 0x1c5   : > { %v6909_v60 = vclamps-f32 %v1573_v11, 1.0  ;;  %v1601_v56 = vsub.f32 1.0, %v1600_v21  ;;  %vm1605_vm2 = vweird.f32 %v7597_v17  ;;  %v1779_v8 = vadd.f32 0.00028619796, %v1778_v39  ;;  %v9513_v11 = vld [vmem:[%s8053_s10 + $0xf0] sm:$0xff] }
 0x1c6   : > { %v1746_v20 = vmul.f32 %v1745_v35, %v9402_v36  ;;  %v1757_v16 = vmul.f32 %v1756_v44, %v9402_v36  ;;  %v1624_v54 = vmul.f32 %v1623_v45, %v9426_v34  ;;  %v1635_v2 = vmul.f32 %v1634_v47, %v9426_v34  ;;  %vm9491_vm3 = vmor %vm1604_vm0, %vm1605_vm2 }
 0x1c7   : > { %v4639_v26 = vadd.f32 1.0, %v6909_v60  ;;  %v1602_v59 = vmul.f32 %v7597_v17, %v1601_v56  ;;  %v1780_v27 = vmul.f32 %v1779_v8, %v9466_v9  ;;  %v1656_v31 = vmul.f32 %v9453_v3, %v9453_v3 }
 0x1c8   : > { %v1611_v23 = vor.u32 1.1754944e-38, %v1610_v33  ;;  %v1758_v41 = vadd.f32 1.0, %v1757_v16  ;;  %v1625_v15 = vadd.f32 0.18741608, %v1624_v54  ;;  %v1636_v36 = vadd.f32 0.4994258, %v1635_v2 }
 0x1c9   : > { %v4739_v51 = vmul.f32 %v4639_v26, %v9393_v29  ;;  %v1603_v12 = vadd.f32 %v7597_v17, %v1602_v59  ;;  %v1781_v37 = vadd.f32 0.0036580483, %v1780_v27  ;;  %v1789_v13 = vmul.f32 3.8918573e-05, %v9466_v9 }
 0x1ca   : > { %v1747_v7 = vadd.f32 1.1283791, %v1746_v20  ;;  %7598 = vrcp.f32 %v1758_v41  ;;  %v1637_v22 = vmul.f32 %v1636_v36, %v9426_v34  ;;  %v9502_v33 = vmin.f32 %v1656_v31, 16.0 }
 0x1cb   : > { %v9497_v62 = vpack.c.bf16 %v4739_v51, %v4735_v0  ;;  %v1607_v30 = vsel %vm9491_vm3, %v7597_v17, %v1603_v12  ;;  %v1768_v29 = vand.u32 2147483647, %v1758_v41  ;;  %v1626_v40 = vmul.f32 %v1625_v15, %v9426_v34 }
 0x1cc   : > { %v1612_v52 = vsel %vm9478_vm1, %v1611_v23, %v1607_v30  ;;  %v1782_v10 = vmul.f32 %v1781_v37, %v9466_v9  ;;  %v9510_v38 = vmul.f32 0.5, %v9308_v25  ;;  %v1638_v39 = vadd.f32 1.0, %v1637_v22  ;;  %v9543_v37 = vld [vmem:[%s8053_s10 + $0xd8] sm:$0xff] }
 0x1cd   : > { %5756 = vmatmul.bf16.gmra.mxu3 %v9497_v62  ;;  %v1613_v5 = vmul.f32 %v1612_v52, %v1588_v63  ;;  %v1790_v17 = vadd.f32 0.001143296, %v1789_v13  ;;  %v9516_v21 = vmul.f32 0.5, %v9327_v61  ;;  %v1770_v32 = vand.u32 2147483648, %v1758_v41 }
 0x1ce   : > { %v1783_v35 = vadd.f32 0.05243302, %v1782_v10  ;;  %v1658_v0 = vmul.f32 2.1237322e-06, %v9502_v33  ;;  %v1748_v34 = vmul.f32 %v1747_v7, %v9348_v24  ;;  %vm1764_vm4 = vweird.f32 %v1758_v41 }
 0x1cf   : > { %v9521_v44 = vmul.f32 0.5, %v9383_v28  ;;  %7600 = vrcp.f32 %v1638_v39  ;;  %vm9523_vm5 = vcmp.eq.f32.partialorder %v1768_v29, 8.507059e+37  ;;  %v1627_v45 = vadd.f32 1.1283791, %v1626_v40 }
 0x1d0   : > { %v7599_v25 = vpop.eup %7598  ;;  %v1791_v61 = vmul.f32 %v1790_v17, %v9466_v9  ;;  %v9529_v47 = vmul.f32 0.70710677, %v9513_v11  ;;  %v6910_v60 = vclamps-f32 %v1613_v5, 1.0  ;;  %v1648_v8 = vand.u32 2147483647, %v1638_v39 }
 0x1d1   : > { %v1760_v56 = vmul.f32 %v7599_v25, %v1758_v41  ;;  %v1659_v24 = vadd.f32 0.00028619796, %v1658_v0  ;;  %v1771_v20 = vor.u32 1.1754944e-38, %v1770_v32  ;;  %v1650_v16 = vand.u32 2147483648, %v1638_v39 }
 0x1d2   : > { %v1784_v28 = vmul.f32 %v1783_v35, %v9466_v9  ;;  %v1792_v54 = vadd.f32 0.014752088, %v1791_v61  ;;  %vm1765_vm6 = vweird.f32 %v7599_v25  ;;  %v1669_v59 = vmul.f32 3.8918573e-05, %v9502_v33 }
 0x1d3   : > { %v1761_v2 = vsub.f32 1.0, %v1760_v56  ;;  %v1660_v26 = vmul.f32 %v1659_v24, %v9502_v33  ;;  %v1628_v27 = vmul.f32 %v1627_v45, %v9396_v43  ;;  %vm1644_vm7 = vweird.f32 %v1638_v39  ;;  %vm9546_vm9 = vmor %vm1764_vm4, %vm1765_vm6 }
 0x1d4   : > { %v1793_v31 = vmul.f32 %v1792_v54, %v9466_v9  ;;  %v1816_v49 = vmul.f32 %v9529_v47, %v9529_v47  ;;  %v4640_v36 = vadd.f32 1.0, %v6910_v60  ;;  %vm9538_vm8 = vcmp.eq.f32.partialorder %v1648_v8, 8.507059e+37 }
 0x1d5   : > { %v7601_v23 = vpop.eup %7600  ;;  %v1762_v15 = vmul.f32 %v7599_v25, %v1761_v2  ;;  %v1661_v12 = vadd.f32 0.0036580483, %v1660_v26  ;;  %v1651_v7 = vor.u32 1.1754944e-38, %v1650_v16  ;;  %v1785_v30 = vadd.f32 0.18741608, %v1784_v28 }
 0x1d6   : > { %v1640_v43 = vmul.f32 %v7601_v23, %v1638_v39  ;;  %v1794_v22 = vadd.f32 0.112945676, %v1793_v31  ;;  %v1670_v40 = vadd.f32 0.001143296, %v1669_v59  ;;  %v9551_v10 = vmin.f32 %v1816_v49, 16.0 }
 0x1d7   : > { %v1763_v52 = vadd.f32 %v7599_v25, %v1762_v15  ;;  %v1662_v29 = vmul.f32 %v1661_v12, %v9502_v33  ;;  %vm1645_vm10 = vweird.f32 %v7601_v23  ;;  %v9555_v41 = vmul.f32 0.70710677, %v9543_v37 }
 0x1d8   : > { %v1641_v5 = vsub.f32 1.0, %v1640_v43  ;;  %v1795_v17 = vmul.f32 %v1794_v22, %v9466_v9  ;;  %v1671_v0 = vmul.f32 %v1670_v40, %v9502_v33  ;;  %v1818_v45 = vmul.f32 2.1237322e-06, %v9551_v10  ;;  %vm9565_vm11 = vmor %vm1644_vm7, %vm1645_vm10 }
 0x1d9   : > { %v1767_v32 = vsel %vm9546_vm9, %v7599_v25, %v1763_v52  ;;  %v1663_v35 = vadd.f32 0.05243302, %v1662_v29  ;;  %v1829_v8 = vmul.f32 3.8918573e-05, %v9551_v10  ;;  %v1786_v26 = vmul.f32 %v1785_v30, %v9466_v9 }
 0x1da   : > { %v1772_v61 = vsel %vm9523_vm5, %v1771_v20, %v1767_v32  ;;  %v1642_v60 = vmul.f32 %v7601_v23, %v1641_v5  ;;  %v1796_v56 = vadd.f32 0.4994258, %v1795_v17  ;;  %v1672_v28 = vadd.f32 0.014752088, %v1671_v0 }
 0x1db   : > { %v1773_v24 = vmul.f32 %v1772_v61, %v1748_v34  ;;  %v1664_v25 = vmul.f32 %v1663_v35, %v9502_v33  ;;  %v1819_v54 = vadd.f32 0.00028619796, %v1818_v45  ;;  %v1830_v20 = vadd.f32 0.001143296, %v1829_v8 }
 0x1dc   : > { %v1643_v2 = vadd.f32 %v7601_v23, %v1642_v60  ;;  %v1797_v63 = vmul.f32 %v1796_v56, %v9466_v9  ;;  %v1673_v34 = vmul.f32 %v1672_v28, %v9502_v33  ;;  %v1696_v39 = vmul.f32 %v9555_v41, %v9555_v41 }
 0x1dd   : > { %v6914_v59 = vclamps-f32 %v1773_v24, 1.0  ;;  %v1665_v31 = vadd.f32 0.18741608, %v1664_v25  ;;  %v1820_v12 = vmul.f32 %v1819_v54, %v9551_v10  ;;  %v1831_v13 = vmul.f32 %v1830_v20, %v9551_v10 }
 0x1de   : > { %v1647_v49 = vsel %vm9565_vm11, %v7601_v23, %v1643_v2  ;;  %v1798_v15 = vadd.f32 1.0, %v1797_v63  ;;  %v4740_v9 = vmul.f32 %v4640_v36, %v9510_v38  ;;  %v1674_v22 = vadd.f32 0.112945676, %v1673_v34  ;;  %v9589_v23 = vld [vmem:[%s8053_s10 + $0xf8] sm:$0xff] }
 0x1df   : > { %v4644_v43 = vadd.f32 1.0, %v6914_v59  ;;  %v1652_v30 = vsel %vm9538_vm8, %v1651_v7, %v1647_v49  ;;  %v9583_v52 = vmul.f32 0.5, %v9405_v4  ;;  %v1787_v29 = vadd.f32 1.1283791, %v1786_v26 }
 0x1e0   : > { %7602 = vrcp.f32 %v1798_v15  ;;  %v9586_v40 = vmul.f32 0.5, %v9444_v57  ;;  %v1666_v17 = vmul.f32 %v1665_v31, %v9502_v33  ;;  %v1675_v38 = vmul.f32 %v1674_v22, %v9502_v33 }
 0x1e1   : > { %v4744_v5 = vmul.f32 %v4644_v43, %v9516_v21  ;;  %v9594_v36 = vmin.f32 %v1696_v39, 16.0  ;;  %v1653_v51 = vmul.f32 %v1652_v30, %v1628_v27  ;;  %v1808_v7 = vand.u32 2147483647, %v1798_v15 }
 0x1e2   : > { %v1821_v32 = vadd.f32 0.0036580483, %v1820_v12  ;;  %v1832_v4 = vadd.f32 0.014752088, %v1831_v13  ;;  %v1810_v0 = vand.u32 2147483648, %v1798_v15  ;;  %v1788_v61 = vmul.f32 %v1787_v29, %v9422_v1 }
 0x1e3   : > { %v9596_v35 = vpack.c.bf16 %v4744_v5, %v4740_v9  ;;  %v1676_v45 = vadd.f32 0.4994258, %v1675_v38  ;;  %v9599_v57 = vmul.f32 0.70710677, %v9589_v23  ;;  %v1698_v56 = vmul.f32 2.1237322e-06, %v9594_v36 }
 0x1e4   : > { %v1822_v21 = vmul.f32 %v1821_v32, %v9551_v10  ;;  %v1833_v60 = vmul.f32 %v1832_v4, %v9551_v10  ;;  %vm1804_vm12 = vweird.f32 %v1798_v15  ;;  %v1667_v27 = vadd.f32 1.1283791, %v1666_v17  ;;  %v9624_v17 = vld [vmem:[%s8053_s10 + $0x100] sm:$0xff] }
 0x1e5   : > { %5542 = vmatmul.bf16.gmra.mxu0 %v9596_v35  ;;  %v1677_v8 = vmul.f32 %v1676_v45, %v9502_v33  ;;  %v1709_v24 = vmul.f32 3.8918573e-05, %v9594_v36  ;;  %v6911_v25 = vclamps-f32 %v1653_v51, 1.0  ;;  %vm9608_vm13 = vcmp.eq.f32.partialorder %v1808_v7, 8.507059e+37 }
 0x1e6   : > { %v7603_v16 = vpop.eup %7602  ;;  %v1823_v1 = vadd.f32 0.05243302, %v1822_v21  ;;  %v1834_v54 = vadd.f32 0.112945676, %v1833_v60  ;;  %v1811_v26 = vor.u32 1.1754944e-38, %v1810_v0  ;;  %v1856_v20 = vmul.f32 %v9599_v57, %v9599_v57 }
 0x1e7   : > { %v1800_v2 = vmul.f32 %v7603_v16, %v1798_v15  ;;  %v1678_v63 = vadd.f32 1.0, %v1677_v8  ;;  %v1699_v31 = vadd.f32 0.00028619796, %v1698_v56  ;;  %v1710_v34 = vadd.f32 0.001143296, %v1709_v24 }
 0x1e8   : > { %v1824_v59 = vmul.f32 %v1823_v1, %v9551_v10  ;;  %v1835_v33 = vmul.f32 %v1834_v54, %v9551_v10  ;;  %vm1805_vm14 = vweird.f32 %v7603_v16  ;;  %v9617_v49 = vmul.f32 %v1667_v27, %v9453_v3 }
 0x1e9   : > { %v1801_v39 = vsub.f32 1.0, %v1800_v2  ;;  %7604 = vrcp.f32 %v1678_v63  ;;  %v4641_v12 = vadd.f32 1.0, %v6911_v25  ;;  %v1700_v9 = vmul.f32 %v1699_v31, %v9594_v36  ;;  %vm9627_vm15 = vmor %vm1804_vm12, %vm1805_vm14 }
 0x1ea   : > { %v1825_v13 = vadd.f32 0.18741608, %v1824_v59  ;;  %v1836_v43 = vadd.f32 0.4994258, %v1835_v33  ;;  %v1688_v22 = vand.u32 2147483647, %v1678_v63  ;;  %v1711_v29 = vmul.f32 %v1710_v34, %v9594_v36 }
 0x1eb   : > { %v1802_v30 = vmul.f32 %v7603_v16, %v1801_v39  ;;  %v9621_v5 = vmin.f32 %v1856_v20, 16.0  ;;  %v1690_v3 = vand.u32 2147483648, %v1678_v63  ;;  %v1701_v32 = vadd.f32 0.0036580483, %v1700_v9  ;;  %v9652_v20 = vld [vmem:[%s8053_s10 + $0x120] sm:$0xff] }
 0x1ec   : > { %v1826_v51 = vmul.f32 %v1825_v13, %v9551_v10  ;;  %v1837_v7 = vmul.f32 %v1836_v43, %v9551_v10  ;;  %v1712_v0 = vadd.f32 0.014752088, %v1711_v29  ;;  %v4741_v60 = vmul.f32 %v4641_v12, %v9521_v44 }
 0x1ed   : > { %v1803_v4 = vadd.f32 %v7603_v16, %v1802_v30  ;;  %v1858_v45 = vmul.f32 2.1237322e-06, %v9621_v5  ;;  %v1869_v21 = vmul.f32 3.8918573e-05, %v9621_v5  ;;  %v1702_v56 = vmul.f32 %v1701_v32, %v9594_v36 }
 0x1ee   : > { %v9636_v15 = vadd.f32 1.0, %v1837_v7  ;;  %v9640_v27 = vmul.f32 0.70710677, %v9624_v17  ;;  %v1713_v24 = vmul.f32 %v1712_v0, %v9594_v36  ;;  %vm1684_vm0 = vweird.f32 %v1678_v63 }
 0x1ef   : > { %v7605_v8 = vpop.eup %7604  ;;  %v1807_v10 = vsel %vm9627_vm15, %v7603_v16, %v1803_v4  ;;  %v1859_v25 = vadd.f32 0.00028619796, %v1858_v45  ;;  %v1870_v1 = vadd.f32 0.001143296, %v1869_v21  ;;  %vm9647_vm1 = vcmp.eq.f32.partialorder %v1688_v22, 8.507059e+37 }
 0x1f0   : > { %v1812_v54 = vsel %vm9608_vm13, %v1811_v26, %v1807_v10  ;;  %v1680_v2 = vmul.f32 %v7605_v8, %v1678_v63  ;;  %v1691_v33 = vor.u32 1.1754944e-38, %v1690_v3  ;;  %v1827_v31 = vadd.f32 1.1283791, %v1826_v51 }
 0x1f1   : > { %v1813_v59 = vmul.f32 %v1812_v54, %v1788_v61  ;;  %7606 = vrcp.f32 %v9636_v15  ;;  %vm1685_vm2 = vweird.f32 %v7605_v8  ;;  %v1703_v34 = vadd.f32 0.05243302, %v1702_v56 }
 0x1f2   : > { %v1681_v16 = vsub.f32 1.0, %v1680_v2  ;;  %v1714_v39 = vadd.f32 0.112945676, %v1713_v24  ;;  %v1860_v28 = vmul.f32 %v1859_v25, %v9621_v5  ;;  %v1871_v26 = vmul.f32 %v1870_v1, %v9621_v5  ;;  %vm9664_vm4 = vmor %vm1684_vm0, %vm1685_vm2 }
 0x1f3   : > { %v6915_v12 = vclamps-f32 %v1813_v59, 1.0  ;;  %v9658_v13 = vmul.f32 0.70710677, %v9652_v20  ;;  %vm1844_vm3 = vweird.f32 %v9636_v15  ;;  %v1704_v61 = vmul.f32 %v1703_v34, %v9594_v36 }
 0x1f4   : > { %v1682_v43 = vmul.f32 %v7605_v8, %v1681_v16  ;;  %v1715_v9 = vmul.f32 %v1714_v39, %v9594_v36  ;;  %v1861_v29 = vadd.f32 0.0036580483, %v1860_v28  ;;  %v1872_v38 = vadd.f32 0.014752088, %v1871_v26 }
 0x1f5   : > { %v4645_v30 = vadd.f32 1.0, %v6915_v12  ;;  %v1896_v3 = vmul.f32 %v9640_v27, %v9640_v27  ;;  %v1848_v7 = vand.u32 2147483647, %v9636_v15  ;;  %v1705_v32 = vadd.f32 0.18741608, %v1704_v61 }
 0x1f6   : > { %v1683_v51 = vadd.f32 %v7605_v8, %v1682_v43  ;;  %v1716_v4 = vadd.f32 0.4994258, %v1715_v9  ;;  %v1862_v21 = vmul.f32 %v1861_v29, %v9621_v5  ;;  %v1873_v63 = vmul.f32 %v1872_v38, %v9621_v5  ;;  %v9739_v43 = vld [vmem:[%s8053_s10 + $0x108] sm:$0xff] }
 0x1f7   : > { %v7607_v0 = vpop.eup %7606  ;;  %v4745_v45 = vmul.f32 %v4645_v30, %v9583_v52  ;;  %v9674_v56 = vmin.f32 %v1896_v3, 16.0  ;;  %v1850_v25 = vand.u32 2147483648, %v9636_v15  ;;  %v1706_v1 = vmul.f32 %v1705_v32, %v9594_v36  ;;  %v7204_v32 = vld [vmem:[%s8060_s18 + $0x1a8] sm:$0xf] }
 0x1f8   : > { %v1687_v10 = vsel %vm9664_vm4, %v7605_v8, %v1683_v51  ;;  %v1840_v24 = vmul.f32 %v7607_v0, %v9636_v15  ;;  %v1717_v2 = vmul.f32 %v1716_v4, %v9594_v36  ;;  %v1863_v59 = vadd.f32 0.05243302, %v1862_v21  ;;  %v7432_v4 = vld [vmem:[%s8060_s18 + $0x1b4] sm:$0xf0] }
 0x1f9   : > { %v9681_v54 = vpack.c.bf16 %v4745_v45, %v4741_v60  ;;  %v1692_v52 = vsel %vm9647_vm1, %v1691_v33, %v1687_v10  ;;  %vm1845_vm5 = vweird.f32 %v7607_v0  ;;  %v1874_v39 = vadd.f32 0.112945676, %v1873_v63  ;;  %v7430_v45 = vld [vmem:[%s8060_s18 + $0x1ac] sm:$0xf] }
 0x1fa   : > { %v1693_v16 = vmul.f32 %v1692_v52, %v9617_v49  ;;  %v1841_v34 = vsub.f32 1.0, %v1840_v24  ;;  %v9688_v8 = vadd.f32 1.0, %v1717_v2  ;;  %v1864_v12 = vmul.f32 %v1863_v59, %v9621_v5  ;;  %vm9697_vm6 = vmor %vm1844_vm3, %vm1845_vm5  ;;  %v7206_v24 = vld [vmem:[%s8060_s18 + $0x1b8] sm:$0xf0] }
 0x1fb   : > { %5615 = vmatmul.bf16.gmra.mxu1 %v9681_v54  ;;  %v1898_v60 = vmul.f32 2.1237322e-06, %v9674_v56  ;;  %v1909_v28 = vmul.f32 3.8918573e-05, %v9674_v56  ;;  %v1828_v33 = vmul.f32 %v1827_v31, %v9529_v47  ;;  %v1875_v26 = vmul.f32 %v1874_v39, %v9621_v5 }
 0x1fc   : > { %v6912_v44 = vclamps-f32 %v1693_v16, 1.0  ;;  %v1842_v36 = vmul.f32 %v7607_v0, %v1841_v34  ;;  %vm9701_vm7 = vcmp.eq.f32.partialorder %v1848_v7, 8.507059e+37  ;;  %v1851_v61 = vor.u32 1.1754944e-38, %v1850_v25  ;;  %v7196_v25 = vld [vmem:[%s8060_s18 + $0x1a0] sm:$0xf] }
 0x1fd   : > { %v1707_v9 = vadd.f32 1.1283791, %v1706_v1  ;;  %7608 = vrcp.f32 %v9688_v8  ;;  %v1728_v31 = vand.u32 2147483647, %v9688_v8  ;;  %v1865_v15 = vadd.f32 0.18741608, %v1864_v12 }
 0x1fe   : > { %v1843_v47 = vadd.f32 %v7607_v0, %v1842_v36  ;;  %v1876_v30 = vadd.f32 0.4994258, %v1875_v26  ;;  %v446_v22 = vmul.f32 0.5, %v9513_v11  ;;  %v4642_v29 = vadd.f32 1.0, %v6912_v44  ;;  %v7431_v1 = vld [vmem:[%s8060_s18 + $0x1ac] sm:$0xf0] }
 0x1ff   : > { %v1899_v38 = vadd.f32 0.00028619796, %v1898_v60  ;;  %v1910_v3 = vadd.f32 0.001143296, %v1909_v28  ;;  %v2056_v21 = vmul.f32 %v9658_v13, %v9658_v13  ;;  %v1866_v11 = vmul.f32 %v1865_v15, %v9621_v5  ;;  %v7429_v60 = vld [vmem:[%s8060_s18 + $0x1a4] sm:$0xf] }
 0x200   : > { %v1847_v51 = vsel %vm9697_vm6, %v7607_v0, %v1843_v47  ;;  %v1877_v7 = vmul.f32 %v1876_v30, %v9621_v5  ;;  %v7205_v10 = vor.u32 %v7432_v4, %v7204_v32  ;;  %v1730_v2 = vand.u32 2147483648, %v9688_v8  ;;  %v7198_v5 = vld [vmem:[%s8060_s18 + $0x1b0] sm:$0xf0] }
 0x201   : > { %v1852_v63 = vsel %vm9701_vm7, %v1851_v61, %v1847_v51  ;;  %v1900_v0 = vmul.f32 %v1899_v38, %v9674_v56  ;;  %v7209_v16 = vor.u32 %v7430_v45, %v7206_v24  ;;  %v1708_v39 = vmul.f32 %v1707_v9, %v9555_v41 }
 0x202   : > { %v1853_v52 = vmul.f32 %v1852_v63, %v1828_v33  ;;  %v9724_v59 = vadd.f32 1.0, %v1877_v7  ;;  %5959 = vmatpush.bf16.xpose.msrb.mxu2 %v7205_v10  ;;  %v7197_v12 = vor.u32 %v7431_v1, %v7196_v25  ;;  %v1911_v44 = vmul.f32 %v1910_v3, %v9674_v56  ;;  %v9760_v63 = vld [vmem:[%s8053_s10 + $0x128] sm:$0xff] }
 0x203   : > { %v7609_v34 = vpop.eup %7608  ;;  %v1901_v28 = vadd.f32 0.0036580483, %v1900_v0  ;;  %vm1724_vm8 = vweird.f32 %v9688_v8  ;;  %vm9732_vm9 = vcmp.eq.f32.partialorder %v1728_v31, 8.507059e+37  ;;  %6032 = vmatpush.bf16.xpose.msrb.mxu3 %v7209_v16  ;;  %v4742_v41 = vmul.f32 %v4642_v29, %v9586_v40 }
 0x204   : > { %v6916_v36 = vclamps-f32 %v1853_v52, 1.0  ;;  %v1720_v26 = vmul.f32 %v7609_v34, %v9688_v8  ;;  %vm1725_vm10 = vweird.f32 %v7609_v34  ;;  %v1867_v49 = vadd.f32 1.1283791, %v1866_v11  ;;  %5813 = vmatpush.bf16.xpose.msrb.mxu0 %v7197_v12 }
 0x205   : > { %7610 = vrcp.f32 %v9724_v59  ;;  %v7201_v47 = vor.u32 %v7429_v60, %v7198_v5  ;;  %v1902_v15 = vmul.f32 %v1901_v28, %v9674_v56  ;;  %v1731_v31 = vor.u32 1.1754944e-38, %v1730_v2  ;;  %vm9751_vm11 = vmor %vm1724_vm8, %vm1725_vm10 }
 0x206   : > { %v4646_v61 = vadd.f32 1.0, %v6916_v36  ;;  %v1721_v9 = vsub.f32 1.0, %v1720_v26  ;;  %v1888_v30 = vand.u32 2147483647, %v9724_v59  ;;  %v1912_v38 = vadd.f32 0.014752088, %v1911_v44 }
 0x207   : > { %v9743_v3 = vmin.f32 %v2056_v21, 16.0  ;;  %5886 = vmatpush.bf16.xpose.msrb.mxu1 %v7201_v47  ;;  %v1903_v51 = vadd.f32 0.05243302, %v1902_v15  ;;  %v9746_v7 = vmul.f32 0.70710677, %v9739_v43  ;;  %v1890_v4 = vand.u32 2147483648, %v9724_v59 }
 0x208   : > { %v4746_v40 = vmul.f32 %v4646_v61, %v446_v22  ;;  %v1722_v29 = vmul.f32 %v7609_v34, %v1721_v9  ;;  %v1913_v45 = vmul.f32 %v1912_v38, %v9674_v56  ;;  %vm1884_vm12 = vweird.f32 %v9724_v59 }
 0x209   : > { %v2058_v21 = vmul.f32 2.1237322e-06, %v9743_v3  ;;  %v2069_v22 = vmul.f32 3.8918573e-05, %v9743_v3  ;;  %v1904_v24 = vmul.f32 %v1903_v51, %v9674_v56  ;;  %v1936_v8 = vmul.f32 %v9746_v7, %v9746_v7 }
 0x20a   : > { %v9762_v11 = vpack.c.bf16 %v4746_v40, %v4742_v41  ;;  %v1723_v10 = vadd.f32 %v7609_v34, %v1722_v29  ;;  %v1914_v1 = vadd.f32 0.112945676, %v1913_v45  ;;  %v9773_v12 = vmul.f32 0.70710677, %v9760_v63 }
 0x20b   : > { %v7611_v25 = vpop.eup %7610  ;;  %v2059_v0 = vadd.f32 0.00028619796, %v2058_v21  ;;  %v2070_v52 = vadd.f32 0.001143296, %v2069_v22  ;;  %v1905_v41 = vadd.f32 0.18741608, %v1904_v24 }
 0x20c   : > { %5688 = vmatmul.bf16.gmra.mxu2 %v9762_v11  ;;  %v1727_v2 = vsel %vm9751_vm11, %v7609_v34, %v1723_v10  ;;  %v1880_v16 = vmul.f32 %v7611_v25, %v9724_v59  ;;  %vm1885_vm13 = vweird.f32 %v7611_v25  ;;  %v1915_v5 = vmul.f32 %v1914_v1, %v9674_v56 }
 0x20d   : > { %v1732_v60 = vsel %vm9732_vm9, %v1731_v31, %v1727_v2  ;;  %v2060_v28 = vmul.f32 %v2059_v0, %v9743_v3  ;;  %v2071_v44 = vmul.f32 %v2070_v52, %v9743_v3  ;;  %v9780_v61 = vmin.f32 %v1936_v8, 16.0  ;;  %vm9787_vm14 = vmor %vm1884_vm12, %vm1885_vm13 }
 0x20e   : > { %v1733_v36 = vmul.f32 %v1732_v60, %v1708_v39  ;;  %v1881_v26 = vsub.f32 1.0, %v1880_v16  ;;  %v1868_v34 = vmul.f32 %v1867_v49, %v9599_v57  ;;  %v1916_v9 = vadd.f32 0.4994258, %v1915_v5 }
 0x20f   : > { %v2061_v47 = vadd.f32 0.0036580483, %v2060_v28  ;;  %v2072_v15 = vadd.f32 0.014752088, %v2071_v44  ;;  %v1891_v33 = vor.u32 1.1754944e-38, %v1890_v4  ;;  %v2096_v49 = vmul.f32 %v9773_v12, %v9773_v12 }
 0x210   : > { %v6913_v38 = vclamps-f32 %v1733_v36, 1.0  ;;  %v1882_v40 = vmul.f32 %v7611_v25, %v1881_v26  ;;  %v1938_v31 = vmul.f32 2.1237322e-06, %v9780_v61  ;;  %v1917_v39 = vmul.f32 %v1916_v9, %v9674_v56 }
 0x211   : > { %v2062_v51 = vmul.f32 %v2061_v47, %v9743_v3  ;;  %v2073_v57 = vmul.f32 %v2072_v15, %v9743_v3  ;;  %vm1889_vm15 = vcmp.eq.f32.partialorder %v1888_v30, 8.507059e+37  ;;  %v1949_v45 = vmul.f32 3.8918573e-05, %v9780_v61 }
 0x212   : > { %v1883_v32 = vadd.f32 %v7611_v25, %v1882_v40  ;;  %v1939_v4 = vadd.f32 0.00028619796, %v1938_v31  ;;  %v1906_v59 = vmul.f32 %v1905_v41, %v9674_v56  ;;  %v1918_v21 = vadd.f32 1.0, %v1917_v39 }
 0x213   : > { %v2063_v22 = vadd.f32 0.05243302, %v2062_v51  ;;  %v2074_v10 = vadd.f32 0.112945676, %v2073_v57  ;;  %v443_v24 = vmul.f32 0.5, %v9543_v37  ;;  %v447_v8 = vmul.f32 0.5, %v9589_v23 }
 0x214   : > { %v1887_v1 = vsel %vm9787_vm14, %v7611_v25, %v1883_v32  ;;  %v4643_v0 = vadd.f32 1.0, %v6913_v38  ;;  %v9803_v2 = vmul.f32 0.5, %v9624_v17  ;;  %7612 = vrcp.f32 %v1918_v21 }
 0x215   : > { %v1892_v52 = vsel %vm1889_vm15, %v1891_v33, %v1887_v1  ;;  %v9805_v30 = vmin.f32 %v2096_v49, 16.0  ;;  %v9808_v56 = vmul.f32 0.5, %v9652_v20  ;;  %v2064_v60 = vmul.f32 %v2063_v22, %v9743_v3 }
 0x216   : > { %v1893_v16 = vmul.f32 %v1892_v52, %v1868_v34  ;;  %v2075_v37 = vmul.f32 %v2074_v10, %v9743_v3  ;;  %v1907_v23 = vadd.f32 1.1283791, %v1906_v59  ;;  %v1940_v5 = vmul.f32 %v1939_v4, %v9780_v61  ;;  %v9821_v4 = vld [vmem:[%s8053_s10 + $0x110] sm:$0xff] }
 0x217   : > { %v1950_v25 = vadd.f32 0.001143296, %v1949_v45  ;;  %v2098_v28 = vmul.f32 2.1237322e-06, %v9805_v30  ;;  %v4743_v17 = vmul.f32 %v4643_v0, %v443_v24  ;;  %v2065_v36 = vadd.f32 0.18741608, %v2064_v60 }
 0x218   : > { %v6917_v44 = vclamps-f32 %v1893_v16, 1.0  ;;  %v2076_v26 = vadd.f32 0.4994258, %v2075_v37  ;;  %v1941_v41 = vadd.f32 0.0036580483, %v1940_v5  ;;  %vm1924_vm0 = vweird.f32 %v1918_v21  ;;  %v9828_v0 = vld [vmem:[%s8053_s10 + $0x130] sm:$0xff] }
 0x219   : > { %v1951_v34 = vmul.f32 %v1950_v25, %v9780_v61  ;;  %v2099_v20 = vadd.f32 0.00028619796, %v2098_v28  ;;  %v2109_v9 = vmul.f32 3.8918573e-05, %v9805_v30  ;;  %v2066_v15 = vmul.f32 %v2065_v36, %v9743_v3 }
 0x21a   : > { %v4647_v47 = vadd.f32 1.0, %v6917_v44  ;;  %v2077_v38 = vmul.f32 %v2076_v26, %v9743_v3  ;;  %v7613_v40 = vpop.eup %7612  ;;  %v1942_v33 = vmul.f32 %v1941_v41, %v9780_v61  ;;  %v1928_v49 = vand.u32 2147483647, %v1918_v21 }
 0x21b   : > { %v1952_v31 = vadd.f32 0.014752088, %v1951_v34  ;;  %v2100_v29 = vmul.f32 %v2099_v20, %v9805_v30  ;;  %v2110_v39 = vadd.f32 0.001143296, %v2109_v9  ;;  %v1920_v57 = vmul.f32 %v7613_v40, %v1918_v21 }
 0x21c   : > { %v4747_v51 = vmul.f32 %v4647_v47, %v447_v8  ;;  %v1930_v32 = vand.u32 2147483648, %v1918_v21  ;;  %v2078_v45 = vadd.f32 1.0, %v2077_v38  ;;  %v1943_v59 = vadd.f32 0.05243302, %v1942_v33 }
 0x21d   : > { %v1953_v22 = vmul.f32 %v1952_v31, %v9780_v61  ;;  %v2101_v10 = vadd.f32 0.0036580483, %v2100_v29  ;;  %v1921_v24 = vsub.f32 1.0, %v1920_v57  ;;  %vm1925_vm1 = vweird.f32 %v7613_v40 }
 0x21e   : > { %v9824_v3 = vpack.c.bf16 %v4747_v51, %v4743_v17  ;;  %v2111_v1 = vmul.f32 %v2110_v39, %v9805_v30  ;;  %v1908_v8 = vmul.f32 %v1907_v23, %v9640_v27  ;;  %v2067_v52 = vadd.f32 1.1283791, %v2066_v15  ;;  %vm9838_vm2 = vmor %vm1924_vm0, %vm1925_vm1 }
 0x21f   : > { %7614 = vrcp.f32 %v2078_v45  ;;  %v9832_v16 = vmul.f32 0.70710677, %v9821_v4  ;;  %v1922_v60 = vmul.f32 %v7613_v40, %v1921_v24  ;;  %v1944_v37 = vmul.f32 %v1943_v59, %v9780_v61 }
 0x220   : > { %12977 = vst [vmem:[#allocation13_spill] sm:$0xff] %v9824_v3  ;;  %5761 = vmatmul.bf16.gmra.mxu3 %v9824_v3  ;;  %v1954_v5 = vadd.f32 0.112945676, %v1953_v22  ;;  %v2102_v25 = vmul.f32 %v2101_v10, %v9805_v30  ;;  %vm9842_vm3 = vcmp.eq.f32.partialorder %v1928_v49, 8.507059e+37  ;;  %v1931_v23 = vor.u32 1.1754944e-38, %v1930_v32 }
 0x221   : > { %v2112_v44 = vadd.f32 0.014752088, %v2111_v1  ;;  %v9847_v17 = vmul.f32 0.70710677, %v9828_v0  ;;  %v1923_v36 = vadd.f32 %v7613_v40, %v1922_v60  ;;  %v1945_v26 = vadd.f32 0.18741608, %v1944_v37 }
 0x222   : > { %v1955_v41 = vmul.f32 %v1954_v5, %v9780_v61  ;;  %v2103_v34 = vadd.f32 0.05243302, %v2102_v25  ;;  %v2068_v21 = vmul.f32 %v2067_v52, %v9658_v13  ;;  %v1976_v9 = vmul.f32 %v9832_v16, %v9832_v16  ;;  %v9869_v37 = vld [vmem:[%s8053_s10 + $0x118] sm:$0xff] }
 0x223   : > { %v2113_v20 = vmul.f32 %v2112_v44, %v9805_v30  ;;  %v2136_v47 = vmul.f32 %v9847_v17, %v9847_v17  ;;  %v1927_v15 = vsel %vm9838_vm2, %v7613_v40, %v1923_v36  ;;  %v1946_v38 = vmul.f32 %v1945_v26, %v9780_v61 }
 0x224   : > { %v1956_v33 = vadd.f32 0.4994258, %v1955_v41  ;;  %v2104_v31 = vmul.f32 %v2103_v34, %v9805_v30  ;;  %v1932_v13 = vsel %vm9842_vm3, %v1931_v23, %v1927_v15  ;;  %vm2084_vm4 = vweird.f32 %v2078_v45 }
 0x225   : > { %v7615_v29 = vpop.eup %7614  ;;  %v2088_v39 = vand.u32 2147483647, %v2078_v45  ;;  %v2114_v51 = vadd.f32 0.112945676, %v2113_v20  ;;  %v1933_v57 = vmul.f32 %v1932_v13, %v1908_v8  ;;  %v2090_v32 = vand.u32 2147483648, %v2078_v45 }
 0x226   : > { %v2080_v49 = vmul.f32 %v7615_v29, %v2078_v45  ;;  %vm2085_vm5 = vweird.f32 %v7615_v29  ;;  %v1957_v59 = vmul.f32 %v1956_v33, %v9780_v61  ;;  %v2105_v40 = vadd.f32 0.18741608, %v2104_v31 }
 0x227   : > { %v2115_v22 = vmul.f32 %v2114_v51, %v9805_v30  ;;  %v9864_v10 = vmin.f32 %v1976_v9, 16.0  ;;  %v6918_v24 = vclamps-f32 %v1933_v57, 1.0  ;;  %v1947_v52 = vadd.f32 1.1283791, %v1946_v38  ;;  %vm9881_vm7 = vmor %vm2084_vm4, %vm2085_vm5 }
 0x228   : > { %v2081_v1 = vsub.f32 1.0, %v2080_v49  ;;  %v9866_v60 = vmin.f32 %v2136_v47, 16.0  ;;  %vm9871_vm6 = vcmp.eq.f32.partialorder %v2088_v39, 8.507059e+37  ;;  %v1958_v8 = vadd.f32 1.0, %v1957_v59 }
 0x229   : > { %v2116_v25 = vadd.f32 0.4994258, %v2115_v22  ;;  %v1978_v61 = vmul.f32 2.1237322e-06, %v9864_v10  ;;  %v2106_v27 = vmul.f32 %v2105_v40, %v9805_v30  ;;  %v1989_v23 = vmul.f32 3.8918573e-05, %v9864_v10 }
 0x22a   : > { %v2082_v28 = vmul.f32 %v7615_v29, %v2081_v1  ;;  %v2138_v44 = vmul.f32 2.1237322e-06, %v9866_v60  ;;  %v2091_v26 = vor.u32 1.1754944e-38, %v2090_v32  ;;  %v4648_v41 = vadd.f32 1.0, %v6918_v24 }
 0x22b   : > { %7616 = vrcp.f32 %v1958_v8  ;;  %v9886_v34 = vmul.f32 0.70710677, %v9869_v37  ;;  %v9889_v9 = vmul.f32 %v1947_v52, %v9746_v7  ;;  %v1968_v47 = vand.u32 2147483647, %v1958_v8 }
 0x22c   : > { %v2083_v20 = vadd.f32 %v7615_v29, %v2082_v28  ;;  %v2117_v15 = vmul.f32 %v2116_v25, %v9805_v30  ;;  %vm1964_vm8 = vweird.f32 %v1958_v8  ;;  %v1970_v38 = vand.u32 2147483648, %v1958_v8 }
 0x22d   : > { %v1979_v45 = vadd.f32 0.00028619796, %v1978_v61  ;;  %v1990_v33 = vadd.f32 0.001143296, %v1989_v23  ;;  %v2107_v13 = vadd.f32 1.1283791, %v2106_v27  ;;  %v4748_v49 = vmul.f32 %v4648_v41, %v9803_v2 }
 0x22e   : > { %v2087_v31 = vsel %vm9881_vm7, %v7615_v29, %v2083_v20  ;;  %v2118_v39 = vadd.f32 1.0, %v2117_v15  ;;  %v2139_v51 = vadd.f32 0.00028619796, %v2138_v44  ;;  %vm9899_vm9 = vcmp.eq.f32.partialorder %v1968_v47, 8.507059e+37  ;;  %v9909_v23 = vld [vmem:[%s8053_s10 + $0x138] sm:$0xff] }
 0x22f   : > { %v2092_v57 = vsel %vm9871_vm6, %v2091_v26, %v2087_v31  ;;  %v1980_v7 = vmul.f32 %v1979_v45, %v9864_v10  ;;  %v1991_v32 = vmul.f32 %v1990_v33, %v9864_v10  ;;  %v2149_v29 = vmul.f32 3.8918573e-05, %v9866_v60 }
 0x230   : > { %v2093_v30 = vmul.f32 %v2092_v57, %v2068_v21  ;;  %7618 = vrcp.f32 %v2118_v39  ;;  %v1971_v22 = vor.u32 1.1754944e-38, %v1970_v38  ;;  %v2140_v52 = vmul.f32 %v2139_v51, %v9866_v60 }
 0x231   : > { %v7617_v40 = vpop.eup %7616  ;;  %v1981_v24 = vadd.f32 0.0036580483, %v1980_v7  ;;  %v1992_v1 = vadd.f32 0.014752088, %v1991_v32  ;;  %v2108_v25 = vmul.f32 %v2107_v13, %v9773_v12  ;;  %vm2124_vm10 = vweird.f32 %v2118_v39 }
 0x232   : > { %v6922_v2 = vclamps-f32 %v2093_v30, 1.0  ;;  %v1960_v5 = vmul.f32 %v7617_v40, %v1958_v8  ;;  %v2128_v21 = vand.u32 2147483647, %v2118_v39  ;;  %v2141_v27 = vadd.f32 0.0036580483, %v2140_v52 }
 0x233   : > { %v1982_v61 = vmul.f32 %v1981_v24, %v9864_v10  ;;  %v1993_v28 = vmul.f32 %v1992_v1, %v9864_v10  ;;  %vm1965_vm11 = vweird.f32 %v7617_v40  ;;  %v2150_v26 = vadd.f32 0.001143296, %v2149_v29 }
 0x234   : > { %v4652_v44 = vadd.f32 1.0, %v6922_v2  ;;  %v1961_v36 = vsub.f32 1.0, %v1960_v5  ;;  %v2130_v41 = vand.u32 2147483648, %v2118_v39  ;;  %v2142_v15 = vmul.f32 %v2141_v27, %v9866_v60  ;;  %vm9918_vm12 = vmor %vm1964_vm8, %vm1965_vm11 }
 0x235   : > { %v1983_v20 = vadd.f32 0.05243302, %v1982_v61  ;;  %v1994_v47 = vadd.f32 0.112945676, %v1993_v28  ;;  %v2151_v33 = vmul.f32 %v2150_v26, %v9866_v60  ;;  %v9915_v31 = vmul.f32 0.70710677, %v9909_v23 }
 0x236   : > { %v7619_v38 = vpop.eup %7618  ;;  %v4752_v12 = vmul.f32 %v4652_v44, %v9808_v56  ;;  %v1962_v45 = vmul.f32 %v7617_v40, %v1961_v36  ;;  %v2016_v32 = vmul.f32 %v9886_v34, %v9886_v34  ;;  %v2143_v29 = vadd.f32 0.05243302, %v2142_v15 }
 0x237   : > { %v2120_v51 = vmul.f32 %v7619_v38, %v2118_v39  ;;  %v1984_v57 = vmul.f32 %v1983_v20, %v9864_v10  ;;  %v1995_v7 = vmul.f32 %v1994_v47, %v9864_v10  ;;  %v2152_v24 = vadd.f32 0.014752088, %v2151_v33 }
 0x238   : > { %v9926_v56 = vpack.c.bf16 %v4752_v12, %v4748_v49  ;;  %v1963_v30 = vadd.f32 %v7617_v40, %v1962_v45  ;;  %vm2125_vm13 = vweird.f32 %v7619_v38  ;;  %vm9931_vm14 = vcmp.eq.f32.partialorder %v2128_v21, 8.507059e+37 }
 0x239   : > { %v2121_v1 = vsub.f32 1.0, %v2120_v51  ;;  %v1985_v8 = vadd.f32 0.18741608, %v1984_v57  ;;  %v1996_v52 = vadd.f32 0.4994258, %v1995_v7  ;;  %v2144_v61 = vmul.f32 %v2143_v29, %v9866_v60  ;;  %vm9943_vm15 = vmor %vm2124_vm10, %vm2125_vm13 }
 0x23a   : > { %5547 = vmatmul.bf16.gmra.mxu0 %v9926_v56  ;;  %v1967_v2 = vsel %vm9918_vm12, %v7617_v40, %v1963_v30  ;;  %v2153_v49 = vmul.f32 %v2152_v24, %v9866_v60  ;;  %v2131_v21 = vor.u32 1.1754944e-38, %v2130_v41  ;;  %v9947_v47 = vmin.f32 %v2016_v32, 16.0 }
 0x23b   : > { %v1972_v28 = vsel %vm9899_vm9, %v1971_v22, %v1967_v2  ;;  %v2122_v27 = vmul.f32 %v7619_v38, %v2121_v1  ;;  %v1986_v44 = vmul.f32 %v1985_v8, %v9864_v10  ;;  %v1997_v36 = vmul.f32 %v1996_v52, %v9864_v10 }
 0x23c   : > { %v1973_v26 = vmul.f32 %v1972_v28, %v9889_v9  ;;  %v2154_v20 = vadd.f32 0.112945676, %v2153_v49  ;;  %v2145_v59 = vadd.f32 0.18741608, %v2144_v61  ;;  %v2176_v22 = vmul.f32 %v9915_v31, %v9915_v31  ;;  %v9968_v49 = vld [vmem:[%s8053_s10 + $0x140] sm:$0xff] }
 0x23d   : > { %v2123_v15 = vadd.f32 %v7619_v38, %v2122_v27  ;;  %v1998_v12 = vadd.f32 1.0, %v1997_v36  ;;  %v1987_v33 = vadd.f32 1.1283791, %v1986_v44  ;;  %v2018_v9 = vmul.f32 2.1237322e-06, %v9947_v47 }
 0x23e   : > { %v6919_v45 = vclamps-f32 %v1973_v26, 1.0  ;;  %v2155_v10 = vmul.f32 %v2154_v20, %v9866_v60  ;;  %v449_v41 = vmul.f32 0.5, %v9739_v43  ;;  %v453_v13 = vmul.f32 0.5, %v9760_v63 }
 0x23f   : > { %v2127_v39 = vsel %vm9943_vm15, %v7619_v38, %v2123_v15  ;;  %7620 = vrcp.f32 %v1998_v12  ;;  %v2019_v30 = vadd.f32 0.00028619796, %v2018_v9  ;;  %v9959_v29 = vmin.f32 %v2176_v22, 16.0 }
 0x240   : > { %v2132_v51 = vsel %vm9931_vm14, %v2131_v21, %v2127_v39  ;;  %v4649_v57 = vadd.f32 1.0, %v6919_v45  ;;  %v2156_v32 = vadd.f32 0.4994258, %v2155_v10  ;;  %v1988_v24 = vmul.f32 %v1987_v33, %v9832_v16 }
 0x241   : > { %v2133_v7 = vmul.f32 %v2132_v51, %v2108_v25  ;;  %vm2004_vm0 = vweird.f32 %v1998_v12  ;;  %v2146_v38 = vmul.f32 %v2145_v59, %v9866_v60  ;;  %v2029_v1 = vmul.f32 3.8918573e-05, %v9947_v47 }
 0x242   : > { %v2008_v8 = vand.u32 2147483647, %v1998_v12  ;;  %v2157_v63 = vmul.f32 %v2156_v32, %v9866_v60  ;;  %v2020_v52 = vmul.f32 %v2019_v30, %v9947_v47  ;;  %v4749_v2 = vmul.f32 %v4649_v57, %v449_v41 }
 0x243   : > { %v6923_v43 = vclamps-f32 %v2133_v7, 1.0  ;;  %v2010_v25 = vand.u32 2147483648, %v1998_v12  ;;  %v2030_v5 = vadd.f32 0.001143296, %v2029_v1  ;;  %v2178_v61 = vmul.f32 2.1237322e-06, %v9959_v29 }
 0x244   : > { %v2158_v27 = vadd.f32 1.0, %v2157_v63  ;;  %v2021_v44 = vadd.f32 0.0036580483, %v2020_v52  ;;  %v2189_v36 = vmul.f32 3.8918573e-05, %v9959_v29  ;;  %vm9972_vm1 = vcmp.eq.f32.partialorder %v2008_v8, 8.507059e+37 }
 0x245   : > { %v7621_v28 = vpop.eup %7620  ;;  %v4653_v16 = vadd.f32 1.0, %v6923_v43  ;;  %v2147_v40 = vadd.f32 1.1283791, %v2146_v38  ;;  %v2031_v21 = vmul.f32 %v2030_v5, %v9947_v47  ;;  %v2179_v60 = vadd.f32 0.00028619796, %v2178_v61  ;;  %v9985_v7 = vld [vmem:[%s8053_s10 + $0x160] sm:$0xff] }
 0x246   : > { %v2000_v26 = vmul.f32 %v7621_v28, %v1998_v12  ;;  %7622 = vrcp.f32 %v2158_v27  ;;  %v9977_v59 = vmul.f32 0.70710677, %v9968_v49  ;;  %vm2005_vm2 = vweird.f32 %v7621_v28 }
 0x247   : > { %v4753_v20 = vmul.f32 %v4653_v16, %v453_v13  ;;  %v2022_v45 = vmul.f32 %v2021_v44, %v9947_v47  ;;  %v2032_v33 = vadd.f32 0.014752088, %v2031_v21  ;;  %v2011_v9 = vor.u32 1.1754944e-38, %v2010_v25  ;;  %vm9989_vm4 = vmor %vm2004_vm0, %vm2005_vm2 }
 0x248   : > { %v2001_v22 = vsub.f32 1.0, %v2000_v26  ;;  %v2180_v39 = vmul.f32 %v2179_v60, %v9959_v29  ;;  %v2190_v41 = vadd.f32 0.001143296, %v2189_v36  ;;  %vm2164_vm3 = vweird.f32 %v2158_v27 }
 0x249   : > { %v9980_v10 = vpack.c.bf16 %v4753_v20, %v4749_v2  ;;  %v2023_v51 = vadd.f32 0.05243302, %v2022_v45  ;;  %v2033_v57 = vmul.f32 %v2032_v33, %v9947_v47  ;;  %v2168_v30 = vand.u32 2147483647, %v2158_v27 }
 0x24a   : > { %v2002_v13 = vmul.f32 %v7621_v28, %v2001_v22  ;;  %v2181_v38 = vadd.f32 0.0036580483, %v2180_v39  ;;  %v2191_v1 = vmul.f32 %v2190_v41, %v9959_v29  ;;  %v2216_v43 = vmul.f32 %v9977_v59, %v9977_v59 }
 0x24b   : > { %5620 = vmatmul.bf16.gmra.mxu1 %v9980_v10  ;;  %v2170_v63 = vand.u32 2147483648, %v2158_v27  ;;  %v2024_v52 = vmul.f32 %v2023_v51, %v9947_v47  ;;  %v2034_v2 = vadd.f32 0.112945676, %v2033_v57  ;;  %v9999_v61 = vmul.f32 0.70710677, %v9985_v7 }
 0x24c   : > { %v2003_v8 = vadd.f32 %v7621_v28, %v2002_v13  ;;  %v7623_v25 = vpop.eup %7622  ;;  %v2182_v5 = vmul.f32 %v2181_v38, %v9959_v29  ;;  %v2192_v12 = vadd.f32 0.014752088, %v2191_v1  ;;  %v10001_v16 = vmin.f32 %v2216_v43, 16.0 }
 0x24d   : > { %v2160_v36 = vmul.f32 %v7623_v25, %v2158_v27  ;;  %vm2165_vm5 = vweird.f32 %v7623_v25  ;;  %v2025_v26 = vadd.f32 0.18741608, %v2024_v52  ;;  %v2035_v60 = vmul.f32 %v2034_v2, %v9947_v47 }
 0x24e   : > { %v2007_v44 = vsel %vm9989_vm4, %v7621_v28, %v2003_v8  ;;  %v2183_v20 = vadd.f32 0.05243302, %v2182_v5  ;;  %v2193_v22 = vmul.f32 %v2192_v12, %v9959_v29  ;;  %v2218_v41 = vmul.f32 2.1237322e-06, %v10001_v16  ;;  %vm10020_vm7 = vmor %vm2164_vm3, %vm2165_vm5 }
 0x24f   : > { %v2012_v21 = vsel %vm9972_vm1, %v2011_v9, %v2007_v44  ;;  %v2161_v33 = vsub.f32 1.0, %v2160_v36  ;;  %v2026_v39 = vmul.f32 %v2025_v26, %v9947_v47  ;;  %v2036_v13 = vadd.f32 0.4994258, %v2035_v60  ;;  %v10032_v44 = vld [vmem:[%s8053_s10 + $0x148] sm:$0xff] }
 0x250   : > { %v2013_v45 = vmul.f32 %v2012_v21, %v1988_v24  ;;  %v2184_v28 = vmul.f32 %v2183_v20, %v9959_v29  ;;  %v2194_v51 = vadd.f32 0.112945676, %v2193_v22  ;;  %v2229_v57 = vmul.f32 3.8918573e-05, %v10001_v16  ;;  %v7188_v60 = vld [vmem:[%s8060_s18 + $0x188] sm:$0xf] }
 0x251   : > { %v2148_v15 = vmul.f32 %v2147_v40, %v9847_v17  ;;  %v2162_v9 = vmul.f32 %v7623_v25, %v2161_v33  ;;  %vm10014_vm6 = vcmp.eq.f32.partialorder %v2168_v30, 8.507059e+37  ;;  %v2219_v24 = vadd.f32 0.00028619796, %v2218_v41  ;;  %v7428_v20 = vld [vmem:[%s8060_s18 + $0x194] sm:$0xf0] }
 0x252   : > { %v2171_v1 = vor.u32 1.1754944e-38, %v2170_v63  ;;  %v2037_v43 = vmul.f32 %v2036_v13, %v9947_v47  ;;  %v2195_v8 = vmul.f32 %v2194_v51, %v9959_v29  ;;  %v2230_v17 = vadd.f32 0.001143296, %v2229_v57  ;;  %v7426_v41 = vld [vmem:[%s8060_s18 + $0x18c] sm:$0xf] }
 0x253   : > { %v6920_v40 = vclamps-f32 %v2013_v45, 1.0  ;;  %v2163_v30 = vadd.f32 %v7623_v25, %v2162_v9  ;;  %v2027_v52 = vadd.f32 1.1283791, %v2026_v39  ;;  %v2220_v2 = vmul.f32 %v2219_v24, %v10001_v16  ;;  %v7190_v51 = vld [vmem:[%s8060_s18 + $0x198] sm:$0xf0] }
 0x254   : > { %v10027_v5 = vadd.f32 1.0, %v2037_v43  ;;  %v2185_v27 = vadd.f32 0.18741608, %v2184_v28  ;;  %v2196_v12 = vadd.f32 0.4994258, %v2195_v8  ;;  %v2376_v63 = vmul.f32 %v9999_v61, %v9999_v61 }
 0x255   : > { %v450_v47 = vmul.f32 0.5, %v9821_v4  ;;  %v454_v36 = vmul.f32 0.5, %v9828_v0  ;;  %v2167_v26 = vsel %vm10020_vm7, %v7623_v25, %v2163_v30  ;;  %v2221_v22 = vadd.f32 0.0036580483, %v2220_v2 }
 0x256   : > { %v2172_v21 = vsel %vm10014_vm6, %v2171_v1, %v2167_v26  ;;  %7624 = vrcp.f32 %v10027_v5  ;;  %v2231_v45 = vmul.f32 %v2230_v17, %v10001_v16  ;;  %v4650_v39 = vadd.f32 1.0, %v6920_v40  ;;  %v10065_v17 = vld [vmem:[%s8053_s10 + $0x168] sm:$0xff] }
 0x257   : > { %v2173_v33 = vmul.f32 %v2172_v21, %v2148_v15  ;;  %v2197_v4 = vmul.f32 %v2196_v12, %v9959_v29  ;;  %v10047_v0 = vmul.f32 0.70710677, %v10032_v44  ;;  %v10050_v25 = vmul.f32 %v2027_v52, %v9886_v34 }
 0x258   : > { %v2186_v13 = vmul.f32 %v2185_v27, %v9959_v29  ;;  %v7189_v28 = vor.u32 %v7428_v20, %v7188_v60  ;;  %v10054_v57 = vmin.f32 %v2376_v63, 16.0  ;;  %v2048_v15 = vand.u32 2147483647, %v10027_v5 }
 0x259   : > { %v6924_v9 = vclamps-f32 %v2173_v33, 1.0  ;;  %v2050_v32 = vand.u32 2147483648, %v10027_v5  ;;  %v10058_v24 = vadd.f32 1.0, %v2197_v4  ;;  %v7193_v38 = vor.u32 %v7426_v41, %v7190_v51 }
 0x25a   : > { %5960 = vmatpush.bf16.xpose.msrb.mxu2 %v7189_v28  ;;  %v2222_v1 = vmul.f32 %v2221_v22, %v10001_v16  ;;  %v2232_v34 = vadd.f32 0.014752088, %v2231_v45  ;;  %v2378_v43 = vmul.f32 2.1237322e-06, %v10054_v57  ;;  %v4750_v8 = vmul.f32 %v4650_v39, %v450_v47 }
 0x25b   : > { %v4654_v29 = vadd.f32 1.0, %v6924_v9  ;;  %vm2044_vm8 = vweird.f32 %v10027_v5  ;;  %7626 = vrcp.f32 %v10058_v24  ;;  %v2187_v30 = vadd.f32 1.1283791, %v2186_v13  ;;  %6033 = vmatpush.bf16.xpose.msrb.mxu3 %v7193_v38 }
 0x25c   : > { %v7625_v40 = vpop.eup %7624  ;;  %v2223_v52 = vadd.f32 0.05243302, %v2222_v1  ;;  %v2233_v2 = vmul.f32 %v2232_v34, %v10001_v16  ;;  %v2379_v27 = vadd.f32 0.00028619796, %v2378_v43  ;;  %vm10069_vm9 = vcmp.eq.f32.partialorder %v2048_v15, 8.507059e+37 }
 0x25d   : > { %v4754_v12 = vmul.f32 %v4654_v29, %v454_v36  ;;  %v2040_v63 = vmul.f32 %v7625_v40, %v10027_v5  ;;  %v2051_v47 = vor.u32 1.1754944e-38, %v2050_v32  ;;  %vm2045_vm10 = vweird.f32 %v7625_v40 }
 0x25e   : > { %v2224_v21 = vmul.f32 %v2223_v52, %v10001_v16  ;;  %v2234_v60 = vadd.f32 0.112945676, %v2233_v2  ;;  %v2380_v20 = vmul.f32 %v2379_v27, %v10054_v57  ;;  %v2389_v33 = vmul.f32 3.8918573e-05, %v10054_v57  ;;  %vm10090_vm12 = vmor %vm2044_vm8, %vm2045_vm10 }
 0x25f   : > { %v10075_v22 = vpack.c.bf16 %v4754_v12, %v4750_v8  ;;  %v2041_v45 = vsub.f32 1.0, %v2040_v63  ;;  %v10079_v36 = vmul.f32 0.70710677, %v10065_v17  ;;  %v2256_v13 = vmul.f32 %v10047_v0, %v10047_v0 }
 0x260   : > { %v2225_v39 = vadd.f32 0.18741608, %v2224_v21  ;;  %v2235_v4 = vmul.f32 %v2234_v60, %v10001_v16  ;;  %v2381_v41 = vadd.f32 0.0036580483, %v2380_v20  ;;  %vm2204_vm11 = vweird.f32 %v10058_v24 }
 0x261   : > { %13004 = vst [vmem:[#allocation14_spill] sm:$0xff] %v10075_v22  ;;  %v7627_v28 = vpop.eup %7626  ;;  %5693 = vmatmul.bf16.gmra.mxu2 %v10075_v22  ;;  %v2042_v51 = vmul.f32 %v7625_v40, %v2041_v45  ;;  %v2208_v9 = vand.u32 2147483647, %v10058_v24  ;;  %v2390_v15 = vadd.f32 0.001143296, %v2389_v33  ;;  %v2210_v1 = vand.u32 2147483648, %v10058_v24 }
 0x262   : > { %v2200_v38 = vmul.f32 %v7627_v28, %v10058_v24  ;;  %v2226_v34 = vmul.f32 %v2225_v39, %v10001_v16  ;;  %v2236_v43 = vadd.f32 0.4994258, %v2235_v4  ;;  %v2382_v8 = vmul.f32 %v2381_v41, %v10054_v57  ;;  %v7417_v22 = vld [vmem:[%s8060_s18 + $0x144] sm:$0xf] }
 0x263   : > { %v2043_v29 = vadd.f32 %v7625_v40, %v2042_v51  ;;  %v2391_v52 = vmul.f32 %v2390_v15, %v10054_v57  ;;  %v10099_v2 = vmin.f32 %v2256_v13, 16.0  ;;  %vm2205_vm13 = vweird.f32 %v7627_v28  ;;  %v10119_v15 = vld [vmem:[%s8053_s10 + $0x150] sm:$0xff] }
 0x264   : > { %v2201_v27 = vsub.f32 1.0, %v2200_v38  ;;  %v2237_v5 = vmul.f32 %v2236_v43, %v10001_v16  ;;  %v2416_v12 = vmul.f32 %v10079_v36, %v10079_v36  ;;  %v2383_v21 = vadd.f32 0.05243302, %v2382_v8  ;;  %vm10113_vm14 = vmor %vm2204_vm11, %vm2205_vm13 }
 0x265   : > { %v2047_v63 = vsel %vm10090_vm12, %v7625_v40, %v2043_v29  ;;  %v2392_v60 = vadd.f32 0.014752088, %v2391_v52  ;;  %v2258_v20 = vmul.f32 2.1237322e-06, %v10099_v2  ;;  %v2188_v33 = vmul.f32 %v2187_v30, %v9915_v31 }
 0x266   : > { %v2052_v45 = vsel %vm10069_vm9, %v2051_v47, %v2047_v63  ;;  %v2202_v39 = vmul.f32 %v7627_v28, %v2201_v27  ;;  %v2238_v4 = vadd.f32 1.0, %v2237_v5  ;;  %v2211_v40 = vor.u32 1.1754944e-38, %v2210_v1 }
 0x267   : > { %v2053_v41 = vmul.f32 %v2052_v45, %v10050_v25  ;;  %v2227_v13 = vadd.f32 1.1283791, %v2226_v34  ;;  %v2393_v51 = vmul.f32 %v2392_v60, %v10054_v57  ;;  %vm2209_vm15 = vcmp.eq.f32.partialorder %v2208_v9, 8.507059e+37 }
 0x268   : > { %v2203_v26 = vadd.f32 %v7627_v28, %v2202_v39  ;;  %7628 = vrcp.f32 %v2238_v4  ;;  %v2259_v31 = vadd.f32 0.00028619796, %v2258_v20  ;;  %v2384_v47 = vmul.f32 %v2383_v21, %v10054_v57 }
 0x269   : > { %v6921_v30 = vclamps-f32 %v2053_v41, 1.0  ;;  %v2394_v25 = vadd.f32 0.112945676, %v2393_v51  ;;  %v10122_v32 = vmin.f32 %v2416_v12, 16.0  ;;  %v451_v24 = vmul.f32 0.5, %v9869_v37 }
 0x26a   : > { %v455_v38 = vmul.f32 0.5, %v9909_v23  ;;  %v2207_v1 = vsel %vm10113_vm14, %v7627_v28, %v2203_v26  ;;  %v10129_v34 = vmul.f32 0.70710677, %v10119_v15  ;;  %v2228_v29 = vmul.f32 %v2227_v13, %v9977_v59 }
 0x26b   : > { %v2212_v43 = vsel %vm2209_vm15, %v2211_v40, %v2207_v1  ;;  %v4651_v9 = vadd.f32 1.0, %v6921_v30  ;;  %v2248_v8 = vand.u32 2147483647, %v2238_v4  ;;  %v2395_v27 = vmul.f32 %v2394_v25, %v10054_v57 }
 0x26c   : > { %v2213_v52 = vmul.f32 %v2212_v43, %v2188_v33  ;;  %v2260_v5 = vmul.f32 %v2259_v31, %v10099_v2  ;;  %v2269_v37 = vmul.f32 3.8918573e-05, %v10099_v2  ;;  %vm2244_vm0 = vweird.f32 %v2238_v4 }
 0x26d   : > { %v2385_v23 = vadd.f32 0.18741608, %v2384_v47  ;;  %v2418_v12 = vmul.f32 2.1237322e-06, %v10122_v32  ;;  %v2429_v28 = vmul.f32 3.8918573e-05, %v10122_v32  ;;  %v4751_v59 = vmul.f32 %v4651_v9, %v451_v24 }
 0x26e   : > { %v7629_v63 = vpop.eup %7628  ;;  %v6925_v21 = vclamps-f32 %v2213_v52, 1.0  ;;  %v2250_v60 = vand.u32 2147483648, %v2238_v4  ;;  %v2396_v20 = vadd.f32 0.4994258, %v2395_v27  ;;  %v2261_v45 = vadd.f32 0.0036580483, %v2260_v5 }
 0x26f   : > { %v2240_v39 = vmul.f32 %v7629_v63, %v2238_v4  ;;  %v2270_v33 = vadd.f32 0.001143296, %v2269_v37  ;;  %v2296_v41 = vmul.f32 %v10129_v34, %v10129_v34  ;;  %v2419_v51 = vadd.f32 0.00028619796, %v2418_v12 }
 0x270   : > { %v4655_v16 = vadd.f32 1.0, %v6925_v21  ;;  %v2397_v40 = vmul.f32 %v2396_v20, %v10054_v57  ;;  %v2262_v13 = vmul.f32 %v2261_v45, %v10099_v2  ;;  %vm2245_vm1 = vweird.f32 %v7629_v63 }
 0x271   : > { %v2241_v26 = vsub.f32 1.0, %v2240_v39  ;;  %v2271_v31 = vmul.f32 %v2270_v33, %v10099_v2  ;;  %v2430_v30 = vadd.f32 0.001143296, %v2429_v28  ;;  %v2420_v1 = vmul.f32 %v2419_v51, %v10122_v32  ;;  %vm10153_vm3 = vmor %vm2244_vm0, %vm2245_vm1  ;;  %v10160_v28 = vld [vmem:[%s8053_s10 + $0x170] sm:$0xff] }
 0x272   : > { %v4755_v47 = vmul.f32 %v4655_v16, %v455_v38  ;;  %v10142_v25 = vadd.f32 1.0, %v2397_v40  ;;  %v2263_v24 = vadd.f32 0.05243302, %v2262_v13  ;;  %vm10145_vm2 = vcmp.eq.f32.partialorder %v2248_v8, 8.507059e+37 }
 0x273   : > { %v2242_v43 = vmul.f32 %v7629_v63, %v2241_v26  ;;  %v2272_v52 = vadd.f32 0.014752088, %v2271_v31  ;;  %v2431_v27 = vmul.f32 %v2430_v30, %v10122_v32  ;;  %v2251_v38 = vor.u32 1.1754944e-38, %v2250_v60 }
 0x274   : > { %v10150_v5 = vpack.c.bf16 %v4755_v47, %v4751_v59  ;;  %v2386_v12 = vmul.f32 %v2385_v23, %v10054_v57  ;;  %7630 = vrcp.f32 %v10142_v25  ;;  %v2264_v21 = vmul.f32 %v2263_v24, %v10099_v2 }
 0x275   : > { %v2243_v8 = vadd.f32 %v7629_v63, %v2242_v43  ;;  %v2273_v20 = vmul.f32 %v2272_v52, %v10099_v2  ;;  %v10164_v45 = vmin.f32 %v2296_v41, 16.0  ;;  %v10168_v4 = vmul.f32 0.5, %v9968_v49 }
 0x276   : > { %13011 = vst [vmem:[#allocation15_spill] sm:$0xff] %v10150_v5  ;;  %5766 = vmatmul.bf16.gmra.mxu3 %v10150_v5  ;;  %v2421_v59 = vadd.f32 0.0036580483, %v2420_v1  ;;  %v2432_v60 = vadd.f32 0.014752088, %v2431_v27  ;;  %vm2404_vm4 = vweird.f32 %v10142_v25  ;;  %v2410_v43 = vand.u32 2147483648, %v10142_v25 }
 0x277   : > { %v2247_v57 = vsel %vm10153_vm3, %v7629_v63, %v2243_v8  ;;  %v2265_v23 = vadd.f32 0.18741608, %v2264_v21  ;;  %v2274_v39 = vadd.f32 0.112945676, %v2273_v20  ;;  %v10173_v33 = vmul.f32 0.70710677, %v10160_v28 }
 0x278   : > { %v2252_v16 = vsel %vm10145_vm2, %v2251_v38, %v2247_v57  ;;  %v2422_v41 = vmul.f32 %v2421_v59, %v10122_v32  ;;  %v2433_v40 = vmul.f32 %v2432_v60, %v10122_v32  ;;  %v2298_v49 = vmul.f32 2.1237322e-06, %v10164_v45 }
 0x279   : > { %v2253_v13 = vmul.f32 %v2252_v16, %v2228_v29  ;;  %v2387_v51 = vadd.f32 1.1283791, %v2386_v12  ;;  %v2275_v26 = vmul.f32 %v2274_v39, %v10099_v2  ;;  %v2309_v63 = vmul.f32 3.8918573e-05, %v10164_v45 }
 0x27a   : > { %v7631_v31 = vpop.eup %7630  ;;  %v2408_v30 = vand.u32 2147483647, %v10142_v25  ;;  %v2423_v47 = vadd.f32 0.05243302, %v2422_v41  ;;  %v2434_v24 = vadd.f32 0.112945676, %v2433_v40  ;;  %v2266_v9 = vmul.f32 %v2265_v23, %v10099_v2 }
 0x27b   : > { %v2400_v1 = vmul.f32 %v7631_v31, %v10142_v25  ;;  %v2456_v29 = vmul.f32 %v10173_v33, %v10173_v33  ;;  %v2276_v52 = vadd.f32 0.4994258, %v2275_v26  ;;  %v2299_v38 = vadd.f32 0.00028619796, %v2298_v49 }
 0x27c   : > { %v2424_v27 = vmul.f32 %v2423_v47, %v10122_v32  ;;  %v2435_v37 = vmul.f32 %v2434_v24, %v10122_v32  ;;  %v6926_v12 = vclamps-f32 %v2253_v13, 1.0  ;;  %vm2405_vm5 = vweird.f32 %v7631_v31 }
 0x27d   : > { %v2401_v8 = vsub.f32 1.0, %v2400_v1  ;;  %v2310_v21 = vadd.f32 0.001143296, %v2309_v63  ;;  %v2277_v20 = vmul.f32 %v2276_v52, %v10099_v2  ;;  %v2300_v57 = vmul.f32 %v2299_v38, %v10164_v45  ;;  %vm10199_vm6 = vmor %vm2404_vm4, %vm2405_vm5 }
 0x27e   : > { %v2425_v59 = vadd.f32 0.18741608, %v2424_v27  ;;  %v2436_v60 = vadd.f32 0.4994258, %v2435_v37  ;;  %v2388_v23 = vmul.f32 %v2387_v51, %v9999_v61  ;;  %v10195_v41 = vmin.f32 %v2456_v29, 16.0 }
 0x27f   : > { %v2402_v39 = vmul.f32 %v7631_v31, %v2401_v8  ;;  %v2311_v16 = vmul.f32 %v2310_v21, %v10164_v45  ;;  %v2411_v49 = vor.u32 1.1754944e-38, %v2410_v43  ;;  %v2278_v13 = vadd.f32 1.0, %v2277_v20 }
 0x280   : > { %v2437_v2 = vmul.f32 %v2436_v60, %v10122_v32  ;;  %v2301_v26 = vadd.f32 0.0036580483, %v2300_v57  ;;  %vm2409_vm7 = vcmp.eq.f32.partialorder %v2408_v30, 8.507059e+37  ;;  %v2267_v47 = vadd.f32 1.1283791, %v2266_v9  ;;  %v10218_v57 = vld [vmem:[%s8053_s10 + $0x158] sm:$0xff] }
 0x281   : > { %v2403_v63 = vadd.f32 %v7631_v31, %v2402_v39  ;;  %v2312_v61 = vadd.f32 0.014752088, %v2311_v16  ;;  %v4656_v51 = vadd.f32 1.0, %v6926_v12  ;;  %7632 = vrcp.f32 %v2278_v13 }
 0x282   : > { %v2426_v24 = vmul.f32 %v2425_v59, %v10122_v32  ;;  %v2458_v1 = vmul.f32 2.1237322e-06, %v10195_v41  ;;  %v10208_v29 = vadd.f32 1.0, %v2437_v2  ;;  %v2302_v43 = vmul.f32 %v2301_v26, %v10164_v45 }
 0x283   : > { %v2407_v25 = vsel %vm10199_vm6, %v7631_v31, %v2403_v63  ;;  %v2469_v52 = vmul.f32 3.8918573e-05, %v10195_v41  ;;  %v2288_v30 = vand.u32 2147483647, %v2278_v13  ;;  %v2290_v9 = vand.u32 2147483648, %v2278_v13 }
 0x284   : > { %v2412_v27 = vsel %vm2409_vm7, %v2411_v49, %v2407_v25  ;;  %v2313_v37 = vmul.f32 %v2312_v61, %v10164_v45  ;;  %v460_v38 = vmul.f32 0.5, %v9985_v7  ;;  %7634 = vrcp.f32 %v10208_v29 }
 0x285   : > { %v2413_v32 = vmul.f32 %v2412_v27, %v2388_v23  ;;  %v4756_v12 = vmul.f32 %v4656_v51, %v10168_v4  ;;  %v2268_v31 = vmul.f32 %v2267_v47, %v10047_v0  ;;  %v2427_v8 = vadd.f32 1.1283791, %v2426_v24 }
 0x286   : > { %v2303_v21 = vadd.f32 0.05243302, %v2302_v43  ;;  %vm2284_vm8 = vweird.f32 %v2278_v13  ;;  %v2314_v59 = vadd.f32 0.112945676, %v2313_v37  ;;  %v2459_v60 = vadd.f32 0.00028619796, %v2458_v1 }
 0x287   : > { %v6930_v20 = vclamps-f32 %v2413_v32, 1.0  ;;  %v7633_v39 = vpop.eup %7632  ;;  %vm10220_vm9 = vcmp.eq.f32.partialorder %v2288_v30, 8.507059e+37  ;;  %v2291_v7 = vor.u32 1.1754944e-38, %v2290_v9  ;;  %v2470_v40 = vadd.f32 0.001143296, %v2469_v52  ;;  %v10236_v30 = vld [vmem:[%s8053_s10 + $0x178] sm:$0xff] }
 0x288   : > { %v2304_v23 = vmul.f32 %v2303_v21, %v10164_v45  ;;  %v2280_v49 = vmul.f32 %v7633_v39, %v2278_v13  ;;  %vm2444_vm10 = vweird.f32 %v10208_v29  ;;  %v2315_v0 = vmul.f32 %v2314_v59, %v10164_v45 }
 0x289   : > { %v4660_v4 = vadd.f32 1.0, %v6930_v20  ;;  %v2448_v2 = vand.u32 2147483647, %v10208_v29  ;;  %v2460_v26 = vmul.f32 %v2459_v60, %v10195_v41  ;;  %v2471_v63 = vmul.f32 %v2470_v40, %v10195_v41 }
 0x28a   : > { %v10231_v47 = vmul.f32 0.70710677, %v10218_v57  ;;  %v7635_v61 = vpop.eup %7634  ;;  %v2281_v24 = vsub.f32 1.0, %v2280_v49  ;;  %vm2285_vm11 = vweird.f32 %v7633_v39  ;;  %v2316_v1 = vadd.f32 0.4994258, %v2315_v0 }
 0x28b   : > { %v4760_v51 = vmul.f32 %v4660_v4, %v460_v38  ;;  %v2440_v25 = vmul.f32 %v7635_v61, %v10208_v29  ;;  %v2450_v43 = vand.u32 2147483648, %v10208_v29  ;;  %v2305_v52 = vadd.f32 0.18741608, %v2304_v23  ;;  %vm10242_vm12 = vmor %vm2284_vm8, %vm2285_vm11 }
 0x28c   : > { %v2461_v27 = vadd.f32 0.0036580483, %v2460_v26  ;;  %v2282_v37 = vmul.f32 %v7633_v39, %v2281_v24  ;;  %v2317_v32 = vmul.f32 %v2316_v1, %v10164_v45  ;;  %v2472_v21 = vadd.f32 0.014752088, %v2471_v63 }
 0x28d   : > { %v10238_v9 = vpack.c.bf16 %v4760_v51, %v4756_v12  ;;  %v2441_v20 = vsub.f32 1.0, %v2440_v25  ;;  %vm2445_vm13 = vweird.f32 %v7635_v61  ;;  %v2336_v60 = vmul.f32 %v10231_v47, %v10231_v47 }
 0x28e   : > { %v2462_v59 = vmul.f32 %v2461_v27, %v10195_v41  ;;  %v2283_v12 = vadd.f32 %v7633_v39, %v2282_v37  ;;  %v2318_v23 = vadd.f32 1.0, %v2317_v32  ;;  %v2473_v40 = vmul.f32 %v2472_v21, %v10195_v41  ;;  %vm10260_vm14 = vmor %vm2444_vm10, %vm2445_vm13 }
 0x28f   : > { %5552 = vmatmul.bf16.gmra.mxu0 %v10238_v9  ;;  %v10252_v4 = vmul.f32 0.70710677, %v10236_v30  ;;  %v2428_v13 = vmul.f32 %v2427_v8, %v10079_v36  ;;  %v2442_v49 = vmul.f32 %v7635_v61, %v2441_v20  ;;  %v2306_v0 = vmul.f32 %v2305_v52, %v10164_v45 }
 0x290   : > { %v2463_v26 = vadd.f32 0.05243302, %v2462_v59  ;;  %v2287_v63 = vsel %vm10242_vm12, %v7633_v39, %v2283_v12  ;;  %vm10264_vm15 = vcmp.eq.f32.partialorder %v2448_v2, 8.507059e+37  ;;  %v2451_v1 = vor.u32 1.1754944e-38, %v2450_v43 }
 0x291   : > { %7636 = vrcp.f32 %v2318_v23  ;;  %v2292_v36 = vsel %vm10220_vm9, %v2291_v7, %v2287_v63  ;;  %v2443_v45 = vadd.f32 %v7635_v61, %v2442_v49  ;;  %v10271_v25 = vmin.f32 %v2336_v60, 16.0 }
 0x292   : > { %v2464_v8 = vmul.f32 %v2463_v26, %v10195_v41  ;;  %v457_v29 = vmul.f32 0.5, %v10032_v44  ;;  %v2293_v39 = vmul.f32 %v2292_v36, %v2268_v31  ;;  %v2474_v52 = vadd.f32 0.112945676, %v2473_v40 }
 0x293   : > { %v2496_v2 = vmul.f32 %v10252_v4, %v10252_v4  ;;  %v461_v27 = vmul.f32 0.5, %v10065_v17  ;;  %v2447_v43 = vsel %vm10260_vm14, %v7635_v61, %v2443_v45  ;;  %v2307_v37 = vadd.f32 1.1283791, %v2306_v0 }
 0x294   : > { %v2465_v16 = vadd.f32 0.18741608, %v2464_v8  ;;  %v6927_v7 = vclamps-f32 %v2293_v39, 1.0  ;;  %v2452_v32 = vsel %vm10264_vm15, %v2451_v1, %v2447_v43  ;;  %v2475_v21 = vmul.f32 %v2474_v52, %v10195_v41  ;;  %v10291_v8 = vld [vmem:[%s8053_s10 + $0x180] sm:$0xff] }
 0x295   : > { %v2338_v44 = vmul.f32 2.1237322e-06, %v10271_v25  ;;  %v2453_v31 = vmul.f32 %v2452_v32, %v2428_v13  ;;  %vm2324_vm0 = vweird.f32 %v2318_v23  ;;  %v2328_v38 = vand.u32 2147483647, %v2318_v23 }
 0x296   : > { %v2349_v20 = vmul.f32 3.8918573e-05, %v10271_v25  ;;  %v4657_v17 = vadd.f32 1.0, %v6927_v7  ;;  %v2476_v60 = vadd.f32 0.4994258, %v2475_v21  ;;  %v10284_v12 = vmin.f32 %v2496_v2, 16.0 }
 0x297   : > { %v7637_v59 = vpop.eup %7636  ;;  %v2339_v61 = vadd.f32 0.00028619796, %v2338_v44  ;;  %v6931_v40 = vclamps-f32 %v2453_v31, 1.0  ;;  %v2330_v0 = vand.u32 2147483648, %v2318_v23  ;;  %v2466_v26 = vmul.f32 %v2465_v16, %v10195_v41  ;;  %v10310_v31 = vld [vmem:[%s8053_s10 + $0x1a0] sm:$0xff] }
 0x298   : > { %v2320_v49 = vmul.f32 %v7637_v59, %v2318_v23  ;;  %vm2325_vm1 = vweird.f32 %v7637_v59  ;;  %v2477_v63 = vmul.f32 %v2476_v60, %v10195_v41  ;;  %v2350_v51 = vadd.f32 0.001143296, %v2349_v20 }
 0x299   : > { %v2340_v13 = vmul.f32 %v2339_v61, %v10271_v25  ;;  %v4661_v24 = vadd.f32 1.0, %v6931_v40  ;;  %v4757_v1 = vmul.f32 %v4657_v17, %v457_v29  ;;  %v2498_v45 = vmul.f32 2.1237322e-06, %v10284_v12  ;;  %vm10300_vm2 = vmor %vm2324_vm0, %vm2325_vm1 }
 0x29a   : > { %v2321_v36 = vsub.f32 1.0, %v2320_v49  ;;  %v10293_v39 = vadd.f32 1.0, %v2477_v63  ;;  %v2351_v2 = vmul.f32 %v2350_v51, %v10271_v25  ;;  %v2509_v43 = vmul.f32 3.8918573e-05, %v10284_v12 }
 0x29b   : > { %v2341_v52 = vadd.f32 0.0036580483, %v2340_v13  ;;  %v4761_v16 = vmul.f32 %v4661_v24, %v461_v27  ;;  %v2308_v41 = vmul.f32 %v2307_v37, %v10129_v34  ;;  %v2499_v32 = vadd.f32 0.00028619796, %v2498_v45 }
 0x29c   : > { %v2322_v7 = vmul.f32 %v7637_v59, %v2321_v36  ;;  %vm10304_vm3 = vcmp.eq.f32.partialorder %v2328_v38, 8.507059e+37  ;;  %v2331_v44 = vor.u32 1.1754944e-38, %v2330_v0  ;;  %7638 = vrcp.f32 %v10293_v39 }
 0x29d   : > { %v10313_v27 = vmul.f32 0.70710677, %v10291_v8  ;;  %v10315_v34 = vpack.c.bf16 %v4761_v16, %v4757_v1  ;;  %v2342_v23 = vmul.f32 %v2341_v52, %v10271_v25  ;;  %v2352_v20 = vadd.f32 0.014752088, %v2351_v2 }
 0x29e   : > { %v2323_v37 = vadd.f32 %v7637_v59, %v2322_v7  ;;  %v10319_v17 = vmul.f32 0.5, %v10119_v15  ;;  %v2467_v38 = vadd.f32 1.1283791, %v2466_v26  ;;  %v2500_v60 = vmul.f32 %v2499_v32, %v10284_v12 }
 0x29f   : > { %13028 = vst [vmem:[#allocation16_spill] sm:$0xff] %v10315_v34  ;;  %v2510_v61 = vadd.f32 0.001143296, %v2509_v43  ;;  %5625 = vmatmul.bf16.gmra.mxu1 %v10315_v34  ;;  %v2343_v49 = vadd.f32 0.05243302, %v2342_v23  ;;  %v2353_v0 = vmul.f32 %v2352_v20, %v10271_v25  ;;  %v2536_v51 = vmul.f32 %v10313_v27, %v10313_v27 }
 0x2a0   : > { %v2327_v40 = vsel %vm10300_vm2, %v7637_v59, %v2323_v37  ;;  %v10327_v63 = vmul.f32 0.70710677, %v10310_v31  ;;  %v2501_v15 = vadd.f32 0.0036580483, %v2500_v60  ;;  %vm2484_vm4 = vweird.f32 %v10293_v39 }
 0x2a1   : > { %v2332_v13 = vsel %vm10304_vm3, %v2331_v44, %v2327_v40  ;;  %v2511_v26 = vmul.f32 %v2510_v61, %v10284_v12  ;;  %v2344_v59 = vmul.f32 %v2343_v49, %v10271_v25  ;;  %v2354_v1 = vadd.f32 0.112945676, %v2353_v0 }
 0x2a2   : > { %v2333_v24 = vmul.f32 %v2332_v13, %v2308_v41  ;;  %v7639_v36 = vpop.eup %7638  ;;  %v2488_v45 = vand.u32 2147483647, %v10293_v39  ;;  %v2502_v52 = vmul.f32 %v2501_v15, %v10284_v12  ;;  %v10338_v43 = vmin.f32 %v2536_v51, 16.0 }
 0x2a3   : > { %v2512_v2 = vadd.f32 0.014752088, %v2511_v26  ;;  %v2480_v16 = vmul.f32 %v7639_v36, %v10293_v39  ;;  %v2490_v7 = vand.u32 2147483648, %v10293_v39  ;;  %v2345_v32 = vadd.f32 0.18741608, %v2344_v59 }
 0x2a4   : > { %v2696_v41 = vmul.f32 %v10327_v63, %v10327_v63  ;;  %v2355_v29 = vmul.f32 %v2354_v1, %v10271_v25  ;;  %v2503_v21 = vadd.f32 0.05243302, %v2502_v52  ;;  %v2538_v37 = vmul.f32 2.1237322e-06, %v10338_v43 }
 0x2a5   : > { %v2513_v44 = vmul.f32 %v2512_v2, %v10284_v12  ;;  %v6928_v23 = vclamps-f32 %v2333_v24, 1.0  ;;  %v2481_v20 = vsub.f32 1.0, %v2480_v16  ;;  %vm2485_vm5 = vweird.f32 %v7639_v36 }
 0x2a6   : > { %v2549_v60 = vmul.f32 3.8918573e-05, %v10338_v43  ;;  %v2346_v61 = vmul.f32 %v2345_v32, %v10271_v25  ;;  %v2356_v40 = vadd.f32 0.4994258, %v2355_v29  ;;  %v2539_v0 = vadd.f32 0.00028619796, %v2538_v37  ;;  %vm10353_vm6 = vmor %vm2484_vm4, %vm2485_vm5 }
 0x2a7   : > { %v2514_v49 = vadd.f32 0.112945676, %v2513_v44  ;;  %v2468_v13 = vmul.f32 %v2467_v38, %v10173_v33  ;;  %v2482_v15 = vmul.f32 %v7639_v36, %v2481_v20  ;;  %v2504_v26 = vmul.f32 %v2503_v21, %v10284_v12  ;;  %v10362_v32 = vld [vmem:[%s8053_s10 + $0x188] sm:$0xff] }
 0x2a8   : > { %v2550_v51 = vadd.f32 0.001143296, %v2549_v60  ;;  %v2491_v59 = vor.u32 1.1754944e-38, %v2490_v7  ;;  %v2357_v1 = vmul.f32 %v2356_v40, %v10271_v25  ;;  %v2540_v2 = vmul.f32 %v2539_v0, %v10338_v43  ;;  %v7427_v60 = vld [vmem:[%s8060_s18 + $0x18c] sm:$0xf0] }
 0x2a9   : > { %v2515_v52 = vmul.f32 %v2514_v49, %v10284_v12  ;;  %v2483_v16 = vadd.f32 %v7639_v36, %v2482_v15  ;;  %vm2489_vm7 = vcmp.eq.f32.partialorder %v2488_v45, 8.507059e+37  ;;  %v4658_v33 = vadd.f32 1.0, %v6928_v23  ;;  %v7180_v23 = vld [vmem:[%s8060_s18 + $0x180] sm:$0xf]  ;;  %v7425_v0 = vld [vmem:[%s8060_s18 + $0x184] sm:$0xf] }
 0x2aa   : > { %v2551_v38 = vmul.f32 %v2550_v51, %v10338_v43  ;;  %v2347_v39 = vadd.f32 1.1283791, %v2346_v61  ;;  %v10364_v29 = vadd.f32 1.0, %v2357_v1  ;;  %v10366_v21 = vmin.f32 %v2696_v41, 16.0  ;;  %v7182_v51 = vld [vmem:[%s8060_s18 + $0x190] sm:$0xf0] }
 0x2ab   : > { %v2516_v7 = vadd.f32 0.4994258, %v2515_v52  ;;  %v2487_v25 = vsel %vm10353_vm6, %v7639_v36, %v2483_v16  ;;  %v2505_v44 = vadd.f32 0.18741608, %v2504_v26  ;;  %v2541_v37 = vadd.f32 0.0036580483, %v2540_v2 }
 0x2ac   : > { %v2552_v20 = vadd.f32 0.014752088, %v2551_v38  ;;  %v2492_v45 = vsel %vm2489_vm7, %v2491_v59, %v2487_v25  ;;  %7640 = vrcp.f32 %v10364_v29  ;;  %v2698_v61 = vmul.f32 2.1237322e-06, %v10366_v21 }
 0x2ad   : > { %v462_v40 = vmul.f32 0.5, %v10160_v28  ;;  %v2493_v49 = vmul.f32 %v2492_v45, %v2468_v13  ;;  %v2517_v41 = vmul.f32 %v2516_v7, %v10284_v12  ;;  %v4758_v15 = vmul.f32 %v4658_v33, %v10319_v17 }
 0x2ae   : > { %v10379_v36 = vmul.f32 0.5, %v10218_v57  ;;  %v7181_v26 = vor.u32 %v7427_v60, %v7180_v23  ;;  %v10383_v24 = vmul.f32 0.70710677, %v10362_v32  ;;  %v10386_v1 = vmul.f32 %v2347_v39, %v10231_v47 }
 0x2af   : > { %v6932_v59 = vclamps-f32 %v2493_v49, 1.0  ;;  %v2506_v28 = vmul.f32 %v2505_v44, %v10284_v12  ;;  %v10389_v13 = vadd.f32 1.0, %v2517_v41  ;;  %v7185_v52 = vor.u32 %v7425_v0, %v7182_v51  ;;  %v10399_v44 = vld [vmem:[%s8053_s10 + $0x1a8] sm:$0xff] }
 0x2b0   : > { %5814 = vmatpush.bf16.xpose.msrb.mxu0 %v7181_v26  ;;  %v2542_v17 = vmul.f32 %v2541_v37, %v10338_v43  ;;  %v2553_v57 = vmul.f32 %v2552_v20, %v10338_v43  ;;  %v2699_v2 = vadd.f32 0.00028619796, %v2698_v61  ;;  %v2368_v33 = vand.u32 2147483647, %v10364_v29 }
 0x2b1   : > { %v4662_v16 = vadd.f32 1.0, %v6932_v59  ;;  %7642 = vrcp.f32 %v10389_v13  ;;  %v2709_v47 = vmul.f32 3.8918573e-05, %v10366_v21  ;;  %v2370_v12 = vand.u32 2147483648, %v10364_v29  ;;  %5887 = vmatpush.bf16.xpose.msrb.mxu1 %v7185_v52 }
 0x2b2   : > { %v7641_v38 = vpop.eup %7640  ;;  %v2543_v39 = vadd.f32 0.05243302, %v2542_v17  ;;  %v2554_v7 = vadd.f32 0.112945676, %v2553_v57  ;;  %v2700_v25 = vmul.f32 %v2699_v2, %v10366_v21  ;;  %vm2364_vm8 = vweird.f32 %v10364_v29 }
 0x2b3   : > { %v4762_v37 = vmul.f32 %v4662_v16, %v462_v40  ;;  %v2360_v20 = vmul.f32 %v7641_v38, %v10364_v29  ;;  %v2507_v45 = vadd.f32 1.1283791, %v2506_v28  ;;  %vm2365_vm9 = vweird.f32 %v7641_v38 }
 0x2b4   : > { %v2544_v23 = vmul.f32 %v2543_v39, %v10338_v43  ;;  %v2555_v60 = vmul.f32 %v2554_v7, %v10338_v43  ;;  %v2701_v61 = vadd.f32 0.0036580483, %v2700_v25  ;;  %v2710_v0 = vadd.f32 0.001143296, %v2709_v47  ;;  %vm10422_vm11 = vmor %vm2364_vm8, %vm2365_vm9 }
 0x2b5   : > { %v10405_v49 = vpack.c.bf16 %v4762_v37, %v4758_v15  ;;  %v2361_v41 = vsub.f32 1.0, %v2360_v20  ;;  %v10408_v26 = vmul.f32 0.70710677, %v10399_v44  ;;  %vm10410_vm10 = vcmp.eq.f32.partialorder %v2368_v33, 8.507059e+37 }
 0x2b6   : > { %v2371_v51 = vor.u32 1.1754944e-38, %v2370_v12  ;;  %v2556_v59 = vadd.f32 0.4994258, %v2555_v60  ;;  %v2576_v28 = vmul.f32 %v10383_v24, %v10383_v24  ;;  %v2545_v15 = vadd.f32 0.18741608, %v2544_v23 }
 0x2b7   : > { %13031 = vst [vmem:[#allocation17_spill] sm:$0xff] %v10405_v49  ;;  %v7643_v52 = vpop.eup %7642  ;;  %5698 = vmatmul.bf16.gmra.mxu2 %v10405_v49  ;;  %v2362_v17 = vmul.f32 %v7641_v38, %v2361_v41  ;;  %v2702_v57 = vmul.f32 %v2701_v61, %v10366_v21  ;;  %v2711_v2 = vmul.f32 %v2710_v0, %v10366_v21  ;;  %vm2524_vm12 = vweird.f32 %v10389_v13 }
 0x2b8   : > { %v2520_v33 = vmul.f32 %v7643_v52, %v10389_v13  ;;  %v2528_v47 = vand.u32 2147483647, %v10389_v13  ;;  %v2557_v12 = vmul.f32 %v2556_v59, %v10338_v43  ;;  %v2530_v7 = vand.u32 2147483648, %v10389_v13  ;;  %v10442_v59 = vld [vmem:[%s8053_s10 + $0x190] sm:$0xff] }
 0x2b9   : > { %v2363_v39 = vadd.f32 %v7641_v38, %v2362_v17  ;;  %v2712_v25 = vadd.f32 0.014752088, %v2711_v2  ;;  %v2736_v29 = vmul.f32 %v10408_v26, %v10408_v26  ;;  %vm2525_vm13 = vweird.f32 %v7643_v52 }
 0x2ba   : > { %v2521_v37 = vsub.f32 1.0, %v2520_v33  ;;  %v10433_v20 = vadd.f32 1.0, %v2557_v12  ;;  %v10435_v23 = vmin.f32 %v2576_v28, 16.0  ;;  %v2546_v61 = vmul.f32 %v2545_v15, %v10338_v43  ;;  %vm2526_vm14 = vmor %vm2524_vm12, %vm2525_vm13 }
 0x2bb   : > { %v2367_v60 = vsel %vm10422_vm11, %v7641_v38, %v2363_v39  ;;  %v2703_v41 = vadd.f32 0.05243302, %v2702_v57  ;;  %v2713_v0 = vmul.f32 %v2712_v25, %v10366_v21  ;;  %v463_v28 = vmul.f32 0.5, %v10236_v30 }
 0x2bc   : > { %v2372_v17 = vsel %vm10410_vm10, %v2371_v51, %v2367_v60  ;;  %v2522_v2 = vmul.f32 %v7643_v52, %v2521_v37  ;;  %7644 = vrcp.f32 %v10433_v20  ;;  %v2578_v33 = vmul.f32 2.1237322e-06, %v10435_v23 }
 0x2bd   : > { %v2373_v16 = vmul.f32 %v2372_v17, %v10386_v1  ;;  %v2508_v38 = vmul.f32 %v2507_v45, %v10252_v4  ;;  %v2531_v43 = vor.u32 1.1754944e-38, %v2530_v7  ;;  %vm2529_vm15 = vcmp.eq.f32.partialorder %v2528_v47, 8.507059e+37 }
 0x2be   : > { %v2523_v15 = vadd.f32 %v7643_v52, %v2522_v2  ;;  %v2714_v40 = vadd.f32 0.112945676, %v2713_v0  ;;  %v10455_v51 = vmul.f32 0.70710677, %v10442_v59  ;;  %v2547_v12 = vadd.f32 1.1283791, %v2546_v61 }
 0x2bf   : > { %v6929_v57 = vclamps-f32 %v2373_v16, 1.0  ;;  %v2704_v39 = vmul.f32 %v2703_v41, %v10366_v21  ;;  %v10458_v30 = vmin.f32 %v2736_v29, 16.0  ;;  %vm2564_vm0 = vweird.f32 %v10433_v20 }
 0x2c0   : > { %v2527_v1 = vsel %vm2526_vm14, %v7643_v52, %v2523_v15  ;;  %v2715_v4 = vmul.f32 %v2714_v40, %v10366_v21  ;;  %v2579_v13 = vadd.f32 0.00028619796, %v2578_v33  ;;  %v2568_v7 = vand.u32 2147483647, %v10433_v20 }
 0x2c1   : > { %v2532_v45 = vsel %vm2529_vm15, %v2531_v43, %v2527_v1  ;;  %v2589_v47 = vmul.f32 3.8918573e-05, %v10435_v23  ;;  %v2738_v25 = vmul.f32 2.1237322e-06, %v10458_v30  ;;  %v4659_v61 = vadd.f32 1.0, %v6929_v57 }
 0x2c2   : > { %v7645_v37 = vpop.eup %7644  ;;  %v2533_v60 = vmul.f32 %v2532_v45, %v2508_v38  ;;  %v2716_v0 = vadd.f32 0.4994258, %v2715_v4  ;;  %v2580_v29 = vmul.f32 %v2579_v13, %v10435_v23  ;;  %v2570_v41 = vand.u32 2147483648, %v10433_v20 }
 0x2c3   : > { %v2560_v52 = vmul.f32 %v7645_v37, %v10433_v20  ;;  %v2705_v17 = vadd.f32 0.18741608, %v2704_v39  ;;  %v2590_v2 = vadd.f32 0.001143296, %v2589_v47  ;;  %vm2565_vm1 = vweird.f32 %v7645_v37  ;;  %v10491_v20 = vld [vmem:[%s8053_s10 + $0x1b0] sm:$0xff] }
 0x2c4   : > { %v6933_v33 = vclamps-f32 %v2533_v60, 1.0  ;;  %v2717_v16 = vmul.f32 %v2716_v0, %v10366_v21  ;;  %v2581_v43 = vadd.f32 0.0036580483, %v2580_v29  ;;  %v2739_v1 = vadd.f32 0.00028619796, %v2738_v25  ;;  %vm10480_vm2 = vmor %vm2564_vm0, %vm2565_vm1 }
 0x2c5   : > { %v2561_v15 = vsub.f32 1.0, %v2560_v52  ;;  %v2591_v40 = vmul.f32 %v2590_v2, %v10435_v23  ;;  %v2749_v38 = vmul.f32 3.8918573e-05, %v10458_v30  ;;  %v4759_v4 = vmul.f32 %v4659_v61, %v10379_v36 }
 0x2c6   : > { %v4663_v57 = vadd.f32 1.0, %v6933_v33  ;;  %v10472_v13 = vadd.f32 1.0, %v2717_v16  ;;  %v2582_v45 = vmul.f32 %v2581_v43, %v10435_v23  ;;  %v2740_v60 = vmul.f32 %v2739_v1, %v10458_v30 }
 0x2c7   : > { %v2562_v39 = vmul.f32 %v7645_v37, %v2561_v15  ;;  %v2592_v47 = vadd.f32 0.014752088, %v2591_v40  ;;  %v2750_v0 = vadd.f32 0.001143296, %v2749_v38  ;;  %v2548_v52 = vmul.f32 %v2547_v12, %v10313_v27 }
 0x2c8   : > { %v4763_v29 = vmul.f32 %v4663_v57, %v463_v28  ;;  %v2571_v36 = vor.u32 1.1754944e-38, %v2570_v41  ;;  %7646 = vrcp.f32 %v10472_v13  ;;  %vm2569_vm3 = vcmp.eq.f32.partialorder %v2568_v7, 8.507059e+37 }
 0x2c9   : > { %v2563_v61 = vadd.f32 %v7645_v37, %v2562_v39  ;;  %v2583_v2 = vadd.f32 0.05243302, %v2582_v45  ;;  %v2593_v33 = vmul.f32 %v2592_v47, %v10435_v23  ;;  %v2706_v28 = vmul.f32 %v2705_v17, %v10366_v21 }
 0x2ca   : > { %v10486_v16 = vpack.c.bf16 %v4763_v29, %v4759_v4  ;;  %v2741_v27 = vadd.f32 0.0036580483, %v2740_v60  ;;  %v2751_v12 = vmul.f32 %v2750_v0, %v10458_v30  ;;  %v464_v43 = vmul.f32 0.5, %v10291_v8 }
 0x2cb   : > { %v2567_v41 = vsel %vm10480_vm2, %v7645_v37, %v2563_v61  ;;  %v2584_v15 = vmul.f32 %v2583_v2, %v10435_v23  ;;  %v2594_v7 = vadd.f32 0.112945676, %v2593_v33  ;;  %v2616_v21 = vmul.f32 %v10455_v51, %v10455_v51 }
 0x2cc   : > { %13038 = vst [vmem:[#allocation18_spill] sm:$0xff] %v10486_v16  ;;  %5771 = vmatmul.bf16.gmra.mxu3 %v10486_v16  ;;  %v2572_v40 = vsel %vm2569_vm3, %v2571_v36, %v2567_v41  ;;  %v2742_v1 = vmul.f32 %v2741_v27, %v10458_v30  ;;  %v2752_v38 = vadd.f32 0.014752088, %v2751_v12  ;;  %v10503_v8 = vmul.f32 0.70710677, %v10491_v20 }
 0x2cd   : > { %v2573_v17 = vmul.f32 %v2572_v40, %v2548_v52  ;;  %v2585_v57 = vadd.f32 0.18741608, %v2584_v15  ;;  %v2595_v4 = vmul.f32 %v2594_v7, %v10435_v23  ;;  %v2707_v45 = vadd.f32 1.1283791, %v2706_v28  ;;  %v10520_v40 = vld [vmem:[%s8053_s10 + $0x198] sm:$0xff] }
 0x2ce   : > { %v7647_v37 = vpop.eup %7646  ;;  %vm2724_vm4 = vweird.f32 %v10472_v13  ;;  %v2743_v39 = vadd.f32 0.05243302, %v2742_v1  ;;  %v2753_v47 = vmul.f32 %v2752_v38, %v10458_v30  ;;  %v10509_v52 = vmin.f32 %v2616_v21, 16.0 }
 0x2cf   : > { %v6934_v60 = vclamps-f32 %v2573_v17, 1.0  ;;  %v2720_v0 = vmul.f32 %v7647_v37, %v10472_v13  ;;  %v2586_v29 = vmul.f32 %v2585_v57, %v10435_v23  ;;  %v2730_v25 = vand.u32 2147483648, %v10472_v13 }
 0x2d0   : > { %v2596_v36 = vadd.f32 0.4994258, %v2595_v4  ;;  %v2744_v61 = vmul.f32 %v2743_v39, %v10458_v30  ;;  %v2754_v2 = vadd.f32 0.112945676, %v2753_v47  ;;  %vm2725_vm5 = vweird.f32 %v7647_v37 }
 0x2d1   : > { %v2721_v33 = vsub.f32 1.0, %v2720_v0  ;;  %v2728_v28 = vand.u32 2147483647, %v10472_v13  ;;  %v2776_v27 = vmul.f32 %v10503_v8, %v10503_v8  ;;  %v4664_v12 = vadd.f32 1.0, %v6934_v60  ;;  %vm10525_vm6 = vmor %vm2724_vm4, %vm2725_vm5 }
 0x2d2   : > { %v2597_v41 = vmul.f32 %v2596_v36, %v10435_v23  ;;  %v2755_v15 = vmul.f32 %v2754_v2, %v10458_v30  ;;  %v2618_v7 = vmul.f32 2.1237322e-06, %v10509_v52  ;;  %v2587_v38 = vadd.f32 1.1283791, %v2586_v29 }
 0x2d3   : > { %v2722_v1 = vmul.f32 %v7647_v37, %v2721_v33  ;;  %v2745_v21 = vadd.f32 0.18741608, %v2744_v61  ;;  %v2629_v17 = vmul.f32 3.8918573e-05, %v10509_v52  ;;  %v2731_v4 = vor.u32 1.1754944e-38, %v2730_v25 }
 0x2d4   : > { %v2598_v23 = vadd.f32 1.0, %v2597_v41  ;;  %v2756_v39 = vadd.f32 0.4994258, %v2755_v15  ;;  %v2619_v47 = vadd.f32 0.00028619796, %v2618_v7  ;;  %v2708_v60 = vmul.f32 %v2707_v45, %v10327_v63  ;;  %v10541_v63 = vld [vmem:[%s8053_s10 + $0x1b8] sm:$0xff] }
 0x2d5   : > { %v2723_v0 = vadd.f32 %v7647_v37, %v2722_v1  ;;  %vm2729_vm7 = vcmp.eq.f32.partialorder %v2728_v28, 8.507059e+37  ;;  %v2630_v36 = vadd.f32 0.001143296, %v2629_v17  ;;  %v468_v29 = vmul.f32 0.5, %v10310_v31 }
 0x2d6   : > { %v4764_v61 = vmul.f32 %v4664_v12, %v464_v43  ;;  %7648 = vrcp.f32 %v2598_v23  ;;  %v10532_v13 = vmul.f32 0.70710677, %v10520_v40  ;;  %v2757_v25 = vmul.f32 %v2756_v39, %v10458_v30 }
 0x2d7   : > { %v2727_v2 = vsel %vm10525_vm6, %v7647_v37, %v2723_v0  ;;  %v2620_v33 = vmul.f32 %v2619_v47, %v10509_v52  ;;  %v10538_v41 = vmin.f32 %v2776_v27, 16.0  ;;  %v10544_v28 = vmul.f32 %v2587_v38, %v10383_v24 }
 0x2d8   : > { %v2732_v45 = vsel %vm2729_vm7, %v2731_v4, %v2727_v2  ;;  %v2746_v31 = vmul.f32 %v2745_v21, %v10458_v30  ;;  %v2631_v43 = vmul.f32 %v2630_v36, %v10509_v52  ;;  %v2608_v15 = vand.u32 2147483647, %v2598_v23 }
 0x2d9   : > { %v2733_v12 = vmul.f32 %v2732_v45, %v2708_v60  ;;  %v10548_v7 = vadd.f32 1.0, %v2757_v25  ;;  %v2621_v37 = vadd.f32 0.0036580483, %v2620_v33  ;;  %vm2604_vm8 = vweird.f32 %v2598_v23 }
 0x2da   : > { %v2632_v1 = vadd.f32 0.014752088, %v2631_v43  ;;  %v2778_v27 = vmul.f32 2.1237322e-06, %v10538_v41  ;;  %v10552_v17 = vmul.f32 0.70710677, %v10541_v63  ;;  %v2656_v30 = vmul.f32 %v10532_v13, %v10532_v13 }
 0x2db   : > { %v6938_v57 = vclamps-f32 %v2733_v12, 1.0  ;;  %7650 = vrcp.f32 %v10548_v7  ;;  %v2789_v24 = vmul.f32 3.8918573e-05, %v10538_v41  ;;  %v2610_v21 = vand.u32 2147483648, %v2598_v23 }
 0x2dc   : > { %v7649_v38 = vpop.eup %7648  ;;  %v2622_v4 = vmul.f32 %v2621_v37, %v10509_v52  ;;  %v2633_v39 = vmul.f32 %v2632_v1, %v10509_v52  ;;  %v2779_v47 = vadd.f32 0.00028619796, %v2778_v27  ;;  %vm10560_vm9 = vcmp.eq.f32.partialorder %v2608_v15, 8.507059e+37 }
 0x2dd   : > { %v4668_v60 = vadd.f32 1.0, %v6938_v57  ;;  %v2600_v0 = vmul.f32 %v7649_v38, %v2598_v23  ;;  %v2747_v2 = vadd.f32 1.1283791, %v2746_v31  ;;  %vm2605_vm10 = vweird.f32 %v7649_v38 }
 0x2de   : > { %v2623_v25 = vadd.f32 0.05243302, %v2622_v4  ;;  %v2634_v33 = vadd.f32 0.112945676, %v2633_v39  ;;  %v2780_v45 = vmul.f32 %v2779_v47, %v10538_v41  ;;  %v2790_v16 = vadd.f32 0.001143296, %v2789_v24  ;;  %vm10575_vm11 = vmor %vm2604_vm8, %vm2605_vm10 }
 0x2df   : > { %v4768_v43 = vmul.f32 %v4668_v60, %v468_v29  ;;  %v2601_v12 = vsub.f32 1.0, %v2600_v0  ;;  %v10565_v49 = vmin.f32 %v2656_v30, 16.0  ;;  %v2611_v37 = vor.u32 1.1754944e-38, %v2610_v21 }
 0x2e0   : > { %v2770_v1 = vand.u32 2147483648, %v10548_v7  ;;  %v2635_v27 = vmul.f32 %v2634_v33, %v10509_v52  ;;  %v2781_v15 = vadd.f32 0.0036580483, %v2780_v45  ;;  %v2791_v4 = vmul.f32 %v2790_v16, %v10538_v41 }
 0x2e1   : > { %v7651_v57 = vpop.eup %7650  ;;  %v10569_v5 = vpack.c.bf16 %v4768_v43, %v4764_v61  ;;  %v2602_v31 = vmul.f32 %v7649_v38, %v2601_v12  ;;  %v2658_v39 = vmul.f32 2.1237322e-06, %v10565_v49  ;;  %vm2764_vm12 = vweird.f32 %v10548_v7 }
 0x2e2   : > { %v2760_v24 = vmul.f32 %v7651_v57, %v10548_v7  ;;  %v2624_v30 = vmul.f32 %v2623_v25, %v10509_v52  ;;  %v2636_v21 = vadd.f32 0.4994258, %v2635_v27  ;;  %v2782_v16 = vmul.f32 %v2781_v15, %v10538_v41 }
 0x2e3   : > { %13043 = vst [vmem:[#allocation19_spill] sm:$0xff] %v10569_v5  ;;  %5557 = vmatmul.bf16.gmra.mxu0 %v10569_v5  ;;  %v2603_v61 = vadd.f32 %v7649_v38, %v2602_v31  ;;  %v2792_v47 = vadd.f32 0.014752088, %v2791_v4  ;;  %v2659_v60 = vadd.f32 0.00028619796, %v2658_v39  ;;  %vm2765_vm13 = vweird.f32 %v7651_v57 }
 0x2e4   : > { %v2761_v0 = vsub.f32 1.0, %v2760_v24  ;;  %v2768_v23 = vand.u32 2147483647, %v10548_v7  ;;  %v2637_v33 = vmul.f32 %v2636_v21, %v10509_v52  ;;  %v2771_v43 = vor.u32 1.1754944e-38, %v2770_v1  ;;  %vm10595_vm14 = vmor %vm2764_vm12, %vm2765_vm13 }
 0x2e5   : > { %v2607_v45 = vsel %vm10575_vm11, %v7649_v38, %v2603_v61  ;;  %v2783_v12 = vadd.f32 0.05243302, %v2782_v16  ;;  %v2793_v25 = vmul.f32 %v2792_v47, %v10538_v41  ;;  %v2660_v4 = vmul.f32 %v2659_v60, %v10565_v49 }
 0x2e6   : > { %v2612_v27 = vsel %vm10560_vm9, %v2611_v37, %v2607_v45  ;;  %v2762_v31 = vmul.f32 %v7651_v57, %v2761_v0  ;;  %v2638_v15 = vadd.f32 1.0, %v2637_v33  ;;  %v2625_v38 = vadd.f32 0.18741608, %v2624_v30 }
 0x2e7   : > { %v2613_v39 = vmul.f32 %v2612_v27, %v10544_v28  ;;  %v2784_v1 = vmul.f32 %v2783_v12, %v10538_v41  ;;  %v2794_v29 = vadd.f32 0.112945676, %v2793_v25  ;;  %v2748_v21 = vmul.f32 %v2747_v2, %v10408_v26  ;;  %v10612_v25 = vld [vmem:[%s8053_s10 + $0x1c0] sm:$0xff] }
 0x2e8   : > { %v2763_v36 = vadd.f32 %v7651_v57, %v2762_v31  ;;  %vm2769_vm15 = vcmp.eq.f32.partialorder %v2768_v23, 8.507059e+37  ;;  %7652 = vrcp.f32 %v2638_v15  ;;  %v2669_v61 = vmul.f32 3.8918573e-05, %v10565_v49 }
 0x2e9   : > { %v6935_v37 = vclamps-f32 %v2613_v39, 1.0  ;;  %v2816_v28 = vmul.f32 %v10552_v17, %v10552_v17  ;;  %v2785_v16 = vadd.f32 0.18741608, %v2784_v1  ;;  %v2795_v30 = vmul.f32 %v2794_v29, %v10538_v41 }
 0x2ea   : > { %v2767_v7 = vsel %vm10595_vm14, %v7651_v57, %v2763_v36  ;;  %v2661_v47 = vadd.f32 0.0036580483, %v2660_v4  ;;  %v465_v60 = vmul.f32 0.5, %v10362_v32  ;;  %v469_v26 = vmul.f32 0.5, %v10399_v44 }
 0x2eb   : > { %v2772_v2 = vsel %vm2769_vm15, %v2771_v43, %v2767_v7  ;;  %v2626_v0 = vmul.f32 %v2625_v38, %v10509_v52  ;;  %v4665_v33 = vadd.f32 1.0, %v6935_v37  ;;  %v2796_v45 = vadd.f32 0.4994258, %v2795_v30 }
 0x2ec   : > { %v2773_v23 = vmul.f32 %v2772_v2, %v2748_v21  ;;  %v2662_v12 = vmul.f32 %v2661_v47, %v10565_v49  ;;  %vm2644_vm0 = vweird.f32 %v2638_v15  ;;  %v2648_v57 = vand.u32 2147483647, %v2638_v15 }
 0x2ed   : > { %v2670_v27 = vadd.f32 0.001143296, %v2669_v61  ;;  %v10614_v31 = vmin.f32 %v2816_v28, 16.0  ;;  %v2650_v32 = vand.u32 2147483648, %v2638_v15  ;;  %v2786_v44 = vmul.f32 %v2785_v16, %v10538_v41 }
 0x2ee   : > { %v7653_v4 = vpop.eup %7652  ;;  %v6939_v39 = vclamps-f32 %v2773_v23, 1.0  ;;  %v2797_v43 = vmul.f32 %v2796_v45, %v10538_v41  ;;  %v10621_v1 = vmul.f32 0.70710677, %v10612_v25  ;;  %v4765_v21 = vmul.f32 %v4665_v33, %v465_v60 }
 0x2ef   : > { %v2640_v52 = vmul.f32 %v7653_v4, %v2638_v15  ;;  %v2671_v24 = vmul.f32 %v2670_v27, %v10565_v49  ;;  %v2818_v38 = vmul.f32 2.1237322e-06, %v10614_v31  ;;  %v2663_v37 = vadd.f32 0.05243302, %v2662_v12 }
 0x2f0   : > { %v4669_v29 = vadd.f32 1.0, %v6939_v39  ;;  %v2798_v36 = vadd.f32 1.0, %v2797_v43  ;;  %vm2645_vm1 = vweird.f32 %v7653_v4  ;;  %v2627_v16 = vadd.f32 1.1283791, %v2626_v0 }
 0x2f1   : > { %v2641_v61 = vsub.f32 1.0, %v2640_v52  ;;  %v2672_v28 = vadd.f32 0.014752088, %v2671_v24  ;;  %v2819_v7 = vadd.f32 0.00028619796, %v2818_v38  ;;  %vm10623_vm2 = vcmp.eq.f32.partialorder %v2648_v57, 8.507059e+37  ;;  %vm10633_vm3 = vmor %vm2644_vm0, %vm2645_vm1 }
 0x2f2   : > { %v4769_v30 = vmul.f32 %v4669_v29, %v469_v26  ;;  %7654 = vrcp.f32 %v2798_v36  ;;  %v2856_v23 = vmul.f32 %v10621_v1, %v10621_v1  ;;  %v2651_v26 = vor.u32 1.1754944e-38, %v2650_v32 }
 0x2f3   : > { %v2642_v41 = vmul.f32 %v7653_v4, %v2641_v61  ;;  %v2673_v2 = vmul.f32 %v2672_v28, %v10565_v49  ;;  %v2820_v0 = vmul.f32 %v2819_v7, %v10614_v31  ;;  %v2829_v45 = vmul.f32 3.8918573e-05, %v10614_v31 }
 0x2f4   : > { %v10630_v60 = vpack.c.bf16 %v4769_v30, %v4765_v21  ;;  %v2787_v57 = vadd.f32 1.1283791, %v2786_v44  ;;  %v2664_v27 = vmul.f32 %v2663_v37, %v10565_v49  ;;  %v2628_v43 = vmul.f32 %v2627_v16, %v10455_v51 }
 0x2f5   : > { %v2643_v12 = vadd.f32 %v7653_v4, %v2642_v41  ;;  %v2674_v39 = vadd.f32 0.112945676, %v2673_v2  ;;  %v2821_v15 = vadd.f32 0.0036580483, %v2820_v0  ;;  %v2830_v52 = vadd.f32 0.001143296, %v2829_v45 }
 0x2f6   : > { %13050 = vst [vmem:[#allocation20_spill] sm:$0xff] %v10630_v60  ;;  %5630 = vmatmul.bf16.gmra.mxu1 %v10630_v60  ;;  %v2808_v32 = vand.u32 2147483647, %v2798_v36  ;;  %v10645_v29 = vmin.f32 %v2856_v23, 16.0  ;;  %v2810_v37 = vand.u32 2147483648, %v2798_v36  ;;  %v2788_v28 = vmul.f32 %v2787_v57, %v10503_v8 }
 0x2f7   : > { %v2647_v24 = vsel %vm10633_vm3, %v7653_v4, %v2643_v12  ;;  %v2675_v38 = vmul.f32 %v2674_v39, %v10565_v49  ;;  %v2822_v61 = vmul.f32 %v2821_v15, %v10614_v31  ;;  %v2831_v51 = vmul.f32 %v2830_v52, %v10614_v31  ;;  %v10653_v4 = vld [vmem:[%s8053_s10 + $0x1e0] sm:$0xff]  ;;  %v7174_v0 = vld [vmem:[%s8060_s18 + $0x178] sm:$0xf0] }
 0x2f8   : > { %v7655_v21 = vpop.eup %7654  ;;  %v2652_v44 = vsel %vm10623_vm2, %v2651_v26, %v2647_v24  ;;  %vm2804_vm4 = vweird.f32 %v2798_v36  ;;  %v2665_v30 = vadd.f32 0.18741608, %v2664_v27  ;;  %v2858_v47 = vmul.f32 2.1237322e-06, %v10645_v29 }
 0x2f9   : > { %v2800_v7 = vmul.f32 %v7655_v21, %v2798_v36  ;;  %v2653_v16 = vmul.f32 %v2652_v44, %v2628_v43  ;;  %v2676_v41 = vadd.f32 0.4994258, %v2675_v38  ;;  %v2823_v2 = vadd.f32 0.05243302, %v2822_v61 }
 0x2fa   : > { %v2832_v23 = vadd.f32 0.014752088, %v2831_v51  ;;  %vm2805_vm5 = vweird.f32 %v7655_v21  ;;  %v2869_v26 = vmul.f32 3.8918573e-05, %v10645_v29  ;;  %vm10657_vm6 = vcmp.eq.f32.partialorder %v2808_v32, 8.507059e+37 }
 0x2fb   : > { %v2801_v33 = vsub.f32 1.0, %v2800_v7  ;;  %v2811_v8 = vor.u32 1.1754944e-38, %v2810_v37  ;;  %v2677_v45 = vmul.f32 %v2676_v41, %v10565_v49  ;;  %v10664_v27 = vmul.f32 0.70710677, %v10653_v4  ;;  %vm2806_vm7 = vmor %vm2804_vm4, %vm2805_vm5 }
 0x2fc   : > { %v2833_v12 = vmul.f32 %v2832_v23, %v10614_v31  ;;  %v2859_v39 = vadd.f32 0.00028619796, %v2858_v47  ;;  %v2870_v43 = vadd.f32 0.001143296, %v2869_v26  ;;  %v6936_v15 = vclamps-f32 %v2653_v16, 1.0 }
 0x2fd   : > { %v2802_v57 = vmul.f32 %v7655_v21, %v2801_v33  ;;  %v2666_v52 = vmul.f32 %v2665_v30, %v10565_v49  ;;  %v10668_v24 = vadd.f32 1.0, %v2677_v45  ;;  %v2824_v44 = vmul.f32 %v2823_v2, %v10614_v31  ;;  %v7424_v26 = vld [vmem:[%s8060_s18 + $0x174] sm:$0xf0]  ;;  %v7422_v45 = vld [vmem:[%s8060_s18 + $0x16c] sm:$0xf] }
 0x2fe   : > { %v2834_v32 = vadd.f32 0.112945676, %v2833_v12  ;;  %v2860_v37 = vmul.f32 %v2859_v39, %v10645_v29  ;;  %v2871_v61 = vmul.f32 %v2870_v43, %v10645_v29  ;;  %v466_v51 = vmul.f32 0.5, %v10442_v59  ;;  %v7164_v43 = vld [vmem:[%s8060_s18 + $0x160] sm:$0xf] }
 0x2ff   : > { %v2803_v38 = vadd.f32 %v7655_v21, %v2802_v57  ;;  %7656 = vrcp.f32 %v10668_v24  ;;  %v470_v36 = vmul.f32 0.5, %v10491_v20  ;;  %v3016_v30 = vmul.f32 %v10664_v27, %v10664_v27 }
 0x300   : > { %v2835_v7 = vmul.f32 %v2834_v32, %v10614_v31  ;;  %v4666_v41 = vadd.f32 1.0, %v6936_v15  ;;  %v2667_v2 = vadd.f32 1.1283791, %v2666_v52  ;;  %v2861_v23 = vadd.f32 0.0036580483, %v2860_v37 }
 0x301   : > { %v2807_v49 = vsel %vm2806_vm7, %v7655_v21, %v2803_v38  ;;  %v2825_v33 = vadd.f32 0.18741608, %v2824_v44  ;;  %v2872_v20 = vadd.f32 0.014752088, %v2871_v61  ;;  %v7172_v21 = vld [vmem:[%s8060_s18 + $0x168] sm:$0xf]  ;;  %vm2684_vm8 = vweird.f32 %v10668_v24 }
 0x302   : > { %v2812_v16 = vsel %vm10657_vm6, %v2811_v8, %v2807_v49  ;;  %v2836_v47 = vadd.f32 0.4994258, %v2835_v7  ;;  %v7173_v39 = vor.u32 %v7424_v26, %v7172_v21  ;;  %v10687_v8 = vmin.f32 %v3016_v30, 16.0  ;;  %v7423_v32 = vld [vmem:[%s8060_s18 + $0x16c] sm:$0xf0] }
 0x303   : > { %v2813_v59 = vmul.f32 %v2812_v16, %v2788_v28  ;;  %v4766_v52 = vmul.f32 %v4666_v41, %v466_v51  ;;  %v7177_v28 = vor.u32 %v7422_v45, %v7174_v0  ;;  %v7421_v38 = vld [vmem:[%s8060_s18 + $0x164] sm:$0xf]  ;;  %v7166_v44 = vld [vmem:[%s8060_s18 + $0x170] sm:$0xf0]  ;;  %v2862_v37 = vmul.f32 %v2861_v23, %v10645_v29 }
 0x304   : > { %v2837_v57 = vmul.f32 %v2836_v47, %v10614_v31  ;;  %5961 = vmatpush.bf16.xpose.msrb.mxu2 %v7173_v39  ;;  %v2873_v16 = vmul.f32 %v2872_v20, %v10645_v29  ;;  %v2688_v30 = vand.u32 2147483647, %v10668_v24  ;;  %v2690_v51 = vand.u32 2147483648, %v10668_v24 }
 0x305   : > { %v6940_v12 = vclamps-f32 %v2813_v59, 1.0  ;;  %v7657_v15 = vpop.eup %7656  ;;  %6034 = vmatpush.bf16.xpose.msrb.mxu3 %v7177_v28  ;;  %v7165_v41 = vor.u32 %v7423_v32, %v7164_v43  ;;  %v7169_v59 = vor.u32 %v7421_v38, %v7166_v44  ;;  %v10702_v23 = vmul.f32 0.5, %v10520_v40 }
 0x306   : > { %v2680_v49 = vmul.f32 %v7657_v15, %v10668_v24  ;;  %v10695_v7 = vadd.f32 1.0, %v2837_v57  ;;  %vm2685_vm9 = vweird.f32 %v7657_v15  ;;  %v2668_v26 = vmul.f32 %v2667_v2, %v10532_v13 }
 0x307   : > { %v4670_v61 = vadd.f32 1.0, %v6940_v12  ;;  %v2826_v20 = vmul.f32 %v2825_v33, %v10614_v31  ;;  %5815 = vmatpush.bf16.xpose.msrb.mxu0 %v7165_v41  ;;  %5888 = vmatpush.bf16.xpose.msrb.mxu1 %v7169_v59  ;;  %v2863_v45 = vadd.f32 0.05243302, %v2862_v37  ;;  %v10707_v12 = vld [vmem:[%s8053_s10 + $0x1c8] sm:$0xff]  ;;  %v3018_v0 = vmul.f32 2.1237322e-06, %v10687_v8  ;;  %vm10714_vm10 = vmor %vm2684_vm8, %vm2685_vm9 }
 0x308   : > { %v2681_v21 = vsub.f32 1.0, %v2680_v49  ;;  %7658 = vrcp.f32 %v10695_v7  ;;  %vm10718_vm11 = vcmp.eq.f32.partialorder %v2688_v30, 8.507059e+37  ;;  %v2691_v31 = vor.u32 1.1754944e-38, %v2690_v51 }
 0x309   : > { %v4770_v47 = vmul.f32 %v4670_v61, %v470_v36  ;;  %v2874_v36 = vadd.f32 0.112945676, %v2873_v16  ;;  %v2864_v2 = vmul.f32 %v2863_v45, %v10645_v29  ;;  %v3029_v33 = vmul.f32 3.8918573e-05, %v10687_v8 }
 0x30a   : > { %v2682_v39 = vmul.f32 %v7657_v15, %v2681_v21  ;;  %v3019_v24 = vadd.f32 0.00028619796, %v3018_v0  ;;  %v10727_v28 = vmul.f32 0.70710677, %v10707_v12  ;;  %v2827_v32 = vadd.f32 1.1283791, %v2826_v20 }
 0x30b   : > { %v10709_v57 = vpack.c.bf16 %v4770_v47, %v4766_v52  ;;  %v2875_v52 = vmul.f32 %v2874_v36, %v10645_v29  ;;  %vm2844_vm12 = vweird.f32 %v10695_v7  ;;  %v2865_v38 = vadd.f32 0.18741608, %v2864_v2  ;;  %v10741_v21 = vld [vmem:[%s8053_s10 + $0x1e8] sm:$0xff] }
 0x30c   : > { %v2683_v43 = vadd.f32 %v7657_v15, %v2682_v39  ;;  %v3030_v44 = vadd.f32 0.001143296, %v3029_v33  ;;  %v3020_v16 = vmul.f32 %v3019_v24, %v10687_v8  ;;  %v2896_v30 = vmul.f32 %v10727_v28, %v10727_v28 }
 0x30d   : > { %13055 = vst [vmem:[#allocation21_spill] sm:$0xff] %v10709_v57  ;;  %5703 = vmatmul.bf16.gmra.mxu2 %v10709_v57  ;;  %v2876_v49 = vadd.f32 0.4994258, %v2875_v52  ;;  %v2850_v59 = vand.u32 2147483648, %v10695_v7  ;;  %v2866_v47 = vmul.f32 %v2865_v38, %v10645_v29  ;;  %v2848_v0 = vand.u32 2147483647, %v10695_v7 }
 0x30e   : > { %v7659_v37 = vpop.eup %7658  ;;  %v2687_v61 = vsel %vm10714_vm10, %v7657_v15, %v2683_v43  ;;  %v3021_v45 = vadd.f32 0.0036580483, %v3020_v16  ;;  %v3031_v39 = vmul.f32 %v3030_v44, %v10687_v8  ;;  %v10746_v40 = vmin.f32 %v2896_v30, 16.0 }
 0x30f   : > { %v2692_v51 = vsel %vm10718_vm11, %v2691_v31, %v2687_v61  ;;  %v2840_v41 = vmul.f32 %v7659_v37, %v10695_v7  ;;  %v2877_v15 = vmul.f32 %v2876_v49, %v10645_v29  ;;  %vm2845_vm13 = vweird.f32 %v7659_v37 }
 0x310   : > { %v2693_v20 = vmul.f32 %v2692_v51, %v2668_v26  ;;  %v3022_v31 = vmul.f32 %v3021_v45, %v10687_v8  ;;  %v3032_v2 = vadd.f32 0.014752088, %v3031_v39  ;;  %v10752_v33 = vmul.f32 0.70710677, %v10741_v21  ;;  %vm10759_vm14 = vmor %vm2844_vm12, %vm2845_vm13 }
 0x311   : > { %v2841_v36 = vsub.f32 1.0, %v2840_v41  ;;  %v10748_v13 = vadd.f32 1.0, %v2877_v15  ;;  %v2898_v29 = vmul.f32 2.1237322e-06, %v10746_v40  ;;  %v2909_v52 = vmul.f32 3.8918573e-05, %v10746_v40 }
 0x312   : > { %v6937_v26 = vclamps-f32 %v2693_v20, 1.0  ;;  %v2828_v24 = vmul.f32 %v2827_v32, %v10552_v17  ;;  %v2851_v44 = vor.u32 1.1754944e-38, %v2850_v59  ;;  %v2867_v61 = vadd.f32 1.1283791, %v2866_v47 }
 0x313   : > { %v2842_v43 = vmul.f32 %v7659_v37, %v2841_v36  ;;  %7660 = vrcp.f32 %v10748_v13  ;;  %vm2849_vm15 = vcmp.eq.f32.partialorder %v2848_v0, 8.507059e+37  ;;  %v3023_v16 = vadd.f32 0.05243302, %v3022_v31 }
 0x314   : > { %v3033_v30 = vmul.f32 %v3032_v2, %v10687_v8  ;;  %v471_v51 = vmul.f32 0.5, %v10541_v63  ;;  %v2899_v41 = vadd.f32 0.00028619796, %v2898_v29  ;;  %v2910_v20 = vadd.f32 0.001143296, %v2909_v52 }
 0x315   : > { %v2843_v49 = vadd.f32 %v7659_v37, %v2842_v43  ;;  %v3056_v17 = vmul.f32 %v10752_v33, %v10752_v33  ;;  %v4667_v32 = vadd.f32 1.0, %v6937_v26  ;;  %v3024_v59 = vmul.f32 %v3023_v16, %v10687_v8 }
 0x316   : > { %v3034_v47 = vadd.f32 0.112945676, %v3033_v30  ;;  %v2868_v45 = vmul.f32 %v2867_v61, %v10621_v1  ;;  %vm2884_vm0 = vweird.f32 %v10748_v13  ;;  %v2900_v39 = vmul.f32 %v2899_v41, %v10746_v40 }
 0x317   : > { %v2847_v7 = vsel %vm10759_vm14, %v7659_v37, %v2843_v49  ;;  %v3025_v36 = vadd.f32 0.18741608, %v3024_v59  ;;  %v2911_v31 = vmul.f32 %v2910_v20, %v10746_v40  ;;  %v2888_v37 = vand.u32 2147483647, %v10748_v13 }
 0x318   : > { %v2852_v15 = vsel %vm2849_vm15, %v2851_v44, %v2847_v7  ;;  %v3035_v0 = vmul.f32 %v3034_v47, %v10687_v8  ;;  %v2890_v26 = vand.u32 2147483648, %v10748_v13  ;;  %v2901_v43 = vadd.f32 0.0036580483, %v2900_v39 }
 0x319   : > { %v2853_v63 = vmul.f32 %v2852_v15, %v2828_v24  ;;  %v7661_v2 = vpop.eup %7660  ;;  %v10778_v29 = vmin.f32 %v3056_v17, 16.0  ;;  %v4767_v1 = vmul.f32 %v4667_v32, %v10702_v23  ;;  %v2912_v61 = vadd.f32 0.014752088, %v2911_v31 }
 0x31a   : > { %v2880_v38 = vmul.f32 %v7661_v2, %v10748_v13  ;;  %vm2885_vm1 = vweird.f32 %v7661_v2  ;;  %v3036_v24 = vadd.f32 0.4994258, %v3035_v0  ;;  %v2902_v44 = vmul.f32 %v2901_v43, %v10746_v40 }
 0x31b   : > { %v6941_v52 = vclamps-f32 %v2853_v63, 1.0  ;;  %v3058_v49 = vmul.f32 2.1237322e-06, %v10778_v29  ;;  %v3026_v41 = vmul.f32 %v3025_v36, %v10687_v8  ;;  %v3069_v20 = vmul.f32 3.8918573e-05, %v10778_v29  ;;  %v10789_v63 = vld [vmem:[%s8053_s10 + $0x1d0] sm:$0xff]  ;;  %vm10794_vm2 = vmor %vm2884_vm0, %vm2885_vm1 }
 0x31c   : > { %v2881_v30 = vsub.f32 1.0, %v2880_v38  ;;  %v3037_v17 = vmul.f32 %v3036_v24, %v10687_v8  ;;  %v2903_v7 = vadd.f32 0.05243302, %v2902_v44  ;;  %v2913_v23 = vmul.f32 %v2912_v61, %v10746_v40  ;;  %v10804_v38 = vld [vmem:[%s8053_s10 + $0x1f0] sm:$0xff] }
 0x31d   : > { %v4671_v16 = vadd.f32 1.0, %v6941_v52  ;;  %v3059_v32 = vadd.f32 0.00028619796, %v3058_v49  ;;  %v2891_v15 = vor.u32 1.1754944e-38, %v2890_v26  ;;  %v3070_v39 = vadd.f32 0.001143296, %v3069_v20 }
 0x31e   : > { %v2882_v47 = vmul.f32 %v7661_v2, %v2881_v30  ;;  %v3038_v0 = vadd.f32 1.0, %v3037_v17  ;;  %v2904_v8 = vmul.f32 %v2903_v7, %v10746_v40  ;;  %v2914_v31 = vadd.f32 0.112945676, %v2913_v23 }
 0x31f   : > { %v4771_v59 = vmul.f32 %v4671_v16, %v471_v51  ;;  %v3060_v43 = vmul.f32 %v3059_v32, %v10778_v29  ;;  %vm2889_vm3 = vcmp.eq.f32.partialorder %v2888_v37, 8.507059e+37  ;;  %v3071_v26 = vmul.f32 %v3070_v39, %v10778_v29 }
 0x320   : > { %v2883_v51 = vadd.f32 %v7661_v2, %v2882_v47  ;;  %v3027_v24 = vadd.f32 1.1283791, %v3026_v41  ;;  %7662 = vrcp.f32 %v3038_v0  ;;  %v10807_v13 = vmul.f32 0.70710677, %v10789_v63 }
 0x321   : > { %v10800_v52 = vpack.c.bf16 %v4771_v59, %v4767_v1  ;;  %v2905_v61 = vadd.f32 0.18741608, %v2904_v8  ;;  %v2915_v1 = vmul.f32 %v2914_v31, %v10746_v40  ;;  %v3061_v49 = vadd.f32 0.0036580483, %v3060_v43 }
 0x322   : > { %v2887_v44 = vsel %vm10794_vm2, %v7661_v2, %v2883_v51  ;;  %v3048_v37 = vand.u32 2147483647, %v3038_v0  ;;  %v3072_v30 = vadd.f32 0.014752088, %v3071_v26  ;;  %v10814_v20 = vmul.f32 0.70710677, %v10804_v38 }
 0x323   : > { %13064 = vst [vmem:[#allocation22_spill] sm:$0xff] %v10800_v52  ;;  %5776 = vmatmul.bf16.gmra.mxu3 %v10800_v52  ;;  %v2892_v16 = vsel %vm2889_vm3, %v2891_v15, %v2887_v44  ;;  %v3050_v17 = vand.u32 2147483648, %v3038_v0  ;;  %v2916_v7 = vadd.f32 0.4994258, %v2915_v1  ;;  %v3062_v23 = vmul.f32 %v3061_v49, %v10778_v29  ;;  %v10830_v51 = vld [vmem:[%s8053_s10 + $0x1d8] sm:$0xff] }
 0x324   : > { %v2893_v41 = vmul.f32 %v2892_v16, %v2868_v45  ;;  %v472_v32 = vmul.f32 0.5, %v10612_v25  ;;  %v2906_v2 = vmul.f32 %v2905_v61, %v10746_v40  ;;  %v3073_v59 = vmul.f32 %v3072_v30, %v10778_v29 }
 0x325   : > { %v2936_v47 = vmul.f32 %v10807_v13, %v10807_v13  ;;  %v10823_v15 = vmul.f32 0.5, %v10653_v4  ;;  %v3028_v45 = vmul.f32 %v3027_v24, %v10664_v27  ;;  %v2917_v39 = vmul.f32 %v2916_v7, %v10746_v40  ;;  %v10839_v27 = vld [vmem:[%s8053_s10 + $0x1f8] sm:$0xff] }
 0x326   : > { %v3063_v36 = vadd.f32 0.05243302, %v3062_v23  ;;  %v7663_v8 = vpop.eup %7662  ;;  %v6942_v31 = vclamps-f32 %v2893_v41, 1.0  ;;  %vm3044_vm4 = vweird.f32 %v3038_v0  ;;  %v3074_v25 = vadd.f32 0.112945676, %v3073_v59 }
 0x327   : > { %v3096_v43 = vmul.f32 %v10814_v20, %v10814_v20  ;;  %v3040_v26 = vmul.f32 %v7663_v8, %v3038_v0  ;;  %vm10832_vm5 = vcmp.eq.f32.partialorder %v3048_v37, 8.507059e+37  ;;  %v3051_v4 = vor.u32 1.1754944e-38, %v3050_v17 }
 0x328   : > { %v10836_v61 = vmin.f32 %v2936_v47, 16.0  ;;  %v2907_v40 = vadd.f32 1.1283791, %v2906_v2  ;;  %v2918_v24 = vadd.f32 1.0, %v2917_v39  ;;  %v3064_v1 = vmul.f32 %v3063_v36, %v10778_v29 }
 0x329   : > { %v3075_v49 = vmul.f32 %v3074_v25, %v10778_v29  ;;  %v3041_v16 = vsub.f32 1.0, %v3040_v26  ;;  %vm3045_vm6 = vweird.f32 %v7663_v8  ;;  %v10845_v37 = vmul.f32 0.70710677, %v10830_v51 }
 0x32a   : > { %v2938_v30 = vmul.f32 2.1237322e-06, %v10836_v61  ;;  %v4672_v41 = vadd.f32 1.0, %v6942_v31  ;;  %7664 = vrcp.f32 %v2918_v24  ;;  %v10847_v17 = vmin.f32 %v3096_v43, 16.0  ;;  %vm10853_vm7 = vmor %vm3044_vm4, %vm3045_vm6 }
 0x32b   : > { %v10850_v7 = vmul.f32 0.70710677, %v10839_v27  ;;  %v3042_v23 = vmul.f32 %v7663_v8, %v3041_v16  ;;  %v3065_v2 = vadd.f32 0.18741608, %v3064_v1  ;;  %v3076_v59 = vadd.f32 0.4994258, %v3075_v49 }
 0x32c   : > { %v2939_v47 = vadd.f32 0.00028619796, %v2938_v30  ;;  %v10858_v36 = vmul.f32 %v2907_v40, %v10727_v28  ;;  %v2928_v25 = vand.u32 2147483647, %v2918_v24  ;;  %v2949_v31 = vmul.f32 3.8918573e-05, %v10836_v61 }
 0x32d   : > { %v3098_v43 = vmul.f32 2.1237322e-06, %v10847_v17  ;;  %v3043_v26 = vadd.f32 %v7663_v8, %v3042_v23  ;;  %v2930_v52 = vand.u32 2147483648, %v2918_v24  ;;  %v3077_v16 = vmul.f32 %v3076_v59, %v10778_v29 }
 0x32e   : > { %v2940_v1 = vmul.f32 %v2939_v47, %v10836_v61  ;;  %v4772_v49 = vmul.f32 %v4672_v41, %v472_v32  ;;  %v2950_v0 = vadd.f32 0.001143296, %v2949_v31  ;;  %v3109_v57 = vmul.f32 3.8918573e-05, %v10847_v17 }
 0x32f   : > { %v3099_v30 = vadd.f32 0.00028619796, %v3098_v43  ;;  %v3047_v28 = vsel %vm10853_vm7, %v7663_v8, %v3043_v26  ;;  %v3066_v40 = vmul.f32 %v3065_v2, %v10778_v29  ;;  %v10868_v60 = vadd.f32 1.0, %v3077_v16 }
 0x330   : > { %v2941_v34 = vadd.f32 0.0036580483, %v2940_v1  ;;  %v7665_v5 = vpop.eup %7664  ;;  %v3052_v23 = vsel %vm10832_vm5, %v3051_v4, %v3047_v28  ;;  %v2951_v59 = vmul.f32 %v2950_v0, %v10836_v61  ;;  %v3110_v41 = vadd.f32 0.001143296, %v3109_v57 }
 0x331   : > { %v3100_v32 = vmul.f32 %v3099_v30, %v10847_v17  ;;  %v3053_v47 = vmul.f32 %v3052_v23, %v3028_v45  ;;  %v2920_v31 = vmul.f32 %v7665_v5, %v2918_v24  ;;  %vm2924_vm8 = vweird.f32 %v2918_v24 }
 0x332   : > { %vm10874_vm9 = vcmp.eq.f32.partialorder %v2928_v25, 8.507059e+37  ;;  %vm2925_vm10 = vweird.f32 %v7665_v5  ;;  %v2931_v29 = vor.u32 1.1754944e-38, %v2930_v52  ;;  %7666 = vrcp.f32 %v10868_v60 }
 0x333   : > { %v2976_v8 = vmul.f32 %v10845_v37, %v10845_v37  ;;  %v6946_v44 = vclamps-f32 %v3053_v47, 1.0  ;;  %v2921_v4 = vsub.f32 1.0, %v2920_v31  ;;  %v2942_v2 = vmul.f32 %v2941_v34, %v10836_v61  ;;  %vm10887_vm12 = vmor %vm2924_vm8, %vm2925_vm10 }
 0x334   : > { %v2952_v43 = vadd.f32 0.014752088, %v2951_v59  ;;  %v3067_v57 = vadd.f32 1.1283791, %v3066_v40  ;;  %vm3084_vm11 = vweird.f32 %v10868_v60  ;;  %v3101_v45 = vadd.f32 0.0036580483, %v3100_v32 }
 0x335   : > { %v3111_v25 = vmul.f32 %v3110_v41, %v10847_v17  ;;  %v4676_v26 = vadd.f32 1.0, %v6946_v44  ;;  %v2922_v16 = vmul.f32 %v7665_v5, %v2921_v4  ;;  %v2943_v1 = vadd.f32 0.05243302, %v2942_v2 }
 0x336   : > { %v2953_v52 = vmul.f32 %v2952_v43, %v10836_v61  ;;  %v3088_v34 = vand.u32 2147483647, %v10868_v60  ;;  %v3102_v30 = vmul.f32 %v3101_v45, %v10847_v17  ;;  %v10893_v40 = vmin.f32 %v2976_v8, 16.0 }
 0x337   : > { %v3112_v28 = vadd.f32 0.014752088, %v3111_v25  ;;  %v4776_v23 = vmul.f32 %v4676_v26, %v10823_v15  ;;  %v2923_v59 = vadd.f32 %v7665_v5, %v2922_v16  ;;  %v2944_v32 = vmul.f32 %v2943_v1, %v10836_v61 }
 0x338   : > { %v2954_v41 = vadd.f32 0.112945676, %v2953_v52  ;;  %v7667_v47 = vpop.eup %7666  ;;  %v3090_v24 = vand.u32 2147483648, %v10868_v60  ;;  %v3103_v31 = vadd.f32 0.05243302, %v3102_v30  ;;  %vm10913_vm14 = vcmp.eq.f32.partialorder %v3088_v34, 8.507059e+37 }
 0x339   : > { %v3113_v44 = vmul.f32 %v3112_v28, %v10847_v17  ;;  %v2978_v4 = vmul.f32 2.1237322e-06, %v10893_v40  ;;  %v10900_v2 = vpack.c.bf16 %v4776_v23, %v4772_v49  ;;  %v2927_v8 = vsel %vm10887_vm12, %v7665_v5, %v2923_v59 }
 0x33a   : > { %v3080_v43 = vmul.f32 %v7667_v47, %v10868_v60  ;;  %v2989_v15 = vmul.f32 3.8918573e-05, %v10893_v40  ;;  %v2932_v45 = vsel %vm10874_vm9, %v2931_v29, %v2927_v8  ;;  %v2945_v25 = vadd.f32 0.18741608, %v2944_v32 }
 0x33b   : > { %13073 = vst [vmem:[#allocation23_spill] sm:$0xff] %v10900_v2  ;;  %v2955_v26 = vmul.f32 %v2954_v41, %v10836_v61  ;;  %v3104_v16 = vmul.f32 %v3103_v31, %v10847_v17  ;;  %5562 = vmatmul.bf16.gmra.mxu0 %v10900_v2  ;;  %v2933_v49 = vmul.f32 %v2932_v45, %v10858_v36  ;;  %vm3085_vm13 = vweird.f32 %v7667_v47  ;;  %v4816_v2 = vld [vmem:[#allocation8] sm:$0xff] }
 0x33c   : > { %v3081_v1 = vsub.f32 1.0, %v3080_v43  ;;  %v3114_v52 = vadd.f32 0.112945676, %v3113_v44  ;;  %v3068_v5 = vmul.f32 %v3067_v57, %v10752_v33  ;;  %v3091_v28 = vor.u32 1.1754944e-38, %v3090_v24  ;;  %vm10920_vm15 = vmor %vm3084_vm11, %vm3085_vm13 }
 0x33d   : > { %v2956_v39 = vadd.f32 0.4994258, %v2955_v26  ;;  %v3105_v29 = vadd.f32 0.18741608, %v3104_v16  ;;  %v2979_v59 = vadd.f32 0.00028619796, %v2978_v4  ;;  %v2946_v33 = vmul.f32 %v2945_v25, %v10836_v61 }
 0x33e   : > { %v3082_v30 = vmul.f32 %v7667_v47, %v3081_v1  ;;  %v3115_v23 = vmul.f32 %v3114_v52, %v10847_v17  ;;  %v6943_v32 = vclamps-f32 %v2933_v49, 1.0  ;;  %v2990_v34 = vadd.f32 0.001143296, %v2989_v15 }
 0x33f   : > { %v2957_v57 = vmul.f32 %v2956_v39, %v10836_v61  ;;  %v3106_v31 = vmul.f32 %v3105_v29, %v10847_v17  ;;  %v2980_v24 = vmul.f32 %v2979_v59, %v10893_v40  ;;  %v3136_v60 = vmul.f32 %v10850_v7, %v10850_v7 }
 0x340   : > { %v3083_v41 = vadd.f32 %v7667_v47, %v3082_v30  ;;  %v3116_v44 = vadd.f32 0.4994258, %v3115_v23  ;;  %v2991_v4 = vmul.f32 %v2990_v34, %v10893_v40  ;;  %v473_v43 = vmul.f32 0.5, %v10707_v12 }
 0x341   : > { %v2958_v8 = vadd.f32 1.0, %v2957_v57  ;;  %v2981_v15 = vadd.f32 0.0036580483, %v2980_v24  ;;  %v4673_v26 = vadd.f32 1.0, %v6943_v32  ;;  %v2947_v16 = vadd.f32 1.1283791, %v2946_v33 }
 0x342   : > { %v3087_v45 = vsel %vm10920_vm15, %v7667_v47, %v3083_v41  ;;  %v3117_v61 = vmul.f32 %v3116_v44, %v10847_v17  ;;  %v3107_v52 = vadd.f32 1.1283791, %v3106_v31  ;;  %v2992_v30 = vadd.f32 0.014752088, %v2991_v4  ;;  %v10952_v57 = vld [vmem:[%s8053_s10 + $0x200] sm:$0xff] }
 0x343   : > { %v3092_v25 = vsel %vm10913_vm14, %v3091_v28, %v3087_v45  ;;  %7668 = vrcp.f32 %v2958_v8  ;;  %v2968_v1 = vand.u32 2147483647, %v2958_v8  ;;  %v2970_v29 = vand.u32 2147483648, %v2958_v8  ;;  %v10960_v4 = vld [vmem:[%s8053_s10 + $0x220] sm:$0xff] }
 0x344   : > { %v3093_v49 = vmul.f32 %v3092_v25, %v3068_v5  ;;  %v10937_v39 = vadd.f32 1.0, %v3117_v61  ;;  %v2982_v12 = vmul.f32 %v2981_v15, %v10893_v40  ;;  %v10940_v47 = vmin.f32 %v3136_v60, 16.0 }
 0x345   : > { %v477_v17 = vmul.f32 0.5, %v10741_v21  ;;  %v4773_v0 = vmul.f32 %v4673_v26, %v473_v43  ;;  %v2948_v28 = vmul.f32 %v2947_v16, %v10807_v13  ;;  %vm2964_vm0 = vweird.f32 %v2958_v8 }
 0x346   : > { %v6947_v23 = vclamps-f32 %v3093_v49, 1.0  ;;  %7670 = vrcp.f32 %v10937_v39  ;;  %v2993_v5 = vmul.f32 %v2992_v30, %v10893_v40  ;;  %v10947_v32 = vmul.f32 %v3107_v52, %v10814_v20 }
 0x347   : > { %v3138_v36 = vmul.f32 2.1237322e-06, %v10940_v47  ;;  %v3149_v33 = vmul.f32 3.8918573e-05, %v10940_v47  ;;  %vm10954_vm1 = vcmp.eq.f32.partialorder %v2968_v1, 8.507059e+37  ;;  %v2971_v13 = vor.u32 1.1754944e-38, %v2970_v29 }
 0x348   : > { %v4677_v59 = vadd.f32 1.0, %v6947_v23  ;;  %v2983_v41 = vadd.f32 0.05243302, %v2982_v12  ;;  %v2994_v31 = vadd.f32 0.112945676, %v2993_v5  ;;  %vm3124_vm2 = vweird.f32 %v10937_v39 }
 0x349   : > { %v7669_v21 = vpop.eup %7668  ;;  %v3139_v20 = vadd.f32 0.00028619796, %v3138_v36  ;;  %v3130_v60 = vand.u32 2147483648, %v10937_v39  ;;  %v3150_v45 = vadd.f32 0.001143296, %v3149_v33 }
 0x34a   : > { %v4777_v44 = vmul.f32 %v4677_v59, %v477_v17  ;;  %v2960_v24 = vmul.f32 %v7669_v21, %v2958_v8  ;;  %v2995_v43 = vmul.f32 %v2994_v31, %v10893_v40  ;;  %v10965_v61 = vmul.f32 0.70710677, %v10952_v57 }
 0x34b   : > { %vm2965_vm3 = vweird.f32 %v7669_v21  ;;  %v3140_v16 = vmul.f32 %v3139_v20, %v10940_v47  ;;  %v2984_v1 = vmul.f32 %v2983_v41, %v10893_v40  ;;  %v10973_v29 = vmul.f32 0.70710677, %v10960_v4 }
 0x34c   : > { %v7671_v15 = vpop.eup %7670  ;;  %v10967_v25 = vpack.c.bf16 %v4777_v44, %v4773_v0  ;;  %v2961_v26 = vsub.f32 1.0, %v2960_v24  ;;  %v2996_v52 = vadd.f32 0.4994258, %v2995_v43  ;;  %v3151_v17 = vmul.f32 %v3150_v45, %v10940_v47  ;;  %vm10980_vm4 = vmor %vm2964_vm0, %vm2965_vm3 }
 0x34d   : > { %v3120_v49 = vmul.f32 %v7671_v15, %v10937_v39  ;;  %v3141_v30 = vadd.f32 0.0036580483, %v3140_v16  ;;  %v3176_v23 = vmul.f32 %v10965_v61, %v10965_v61  ;;  %vm3125_vm5 = vweird.f32 %v7671_v15 }
 0x34e   : > { %13080 = vst [vmem:[#allocation24_spill] sm:$0xff] %v10967_v25  ;;  %5635 = vmatmul.bf16.gmra.mxu1 %v10967_v25  ;;  %v2962_v12 = vmul.f32 %v7669_v21, %v2961_v26  ;;  %v3128_v59 = vand.u32 2147483647, %v10937_v39  ;;  %v2997_v36 = vmul.f32 %v2996_v52, %v10893_v40  ;;  %v3152_v31 = vadd.f32 0.014752088, %v3151_v17  ;;  %vm10993_vm6 = vmor %vm3124_vm2, %vm3125_vm5 }
 0x34f   : > { %v3121_v5 = vsub.f32 1.0, %v3120_v49  ;;  %v3142_v41 = vmul.f32 %v3141_v30, %v10940_v47  ;;  %v10987_v44 = vmin.f32 %v3176_v23, 16.0  ;;  %v3131_v20 = vor.u32 1.1754944e-38, %v3130_v60 }
 0x350   : > { %v2963_v33 = vadd.f32 %v7669_v21, %v2962_v12  ;;  %v2985_v43 = vadd.f32 0.18741608, %v2984_v1  ;;  %v2998_v8 = vadd.f32 1.0, %v2997_v36  ;;  %v3153_v16 = vmul.f32 %v3152_v31, %v10940_v47 }
 0x351   : > { %v3122_v24 = vmul.f32 %v7671_v15, %v3121_v5  ;;  %v3178_v49 = vmul.f32 2.1237322e-06, %v10987_v44  ;;  %v3336_v52 = vmul.f32 %v10973_v29, %v10973_v29  ;;  %vm3129_vm7 = vcmp.eq.f32.partialorder %v3128_v59, 8.507059e+37 }
 0x352   : > { %v2967_v45 = vsel %vm10980_vm4, %v7669_v21, %v2963_v33  ;;  %7672 = vrcp.f32 %v2998_v8  ;;  %v474_v21 = vmul.f32 0.5, %v10789_v63  ;;  %v478_v39 = vmul.f32 0.5, %v10804_v38 }
 0x353   : > { %v2972_v60 = vsel %vm10954_vm1, %v2971_v13, %v2967_v45  ;;  %v3123_v1 = vadd.f32 %v7671_v15, %v3122_v24  ;;  %v3143_v30 = vadd.f32 0.05243302, %v3142_v41  ;;  %v3154_v23 = vadd.f32 0.112945676, %v3153_v16 }
 0x354   : > { %v2973_v12 = vmul.f32 %v2972_v60, %v2948_v28  ;;  %v3179_v0 = vadd.f32 0.00028619796, %v3178_v49  ;;  %v3189_v5 = vmul.f32 3.8918573e-05, %v10987_v44  ;;  %v2986_v34 = vmul.f32 %v2985_v43, %v10893_v40 }
 0x355   : > { %v3127_v17 = vsel %vm10993_vm6, %v7671_v15, %v3123_v1  ;;  %v11009_v13 = vmin.f32 %v3336_v52, 16.0  ;;  %v11013_v63 = vmul.f32 0.5, %v10830_v51  ;;  %v3155_v38 = vmul.f32 %v3154_v23, %v10940_v47 }
 0x356   : > { %v6944_v36 = vclamps-f32 %v2973_v12, 1.0  ;;  %v3132_v33 = vsel %vm3129_vm7, %v3131_v20, %v3127_v17  ;;  %v3180_v28 = vmul.f32 %v3179_v0, %v10987_v44  ;;  %v11018_v41 = vmul.f32 0.5, %v10839_v27 }
 0x357   : > { %v3133_v59 = vmul.f32 %v3132_v33, %v10947_v32  ;;  %v3190_v31 = vadd.f32 0.001143296, %v3189_v5  ;;  %v3338_v24 = vmul.f32 2.1237322e-06, %v11009_v13  ;;  %v3144_v43 = vmul.f32 %v3143_v30, %v10940_v47 }
 0x358   : > { %v4674_v15 = vadd.f32 1.0, %v6944_v36  ;;  %v7673_v20 = vpop.eup %7672  ;;  %v3156_v45 = vadd.f32 0.4994258, %v3155_v38  ;;  %v3181_v32 = vadd.f32 0.0036580483, %v3180_v28  ;;  %vm3004_vm8 = vweird.f32 %v2998_v8  ;;  %v11028_v36 = vld [vmem:[%s8053_s10 + $0x208] sm:$0xff] }
 0x359   : > { %v6948_v40 = vclamps-f32 %v3133_v59, 1.0  ;;  %v2987_v26 = vadd.f32 1.1283791, %v2986_v34  ;;  %v3000_v51 = vmul.f32 %v7673_v20, %v2998_v8  ;;  %v3008_v16 = vand.u32 2147483647, %v2998_v8 }
 0x35a   : > { %v4774_v52 = vmul.f32 %v4674_v15, %v474_v21  ;;  %v3010_v60 = vand.u32 2147483648, %v2998_v8  ;;  %v3157_v27 = vmul.f32 %v3156_v45, %v10940_v47  ;;  %vm3005_vm9 = vweird.f32 %v7673_v20 }
 0x35b   : > { %v4678_v49 = vadd.f32 1.0, %v6948_v40  ;;  %v3001_v1 = vsub.f32 1.0, %v3000_v51  ;;  %v3182_v12 = vmul.f32 %v3181_v32, %v10987_v44  ;;  %v3191_v17 = vmul.f32 %v3190_v31, %v10987_v44  ;;  %vm11035_vm10 = vmor %vm3004_vm8, %vm3005_vm9 }
 0x35c   : > { %v3145_v30 = vadd.f32 0.18741608, %v3144_v43  ;;  %v11025_v0 = vadd.f32 1.0, %v3157_v27  ;;  %v3339_v5 = vadd.f32 0.00028619796, %v3338_v24  ;;  %v2988_v28 = vmul.f32 %v2987_v26, %v10845_v37  ;;  %v11043_v43 = vld [vmem:[%s8053_s10 + $0x228] sm:$0xff] }
 0x35d   : > { %v4778_v23 = vmul.f32 %v4678_v49, %v478_v39  ;;  %v3002_v33 = vmul.f32 %v7673_v20, %v3001_v1  ;;  %v3183_v34 = vadd.f32 0.05243302, %v3182_v12  ;;  %v3192_v21 = vadd.f32 0.014752088, %v3191_v17 }
 0x35e   : > { %v3349_v59 = vmul.f32 3.8918573e-05, %v11009_v13  ;;  %v3011_v39 = vor.u32 1.1754944e-38, %v3010_v60  ;;  %7674 = vrcp.f32 %v11025_v0  ;;  %vm3009_vm11 = vcmp.eq.f32.partialorder %v3008_v16, 8.507059e+37 }
 0x35f   : > { %v11031_v38 = vpack.c.bf16 %v4778_v23, %v4774_v52  ;;  %v3003_v31 = vadd.f32 %v7673_v20, %v3002_v33  ;;  %v3184_v24 = vmul.f32 %v3183_v34, %v10987_v44  ;;  %v3193_v40 = vmul.f32 %v3192_v21, %v10987_v44 }
 0x360   : > { %v3146_v37 = vmul.f32 %v3145_v30, %v10940_v47  ;;  %v3340_v8 = vmul.f32 %v3339_v5, %v11009_v13  ;;  %v3350_v45 = vadd.f32 0.001143296, %v3349_v59  ;;  %v11049_v32 = vmul.f32 0.70710677, %v11028_v36 }
 0x361   : > { %13085 = vst [vmem:[#allocation25_spill] sm:$0xff] %v11031_v38  ;;  %5708 = vmatmul.bf16.gmra.mxu2 %v11031_v38  ;;  %v3007_v26 = vsel %vm11035_vm10, %v7673_v20, %v3003_v31  ;;  %v11054_v51 = vmul.f32 0.5, %v10952_v57  ;;  %v3185_v16 = vadd.f32 0.18741608, %v3184_v24  ;;  %v3194_v49 = vadd.f32 0.112945676, %v3193_v40 }
 0x362   : > { %v3012_v52 = vsel %vm3009_vm11, %v3011_v39, %v3007_v26  ;;  %v3341_v60 = vadd.f32 0.0036580483, %v3340_v8  ;;  %v3351_v27 = vmul.f32 %v3350_v45, %v11009_v13  ;;  %v11058_v47 = vmul.f32 0.70710677, %v11043_v43 }
 0x363   : > { %v3013_v1 = vmul.f32 %v3012_v52, %v2988_v28  ;;  %v3170_v12 = vand.u32 2147483648, %v11025_v0  ;;  %v3195_v17 = vmul.f32 %v3194_v49, %v10987_v44  ;;  %v3216_v20 = vmul.f32 %v11049_v32, %v11049_v32 }
 0x364   : > { %v7675_v23 = vpop.eup %7674  ;;  %v3147_v57 = vadd.f32 1.1283791, %v3146_v37  ;;  %v3342_v30 = vmul.f32 %v3341_v60, %v11009_v13  ;;  %v3352_v5 = vadd.f32 0.014752088, %v3351_v27  ;;  %v3376_v33 = vmul.f32 %v11058_v47, %v11058_v47 }
 0x365   : > { %v6945_v34 = vclamps-f32 %v3013_v1, 1.0  ;;  %v3160_v21 = vmul.f32 %v7675_v23, %v11025_v0  ;;  %vm3164_vm12 = vweird.f32 %v11025_v0  ;;  %v3186_v59 = vmul.f32 %v3185_v16, %v10987_v44  ;;  %v11080_v1 = vld [vmem:[%s8053_s10 + $0x210] sm:$0xff] }
 0x366   : > { %v3196_v28 = vadd.f32 0.4994258, %v3195_v17  ;;  %v3343_v15 = vadd.f32 0.05243302, %v3342_v30  ;;  %v3353_v39 = vmul.f32 %v3352_v5, %v11009_v13  ;;  %v11071_v31 = vmin.f32 %v3216_v20, 16.0 }
 0x367   : > { %v3161_v24 = vsub.f32 1.0, %v3160_v21  ;;  %vm3165_vm13 = vweird.f32 %v7675_v23  ;;  %v3168_v40 = vand.u32 2147483647, %v11025_v0  ;;  %v3171_v37 = vor.u32 1.1754944e-38, %v3170_v12 }
 0x368   : > { %v3197_v8 = vmul.f32 %v3196_v28, %v10987_v44  ;;  %v3344_v45 = vmul.f32 %v3343_v15, %v11009_v13  ;;  %v3354_v26 = vadd.f32 0.112945676, %v3353_v39  ;;  %v11076_v49 = vmin.f32 %v3376_v33, 16.0  ;;  %vm11084_vm14 = vmor %vm3164_vm12, %vm3165_vm13 }
 0x369   : > { %v3162_v16 = vmul.f32 %v7675_v23, %v3161_v24  ;;  %v4675_v52 = vadd.f32 1.0, %v6945_v34  ;;  %v3187_v60 = vadd.f32 1.1283791, %v3186_v59  ;;  %v3218_v27 = vmul.f32 2.1237322e-06, %v11071_v31 }
 0x36a   : > { %v3198_v12 = vadd.f32 1.0, %v3197_v8  ;;  %v3345_v44 = vadd.f32 0.18741608, %v3344_v45  ;;  %v3355_v20 = vmul.f32 %v3354_v26, %v11009_v13  ;;  %v3229_v30 = vmul.f32 3.8918573e-05, %v11071_v31 }
 0x36b   : > { %v3148_v5 = vmul.f32 %v3147_v57, %v10850_v7  ;;  %v3163_v33 = vadd.f32 %v7675_v23, %v3162_v16  ;;  %vm3169_vm15 = vcmp.eq.f32.partialorder %v3168_v40, 8.507059e+37  ;;  %v3219_v34 = vadd.f32 0.00028619796, %v3218_v27 }
 0x36c   : > { %7676 = vrcp.f32 %v3198_v12  ;;  %v3378_v21 = vmul.f32 2.1237322e-06, %v11076_v49  ;;  %v3389_v0 = vmul.f32 3.8918573e-05, %v11076_v49  ;;  %v11094_v59 = vmul.f32 0.70710677, %v11080_v1 }
 0x36d   : > { %v3167_v28 = vsel %vm11084_vm14, %v7675_v23, %v3163_v33  ;;  %v11099_v15 = vmul.f32 %v3187_v60, %v10965_v61  ;;  %v3356_v39 = vadd.f32 0.4994258, %v3355_v20  ;;  %v3220_v7 = vmul.f32 %v3219_v34, %v11071_v31 }
 0x36e   : > { %v3172_v57 = vsel %vm3169_vm15, %v3171_v37, %v3167_v28  ;;  %v4775_v24 = vmul.f32 %v4675_v52, %v11013_v63  ;;  %v3346_v40 = vmul.f32 %v3345_v44, %v11009_v13  ;;  %v3230_v8 = vadd.f32 0.001143296, %v3229_v30  ;;  %v11110_v63 = vld [vmem:[%s8053_s10 + $0x230] sm:$0xff] }
 0x36f   : > { %v3173_v45 = vmul.f32 %v3172_v57, %v3148_v5  ;;  %v3208_v26 = vand.u32 2147483647, %v3198_v12  ;;  %v3357_v16 = vmul.f32 %v3356_v39, %v11009_v13  ;;  %v3221_v27 = vadd.f32 0.0036580483, %v3220_v7 }
 0x370   : > { %v3210_v17 = vand.u32 2147483648, %v3198_v12  ;;  %v3231_v23 = vmul.f32 %v3230_v8, %v11071_v31  ;;  %v3379_v61 = vadd.f32 0.00028619796, %v3378_v21  ;;  %v3390_v60 = vadd.f32 0.001143296, %v3389_v0 }
 0x371   : > { %v6949_v20 = vclamps-f32 %v3173_v45, 1.0  ;;  %vm3204_vm0 = vweird.f32 %v3198_v12  ;;  %v11106_v33 = vadd.f32 1.0, %v3357_v16  ;;  %v3222_v37 = vmul.f32 %v3221_v27, %v11071_v31 }
 0x372   : > { %v7677_v52 = vpop.eup %7676  ;;  %v3347_v44 = vadd.f32 1.1283791, %v3346_v40  ;;  %v3232_v30 = vadd.f32 0.014752088, %v3231_v23  ;;  %v3380_v5 = vmul.f32 %v3379_v61, %v11076_v49  ;;  %v3391_v13 = vmul.f32 %v3390_v60, %v11076_v49 }
 0x373   : > { %v4679_v34 = vadd.f32 1.0, %v6949_v20  ;;  %v3200_v28 = vmul.f32 %v7677_v52, %v3198_v12  ;;  %vm11114_vm1 = vcmp.eq.f32.partialorder %v3208_v26, 8.507059e+37  ;;  %7678 = vrcp.f32 %v11106_v33 }
 0x374   : > { %vm3205_vm2 = vweird.f32 %v7677_v52  ;;  %v3211_v0 = vor.u32 1.1754944e-38, %v3210_v17  ;;  %v3223_v39 = vadd.f32 0.05243302, %v3222_v37  ;;  %v11120_v7 = vmul.f32 0.70710677, %v11110_v63 }
 0x375   : > { %v4779_v57 = vmul.f32 %v4679_v34, %v11018_v41  ;;  %v3201_v40 = vsub.f32 1.0, %v3200_v28  ;;  %v3233_v8 = vmul.f32 %v3232_v30, %v11071_v31  ;;  %v3381_v45 = vadd.f32 0.0036580483, %v3380_v5  ;;  %vm11133_vm3 = vmor %vm3204_vm0, %vm3205_vm2 }
 0x376   : > { %v3348_v16 = vmul.f32 %v3347_v44, %v10973_v29  ;;  %v3224_v26 = vmul.f32 %v3223_v39, %v11071_v31  ;;  %v3392_v27 = vadd.f32 0.014752088, %v3391_v13  ;;  %v3256_v23 = vmul.f32 %v11094_v59, %v11094_v59 }
 0x377   : > { %v11128_v61 = vpack.c.bf16 %v4779_v57, %v4775_v24  ;;  %v3202_v17 = vmul.f32 %v7677_v52, %v3201_v40  ;;  %v3234_v60 = vadd.f32 0.112945676, %v3233_v8  ;;  %v3382_v20 = vmul.f32 %v3381_v45, %v11076_v49 }
 0x378   : > { %vm3364_vm4 = vweird.f32 %v11106_v33  ;;  %v3368_v29 = vand.u32 2147483647, %v11106_v33  ;;  %v3225_v37 = vadd.f32 0.18741608, %v3224_v26  ;;  %v3393_v44 = vmul.f32 %v3392_v27, %v11076_v49 }
 0x379   : > { %13092 = vst [vmem:[#allocation26_spill] sm:$0xff] %v11128_v61  ;;  %v7679_v30 = vpop.eup %7678  ;;  %5781 = vmatmul.bf16.gmra.mxu3 %v11128_v61  ;;  %v3203_v24 = vadd.f32 %v7677_v52, %v3202_v17  ;;  %v3370_v5 = vand.u32 2147483648, %v11106_v33  ;;  %v3235_v13 = vmul.f32 %v3234_v60, %v11071_v31  ;;  %v3383_v12 = vadd.f32 0.05243302, %v3382_v20 }
 0x37a   : > { %v3360_v34 = vmul.f32 %v7679_v30, %v11106_v33  ;;  %v3394_v28 = vadd.f32 0.112945676, %v3393_v44  ;;  %v11144_v39 = vmin.f32 %v3256_v23, 16.0  ;;  %v3416_v57 = vmul.f32 %v11120_v7, %v11120_v7 }
 0x37b   : > { %v3207_v40 = vsel %vm11133_vm3, %v7677_v52, %v3203_v24  ;;  %vm3365_vm5 = vweird.f32 %v7679_v30  ;;  %v3236_v8 = vadd.f32 0.4994258, %v3235_v13  ;;  %v3384_v45 = vmul.f32 %v3383_v12, %v11076_v49 }
 0x37c   : > { %v3212_v26 = vsel %vm11114_vm1, %v3211_v0, %v3207_v40  ;;  %v3361_v27 = vsub.f32 1.0, %v3360_v34  ;;  %v3226_v17 = vmul.f32 %v3225_v37, %v11071_v31  ;;  %v3395_v60 = vmul.f32 %v3394_v28, %v11076_v49  ;;  %vm11162_vm6 = vmor %vm3364_vm4, %vm3365_vm5 }
 0x37d   : > { %v3213_v23 = vmul.f32 %v3212_v26, %v11099_v15  ;;  %v3237_v20 = vmul.f32 %v3236_v8, %v11071_v31  ;;  %v3385_v44 = vadd.f32 0.18741608, %v3384_v45  ;;  %v3258_v41 = vmul.f32 2.1237322e-06, %v11144_v39 }
 0x37e   : > { %v3362_v52 = vmul.f32 %v7679_v30, %v3361_v27  ;;  %v3371_v24 = vor.u32 1.1754944e-38, %v3370_v5  ;;  %v3396_v13 = vadd.f32 0.4994258, %v3395_v60  ;;  %v3269_v12 = vmul.f32 3.8918573e-05, %v11144_v39 }
 0x37f   : > { %v6950_v61 = vclamps-f32 %v3213_v23, 1.0  ;;  %v3238_v0 = vadd.f32 1.0, %v3237_v20  ;;  %v3386_v15 = vmul.f32 %v3385_v44, %v11076_v49  ;;  %v3259_v31 = vadd.f32 0.00028619796, %v3258_v41 }
 0x380   : > { %v3363_v37 = vadd.f32 %v7679_v30, %v3362_v52  ;;  %vm3369_vm7 = vcmp.eq.f32.partialorder %v3368_v29, 8.507059e+37  ;;  %v3227_v34 = vadd.f32 1.1283791, %v3226_v17  ;;  %v3397_v5 = vmul.f32 %v3396_v13, %v11076_v49 }
 0x381   : > { %v4680_v28 = vadd.f32 1.0, %v6950_v61  ;;  %7680 = vrcp.f32 %v3238_v0  ;;  %v3270_v40 = vadd.f32 0.001143296, %v3269_v12  ;;  %v11168_v8 = vmin.f32 %v3416_v57, 16.0  ;;  %v11176_v61 = vld [vmem:[%s8053_s10 + $0x218] sm:$0xff] }
 0x382   : > { %v3367_v33 = vsel %vm11162_vm6, %v7679_v30, %v3363_v37  ;;  %v3248_v45 = vand.u32 2147483647, %v3238_v0  ;;  %v3250_v26 = vand.u32 2147483648, %v3238_v0  ;;  %v3398_v27 = vadd.f32 1.0, %v3397_v5 }
 0x383   : > { %v3372_v60 = vsel %vm3369_vm7, %v3371_v24, %v3367_v33  ;;  %v3387_v23 = vadd.f32 1.1283791, %v3386_v15  ;;  %v3260_v20 = vmul.f32 %v3259_v31, %v11144_v39  ;;  %v484_v29 = vmul.f32 0.5, %v10960_v4 }
 0x384   : > { %v3373_v17 = vmul.f32 %v3372_v60, %v3348_v16  ;;  %v3228_v49 = vmul.f32 %v3227_v34, %v11049_v32  ;;  %7682 = vrcp.f32 %v3398_v27  ;;  %v4780_v57 = vmul.f32 %v4680_v28, %v11054_v51 }
 0x385   : > { %vm3244_vm8 = vweird.f32 %v3238_v0  ;;  %v3251_v44 = vor.u32 1.1754944e-38, %v3250_v26  ;;  %v3261_v30 = vadd.f32 0.0036580483, %v3260_v20  ;;  %vm11179_vm9 = vcmp.eq.f32.partialorder %v3248_v45, 8.507059e+37 }
 0x386   : > { %v6954_v41 = vclamps-f32 %v3373_v17, 1.0  ;;  %v3271_v24 = vmul.f32 %v3270_v40, %v11144_v39  ;;  %v3418_v4 = vmul.f32 2.1237322e-06, %v11168_v8  ;;  %v3429_v16 = vmul.f32 3.8918573e-05, %v11168_v8 }
 0x387   : > { %v7681_v32 = vpop.eup %7680  ;;  %v11187_v13 = vmul.f32 %v3387_v23, %v11058_v47  ;;  %vm3404_vm10 = vweird.f32 %v3398_v27  ;;  %v3262_v51 = vmul.f32 %v3261_v30, %v11144_v39  ;;  %v11191_v12 = vmul.f32 0.70710677, %v11176_v61 }
 0x388   : > { %v4684_v21 = vadd.f32 1.0, %v6954_v41  ;;  %v3240_v15 = vmul.f32 %v7681_v32, %v3238_v0  ;;  %v3408_v31 = vand.u32 2147483647, %v3398_v27  ;;  %v3272_v37 = vadd.f32 0.014752088, %v3271_v24 }
 0x389   : > { %v3263_v34 = vadd.f32 0.05243302, %v3262_v51  ;;  %v3419_v5 = vadd.f32 0.00028619796, %v3418_v4  ;;  %v3430_v28 = vadd.f32 0.001143296, %v3429_v16  ;;  %v3296_v40 = vmul.f32 %v11191_v12, %v11191_v12 }
 0x38a   : > { %v7683_v33 = vpop.eup %7682  ;;  %v4784_v45 = vmul.f32 %v4684_v21, %v484_v29  ;;  %v3241_v47 = vsub.f32 1.0, %v3240_v15  ;;  %vm3245_vm11 = vweird.f32 %v7681_v32  ;;  %v3273_v26 = vmul.f32 %v3272_v37, %v11144_v39 }
 0x38b   : > { %v3400_v60 = vmul.f32 %v7683_v33, %v3398_v27  ;;  %v3410_v23 = vand.u32 2147483648, %v3398_v27  ;;  %v3264_v20 = vmul.f32 %v3263_v34, %v11144_v39  ;;  %v3420_v17 = vmul.f32 %v3419_v5, %v11168_v8  ;;  %vm11202_vm12 = vmor %vm3244_vm8, %vm3245_vm11 }
 0x38c   : > { %v11198_v30 = vpack.c.bf16 %v4784_v45, %v4780_v57  ;;  %v3242_v41 = vmul.f32 %v7681_v32, %v3241_v47  ;;  %v3274_v24 = vadd.f32 0.112945676, %v3273_v26  ;;  %v3431_v4 = vmul.f32 %v3430_v28, %v11168_v8  ;;  %v11216_v47 = vld [vmem:[%s8053_s10 + $0x238] sm:$0xff] }
 0x38d   : > { %v3401_v16 = vsub.f32 1.0, %v3400_v60  ;;  %vm3405_vm13 = vweird.f32 %v7683_v33  ;;  %v3421_v51 = vadd.f32 0.0036580483, %v3420_v17  ;;  %v11206_v21 = vmin.f32 %v3296_v40, 16.0 }
 0x38e   : > { %13099 = vst [vmem:[#allocation27_spill] sm:$0xff] %v11198_v30  ;;  %5567 = vmatmul.bf16.gmra.mxu0 %v11198_v30  ;;  %v3243_v15 = vadd.f32 %v7681_v32, %v3242_v41  ;;  %vm11209_vm14 = vcmp.eq.f32.partialorder %v3408_v31, 8.507059e+37  ;;  %v3275_v37 = vmul.f32 %v3274_v24, %v11144_v39  ;;  %v3432_v34 = vadd.f32 0.014752088, %v3431_v4  ;;  %vm11221_vm15 = vmor %vm3404_vm10, %vm3405_vm13 }
 0x38f   : > { %v3402_v0 = vmul.f32 %v7683_v33, %v3401_v16  ;;  %v3411_v5 = vor.u32 1.1754944e-38, %v3410_v23  ;;  %v3265_v28 = vadd.f32 0.18741608, %v3264_v20  ;;  %v3422_v45 = vmul.f32 %v3421_v51, %v11168_v8 }
 0x390   : > { %v3247_v40 = vsel %vm11202_vm12, %v7681_v32, %v3243_v15  ;;  %v3276_v31 = vadd.f32 0.4994258, %v3275_v37  ;;  %v3433_v60 = vmul.f32 %v3432_v34, %v11168_v8  ;;  %v3298_v17 = vmul.f32 2.1237322e-06, %v11206_v21  ;;  %v5528_v34 = vpop.f32.mrf.mxu0 }
 0x391   : > { %v3252_v23 = vsel %vm11179_vm9, %v3251_v44, %v3247_v40  ;;  %v3403_v20 = vadd.f32 %v7683_v33, %v3402_v0  ;;  %v3423_v41 = vadd.f32 0.05243302, %v3422_v45  ;;  %v3309_v24 = vmul.f32 3.8918573e-05, %v11206_v21  ;;  %v5601_v0 = vpop.f32.mrf.mxu1 }
 0x392   : > { %v3253_v4 = vmul.f32 %v3252_v23, %v3228_v49  ;;  %v3277_v32 = vmul.f32 %v3276_v31, %v11144_v39  ;;  %v3434_v27 = vadd.f32 0.112945676, %v3433_v60  ;;  %v11232_v29 = vmul.f32 0.70710677, %v11216_v47 }
 0x393   : > { %v3407_v16 = vsel %vm11221_vm15, %v7683_v33, %v3403_v20  ;;  %v3266_v51 = vmul.f32 %v3265_v28, %v11144_v39  ;;  %v3424_v15 = vmul.f32 %v3423_v41, %v11168_v8  ;;  %v481_v45 = vmul.f32 0.5, %v11028_v36  ;;  %v11254_v41 = vld [vmem:[%s8053_s10 + $0x240] sm:$0xff] }
 0x394   : > { %v6951_v52 = vclamps-f32 %v3253_v4, 1.0  ;;  %v3412_v44 = vsel %vm11209_vm14, %v3411_v5, %v3407_v16  ;;  %v3278_v37 = vadd.f32 1.0, %v3277_v32  ;;  %v3435_v49 = vmul.f32 %v3434_v27, %v11168_v8 }
 0x395   : > { %v3413_v40 = vmul.f32 %v3412_v44, %v11187_v13  ;;  %v3299_v26 = vadd.f32 0.00028619796, %v3298_v17  ;;  %v3310_v33 = vadd.f32 0.001143296, %v3309_v24  ;;  %v11243_v31 = vadd.f32 %v5601_v0, %v5528_v34 }
 0x396   : > { %v4681_v39 = vadd.f32 1.0, %v6951_v52  ;;  %7684 = vrcp.f32 %v3278_v37  ;;  %v3456_v57 = vmul.f32 %v11232_v29, %v11232_v29  ;;  %v485_v5 = vmul.f32 0.5, %v11043_v43 }
 0x397   : > { %v6955_v28 = vclamps-f32 %v3413_v40, 1.0  ;;  %v11249_v60 = vmul.f32 0.5, %v11080_v1  ;;  %v3436_v23 = vadd.f32 0.4994258, %v3435_v49  ;;  %v3267_v36 = vadd.f32 1.1283791, %v3266_v51 }
 0x398   : > { %v3425_v20 = vadd.f32 0.18741608, %v3424_v15  ;;  %v3300_v13 = vmul.f32 %v3299_v26, %v11206_v21  ;;  %v3311_v17 = vmul.f32 %v3310_v33, %v11206_v21  ;;  %v4781_v4 = vmul.f32 %v4681_v39, %v481_v45 }
 0x399   : > { %v4685_v24 = vadd.f32 1.0, %v6955_v28  ;;  %v3288_v32 = vand.u32 2147483647, %v3278_v37  ;;  %v3437_v27 = vmul.f32 %v3436_v23, %v11168_v8  ;;  %v11258_v43 = vmul.f32 0.5, %v11110_v63 }
 0x39a   : > { %v3301_v16 = vadd.f32 0.0036580483, %v3300_v13  ;;  %v3312_v1 = vadd.f32 0.014752088, %v3311_v17  ;;  %v11260_v52 = vmin.f32 %v3456_v57, 16.0  ;;  %v3290_v15 = vand.u32 2147483648, %v3278_v37 }
 0x39b   : > { %v4785_v51 = vmul.f32 %v4685_v24, %v485_v5  ;;  %v11262_v44 = vadd.f32 1.0, %v3437_v27  ;;  %v11265_v49 = vmul.f32 0.70710677, %v11254_v41  ;;  %v3426_v39 = vmul.f32 %v3425_v20, %v11168_v8  ;;  %v11316_v24 = vld [vmem:[%s8053_s10 + $0x248] sm:$0xff] }
 0x39c   : > { %v7685_v34 = vpop.eup %7684  ;;  %v3302_v0 = vmul.f32 %v3301_v16, %v11206_v21  ;;  %v3313_v45 = vmul.f32 %v3312_v1, %v11206_v21  ;;  %v3458_v40 = vmul.f32 2.1237322e-06, %v11260_v52  ;;  %v3469_v63 = vmul.f32 3.8918573e-05, %v11260_v52 }
 0x39d   : > { %v11271_v26 = vpack.c.bf16 %v4785_v51, %v4781_v4  ;;  %v3280_v33 = vmul.f32 %v7685_v34, %v3278_v37  ;;  %7686 = vrcp.f32 %v11262_v44  ;;  %v3268_v57 = vmul.f32 %v3267_v36, %v11094_v59 }
 0x39e   : > { %vm3284_vm0 = vweird.f32 %v3278_v37  ;;  %vm3285_vm1 = vweird.f32 %v7685_v34  ;;  %v3303_v5 = vadd.f32 0.05243302, %v3302_v0  ;;  %v3314_v23 = vadd.f32 0.112945676, %v3313_v45 }
 0x39f   : > { %13106 = vst [vmem:[#allocation28_spill] sm:$0xff] %v11271_v26  ;;  %5640 = vmatmul.bf16.gmra.mxu1 %v11271_v26  ;;  %v3281_v28 = vsub.f32 1.0, %v3280_v33  ;;  %v3459_v13 = vadd.f32 0.00028619796, %v3458_v40  ;;  %v3496_v17 = vmul.f32 %v11265_v49, %v11265_v49  ;;  %vm11279_vm2 = vcmp.eq.f32.partialorder %v3288_v32, 8.507059e+37  ;;  %vm11288_vm3 = vmor %vm3284_vm0, %vm3285_vm1 }
 0x3a0   : > { %v3291_v8 = vor.u32 1.1754944e-38, %v3290_v15  ;;  %v3304_v20 = vmul.f32 %v3303_v5, %v11206_v21  ;;  %v3470_v4 = vadd.f32 0.001143296, %v3469_v63  ;;  %v3427_v36 = vadd.f32 1.1283791, %v3426_v39 }
 0x3a1   : > { %v3282_v59 = vmul.f32 %v7685_v34, %v3281_v28  ;;  %v3315_v27 = vmul.f32 %v3314_v23, %v11206_v21  ;;  %v3460_v16 = vmul.f32 %v3459_v13, %v11260_v52  ;;  %vm3444_vm4 = vweird.f32 %v11262_v44 }
 0x3a2   : > { %v3448_v32 = vand.u32 2147483647, %v11262_v44  ;;  %v3305_v51 = vadd.f32 0.18741608, %v3304_v20  ;;  %v3471_v15 = vmul.f32 %v3470_v4, %v11260_v52  ;;  %v11295_v33 = vmin.f32 %v3496_v17, 16.0 }
 0x3a3   : > { %v7687_v0 = vpop.eup %7686  ;;  %v3283_v45 = vadd.f32 %v7685_v34, %v3282_v59  ;;  %v3316_v40 = vadd.f32 0.4994258, %v3315_v27  ;;  %v3461_v63 = vadd.f32 0.0036580483, %v3460_v16  ;;  %v3450_v39 = vand.u32 2147483648, %v11262_v44 }
 0x3a4   : > { %v3440_v37 = vmul.f32 %v7687_v0, %v11262_v44  ;;  %vm3445_vm5 = vweird.f32 %v7687_v0  ;;  %v3472_v5 = vadd.f32 0.014752088, %v3471_v15  ;;  %v3498_v20 = vmul.f32 2.1237322e-06, %v11295_v33 }
 0x3a5   : > { %v3287_v28 = vsel %vm11288_vm3, %v7685_v34, %v3283_v45  ;;  %v3317_v23 = vmul.f32 %v3316_v40, %v11206_v21  ;;  %v3462_v13 = vmul.f32 %v3461_v63, %v11260_v52  ;;  %v3306_v59 = vmul.f32 %v3305_v51, %v11206_v21  ;;  %v11311_v34 = vld [vmem:[%s8053_s10 + $0x260] sm:$0xff]  ;;  %vm11321_vm6 = vmor %vm3444_vm4, %vm3445_vm5 }
 0x3a6   : > { %v3292_v17 = vsel %vm11279_vm2, %v3291_v8, %v3287_v28  ;;  %v3441_v4 = vsub.f32 1.0, %v3440_v37  ;;  %v3473_v27 = vmul.f32 %v3472_v5, %v11260_v52  ;;  %v3499_v45 = vadd.f32 0.00028619796, %v3498_v20 }
 0x3a7   : > { %v3293_v16 = vmul.f32 %v3292_v17, %v3268_v57  ;;  %v11308_v15 = vadd.f32 1.0, %v3317_v23  ;;  %v3463_v1 = vadd.f32 0.05243302, %v3462_v13  ;;  %v3428_v40 = vmul.f32 %v3427_v36, %v11120_v7 }
 0x3a8   : > { %v3442_v63 = vmul.f32 %v7687_v0, %v3441_v4  ;;  %v3474_v26 = vadd.f32 0.112945676, %v3473_v27  ;;  %v3509_v38 = vmul.f32 3.8918573e-05, %v11295_v33  ;;  %vm3449_vm7 = vcmp.eq.f32.partialorder %v3448_v32, 8.507059e+37 }
 0x3a9   : > { %v6952_v8 = vclamps-f32 %v3293_v16, 1.0  ;;  %v3451_v57 = vor.u32 1.1754944e-38, %v3450_v39  ;;  %7688 = vrcp.f32 %v11308_v15  ;;  %v3307_v7 = vadd.f32 1.1283791, %v3306_v59 }
 0x3aa   : > { %v3443_v51 = vadd.f32 %v7687_v0, %v3442_v63  ;;  %v3475_v36 = vmul.f32 %v3474_v26, %v11260_v52  ;;  %v11328_v37 = vmul.f32 0.70710677, %v11311_v34  ;;  %v11331_v5 = vmul.f32 0.5, %v11176_v61  ;;  %v5674_v63 = vpop.f32.mrf.mxu2 }
 0x3ab   : > { %v3464_v44 = vmul.f32 %v3463_v1, %v11260_v52  ;;  %v3500_v32 = vmul.f32 %v3499_v45, %v11295_v33  ;;  %v11336_v39 = vmul.f32 0.70710677, %v11316_v24  ;;  %v4682_v26 = vadd.f32 1.0, %v6952_v8  ;;  %v7156_v1 = vld [vmem:[%s8060_s18 + $0x148] sm:$0xf] }
 0x3ac   : > { %v3447_v28 = vsel %vm11321_vm6, %v7687_v0, %v3443_v51  ;;  %v3476_v23 = vadd.f32 0.4994258, %v3475_v36  ;;  %v3510_v13 = vadd.f32 0.001143296, %v3509_v38  ;;  %v3328_v17 = vand.u32 2147483647, %v11308_v15  ;;  %v5747_v38 = vpop.f32.mrf.mxu3 }
 0x3ad   : > { %v3452_v20 = vsel %vm3449_vm7, %v3451_v57, %v3447_v28  ;;  %v3330_v61 = vand.u32 2147483648, %v11308_v15  ;;  %v3501_v4 = vadd.f32 0.0036580483, %v3500_v32  ;;  %v11343_v27 = vmul.f32 %v3307_v7, %v11191_v12  ;;  %v7420_v0 = vld [vmem:[%s8060_s18 + $0x154] sm:$0xf0] }
 0x3ae   : > { %v3453_v59 = vmul.f32 %v3452_v20, %v3428_v40  ;;  %v3477_v16 = vmul.f32 %v3476_v23, %v11260_v52  ;;  %v7418_v45 = vld [vmem:[%s8060_s18 + $0x14c] sm:$0xf]  ;;  %v3656_v8 = vmul.f32 %v11328_v37, %v11328_v37  ;;  %vm3324_vm8 = vweird.f32 %v11308_v15  ;;  %v7158_v12 = vld [vmem:[%s8060_s18 + $0x158] sm:$0xf0]  ;;  %v7148_v7 = vld [vmem:[%s8060_s18 + $0x140] sm:$0xf] }
 0x3af   : > { %v7689_v21 = vpop.eup %7688  ;;  %v3465_v57 = vadd.f32 0.18741608, %v3464_v44  ;;  %v7157_v40 = vor.u32 %v7420_v0, %v7156_v1  ;;  %v5675_v51 = vadd.f32 %v5674_v63, %v11243_v31  ;;  %v4782_v32 = vmul.f32 %v4682_v26, %v11249_v60  ;;  %v7419_v23 = vld [vmem:[%s8060_s18 + $0x14c] sm:$0xf0]  ;;  %v7150_v1 = vld [vmem:[%s8060_s18 + $0x150] sm:$0xf0]  ;;  %v5603_v60 = vpop.f32.mrf.mxu1 }
 0x3b0   : > { %v6956_v36 = vclamps-f32 %v3453_v59, 1.0  ;;  %v3320_v28 = vmul.f32 %v7689_v21, %v11308_v15  ;;  %v3511_v20 = vmul.f32 %v3510_v13, %v11295_v33  ;;  %v11359_v25 = vadd.f32 1.0, %v3477_v16  ;;  %v5530_v59 = vpop.f32.mrf.mxu0 }
 0x3b1   : > { %5962 = vmatpush.bf16.xpose.msrb.mxu2 %v7157_v40  ;;  %v7161_v30 = vor.u32 %v7418_v45, %v7158_v12  ;;  %v5748_v44 = vadd.f32 %v5747_v38, %v5675_v51  ;;  %v3502_v0 = vmul.f32 %v3501_v4, %v11295_v33  ;;  %vm3325_vm9 = vweird.f32 %v7689_v21 }
 0x3b2   : > { %v4686_v31 = vadd.f32 1.0, %v6956_v36  ;;  %v3321_v63 = vsub.f32 1.0, %v3320_v28  ;;  %v7149_v26 = vor.u32 %v7419_v23, %v7148_v7  ;;  %vm11364_vm10 = vcmp.eq.f32.partialorder %v3328_v17, 8.507059e+37  ;;  %vm11373_vm11 = vmor %vm3324_vm8, %vm3325_vm9  ;;  %v4819_v23 = vld [vmem:[#allocation8 + $0x18] sm:$0xff] }
 0x3b3   : > { %v3331_v13 = vor.u32 1.1754944e-38, %v3330_v61  ;;  %v3466_v16 = vmul.f32 %v3465_v57, %v11260_v52  ;;  %7690 = vrcp.f32 %v11359_v25  ;;  %6035 = vmatpush.bf16.xpose.msrb.mxu3 %v7161_v30  ;;  %v6395_v4 = vadd.f32 %v5748_v44, %v4816_v2  ;;  %v5676_v2 = vpop.f32.mrf.mxu2 }
 0x3b4   : > { %v4786_v45 = vmul.f32 %v4686_v31, %v11258_v43  ;;  %v3322_v38 = vmul.f32 %v7689_v21, %v3321_v63  ;;  %5816 = vmatpush.bf16.xpose.msrb.mxu0 %v7149_v26  ;;  %v7153_v40 = vor.u32 %v7417_v22, %v7150_v1  ;;  %v3490_v17 = vand.u32 2147483648, %v11359_v25  ;;  %v5749_v44 = vpop.f32.mrf.mxu3 }
 0x3b5   : > { %v5604_v61 = vadd.f32 %v5603_v60, %v5530_v59  ;;  %v3503_v51 = vadd.f32 0.05243302, %v3502_v0  ;;  %v3536_v52 = vmul.f32 %v11336_v39, %v11336_v39  ;;  %6470 = vst [vmem:[#allocation8] sm:$0xff] %v6395_v4  ;;  %v3512_v22 = vadd.f32 0.014752088, %v3511_v20 }
 0x3b6   : > { %v11380_v30 = vpack.c.bf16 %v4786_v45, %v4782_v32  ;;  %v3323_v43 = vadd.f32 %v7689_v21, %v3322_v38  ;;  %5889 = vmatpush.bf16.xpose.msrb.mxu1 %v7153_v40  ;;  %v11382_v57 = vmin.f32 %v3656_v8, 16.0  ;;  %v3467_v15 = vadd.f32 1.1283791, %v3466_v16  ;;  %v11400_v45 = vld [vmem:[%s8053_s10 + $0x268] sm:$0xff] }
 0x3b7   : > { %vm3484_vm12 = vweird.f32 %v11359_v25  ;;  %v5677_v7 = vadd.f32 %v5676_v2, %v5604_v61  ;;  %v3504_v36 = vmul.f32 %v3503_v51, %v11295_v33  ;;  %v3488_v28 = vand.u32 2147483647, %v11359_v25 }
 0x3b8   : > { %13117 = vst [vmem:[#allocation29_spill] sm:$0xff] %v11380_v30  ;;  %5713 = vmatmul.bf16.gmra.mxu2 %v11380_v30  ;;  %v3327_v32 = vsel %vm11373_vm11, %v7689_v21, %v3323_v43  ;;  %v3513_v20 = vmul.f32 %v3512_v22, %v11295_v33  ;;  %v3658_v8 = vmul.f32 2.1237322e-06, %v11382_v57  ;;  %v3669_v63 = vmul.f32 3.8918573e-05, %v11382_v57 }
 0x3b9   : > { %v7691_v1 = vpop.eup %7690  ;;  %v3332_v0 = vsel %vm11364_vm10, %v3331_v13, %v3327_v32  ;;  %v5750_v31 = vadd.f32 %v5749_v44, %v5677_v7  ;;  %v11395_v59 = vmin.f32 %v3536_v52, 16.0  ;;  %v3491_v26 = vor.u32 1.1754944e-38, %v3490_v17 }
 0x3ba   : > { %v3333_v60 = vmul.f32 %v3332_v0, %v11343_v27  ;;  %v3480_v21 = vmul.f32 %v7691_v1, %v11359_v25  ;;  %v3514_v16 = vadd.f32 0.112945676, %v3513_v20  ;;  %v3505_v4 = vadd.f32 0.18741608, %v3504_v36 }
 0x3bb   : > { %v6398_v38 = vadd.f32 %v5750_v31, %v4819_v23  ;;  %v3659_v40 = vadd.f32 0.00028619796, %v3658_v8  ;;  %v3670_v12 = vadd.f32 0.001143296, %v3669_v63  ;;  %vm3485_vm13 = vweird.f32 %v7691_v1 }
 0x3bc   : > { %v3481_v61 = vsub.f32 1.0, %v3480_v21  ;;  %v3515_v3 = vmul.f32 %v3514_v16, %v11295_v33  ;;  %v3538_v13 = vmul.f32 2.1237322e-06, %v11395_v59  ;;  %v6953_v51 = vclamps-f32 %v3333_v60, 1.0  ;;  %vm11413_vm14 = vmor %vm3484_vm12, %vm3485_vm13 }
 0x3bd   : > { %6473 = vst [vmem:[#allocation8 + $0x18] sm:$0xff] %v6398_v38  ;;  %v3660_v27 = vmul.f32 %v3659_v40, %v11382_v57  ;;  %v3671_v52 = vmul.f32 %v3670_v12, %v11382_v57  ;;  %v3549_v17 = vmul.f32 3.8918573e-05, %v11395_v59  ;;  %v11408_v22 = vmul.f32 0.70710677, %v11400_v45 }
 0x3be   : > { %v3482_v43 = vmul.f32 %v7691_v1, %v3481_v61  ;;  %v3516_v2 = vadd.f32 0.4994258, %v3515_v3  ;;  %v3539_v7 = vadd.f32 0.00028619796, %v3538_v13  ;;  %v3468_v36 = vmul.f32 %v3467_v15, %v11232_v29 }
 0x3bf   : > { %v3661_v23 = vadd.f32 0.0036580483, %v3660_v27  ;;  %v3672_v44 = vadd.f32 0.014752088, %v3671_v52  ;;  %v3550_v20 = vadd.f32 0.001143296, %v3549_v17  ;;  %v3506_v60 = vmul.f32 %v3505_v4, %v11295_v33 }
 0x3c0   : > { %v3483_v8 = vadd.f32 %v7691_v1, %v3482_v43  ;;  %vm3489_vm15 = vcmp.eq.f32.partialorder %v3488_v28, 8.507059e+37  ;;  %v3517_v0 = vmul.f32 %v3516_v2, %v11295_v33  ;;  %v3540_v31 = vmul.f32 %v3539_v7, %v11395_v59 }
 0x3c1   : > { %v4683_v63 = vadd.f32 1.0, %v6953_v51  ;;  %v3662_v29 = vmul.f32 %v3661_v23, %v11382_v57  ;;  %v3673_v25 = vmul.f32 %v3672_v44, %v11382_v57  ;;  %v3551_v16 = vmul.f32 %v3550_v20, %v11395_v59 }
 0x3c2   : > { %v3487_v15 = vsel %vm11413_vm14, %v7691_v1, %v3483_v8  ;;  %v3518_v21 = vadd.f32 1.0, %v3517_v0  ;;  %v3696_v28 = vmul.f32 %v11408_v22, %v11408_v22  ;;  %v3541_v61 = vadd.f32 0.0036580483, %v3540_v31 }
 0x3c3   : > { %v3492_v38 = vsel %vm3489_vm15, %v3491_v26, %v3487_v15  ;;  %v3663_v40 = vadd.f32 0.05243302, %v3662_v29  ;;  %v3674_v12 = vadd.f32 0.112945676, %v3673_v25  ;;  %v487_v33 = vmul.f32 0.5, %v11216_v47  ;;  %v11440_v29 = vld [vmem:[%s8053_s10 + $0x250] sm:$0xff] }
 0x3c4   : > { %v3493_v3 = vmul.f32 %v3492_v38, %v3468_v36  ;;  %7692 = vrcp.f32 %v3518_v21  ;;  %v3542_v1 = vmul.f32 %v3541_v61, %v11395_v59  ;;  %v3507_v27 = vadd.f32 1.1283791, %v3506_v60 }
 0x3c5   : > { %v3664_v4 = vmul.f32 %v3663_v40, %v11382_v57  ;;  %v3675_v13 = vmul.f32 %v3674_v12, %v11382_v57  ;;  %v3552_v52 = vadd.f32 0.014752088, %v3551_v16  ;;  %v11431_v17 = vmin.f32 %v3696_v28, 16.0 }
 0x3c6   : > { %v6957_v51 = vclamps-f32 %v3493_v3, 1.0  ;;  %v4783_v26 = vmul.f32 %v4683_v63, %v11331_v5  ;;  %vm3524_vm0 = vweird.f32 %v3518_v21  ;;  %v3543_v36 = vadd.f32 0.05243302, %v3542_v1 }
 0x3c7   : > { %v3665_v43 = vadd.f32 0.18741608, %v3664_v4  ;;  %v3676_v2 = vadd.f32 0.4994258, %v3675_v13  ;;  %v3553_v47 = vmul.f32 %v3552_v52, %v11395_v59  ;;  %v3698_v32 = vmul.f32 2.1237322e-06, %v11431_v17 }
 0x3c8   : > { %v4687_v7 = vadd.f32 1.0, %v6957_v51  ;;  %v3528_v23 = vand.u32 2147483647, %v3518_v21  ;;  %v3530_v44 = vand.u32 2147483648, %v3518_v21  ;;  %v3544_v5 = vmul.f32 %v3543_v36, %v11395_v59 }
 0x3c9   : > { %v3666_v20 = vmul.f32 %v3665_v43, %v11382_v57  ;;  %v3677_v8 = vmul.f32 %v3676_v2, %v11382_v57  ;;  %v3554_v63 = vadd.f32 0.112945676, %v3553_v47  ;;  %v3699_v60 = vadd.f32 0.00028619796, %v3698_v32  ;;  %v11460_v2 = vld [vmem:[%s8053_s10 + $0x270] sm:$0xff] }
 0x3ca   : > { %v7693_v0 = vpop.eup %7692  ;;  %v4787_v31 = vmul.f32 %v4687_v7, %v487_v33  ;;  %v3709_v28 = vmul.f32 3.8918573e-05, %v11431_v17  ;;  %v3545_v40 = vadd.f32 0.18741608, %v3544_v5  ;;  %v11448_v3 = vmul.f32 0.70710677, %v11440_v29 }
 0x3cb   : > { %v3520_v25 = vmul.f32 %v7693_v0, %v3518_v21  ;;  %v3667_v15 = vadd.f32 1.1283791, %v3666_v20  ;;  %v3678_v16 = vadd.f32 1.0, %v3677_v8  ;;  %v3555_v12 = vmul.f32 %v3554_v63, %v11395_v59 }
 0x3cc   : > { %v11443_v38 = vpack.c.bf16 %v4787_v31, %v4783_v26  ;;  %v3700_v57 = vmul.f32 %v3699_v60, %v11431_v17  ;;  %vm3525_vm1 = vweird.f32 %v7693_v0  ;;  %v11452_v33 = vmul.f32 0.5, %v11254_v41 }
 0x3cd   : > { %v3521_v61 = vsub.f32 1.0, %v3520_v25  ;;  %7694 = vrcp.f32 %v3678_v16  ;;  %v11455_v4 = vmul.f32 0.5, %v11311_v34  ;;  %v3508_v13 = vmul.f32 %v3507_v27, %v11265_v49  ;;  %vm11463_vm2 = vmor %vm3524_vm0, %vm3525_vm1 }
 0x3ce   : > { %13120 = vst [vmem:[#allocation30_spill] sm:$0xff] %v11443_v38  ;;  %5786 = vmatmul.bf16.gmra.mxu3 %v11443_v38  ;;  %v3556_v1 = vadd.f32 0.4994258, %v3555_v12  ;;  %v3546_v52 = vmul.f32 %v3545_v40, %v11395_v59  ;;  %v3701_v26 = vadd.f32 0.0036580483, %v3700_v57  ;;  %vm11467_vm3 = vcmp.eq.f32.partialorder %v3528_v23, 8.507059e+37 }
 0x3cf   : > { %v3522_v51 = vmul.f32 %v7693_v0, %v3521_v61  ;;  %v3710_v43 = vadd.f32 0.001143296, %v3709_v28  ;;  %v3531_v34 = vor.u32 1.1754944e-38, %v3530_v44  ;;  %v3668_v49 = vmul.f32 %v3667_v15, %v11328_v37  ;;  %v11487_v12 = vld [vmem:[%s8053_s10 + $0x258] sm:$0xff] }
 0x3d0   : > { %v3557_v27 = vmul.f32 %v3556_v1, %v11395_v59  ;;  %v3702_v47 = vmul.f32 %v3701_v26, %v11431_v17  ;;  %v3576_v21 = vmul.f32 %v11448_v3, %v11448_v3  ;;  %v3688_v20 = vand.u32 2147483647, %v3678_v16 }
 0x3d1   : > { %v3523_v36 = vadd.f32 %v7693_v0, %v3522_v51  ;;  %v3711_v32 = vmul.f32 %v3710_v43, %v11431_v17  ;;  %v3690_v8 = vand.u32 2147483648, %v3678_v16  ;;  %v11478_v31 = vmul.f32 0.70710677, %v11460_v2 }
 0x3d2   : > { %v3558_v23 = vadd.f32 1.0, %v3557_v27  ;;  %v3547_v59 = vadd.f32 1.1283791, %v3546_v52  ;;  %v3703_v5 = vadd.f32 0.05243302, %v3702_v47  ;;  %v11484_v15 = vmin.f32 %v3576_v21, 16.0 }
 0x3d3   : > { %v7695_v44 = vpop.eup %7694  ;;  %v3527_v37 = vsel %vm11463_vm2, %v7693_v0, %v3523_v36  ;;  %v3712_v63 = vadd.f32 0.014752088, %v3711_v32  ;;  %vm3684_vm4 = vweird.f32 %v3678_v16  ;;  %vm11492_vm6 = vcmp.eq.f32.partialorder %v3688_v20, 8.507059e+37 }
 0x3d4   : > { %v3532_v60 = vsel %vm11467_vm3, %v3531_v34, %v3527_v37  ;;  %v3680_v25 = vmul.f32 %v7695_v44, %v3678_v16  ;;  %7696 = vrcp.f32 %v3558_v23  ;;  %vm3685_vm5 = vweird.f32 %v7695_v44 }
 0x3d5   : > { %v3533_v28 = vmul.f32 %v3532_v60, %v3508_v13  ;;  %v3568_v40 = vand.u32 2147483647, %v3558_v23  ;;  %v3704_v61 = vmul.f32 %v3703_v5, %v11431_v17  ;;  %v3713_v0 = vmul.f32 %v3712_v63, %v11431_v17  ;;  %vm11504_vm7 = vmor %vm3684_vm4, %vm3685_vm5 }
 0x3d6   : > { %v3681_v57 = vsub.f32 1.0, %v3680_v25  ;;  %v3578_v1 = vmul.f32 2.1237322e-06, %v11484_v15  ;;  %v3691_v26 = vor.u32 1.1754944e-38, %v3690_v8  ;;  %v3736_v13 = vmul.f32 %v11478_v31, %v11478_v31 }
 0x3d7   : > { %v6958_v51 = vclamps-f32 %v3533_v28, 1.0  ;;  %v3548_v7 = vmul.f32 %v3547_v59, %v11336_v39  ;;  %v3714_v41 = vadd.f32 0.112945676, %v3713_v0  ;;  %v11500_v34 = vmul.f32 0.70710677, %v11487_v12 }
 0x3d8   : > { %v3682_v43 = vmul.f32 %v7695_v44, %v3681_v57  ;;  %vm3564_vm8 = vweird.f32 %v3558_v23  ;;  %v3570_v36 = vand.u32 2147483648, %v3558_v23  ;;  %v3579_v47 = vadd.f32 0.00028619796, %v3578_v1 }
 0x3d9   : > { %v3589_v32 = vmul.f32 3.8918573e-05, %v11484_v15  ;;  %vm11509_vm9 = vcmp.eq.f32.partialorder %v3568_v40, 8.507059e+37  ;;  %v3705_v39 = vadd.f32 0.18741608, %v3704_v61  ;;  %v3715_v37 = vmul.f32 %v3714_v41, %v11431_v17 }
 0x3da   : > { %v7697_v21 = vpop.eup %7696  ;;  %v3683_v20 = vadd.f32 %v7695_v44, %v3682_v43  ;;  %v4688_v59 = vadd.f32 1.0, %v6958_v51  ;;  %v3580_v5 = vmul.f32 %v3579_v47, %v11484_v15  ;;  %v11515_v63 = vmin.f32 %v3736_v13, 16.0 }
 0x3db   : > { %v3560_v16 = vmul.f32 %v7697_v21, %v3558_v23  ;;  %vm3565_vm10 = vweird.f32 %v7697_v21  ;;  %v3716_v25 = vadd.f32 0.4994258, %v3715_v37  ;;  %v3590_v28 = vadd.f32 0.001143296, %v3589_v32 }
 0x3dc   : > { %v3687_v60 = vsel %vm11504_vm7, %v7695_v44, %v3683_v20  ;;  %v3581_v0 = vadd.f32 0.0036580483, %v3580_v5  ;;  %v3738_v61 = vmul.f32 2.1237322e-06, %v11515_v63  ;;  %v3571_v51 = vor.u32 1.1754944e-38, %v3570_v36  ;;  %vm11528_vm11 = vmor %vm3564_vm8, %vm3565_vm10 }
 0x3dd   : > { %v3692_v40 = vsel %vm11492_vm6, %v3691_v26, %v3687_v60  ;;  %v3561_v57 = vsub.f32 1.0, %v3560_v16  ;;  %v3717_v43 = vmul.f32 %v3716_v25, %v11431_v17  ;;  %v3591_v13 = vmul.f32 %v3590_v28, %v11484_v15  ;;  %v5533_v60 = vpop.f32.mrf.mxu0  ;;  %v5606_v25 = vpop.f32.mrf.mxu1 }
 0x3de   : > { %v3693_v1 = vmul.f32 %v3692_v40, %v3668_v49  ;;  %v3582_v27 = vmul.f32 %v3581_v0, %v11484_v15  ;;  %v3739_v44 = vadd.f32 0.00028619796, %v3738_v61  ;;  %v3749_v47 = vmul.f32 3.8918573e-05, %v11515_v63 }
 0x3df   : > { %v3562_v41 = vmul.f32 %v7697_v21, %v3561_v57  ;;  %v3706_v49 = vmul.f32 %v3705_v39, %v11431_v17  ;;  %v11533_v26 = vadd.f32 1.0, %v3717_v43  ;;  %v3592_v36 = vadd.f32 0.014752088, %v3591_v13  ;;  %v11550_v43 = vld [vmem:[%s8053_s10 + $0x278] sm:$0xff] }
 0x3e0   : > { %v6962_v32 = vclamps-f32 %v3693_v1, 1.0  ;;  %v4788_v20 = vmul.f32 %v4688_v59, %v11452_v33  ;;  %v3583_v16 = vadd.f32 0.05243302, %v3582_v27  ;;  %v3740_v5 = vmul.f32 %v3739_v44, %v11515_v63 }
 0x3e1   : > { %v3563_v37 = vadd.f32 %v7697_v21, %v3562_v41  ;;  %7698 = vrcp.f32 %v11533_v26  ;;  %v3750_v23 = vadd.f32 0.001143296, %v3749_v47  ;;  %v3616_v40 = vmul.f32 %v11500_v34, %v11500_v34 }
 0x3e2   : > { %v4692_v28 = vadd.f32 1.0, %v6962_v32  ;;  %v11540_v17 = vadd.f32 %v5606_v25, %v5533_v60  ;;  %v3584_v33 = vmul.f32 %v3583_v16, %v11484_v15  ;;  %v3593_v59 = vmul.f32 %v3592_v36, %v11484_v15 }
 0x3e3   : > { %v3567_v39 = vsel %vm11528_vm11, %v7697_v21, %v3563_v37  ;;  %v3707_v61 = vadd.f32 1.1283791, %v3706_v49  ;;  %v3741_v1 = vadd.f32 0.0036580483, %v3740_v5  ;;  %v489_v13 = vmul.f32 0.5, %v11316_v24 }
 0x3e4   : > { %v4792_v57 = vmul.f32 %v4692_v28, %v11455_v4  ;;  %v3572_v0 = vsel %vm11509_vm9, %v3571_v51, %v3567_v39  ;;  %v11554_v41 = vmul.f32 0.5, %v11400_v45  ;;  %v3594_v21 = vadd.f32 0.112945676, %v3593_v59 }
 0x3e5   : > { %v3573_v27 = vmul.f32 %v3572_v0, %v3548_v7  ;;  %v3742_v47 = vmul.f32 %v3741_v1, %v11515_v63  ;;  %v3751_v4 = vmul.f32 %v3750_v23, %v11515_v63  ;;  %v11560_v32 = vmin.f32 %v3616_v40, 16.0  ;;  %v5535_v38 = vpop.f32.mrf.mxu0 }
 0x3e6   : > { %v11556_v44 = vpack.c.bf16 %v4792_v57, %v4788_v20  ;;  %v11563_v8 = vmul.f32 0.5, %v11440_v29  ;;  %v3585_v51 = vadd.f32 0.18741608, %v3584_v33  ;;  %v3595_v52 = vmul.f32 %v3594_v21, %v11484_v15 }
 0x3e7   : > { %v11567_v24 = vmul.f32 0.70710677, %v11550_v43  ;;  %v7699_v45 = vpop.eup %7698  ;;  %v3708_v7 = vmul.f32 %v3707_v61, %v11408_v22  ;;  %v3743_v49 = vadd.f32 0.05243302, %v3742_v47  ;;  %v3752_v36 = vadd.f32 0.014752088, %v3751_v4 }
 0x3e8   : > { %13133 = vst [vmem:[#allocation31_spill] sm:$0xff] %v11556_v44  ;;  %5572 = vmatmul.bf16.gmra.mxu0 %v11556_v44  ;;  %v3618_v20 = vmul.f32 2.1237322e-06, %v11560_v32  ;;  %v6959_v37 = vclamps-f32 %v3573_v27, 1.0  ;;  %v3720_v16 = vmul.f32 %v7699_v45, %v11533_v26  ;;  %vm3724_vm12 = vweird.f32 %v11533_v26 }
 0x3e9   : > { %v3730_v29 = vand.u32 2147483648, %v11533_v26  ;;  %v3596_v5 = vadd.f32 0.4994258, %v3595_v52  ;;  %v3744_v60 = vmul.f32 %v3743_v49, %v11515_v63  ;;  %v3753_v25 = vmul.f32 %v3752_v36, %v11515_v63 }
 0x3ea   : > { %v3619_v28 = vadd.f32 0.00028619796, %v3618_v20  ;;  %v3721_v23 = vsub.f32 1.0, %v3720_v16  ;;  %vm3725_vm13 = vweird.f32 %v7699_v45  ;;  %v3728_v22 = vand.u32 2147483647, %v11533_v26  ;;  %v11593_v20 = vld [vmem:[%s8053_s10 + $0x280] sm:$0xff] }
 0x3eb   : > { %v3629_v40 = vmul.f32 3.8918573e-05, %v11560_v32  ;;  %v3586_v39 = vmul.f32 %v3585_v51, %v11484_v15  ;;  %v3597_v33 = vmul.f32 %v3596_v5, %v11484_v15  ;;  %v3754_v59 = vadd.f32 0.112945676, %v3753_v25  ;;  %vm11586_vm14 = vmor %vm3724_vm12, %vm3725_vm13 }
 0x3ec   : > { %v3776_v57 = vmul.f32 %v11567_v24, %v11567_v24  ;;  %v3722_v0 = vmul.f32 %v7699_v45, %v3721_v23  ;;  %v3745_v61 = vadd.f32 0.18741608, %v3744_v60  ;;  %v3620_v1 = vmul.f32 %v3619_v28, %v11560_v32 }
 0x3ed   : > { %v3630_v27 = vadd.f32 0.001143296, %v3629_v40  ;;  %v3731_v47 = vor.u32 1.1754944e-38, %v3730_v29  ;;  %v4689_v4 = vadd.f32 1.0, %v6959_v37  ;;  %v3598_v51 = vadd.f32 1.0, %v3597_v33 }
 0x3ee   : > { %v3755_v15 = vmul.f32 %v3754_v59, %v11515_v63  ;;  %v3723_v52 = vadd.f32 %v7699_v45, %v3722_v0  ;;  %vm3729_vm15 = vcmp.eq.f32.partialorder %v3728_v22, 8.507059e+37  ;;  %v3621_v49 = vadd.f32 0.0036580483, %v3620_v1 }
 0x3ef   : > { %v3631_v36 = vmul.f32 %v3630_v27, %v11560_v32  ;;  %v11596_v16 = vmul.f32 0.5, %v11460_v2  ;;  %v3587_v26 = vadd.f32 1.1283791, %v3586_v39  ;;  %7700 = vrcp.f32 %v3598_v51 }
 0x3f0   : > { %v11598_v5 = vmin.f32 %v3776_v57, 16.0  ;;  %v3727_v37 = vsel %vm11586_vm14, %v7699_v45, %v3723_v52  ;;  %v3746_v29 = vmul.f32 %v3745_v61, %v11515_v63  ;;  %v3756_v60 = vadd.f32 0.4994258, %v3755_v15 }
 0x3f1   : > { %v3622_v25 = vmul.f32 %v3621_v49, %v11560_v32  ;;  %v3732_v28 = vsel %vm3729_vm15, %v3731_v47, %v3727_v37  ;;  %v4789_v23 = vmul.f32 %v4689_v4, %v489_v13  ;;  %v3632_v22 = vadd.f32 0.014752088, %v3631_v36  ;;  %v11617_v36 = vld [vmem:[%s8053_s10 + $0x2a0] sm:$0xff]  ;;  %v11669_v37 = vld [vmem:[%s8053_s10 + $0x288] sm:$0xff] }
 0x3f2   : > { %v11605_v40 = vmul.f32 0.70710677, %v11593_v20  ;;  %v3733_v2 = vmul.f32 %v3732_v28, %v3708_v7  ;;  %v3608_v33 = vand.u32 2147483647, %v3598_v51  ;;  %v3757_v39 = vmul.f32 %v3756_v60, %v11515_v63 }
 0x3f3   : > { %v3623_v59 = vadd.f32 0.05243302, %v3622_v25  ;;  %v3610_v57 = vand.u32 2147483648, %v3598_v51  ;;  %v3633_v0 = vmul.f32 %v3632_v22, %v11560_v32  ;;  %v3778_v45 = vmul.f32 2.1237322e-06, %v11598_v5 }
 0x3f4   : > { %v3789_v61 = vmul.f32 3.8918573e-05, %v11598_v5  ;;  %v6963_v1 = vclamps-f32 %v3733_v2, 1.0  ;;  %v3747_v27 = vadd.f32 1.1283791, %v3746_v29  ;;  %v11611_v13 = vadd.f32 1.0, %v3757_v39 }
 0x3f5   : > { %v3624_v21 = vmul.f32 %v3623_v59, %v11560_v32  ;;  %v7701_v47 = vpop.eup %7700  ;;  %v3588_v7 = vmul.f32 %v3587_v26, %v11448_v3  ;;  %v3634_v4 = vadd.f32 0.112945676, %v3633_v0  ;;  %v3779_v63 = vadd.f32 0.00028619796, %v3778_v45 }
 0x3f6   : > { %v3790_v15 = vadd.f32 0.001143296, %v3789_v61  ;;  %v4693_v52 = vadd.f32 1.0, %v6963_v1  ;;  %v3600_v49 = vmul.f32 %v7701_v47, %v3598_v51  ;;  %vm3604_vm0 = vweird.f32 %v3598_v51 }
 0x3f7   : > { %7702 = vrcp.f32 %v11611_v13  ;;  %vm3605_vm1 = vweird.f32 %v7701_v47  ;;  %vm11619_vm2 = vcmp.eq.f32.partialorder %v3608_v33, 8.507059e+37  ;;  %v3625_v29 = vadd.f32 0.18741608, %v3624_v21 }
 0x3f8   : > { %v3816_v60 = vmul.f32 %v11605_v40, %v11605_v40  ;;  %v4793_v3 = vmul.f32 %v4693_v52, %v11554_v41  ;;  %v3601_v26 = vsub.f32 1.0, %v3600_v49  ;;  %v3635_v25 = vmul.f32 %v3634_v4, %v11560_v32  ;;  %vm11639_vm3 = vmor %vm3604_vm0, %vm3605_vm1 }
 0x3f9   : > { %v3780_v28 = vmul.f32 %v3779_v63, %v11598_v5  ;;  %v3611_v22 = vor.u32 1.1754944e-38, %v3610_v57  ;;  %v11629_v2 = vmul.f32 %v3747_v27, %v11478_v31  ;;  %v3791_v33 = vmul.f32 %v3790_v15, %v11598_v5 }
 0x3fa   : > { %v11633_v39 = vmul.f32 0.70710677, %v11617_v36  ;;  %v11635_v59 = vpack.c.bf16 %v4793_v3, %v4789_v23  ;;  %v3602_v0 = vmul.f32 %v7701_v47, %v3601_v26  ;;  %v3636_v45 = vadd.f32 0.4994258, %v3635_v25 }
 0x3fb   : > { %v3781_v61 = vadd.f32 0.0036580483, %v3780_v28  ;;  %vm3764_vm4 = vweird.f32 %v11611_v13  ;;  %v3768_v31 = vand.u32 2147483647, %v11611_v13  ;;  %v3792_v57 = vadd.f32 0.014752088, %v3791_v33 }
 0x3fc   : > { %13138 = vst [vmem:[#allocation32_spill] sm:$0xff] %v11635_v59  ;;  %v11645_v1 = vmin.f32 %v3816_v60, 16.0  ;;  %5645 = vmatmul.bf16.gmra.mxu1 %v11635_v59  ;;  %v3603_v23 = vadd.f32 %v7701_v47, %v3602_v0  ;;  %v3626_v21 = vmul.f32 %v3625_v29, %v11560_v32  ;;  %v3637_v4 = vmul.f32 %v3636_v45, %v11560_v32 }
 0x3fd   : > { %v7703_v27 = vpop.eup %7702  ;;  %v3782_v51 = vmul.f32 %v3781_v61, %v11598_v5  ;;  %v3770_v15 = vand.u32 2147483648, %v11611_v13  ;;  %v3793_v52 = vmul.f32 %v3792_v57, %v11598_v5  ;;  %vm11678_vm7 = vcmp.eq.f32.partialorder %v3768_v31, 8.507059e+37 }
 0x3fe   : > { %v3760_v63 = vmul.f32 %v7703_v27, %v11611_v13  ;;  %vm3765_vm5 = vweird.f32 %v7703_v27  ;;  %v3607_v49 = vsel %vm11639_vm3, %v7701_v47, %v3603_v23  ;;  %v11656_v60 = vadd.f32 1.0, %v3637_v4 }
 0x3ff   : > { %v3783_v3 = vadd.f32 0.05243302, %v3782_v51  ;;  %v3818_v29 = vmul.f32 2.1237322e-06, %v11645_v1  ;;  %v3612_v32 = vsel %vm11619_vm2, %v3611_v22, %v3607_v49  ;;  %v3794_v25 = vadd.f32 0.112945676, %v3793_v52  ;;  %vm11674_vm6 = vmor %vm3764_vm4, %vm3765_vm5 }
 0x400   : > { %v3761_v26 = vsub.f32 1.0, %v3760_v63  ;;  %v3829_v28 = vmul.f32 3.8918573e-05, %v11645_v1  ;;  %v3613_v33 = vmul.f32 %v3612_v32, %v3588_v7  ;;  %v3627_v0 = vadd.f32 1.1283791, %v3626_v21 }
 0x401   : > { %7704 = vrcp.f32 %v11656_v60  ;;  %v3976_v47 = vmul.f32 %v11633_v39, %v11633_v39  ;;  %v3648_v61 = vand.u32 2147483647, %v11656_v60  ;;  %v3784_v41 = vmul.f32 %v3783_v3, %v11598_v5 }
 0x402   : > { %v3762_v45 = vmul.f32 %v7703_v27, %v3761_v26  ;;  %v3795_v57 = vmul.f32 %v3794_v25, %v11598_v5  ;;  %v6960_v22 = vclamps-f32 %v3613_v33, 1.0  ;;  %v3771_v21 = vor.u32 1.1754944e-38, %v3770_v15  ;;  %v5752_v33 = vpop.f32.mrf.mxu3 }
 0x403   : > { %v3819_v4 = vadd.f32 0.00028619796, %v3818_v29  ;;  %v3785_v63 = vadd.f32 0.18741608, %v3784_v41  ;;  %v3830_v49 = vadd.f32 0.001143296, %v3829_v28  ;;  %v11683_v3 = vmul.f32 %v3627_v0, %v11500_v34  ;;  %v5679_v28 = vpop.f32.mrf.mxu2 }
 0x404   : > { %v3763_v51 = vadd.f32 %v7703_v27, %v3762_v45  ;;  %v3796_v52 = vadd.f32 0.4994258, %v3795_v57  ;;  %v3650_v13 = vand.u32 2147483648, %v11656_v60  ;;  %v11686_v32 = vmin.f32 %v3976_v47, 16.0  ;;  %v7140_v0 = vld [vmem:[%s8060_s18 + $0x128] sm:$0xf] }
 0x405   : > { %v11689_v31 = vmul.f32 0.70710677, %v11669_v37  ;;  %v4690_v29 = vadd.f32 1.0, %v6960_v22  ;;  %vm11693_vm8 = vcmp.eq.f32.partialorder %v3648_v61, 8.507059e+37  ;;  %v3786_v34 = vmul.f32 %v3785_v63, %v11598_v5  ;;  %v7416_v41 = vld [vmem:[%s8060_s18 + $0x134] sm:$0xf0] }
 0x406   : > { %v3767_v15 = vsel %vm11674_vm6, %v7703_v27, %v3763_v51  ;;  %v3797_v25 = vmul.f32 %v3796_v52, %v11598_v5  ;;  %vm3644_vm9 = vweird.f32 %v11656_v60  ;;  %v5680_v27 = vadd.f32 %v5679_v28, %v11540_v17  ;;  %v7414_v61 = vld [vmem:[%s8060_s18 + $0x12c] sm:$0xf]  ;;  %v7142_v57 = vld [vmem:[%s8060_s18 + $0x138] sm:$0xf0]  ;;  %v5608_v17 = vpop.f32.mrf.mxu1 }
 0x407   : > { %v7705_v47 = vpop.eup %7704  ;;  %v3772_v45 = vsel %vm11678_vm7, %v3771_v21, %v3767_v15  ;;  %v3820_v22 = vmul.f32 %v3819_v4, %v11645_v1  ;;  %v3831_v51 = vmul.f32 %v3830_v49, %v11645_v1  ;;  %v3978_v63 = vmul.f32 2.1237322e-06, %v11686_v32  ;;  %v4822_v21 = vld [vmem:[#allocation8 + $0x30] sm:$0xff] }
 0x408   : > { %v3773_v7 = vmul.f32 %v3772_v45, %v11629_v2  ;;  %v3640_v5 = vmul.f32 %v7705_v47, %v11656_v60  ;;  %v3787_v52 = vadd.f32 1.1283791, %v3786_v34  ;;  %v11712_v23 = vadd.f32 1.0, %v3797_v25 }
 0x409   : > { %v5753_v15 = vadd.f32 %v5752_v33, %v5680_v27  ;;  %v7141_v28 = vor.u32 %v7416_v41, %v7140_v0  ;;  %vm3645_vm10 = vweird.f32 %v7705_v47  ;;  %v7145_v4 = vor.u32 %v7414_v61, %v7142_v57 }
 0x40a   : > { %v6964_v59 = vclamps-f32 %v3773_v7, 1.0  ;;  %v3641_v30 = vsub.f32 1.0, %v3640_v5  ;;  %v4790_v2 = vmul.f32 %v4690_v29, %v11563_v8  ;;  %v3651_v45 = vor.u32 1.1754944e-38, %v3650_v13  ;;  %vm11720_vm11 = vmor %vm3644_vm9, %vm3645_vm10  ;;  %v11734_v7 = vld [vmem:[%s8053_s10 + $0x2a8] sm:$0xff] }
 0x40b   : > { %7706 = vrcp.f32 %v11712_v23  ;;  %5963 = vmatpush.bf16.xpose.msrb.mxu2 %v7141_v28  ;;  %v3856_v49 = vmul.f32 %v11689_v31, %v11689_v31  ;;  %v6401_v44 = vadd.f32 %v5753_v15, %v4822_v21  ;;  %v5609_v33 = vadd.f32 %v5608_v17, %v5535_v38  ;;  %6036 = vmatpush.bf16.xpose.msrb.mxu3 %v7145_v4  ;;  %v5681_v27 = vpop.f32.mrf.mxu2 }
 0x40c   : > { %v4694_v34 = vadd.f32 1.0, %v6964_v59  ;;  %v3642_v25 = vmul.f32 %v7705_v47, %v3641_v30  ;;  %v11725_v8 = vmul.f32 %v3787_v52, %v11567_v24  ;;  %vm3804_vm12 = vweird.f32 %v11712_v23 }
 0x40d   : > { %v3821_v13 = vadd.f32 0.0036580483, %v3820_v22  ;;  %v3832_v29 = vadd.f32 0.014752088, %v3831_v51  ;;  %v3808_v38 = vand.u32 2147483647, %v11712_v23  ;;  %v5682_v41 = vadd.f32 %v5681_v27, %v5609_v33 }
 0x40e   : > { %v4794_v59 = vmul.f32 %v4694_v34, %v11596_v16  ;;  %v3643_v30 = vadd.f32 %v7705_v47, %v3642_v25  ;;  %6476 = vst [vmem:[#allocation8 + $0x30] sm:$0xff] %v6401_v44  ;;  %v3979_v60 = vadd.f32 0.00028619796, %v3978_v63  ;;  %v3989_v24 = vmul.f32 3.8918573e-05, %v11686_v32  ;;  %v4825_v51 = vld [vmem:[#allocation8 + $0x48] sm:$0xff]  ;;  %v5754_v44 = vpop.f32.mrf.mxu3 }
 0x40f   : > { %v3822_v61 = vmul.f32 %v3821_v13, %v11645_v1  ;;  %v3833_v57 = vmul.f32 %v3832_v29, %v11645_v1  ;;  %v3810_v22 = vand.u32 2147483648, %v11712_v23  ;;  %v5755_v15 = vadd.f32 %v5754_v44, %v5682_v41 }
 0x410   : > { %v11736_v5 = vpack.c.bf16 %v4794_v59, %v4790_v2  ;;  %v3647_v16 = vsel %vm11720_vm11, %v7705_v47, %v3643_v30  ;;  %v3980_v63 = vmul.f32 %v3979_v60, %v11686_v32  ;;  %v11748_v34 = vmul.f32 0.70710677, %v11734_v7 }
 0x411   : > { %v7707_v52 = vpop.eup %7706  ;;  %v3652_v21 = vsel %vm11693_vm8, %v3651_v45, %v3647_v16  ;;  %v3823_v17 = vadd.f32 0.05243302, %v3822_v61  ;;  %v3834_v28 = vadd.f32 0.112945676, %v3833_v57  ;;  %v6404_v25 = vadd.f32 %v5755_v15, %v4825_v51 }
 0x412   : > { %5718 = vmatmul.bf16.gmra.mxu2 %v11736_v5  ;;  %v3653_v4 = vmul.f32 %v3652_v21, %v11683_v3  ;;  %v3800_v2 = vmul.f32 %v7707_v52, %v11712_v23  ;;  %v3981_v47 = vadd.f32 0.0036580483, %v3980_v63  ;;  %v3990_v26 = vadd.f32 0.001143296, %v3989_v24  ;;  %v11793_v24 = vld [vmem:[%s8053_s10 + $0x290] sm:$0xff] }
 0x413   : > { %v3824_v33 = vmul.f32 %v3823_v17, %v11645_v1  ;;  %v3835_v0 = vmul.f32 %v3834_v28, %v11645_v1  ;;  %vm3805_vm13 = vweird.f32 %v7707_v52  ;;  %v11753_v29 = vmin.f32 %v3856_v49, 16.0  ;;  %6479 = vst [vmem:[#allocation8 + $0x48] sm:$0xff] %v6404_v25 }
 0x414   : > { %v3801_v45 = vsub.f32 1.0, %v3800_v2  ;;  %v3982_v13 = vmul.f32 %v3981_v47, %v11686_v32  ;;  %v6961_v59 = vclamps-f32 %v3653_v4, 1.0  ;;  %vm11755_vm14 = vcmp.eq.f32.partialorder %v3808_v38, 8.507059e+37  ;;  %vm11763_vm15 = vmor %vm3804_vm12, %vm3805_vm13 }
 0x415   : > { %v3836_v30 = vadd.f32 0.4994258, %v3835_v0  ;;  %v3991_v27 = vmul.f32 %v3990_v26, %v11686_v32  ;;  %v3825_v41 = vadd.f32 0.18741608, %v3824_v33  ;;  %v3858_v57 = vmul.f32 2.1237322e-06, %v11753_v29 }
 0x416   : > { %v3802_v60 = vmul.f32 %v7707_v52, %v3801_v45  ;;  %v3983_v61 = vadd.f32 0.05243302, %v3982_v13  ;;  %v3811_v49 = vor.u32 1.1754944e-38, %v3810_v22  ;;  %v3869_v51 = vmul.f32 3.8918573e-05, %v11753_v29 }
 0x417   : > { %v3837_v38 = vmul.f32 %v3836_v30, %v11645_v1  ;;  %v3992_v16 = vadd.f32 0.014752088, %v3991_v27  ;;  %v3859_v21 = vadd.f32 0.00028619796, %v3858_v57  ;;  %v4016_v15 = vmul.f32 %v11748_v34, %v11748_v34 }
 0x418   : > { %v3803_v44 = vadd.f32 %v7707_v52, %v3802_v60  ;;  %v3984_v63 = vmul.f32 %v3983_v61, %v11686_v32  ;;  %v491_v17 = vmul.f32 0.5, %v11487_v12  ;;  %v4691_v23 = vadd.f32 1.0, %v6961_v59 }
 0x419   : > { %v3838_v28 = vadd.f32 1.0, %v3837_v38  ;;  %v3993_v4 = vmul.f32 %v3992_v16, %v11686_v32  ;;  %v3826_v2 = vmul.f32 %v3825_v41, %v11645_v1  ;;  %v3860_v25 = vmul.f32 %v3859_v21, %v11753_v29 }
 0x41a   : > { %v3807_v22 = vsel %vm11763_vm15, %v7707_v52, %v3803_v44  ;;  %v3985_v47 = vadd.f32 0.18741608, %v3984_v63  ;;  %v3870_v0 = vadd.f32 0.001143296, %v3869_v51  ;;  %v11782_v45 = vmin.f32 %v4016_v15, 16.0 }
 0x41b   : > { %v3812_v33 = vsel %vm11755_vm14, %v3811_v49, %v3807_v22  ;;  %7708 = vrcp.f32 %v3838_v28  ;;  %v495_v13 = vmul.f32 0.5, %v11550_v43  ;;  %v11786_v52 = vmul.f32 0.5, %v11593_v20 }
 0x41c   : > { %v3813_v12 = vmul.f32 %v3812_v33, %v11725_v8  ;;  %v3986_v26 = vmul.f32 %v3985_v47, %v11686_v32  ;;  %v3994_v1 = vadd.f32 0.112945676, %v3993_v4  ;;  %v3861_v59 = vadd.f32 0.0036580483, %v3860_v25 }
 0x41d   : > { %v4791_v27 = vmul.f32 %v4691_v23, %v491_v17  ;;  %v3827_v3 = vadd.f32 1.1283791, %v3826_v2  ;;  %v3848_v60 = vand.u32 2147483647, %v3838_v28  ;;  %v3871_v8 = vmul.f32 %v3870_v0, %v11753_v29  ;;  %v11797_v23 = vld [vmem:[%s8053_s10 + $0x2b0] sm:$0xff] }
 0x41e   : > { %v6965_v30 = vclamps-f32 %v3813_v12, 1.0  ;;  %v3995_v41 = vmul.f32 %v3994_v1, %v11686_v32  ;;  %v3862_v61 = vmul.f32 %v3861_v59, %v11753_v29  ;;  %v4018_v57 = vmul.f32 2.1237322e-06, %v11782_v45 }
 0x41f   : > { %v3850_v20 = vand.u32 2147483648, %v3838_v28  ;;  %v3987_v49 = vadd.f32 1.1283791, %v3986_v26  ;;  %v4029_v38 = vmul.f32 3.8918573e-05, %v11782_v45  ;;  %vm3844_vm0 = vweird.f32 %v3838_v28 }
 0x420   : > { %v4695_v43 = vadd.f32 1.0, %v6965_v30  ;;  %v3996_v51 = vadd.f32 0.4994258, %v3995_v41  ;;  %v3863_v44 = vadd.f32 0.05243302, %v3862_v61  ;;  %v11816_v61 = vmul.f32 0.5, %v11617_v36 }
 0x421   : > { %v7709_v16 = vpop.eup %7708  ;;  %v3872_v63 = vadd.f32 0.014752088, %v3871_v8  ;;  %v4019_v17 = vadd.f32 0.00028619796, %v4018_v57  ;;  %v11800_v4 = vmul.f32 0.70710677, %v11793_v24  ;;  %v3828_v8 = vmul.f32 %v3827_v3, %v11605_v40 }
 0x422   : > { %v4795_v21 = vmul.f32 %v4695_v43, %v495_v13  ;;  %v3840_v15 = vmul.f32 %v7709_v16, %v3838_v28  ;;  %v3997_v22 = vmul.f32 %v3996_v51, %v11686_v32  ;;  %v3864_v2 = vmul.f32 %v3863_v44, %v11753_v29 }
 0x423   : > { %v3873_v47 = vmul.f32 %v3872_v63, %v11753_v29  ;;  %v4030_v25 = vadd.f32 0.001143296, %v4029_v38  ;;  %vm3845_vm1 = vweird.f32 %v7709_v16  ;;  %v4020_v12 = vmul.f32 %v4019_v17, %v11782_v45 }
 0x424   : > { %v11805_v33 = vpack.c.bf16 %v4795_v21, %v4791_v27  ;;  %v3841_v0 = vsub.f32 1.0, %v3840_v15  ;;  %v3998_v26 = vadd.f32 1.0, %v3997_v22  ;;  %v11810_v59 = vmul.f32 0.70710677, %v11797_v23  ;;  %vm11820_vm2 = vmor %vm3844_vm0, %vm3845_vm1 }
 0x425   : > { %v3874_v13 = vadd.f32 0.112945676, %v3873_v47  ;;  %v4031_v1 = vmul.f32 %v4030_v25, %v11782_v45  ;;  %v3865_v30 = vadd.f32 0.18741608, %v3864_v2  ;;  %v4021_v41 = vadd.f32 0.0036580483, %v4020_v12 }
 0x426   : > { %13153 = vst [vmem:[#allocation33_spill] sm:$0xff] %v11805_v33  ;;  %5791 = vmatmul.bf16.gmra.mxu3 %v11805_v33  ;;  %v3842_v32 = vmul.f32 %v7709_v16, %v3841_v0  ;;  %v3896_v27 = vmul.f32 %v11800_v4, %v11800_v4  ;;  %v3851_v43 = vor.u32 1.1754944e-38, %v3850_v20  ;;  %7710 = vrcp.f32 %v3998_v26 }
 0x427   : > { %vm3849_vm3 = vcmp.eq.f32.partialorder %v3848_v60, 8.507059e+37  ;;  %v3875_v51 = vmul.f32 %v3874_v13, %v11753_v29  ;;  %v4022_v44 = vmul.f32 %v4021_v41, %v11782_v45  ;;  %v11827_v63 = vmul.f32 %v3987_v49, %v11633_v39 }
 0x428   : > { %v3843_v38 = vadd.f32 %v7709_v16, %v3842_v32  ;;  %v4032_v36 = vadd.f32 0.014752088, %v4031_v1  ;;  %v11829_v21 = vmin.f32 %v3896_v27, 16.0  ;;  %v4056_v40 = vmul.f32 %v11810_v59, %v11810_v59 }
 0x429   : > { %v3866_v3 = vmul.f32 %v3865_v30, %v11753_v29  ;;  %v3876_v20 = vadd.f32 0.4994258, %v3875_v51  ;;  %v4023_v60 = vadd.f32 0.05243302, %v4022_v44  ;;  %v4008_v2 = vand.u32 2147483647, %v3998_v26 }
 0x42a   : > { %v3847_v28 = vsel %vm11820_vm2, %v7709_v16, %v3843_v38  ;;  %v4033_v17 = vmul.f32 %v4032_v36, %v11782_v45  ;;  %v3898_v22 = vmul.f32 2.1237322e-06, %v11829_v21  ;;  %v3909_v39 = vmul.f32 3.8918573e-05, %v11829_v21 }
 0x42b   : > { %v3852_v15 = vsel %vm3849_vm3, %v3851_v43, %v3847_v28  ;;  %v3877_v47 = vmul.f32 %v3876_v20, %v11753_v29  ;;  %v4024_v25 = vmul.f32 %v4023_v60, %v11782_v45  ;;  %vm4004_vm4 = vweird.f32 %v3998_v26 }
 0x42c   : > { %v3853_v49 = vmul.f32 %v3852_v15, %v3828_v8  ;;  %v7711_v0 = vpop.eup %7710  ;;  %v4010_v16 = vand.u32 2147483648, %v3998_v26  ;;  %v4034_v12 = vadd.f32 0.112945676, %v4033_v17  ;;  %v3899_v13 = vadd.f32 0.00028619796, %v3898_v22 }
 0x42d   : > { %v4000_v32 = vmul.f32 %v7711_v0, %v3998_v26  ;;  %v3867_v30 = vadd.f32 1.1283791, %v3866_v3  ;;  %v3878_v41 = vadd.f32 1.0, %v3877_v47  ;;  %v4025_v27 = vadd.f32 0.18741608, %v4024_v25 }
 0x42e   : > { %v6966_v1 = vclamps-f32 %v3853_v49, 1.0  ;;  %v4035_v57 = vmul.f32 %v4034_v12, %v11782_v45  ;;  %v3900_v43 = vmul.f32 %v3899_v13, %v11829_v21  ;;  %v3910_v8 = vadd.f32 0.001143296, %v3909_v39 }
 0x42f   : > { %v4001_v38 = vsub.f32 1.0, %v4000_v32  ;;  %vm4005_vm5 = vweird.f32 %v7711_v0  ;;  %vm11843_vm6 = vcmp.eq.f32.partialorder %v4008_v2, 8.507059e+37  ;;  %7712 = vrcp.f32 %v3878_v41  ;;  %v11870_v32 = vld [vmem:[%s8053_s10 + $0x2b8] sm:$0xff] }
 0x430   : > { %v4696_v51 = vadd.f32 1.0, %v6966_v1  ;;  %v3888_v44 = vand.u32 2147483647, %v3878_v41  ;;  %v3890_v36 = vand.u32 2147483648, %v3878_v41  ;;  %v4036_v28 = vadd.f32 0.4994258, %v4035_v57  ;;  %vm11849_vm7 = vmor %vm4004_vm4, %vm4005_vm5 }
 0x431   : > { %v4002_v20 = vmul.f32 %v7711_v0, %v4001_v38  ;;  %v4011_v3 = vor.u32 1.1754944e-38, %v4010_v16  ;;  %v3901_v60 = vadd.f32 0.0036580483, %v3900_v43  ;;  %v3911_v15 = vmul.f32 %v3910_v8, %v11829_v21 }
 0x432   : > { %v3868_v22 = vmul.f32 %v3867_v30, %v11689_v31  ;;  %vm3884_vm8 = vweird.f32 %v3878_v41  ;;  %v4026_v39 = vmul.f32 %v4025_v27, %v11782_v45  ;;  %v4037_v49 = vmul.f32 %v4036_v28, %v11782_v45  ;;  %v11867_v31 = vld [vmem:[%s8053_s10 + $0x298] sm:$0xff] }
 0x433   : > { %v4003_v2 = vadd.f32 %v7711_v0, %v4002_v20  ;;  %v3902_v47 = vmul.f32 %v3901_v60, %v11829_v21  ;;  %v3912_v25 = vadd.f32 0.014752088, %v3911_v15  ;;  %v11857_v16 = vmin.f32 %v4056_v40, 16.0 }
 0x434   : > { %v4796_v12 = vmul.f32 %v4696_v51, %v11786_v52  ;;  %vm11860_vm9 = vcmp.eq.f32.partialorder %v3888_v44, 8.507059e+37  ;;  %v3891_v13 = vor.u32 1.1754944e-38, %v3890_v36  ;;  %v11864_v1 = vadd.f32 1.0, %v4037_v49 }
 0x435   : > { %v7713_v45 = vpop.eup %7712  ;;  %v4007_v30 = vsel %vm11849_vm7, %v7711_v0, %v4003_v2  ;;  %v3903_v27 = vadd.f32 0.05243302, %v3902_v47  ;;  %v3913_v40 = vmul.f32 %v3912_v25, %v11829_v21  ;;  %v4058_v52 = vmul.f32 2.1237322e-06, %v11857_v16 }
 0x436   : > { %v4012_v57 = vsel %vm11843_vm6, %v4011_v3, %v4007_v30  ;;  %v3880_v43 = vmul.f32 %v7713_v45, %v3878_v41  ;;  %v4027_v8 = vadd.f32 1.1283791, %v4026_v39  ;;  %7714 = vrcp.f32 %v11864_v1 }
 0x437   : > { %v4013_v38 = vmul.f32 %v4012_v57, %v11827_v63  ;;  %vm3885_vm10 = vweird.f32 %v7713_v45  ;;  %v11881_v51 = vmul.f32 0.70710677, %v11867_v31  ;;  %v11884_v0 = vmul.f32 0.70710677, %v11870_v32 }
 0x438   : > { %v3881_v44 = vsub.f32 1.0, %v3880_v43  ;;  %v3904_v36 = vmul.f32 %v3903_v27, %v11829_v21  ;;  %v3914_v28 = vadd.f32 0.112945676, %v3913_v40  ;;  %v4059_v20 = vadd.f32 0.00028619796, %v4058_v52  ;;  %vm11894_vm12 = vmor %vm3884_vm8, %vm3885_vm10 }
 0x439   : > { %v6970_v29 = vclamps-f32 %v4013_v38, 1.0  ;;  %vm4044_vm11 = vweird.f32 %v11864_v1  ;;  %v4048_v3 = vand.u32 2147483647, %v11864_v1  ;;  %v4069_v60 = vmul.f32 3.8918573e-05, %v11857_v16 }
 0x43a   : > { %v3882_v63 = vmul.f32 %v7713_v45, %v3881_v44  ;;  %v3905_v15 = vadd.f32 0.18741608, %v3904_v36  ;;  %v3915_v17 = vmul.f32 %v3914_v28, %v11829_v21  ;;  %v4060_v39 = vmul.f32 %v4059_v20, %v11857_v16 }
 0x43b   : > { %v4700_v49 = vadd.f32 1.0, %v6970_v29  ;;  %v4050_v47 = vand.u32 2147483648, %v11864_v1  ;;  %v4070_v25 = vadd.f32 0.001143296, %v4069_v60  ;;  %v3936_v30 = vmul.f32 %v11881_v51, %v11881_v51 }
 0x43c   : > { %v7715_v27 = vpop.eup %7714  ;;  %v3883_v40 = vadd.f32 %v7713_v45, %v3882_v63  ;;  %v3906_v52 = vmul.f32 %v3905_v15, %v11829_v21  ;;  %v3916_v57 = vadd.f32 0.4994258, %v3915_v17  ;;  %v4061_v43 = vadd.f32 0.0036580483, %v4060_v39 }
 0x43d   : > { %v4800_v38 = vmul.f32 %v4700_v49, %v11816_v61  ;;  %v4040_v41 = vmul.f32 %v7715_v27, %v11864_v1  ;;  %v4071_v44 = vmul.f32 %v4070_v25, %v11857_v16  ;;  %v4096_v36 = vmul.f32 %v11884_v0, %v11884_v0 }
 0x43e   : > { %v3887_v28 = vsel %vm11894_vm12, %v7713_v45, %v3883_v40  ;;  %vm4045_vm13 = vweird.f32 %v7715_v27  ;;  %v3917_v20 = vmul.f32 %v3916_v57, %v11829_v21  ;;  %v4062_v29 = vmul.f32 %v4061_v43, %v11857_v16 }
 0x43f   : > { %v11911_v60 = vpack.c.bf16 %v4800_v38, %v4796_v12  ;;  %v3892_v61 = vsel %vm11860_vm9, %v3891_v13, %v3887_v28  ;;  %v4041_v63 = vsub.f32 1.0, %v4040_v41  ;;  %v4072_v15 = vadd.f32 0.014752088, %v4071_v44  ;;  %vm11921_vm14 = vmor %vm4044_vm11, %vm4045_vm13 }
 0x440   : > { %v3893_v17 = vmul.f32 %v3892_v61, %v3868_v22  ;;  %v3907_v39 = vadd.f32 1.1283791, %v3906_v52  ;;  %v3918_v49 = vadd.f32 1.0, %v3917_v20  ;;  %v4063_v25 = vadd.f32 0.05243302, %v4062_v29 }
 0x441   : > { %13164 = vst [vmem:[#allocation34_spill] sm:$0xff] %v11911_v60  ;;  %5577 = vmatmul.bf16.gmra.mxu0 %v11911_v60  ;;  %v4028_v45 = vmul.f32 %v4027_v8, %v11748_v34  ;;  %v4042_v2 = vmul.f32 %v7715_v27, %v4041_v63  ;;  %v4073_v21 = vmul.f32 %v4072_v15, %v11857_v16  ;;  %v4051_v26 = vor.u32 1.1754944e-38, %v4050_v47 }
 0x442   : > { %v6967_v40 = vclamps-f32 %v3893_v17, 1.0  ;;  %7716 = vrcp.f32 %v3918_v49  ;;  %v11925_v22 = vmin.f32 %v3936_v30, 16.0  ;;  %vm4049_vm15 = vcmp.eq.f32.partialorder %v4048_v3, 8.507059e+37 }
 0x443   : > { %v4043_v13 = vadd.f32 %v7715_v27, %v4042_v2  ;;  %v4064_v52 = vmul.f32 %v4063_v25, %v11857_v16  ;;  %v4074_v34 = vadd.f32 0.112945676, %v4073_v21  ;;  %v497_v8 = vmul.f32 0.5, %v11669_v37 }
 0x444   : > { %v501_v57 = vmul.f32 0.5, %v11734_v7  ;;  %v11931_v43 = vmul.f32 %v3907_v39, %v11800_v4  ;;  %v11933_v1 = vmin.f32 %v4096_v36, 16.0  ;;  %v4697_v38 = vadd.f32 1.0, %v6967_v40 }
 0x445   : > { %v4047_v47 = vsel %vm11921_vm14, %v7715_v27, %v4043_v13  ;;  %v4065_v30 = vadd.f32 0.18741608, %v4064_v52  ;;  %v4075_v41 = vmul.f32 %v4074_v34, %v11857_v16  ;;  %v3928_v44 = vand.u32 2147483647, %v3918_v49  ;;  %v11947_v52 = vld [vmem:[%s8053_s10 + $0x2c0] sm:$0xff] }
 0x446   : > { %v4052_v3 = vsel %vm4049_vm15, %v4051_v26, %v4047_v47  ;;  %v3938_v28 = vmul.f32 2.1237322e-06, %v11925_v22  ;;  %v3949_v37 = vmul.f32 3.8918573e-05, %v11925_v22  ;;  %v3930_v7 = vand.u32 2147483648, %v3918_v49 }
 0x447   : > { %v4053_v20 = vmul.f32 %v4052_v3, %v4028_v45  ;;  %v4076_v29 = vadd.f32 0.4994258, %v4075_v41  ;;  %v4098_v4 = vmul.f32 2.1237322e-06, %v11933_v1  ;;  %vm3924_vm0 = vweird.f32 %v3918_v49 }
 0x448   : > { %v7717_v36 = vpop.eup %7716  ;;  %v3939_v61 = vadd.f32 0.00028619796, %v3938_v28  ;;  %v3950_v27 = vadd.f32 0.001143296, %v3949_v37  ;;  %v4109_v63 = vmul.f32 3.8918573e-05, %v11933_v1  ;;  %v4797_v17 = vmul.f32 %v4697_v38, %v497_v8 }
 0x449   : > { %v6971_v15 = vclamps-f32 %v4053_v20, 1.0  ;;  %v3920_v39 = vmul.f32 %v7717_v36, %v3918_v49  ;;  %v4066_v25 = vmul.f32 %v4065_v30, %v11857_v16  ;;  %v4077_v2 = vmul.f32 %v4076_v29, %v11857_v16 }
 0x44a   : > { %v3940_v45 = vmul.f32 %v3939_v61, %v11925_v22  ;;  %v3951_v21 = vmul.f32 %v3950_v27, %v11925_v22  ;;  %v4099_v40 = vadd.f32 0.00028619796, %v4098_v4  ;;  %vm3925_vm1 = vweird.f32 %v7717_v36  ;;  %v5538_v4 = vpop.f32.mrf.mxu0 }
 0x44b   : > { %v4701_v12 = vadd.f32 1.0, %v6971_v15  ;;  %v3921_v26 = vsub.f32 1.0, %v3920_v39  ;;  %v4110_v13 = vadd.f32 0.001143296, %v4109_v63  ;;  %v4078_v34 = vadd.f32 1.0, %v4077_v2  ;;  %vm11952_vm2 = vmor %vm3924_vm0, %vm3925_vm1 }
 0x44c   : > { %v3941_v47 = vadd.f32 0.0036580483, %v3940_v45  ;;  %v3952_v41 = vadd.f32 0.014752088, %v3951_v21  ;;  %v4100_v8 = vmul.f32 %v4099_v40, %v11933_v1  ;;  %v4067_v3 = vadd.f32 1.1283791, %v4066_v25 }
 0x44d   : > { %v4801_v38 = vmul.f32 %v4701_v12, %v501_v57  ;;  %v3922_v30 = vmul.f32 %v7717_v36, %v3921_v26  ;;  %v4111_v16 = vmul.f32 %v4110_v13, %v11933_v1  ;;  %vm11956_vm3 = vcmp.eq.f32.partialorder %v3928_v44, 8.507059e+37  ;;  %v5611_v57 = vpop.f32.mrf.mxu1 }
 0x44e   : > { %v3931_v20 = vor.u32 1.1754944e-38, %v3930_v7  ;;  %7718 = vrcp.f32 %v4078_v34  ;;  %v11961_v29 = vmul.f32 0.70710677, %v11947_v52  ;;  %v3942_v49 = vmul.f32 %v3941_v47, %v11925_v22 }
 0x44f   : > { %v11963_v61 = vpack.c.bf16 %v4801_v38, %v4797_v17  ;;  %v3923_v27 = vadd.f32 %v7717_v36, %v3922_v30  ;;  %v3953_v63 = vmul.f32 %v3952_v41, %v11925_v22  ;;  %v5612_v15 = vadd.f32 %v5611_v57, %v5538_v4  ;;  %v11990_v4 = vld [vmem:[%s8053_s10 + $0x2e0] sm:$0xff] }
 0x450   : > { %v11968_v44 = vmul.f32 0.5, %v11793_v24  ;;  %v4101_v39 = vadd.f32 0.0036580483, %v4100_v8  ;;  %v4112_v25 = vadd.f32 0.014752088, %v4111_v16  ;;  %v11974_v2 = vmul.f32 %v4067_v3, %v11810_v59 }
 0x451   : > { %13171 = vst [vmem:[#allocation35_spill] sm:$0xff] %v11963_v61  ;;  %5650 = vmatmul.bf16.gmra.mxu1 %v11963_v61  ;;  %v3927_v7 = vsel %vm11952_vm2, %v7717_v36, %v3923_v27  ;;  %v3943_v17 = vadd.f32 0.05243302, %v3942_v49  ;;  %v3954_v45 = vadd.f32 0.112945676, %v3953_v63  ;;  %v4136_v12 = vmul.f32 %v11961_v29, %v11961_v29 }
 0x452   : > { %v3932_v21 = vsel %vm11956_vm3, %v3931_v20, %v3927_v7  ;;  %v4102_v40 = vmul.f32 %v4101_v39, %v11933_v1  ;;  %v4113_v24 = vmul.f32 %v4112_v25, %v11933_v1  ;;  %v4088_v13 = vand.u32 2147483647, %v4078_v34  ;;  %v12381_v61 = vld [vmem:[%s8053_s10 + $0x310] sm:$0xf] }
 0x453   : > { %v3933_v26 = vmul.f32 %v3932_v21, %v11931_v43  ;;  %v3944_v36 = vmul.f32 %v3943_v17, %v11925_v22  ;;  %v3955_v59 = vmul.f32 %v3954_v45, %v11925_v22  ;;  %vm4084_vm4 = vweird.f32 %v4078_v34 }
 0x454   : > { %v7719_v47 = vpop.eup %7718  ;;  %v4103_v41 = vadd.f32 0.05243302, %v4102_v40  ;;  %v4114_v8 = vadd.f32 0.112945676, %v4113_v24  ;;  %v11985_v38 = vmin.f32 %v4136_v12, 16.0  ;;  %v4090_v16 = vand.u32 2147483648, %v4078_v34 }
 0x455   : > { %v6968_v30 = vclamps-f32 %v3933_v26, 1.0  ;;  %v4080_v3 = vmul.f32 %v7719_v47, %v4078_v34  ;;  %v3945_v28 = vadd.f32 0.18741608, %v3944_v36  ;;  %v3956_v37 = vadd.f32 0.4994258, %v3955_v59 }
 0x456   : > { %v4104_v20 = vmul.f32 %v4103_v41, %v11933_v1  ;;  %v4115_v43 = vmul.f32 %v4114_v8, %v11933_v1  ;;  %v4138_v57 = vmul.f32 2.1237322e-06, %v11985_v38  ;;  %vm4085_vm5 = vweird.f32 %v7719_v47  ;;  %v7132_v59 = vld [vmem:[%s8060_s18 + $0x120] sm:$0xf]  ;;  %v7415_v41 = vld [vmem:[%s8060_s18 + $0x12c] sm:$0xf0]  ;;  %v5684_v8 = vpop.f32.mrf.mxu2 }
 0x457   : > { %v4081_v27 = vsub.f32 1.0, %v4080_v3  ;;  %vm11993_vm6 = vcmp.eq.f32.partialorder %v4088_v13, 8.507059e+37  ;;  %v3946_v63 = vmul.f32 %v3945_v28, %v11925_v22  ;;  %v3957_v39 = vmul.f32 %v3956_v37, %v11925_v22  ;;  %vm12004_vm7 = vmor %vm4084_vm4, %vm4085_vm5  ;;  %v5757_v3 = vpop.f32.mrf.mxu3  ;;  %v7134_v34 = vld [vmem:[%s8060_s18 + $0x130] sm:$0xf0] }
 0x458   : > { %v4105_v25 = vadd.f32 0.18741608, %v4104_v20  ;;  %v4116_v7 = vadd.f32 0.4994258, %v4115_v43  ;;  %v4139_v17 = vadd.f32 0.00028619796, %v4138_v57  ;;  %v7133_v37 = vor.u32 %v7415_v41, %v7132_v59  ;;  %v5540_v59 = vpop.f32.mrf.mxu0  ;;  %v5613_v41 = vpop.f32.mrf.mxu1 }
 0x459   : > { %v4082_v45 = vmul.f32 %v7719_v47, %v4081_v27  ;;  %v4091_v21 = vor.u32 1.1754944e-38, %v4090_v16  ;;  %v12000_v40 = vmul.f32 0.70710677, %v11990_v4  ;;  %v4149_v24 = vmul.f32 3.8918573e-05, %v11985_v38 }
 0x45a   : > { %v4698_v26 = vadd.f32 1.0, %v6968_v30  ;;  %v12008_v13 = vadd.f32 1.0, %v3957_v39  ;;  %v4106_v22 = vmul.f32 %v4105_v25, %v11933_v1  ;;  %v4117_v36 = vmul.f32 %v4116_v7, %v11933_v1  ;;  %v7413_v20 = vld [vmem:[%s8060_s18 + $0x124] sm:$0xf]  ;;  %5817 = vmatpush.bf16.xpose.msrb.mxu0 %v7133_v37 }
 0x45b   : > { %v4083_v16 = vadd.f32 %v7719_v47, %v4082_v45  ;;  %v3947_v28 = vadd.f32 1.1283791, %v3946_v63  ;;  %v5685_v43 = vadd.f32 %v5684_v8, %v5612_v15  ;;  %v4140_v27 = vmul.f32 %v4139_v17, %v11985_v38  ;;  %v4828_v7 = vld [vmem:[#allocation8 + $0x60] sm:$0xff] }
 0x45c   : > { %7720 = vrcp.f32 %v12008_v13  ;;  %v3968_v30 = vand.u32 2147483647, %v12008_v13  ;;  %v3970_v57 = vand.u32 2147483648, %v12008_v13  ;;  %v4107_v39 = vadd.f32 1.1283791, %v4106_v22 }
 0x45d   : > { %v4087_v1 = vsel %vm12004_vm7, %v7719_v47, %v4083_v16  ;;  %v12022_v25 = vadd.f32 1.0, %v4117_v36  ;;  %v7137_v63 = vor.u32 %v7413_v20, %v7134_v34  ;;  %v5758_v45 = vadd.f32 %v5757_v3, %v5685_v43  ;;  %v4831_v43 = vld [vmem:[#allocation8 + $0x78] sm:$0xff] }
 0x45e   : > { %v4092_v15 = vsel %vm11993_vm6, %v4091_v21, %v4087_v1  ;;  %v4150_v8 = vadd.f32 0.001143296, %v4149_v24  ;;  %v4296_v33 = vmul.f32 %v12000_v40, %v12000_v40  ;;  %v502_v17 = vmul.f32 0.5, %v11797_v23  ;;  %v5686_v3 = vpop.f32.mrf.mxu2 }
 0x45f   : > { %v4093_v47 = vmul.f32 %v4092_v15, %v11974_v2  ;;  %v4798_v12 = vmul.f32 %v4698_v26, %v11968_v44  ;;  %7722 = vrcp.f32 %v12022_v25  ;;  %5890 = vmatpush.bf16.xpose.msrb.mxu1 %v7137_v63  ;;  %v12033_v22 = vmul.f32 %v3947_v28, %v11881_v51 }
 0x460   : > { %vm3964_vm8 = vweird.f32 %v12008_v13  ;;  %v3971_v49 = vor.u32 1.1754944e-38, %v3970_v57  ;;  %v6407_v21 = vadd.f32 %v5758_v45, %v4828_v7  ;;  %vm12036_vm9 = vcmp.eq.f32.partialorder %v3968_v30, 8.507059e+37  ;;  %v5759_v30 = vpop.f32.mrf.mxu3 }
 0x461   : > { %v6972_v24 = vclamps-f32 %v4093_v47, 1.0  ;;  %v12041_v23 = vmul.f32 %v4107_v39, %v11884_v0  ;;  %v5614_v2 = vadd.f32 %v5613_v41, %v5540_v59  ;;  %v4141_v44 = vadd.f32 0.0036580483, %v4140_v27  ;;  %v12059_v47 = vld [vmem:[%s8053_s10 + $0x2e8] sm:$0xff] }
 0x462   : > { %v7721_v26 = vpop.eup %7720  ;;  %vm4124_vm10 = vweird.f32 %v12022_v25  ;;  %v4128_v51 = vand.u32 2147483647, %v12022_v25  ;;  %6482 = vst [vmem:[#allocation8 + $0x60] sm:$0xff] %v6407_v21  ;;  %v4151_v16 = vmul.f32 %v4150_v8, %v11985_v38  ;;  %v12046_v28 = vmin.f32 %v4296_v33, 16.0  ;;  %v12056_v8 = vld [vmem:[%s8053_s10 + $0x2c8] sm:$0xff] }
 0x463   : > { %v4702_v37 = vadd.f32 1.0, %v6972_v24  ;;  %v3960_v20 = vmul.f32 %v7721_v26, %v12008_v13  ;;  %v4130_v34 = vand.u32 2147483648, %v12022_v25  ;;  %v5687_v0 = vadd.f32 %v5686_v3, %v5614_v2 }
 0x464   : > { %vm3965_vm11 = vweird.f32 %v7721_v26  ;;  %v4142_v57 = vmul.f32 %v4141_v44, %v11985_v38  ;;  %v4152_v27 = vadd.f32 0.014752088, %v4151_v16  ;;  %v4298_v1 = vmul.f32 2.1237322e-06, %v12046_v28 }
 0x465   : > { %v7723_v39 = vpop.eup %7722  ;;  %v4802_v63 = vmul.f32 %v4702_v37, %v502_v17  ;;  %v3961_v33 = vsub.f32 1.0, %v3960_v20  ;;  %v5760_v7 = vadd.f32 %v5759_v30, %v5687_v0  ;;  %v4309_v15 = vmul.f32 3.8918573e-05, %v12046_v28  ;;  %vm12066_vm13 = vmor %vm3964_vm8, %vm3965_vm11 }
 0x466   : > { %v4120_v45 = vmul.f32 %v7723_v39, %v12022_v25  ;;  %vm4125_vm12 = vweird.f32 %v7723_v39  ;;  %v4143_v59 = vadd.f32 0.05243302, %v4142_v57  ;;  %v4153_v41 = vmul.f32 %v4152_v27, %v11985_v38 }
 0x467   : > { %v12061_v21 = vpack.c.bf16 %v4802_v63, %v4798_v12  ;;  %v3962_v24 = vmul.f32 %v7721_v26, %v3961_v33  ;;  %v6410_v2 = vadd.f32 %v5760_v7, %v4831_v43  ;;  %v4299_v44 = vadd.f32 0.00028619796, %v4298_v1  ;;  %vm12086_vm14 = vmor %vm4124_vm10, %vm4125_vm12 }
 0x468   : > { %v4121_v3 = vsub.f32 1.0, %v4120_v45  ;;  %v4144_v16 = vmul.f32 %v4143_v59, %v11985_v38  ;;  %v4154_v37 = vadd.f32 0.112945676, %v4153_v41  ;;  %v4310_v20 = vadd.f32 0.001143296, %v4309_v15 }
 0x469   : > { %13178 = vst [vmem:[#allocation36_spill] sm:$0xff] %v12061_v21  ;;  %5723 = vmatmul.bf16.gmra.mxu2 %v12061_v21  ;;  %v3963_v0 = vadd.f32 %v7721_v26, %v3962_v24  ;;  %v4300_v12 = vmul.f32 %v4299_v44, %v12046_v28  ;;  %v12074_v43 = vmul.f32 0.70710677, %v12056_v8  ;;  %v12077_v13 = vmul.f32 0.70710677, %v12059_v47 }
 0x46a   : > { %6485 = vst [vmem:[#allocation8 + $0x78] sm:$0xff] %v6410_v2  ;;  %v4122_v30 = vmul.f32 %v7723_v39, %v4121_v3  ;;  %v4145_v57 = vadd.f32 0.18741608, %v4144_v16  ;;  %v4155_v27 = vmul.f32 %v4154_v37, %v11985_v38  ;;  %v4311_v1 = vmul.f32 %v4310_v20, %v12046_v28  ;;  %v7118_v21 = vld [vmem:[%s8060_s18 + $0x110] sm:$0xf0] }
 0x46b   : > { %v3967_v63 = vsel %vm12066_vm13, %v7721_v26, %v3963_v0  ;;  %vm4129_vm15 = vcmp.eq.f32.partialorder %v4128_v51, 8.507059e+37  ;;  %v4131_v7 = vor.u32 1.1754944e-38, %v4130_v34  ;;  %v4301_v15 = vadd.f32 0.0036580483, %v4300_v12 }
 0x46c   : > { %v3972_v45 = vsel %vm12036_vm9, %v3971_v49, %v3967_v63  ;;  %v4123_v59 = vadd.f32 %v7723_v39, %v4122_v30  ;;  %v4156_v41 = vadd.f32 0.4994258, %v4155_v27  ;;  %v4176_v24 = vmul.f32 %v12074_v43, %v12074_v43 }
 0x46d   : > { %v3973_v26 = vmul.f32 %v3972_v45, %v12033_v22  ;;  %v4146_v2 = vmul.f32 %v4145_v57, %v11985_v38  ;;  %v4302_v25 = vmul.f32 %v4301_v15, %v12046_v28  ;;  %v4312_v44 = vadd.f32 0.014752088, %v4311_v1 }
 0x46e   : > { %v4127_v51 = vsel %vm12086_vm14, %v7723_v39, %v4123_v59  ;;  %v4157_v34 = vmul.f32 %v4156_v41, %v11985_v38  ;;  %v4336_v49 = vmul.f32 %v12077_v13, %v12077_v13  ;;  %v499_v22 = vmul.f32 0.5, %v11867_v31 }
 0x46f   : > { %v6969_v36 = vclamps-f32 %v3973_v26, 1.0  ;;  %v4132_v17 = vsel %vm4129_vm15, %v4131_v7, %v4127_v51  ;;  %v4303_v3 = vadd.f32 0.05243302, %v4302_v25  ;;  %v4313_v16 = vmul.f32 %v4312_v44, %v12046_v28 }
 0x470   : > { %v4133_v37 = vmul.f32 %v4132_v17, %v12041_v23  ;;  %v4158_v20 = vadd.f32 1.0, %v4157_v34  ;;  %v12105_v0 = vmin.f32 %v4176_v24, 16.0  ;;  %v4147_v30 = vadd.f32 1.1283791, %v4146_v2 }
 0x471   : > { %v4699_v12 = vadd.f32 1.0, %v6969_v36  ;;  %v4304_v39 = vmul.f32 %v4303_v3, %v12046_v28  ;;  %v4314_v38 = vadd.f32 0.112945676, %v4313_v16  ;;  %v503_v57 = vmul.f32 0.5, %v11870_v32 }
 0x472   : > { %v6973_v27 = vclamps-f32 %v4133_v37, 1.0  ;;  %7724 = vrcp.f32 %v4158_v20  ;;  %v12109_v1 = vmin.f32 %v4336_v49, 16.0  ;;  %v4178_v23 = vmul.f32 2.1237322e-06, %v12105_v0 }
 0x473   : > { %v4305_v63 = vadd.f32 0.18741608, %v4304_v39  ;;  %v4315_v33 = vmul.f32 %v4314_v38, %v12046_v28  ;;  %v4799_v7 = vmul.f32 %v4699_v12, %v499_v22  ;;  %v4189_v15 = vmul.f32 3.8918573e-05, %v12105_v0  ;;  %v12127_v12 = vld [vmem:[%s8053_s10 + $0x2d0] sm:$0xff] }
 0x474   : > { %v4703_v31 = vadd.f32 1.0, %v6973_v27  ;;  %v12115_v45 = vmul.f32 0.5, %v11947_v52  ;;  %v4148_v59 = vmul.f32 %v4147_v30, %v11961_v29  ;;  %v4338_v32 = vmul.f32 2.1237322e-06, %v12109_v1 }
 0x475   : > { %v4316_v41 = vadd.f32 0.4994258, %v4315_v33  ;;  %v4179_v26 = vadd.f32 0.00028619796, %v4178_v23  ;;  %v4190_v2 = vadd.f32 0.001143296, %v4189_v15  ;;  %vm4164_vm0 = vweird.f32 %v4158_v20 }
 0x476   : > { %v4803_v24 = vmul.f32 %v4703_v31, %v503_v57  ;;  %v4349_v25 = vmul.f32 3.8918573e-05, %v12109_v1  ;;  %v4306_v44 = vmul.f32 %v4305_v63, %v12046_v28  ;;  %v4339_v34 = vadd.f32 0.00028619796, %v4338_v32 }
 0x477   : > { %v4317_v51 = vmul.f32 %v4316_v41, %v12046_v28  ;;  %v4180_v29 = vmul.f32 %v4179_v26, %v12105_v0  ;;  %v4191_v36 = vmul.f32 %v4190_v2, %v12105_v0  ;;  %v4168_v16 = vand.u32 2147483647, %v4158_v20 }
 0x478   : > { %v7725_v49 = vpop.eup %7724  ;;  %v12122_v52 = vpack.c.bf16 %v4803_v24, %v4799_v7  ;;  %v4350_v17 = vadd.f32 0.001143296, %v4349_v25  ;;  %v4170_v22 = vand.u32 2147483648, %v4158_v20  ;;  %v4340_v28 = vmul.f32 %v4339_v34, %v12109_v1 }
 0x479   : > { %v4160_v3 = vmul.f32 %v7725_v49, %v4158_v20  ;;  %v4318_v37 = vadd.f32 1.0, %v4317_v51  ;;  %v4181_v30 = vadd.f32 0.0036580483, %v4180_v29  ;;  %v4192_v39 = vadd.f32 0.014752088, %v4191_v36  ;;  %v12150_v36 = vld [vmem:[%s8053_s10 + $0x2f0] sm:$0xff] }
 0x47a   : > { %13183 = vst [vmem:[#allocation37_spill] sm:$0xff] %v12122_v52  ;;  %5796 = vmatmul.bf16.gmra.mxu3 %v12122_v52  ;;  %v4351_v38 = vmul.f32 %v4350_v17, %v12109_v1  ;;  %vm4165_vm1 = vweird.f32 %v7725_v49  ;;  %v4307_v27 = vadd.f32 1.1283791, %v4306_v44  ;;  %v4341_v31 = vadd.f32 0.0036580483, %v4340_v28 }
 0x47b   : > { %v4161_v57 = vsub.f32 1.0, %v4160_v3  ;;  %7726 = vrcp.f32 %v4318_v37  ;;  %v4182_v63 = vmul.f32 %v4181_v30, %v12105_v0  ;;  %v4193_v33 = vmul.f32 %v4192_v39, %v12105_v0  ;;  %vm12142_vm3 = vmor %vm4164_vm0, %vm4165_vm1 }
 0x47c   : > { %v12135_v7 = vmul.f32 0.70710677, %v12127_v12  ;;  %vm12137_vm2 = vcmp.eq.f32.partialorder %v4168_v16, 8.507059e+37  ;;  %v4328_v41 = vand.u32 2147483647, %v4318_v37  ;;  %v4171_v26 = vor.u32 1.1754944e-38, %v4170_v22 }
 0x47d   : > { %v4162_v23 = vmul.f32 %v7725_v49, %v4161_v57  ;;  %v4352_v32 = vadd.f32 0.014752088, %v4351_v38  ;;  %v4183_v2 = vadd.f32 0.05243302, %v4182_v63  ;;  %v4194_v25 = vadd.f32 0.112945676, %v4193_v33 }
 0x47e   : > { %v4342_v44 = vmul.f32 %v4341_v31, %v12109_v1  ;;  %v4308_v34 = vmul.f32 %v4307_v27, %v12000_v40  ;;  %vm4324_vm4 = vweird.f32 %v4318_v37  ;;  %v4216_v16 = vmul.f32 %v12135_v7, %v12135_v7 }
 0x47f   : > { %v4163_v51 = vadd.f32 %v7725_v49, %v4162_v23  ;;  %v4353_v29 = vmul.f32 %v4352_v32, %v12109_v1  ;;  %v4184_v17 = vmul.f32 %v4183_v2, %v12105_v0  ;;  %v4195_v20 = vmul.f32 %v4194_v25, %v12105_v0 }
 0x480   : > { %v4343_v3 = vadd.f32 0.05243302, %v4342_v44  ;;  %vm12158_vm5 = vcmp.eq.f32.partialorder %v4328_v41, 8.507059e+37  ;;  %v4330_v40 = vand.u32 2147483648, %v4318_v37  ;;  %v12165_v63 = vmul.f32 0.70710677, %v12150_v36 }
 0x481   : > { %v7727_v22 = vpop.eup %7726  ;;  %v4167_v30 = vsel %vm12142_vm3, %v7725_v49, %v4163_v51  ;;  %v4354_v28 = vadd.f32 0.112945676, %v4353_v29  ;;  %v4185_v27 = vadd.f32 0.18741608, %v4184_v17  ;;  %v4196_v31 = vadd.f32 0.4994258, %v4195_v20 }
 0x482   : > { %v4172_v38 = vsel %vm12137_vm2, %v4171_v26, %v4167_v30  ;;  %v4320_v57 = vmul.f32 %v7727_v22, %v4318_v37  ;;  %v4344_v23 = vmul.f32 %v4343_v3, %v12109_v1  ;;  %vm4325_vm6 = vweird.f32 %v7727_v22 }
 0x483   : > { %v4173_v33 = vmul.f32 %v4172_v38, %v4148_v59  ;;  %v4355_v49 = vmul.f32 %v4354_v28, %v12109_v1  ;;  %v4186_v32 = vmul.f32 %v4185_v27, %v12105_v0  ;;  %v12170_v24 = vmin.f32 %v4216_v16, 16.0  ;;  %vm12176_vm7 = vmor %vm4324_vm4, %vm4325_vm6 }
 0x484   : > { %v4321_v41 = vsub.f32 1.0, %v4320_v57  ;;  %v4197_v15 = vmul.f32 %v4196_v31, %v12105_v0  ;;  %v4345_v26 = vadd.f32 0.18741608, %v4344_v23  ;;  %v4331_v51 = vor.u32 1.1754944e-38, %v4330_v40 }
 0x485   : > { %v6974_v2 = vclamps-f32 %v4173_v33, 1.0  ;;  %v4356_v25 = vadd.f32 0.4994258, %v4355_v49  ;;  %v4218_v59 = vmul.f32 2.1237322e-06, %v12170_v24  ;;  %v4376_v0 = vmul.f32 %v12165_v63, %v12165_v63  ;;  %v12186_v33 = vld [vmem:[%s8053_s10 + $0x2d8] sm:$0xff] }
 0x486   : > { %v4322_v44 = vmul.f32 %v7727_v22, %v4321_v41  ;;  %v4229_v29 = vmul.f32 3.8918573e-05, %v12170_v24  ;;  %v4198_v20 = vadd.f32 1.0, %v4197_v15  ;;  %v4346_v3 = vmul.f32 %v4345_v26, %v12109_v1 }
 0x487   : > { %v4357_v16 = vmul.f32 %v4356_v25, %v12109_v1  ;;  %v4187_v40 = vadd.f32 1.1283791, %v4186_v32  ;;  %v4219_v28 = vadd.f32 0.00028619796, %v4218_v59  ;;  %v508_v57 = vmul.f32 0.5, %v11990_v4 }
 0x488   : > { %v4323_v30 = vadd.f32 %v7727_v22, %v4322_v44  ;;  %v4230_v38 = vadd.f32 0.001143296, %v4229_v29  ;;  %v4704_v27 = vadd.f32 1.0, %v6974_v2  ;;  %7728 = vrcp.f32 %v4198_v20 }
 0x489   : > { %v4208_v37 = vand.u32 2147483647, %v4198_v20  ;;  %v4210_v23 = vand.u32 2147483648, %v4198_v20  ;;  %v4347_v49 = vadd.f32 1.1283791, %v4346_v3  ;;  %v4358_v1 = vadd.f32 1.0, %v4357_v16 }
 0x48a   : > { %v4327_v31 = vsel %vm12176_vm7, %v7727_v22, %v4323_v30  ;;  %v4220_v32 = vmul.f32 %v4219_v28, %v12170_v24  ;;  %v4231_v15 = vmul.f32 %v4230_v38, %v12170_v24  ;;  %v12194_v26 = vmin.f32 %v4376_v0, 16.0 }
 0x48b   : > { %v4332_v41 = vsel %vm12158_vm5, %v4331_v51, %v4327_v31  ;;  %v4188_v2 = vmul.f32 %v4187_v40, %v12074_v43  ;;  %7730 = vrcp.f32 %v4358_v1  ;;  %v12198_v25 = vmul.f32 0.70710677, %v12186_v33 }
 0x48c   : > { %v4333_v4 = vmul.f32 %v4332_v41, %v4308_v34  ;;  %v4804_v22 = vmul.f32 %v4704_v27, %v12115_v45  ;;  %vm4204_vm8 = vweird.f32 %v4198_v20  ;;  %v4211_v44 = vor.u32 1.1754944e-38, %v4210_v23 }
 0x48d   : > { %v4221_v59 = vadd.f32 0.0036580483, %v4220_v32  ;;  %vm12201_vm9 = vcmp.eq.f32.partialorder %v4208_v37, 8.507059e+37  ;;  %v12206_v29 = vmul.f32 %v4347_v49, %v12077_v13  ;;  %v4232_v34 = vadd.f32 0.014752088, %v4231_v15 }
 0x48e   : > { %v6978_v39 = vclamps-f32 %v4333_v4, 1.0  ;;  %v4378_v43 = vmul.f32 2.1237322e-06, %v12194_v26  ;;  %v7729_v17 = vpop.eup %7728  ;;  %vm4364_vm10 = vweird.f32 %v4358_v1  ;;  %v4368_v3 = vand.u32 2147483647, %v4358_v1 }
 0x48f   : > { %v4222_v16 = vmul.f32 %v4221_v59, %v12170_v24  ;;  %v4389_v45 = vmul.f32 3.8918573e-05, %v12194_v26  ;;  %v4200_v30 = vmul.f32 %v7729_v17, %v4198_v20  ;;  %v4370_v40 = vand.u32 2147483648, %v4358_v1 }
 0x490   : > { %v4708_v0 = vadd.f32 1.0, %v6978_v39  ;;  %v4233_v28 = vmul.f32 %v4232_v34, %v12170_v24  ;;  %v4379_v27 = vadd.f32 0.00028619796, %v4378_v43  ;;  %v4256_v37 = vmul.f32 %v12198_v25, %v12198_v25 }
 0x491   : > { %v4223_v38 = vadd.f32 0.05243302, %v4222_v16  ;;  %v4390_v13 = vadd.f32 0.001143296, %v4389_v45  ;;  %v7731_v31 = vpop.eup %7730  ;;  %v4201_v49 = vsub.f32 1.0, %v4200_v30  ;;  %vm4205_vm11 = vweird.f32 %v7729_v17  ;;  %v12221_v16 = vld [vmem:[%s8053_s10 + $0x2f8] sm:$0xff] }
 0x492   : > { %v4808_v23 = vmul.f32 %v4708_v0, %v508_v57  ;;  %v4234_v41 = vadd.f32 0.112945676, %v4233_v28  ;;  %v4360_v32 = vmul.f32 %v7731_v31, %v4358_v1  ;;  %vm4365_vm12 = vweird.f32 %v7731_v31  ;;  %vm12224_vm13 = vmor %vm4204_vm8, %vm4205_vm11 }
 0x493   : > { %v4224_v15 = vmul.f32 %v4223_v38, %v12170_v24  ;;  %v4380_v4 = vmul.f32 %v4379_v27, %v12194_v26  ;;  %v4202_v39 = vmul.f32 %v7729_v17, %v4201_v49  ;;  %v4391_v43 = vmul.f32 %v4390_v13, %v12194_v26  ;;  %vm12241_vm15 = vmor %vm4364_vm10, %vm4365_vm12 }
 0x494   : > { %v12216_v59 = vpack.c.bf16 %v4808_v23, %v4804_v22  ;;  %v4235_v34 = vmul.f32 %v4234_v41, %v12170_v24  ;;  %v4361_v45 = vsub.f32 1.0, %v4360_v32  ;;  %v12228_v28 = vmin.f32 %v4256_v37, 16.0 }
 0x495   : > { %v4225_v0 = vadd.f32 0.18741608, %v4224_v15  ;;  %v4381_v30 = vadd.f32 0.0036580483, %v4380_v4  ;;  %v4203_v22 = vadd.f32 %v7729_v17, %v4202_v39  ;;  %vm12231_vm14 = vcmp.eq.f32.partialorder %v4368_v3, 8.507059e+37 }
 0x496   : > { %13194 = vst [vmem:[#allocation38_spill] sm:$0xff] %v12216_v59  ;;  %5582 = vmatmul.bf16.gmra.mxu0 %v12216_v59  ;;  %v4236_v27 = vadd.f32 0.4994258, %v4235_v34  ;;  %v4392_v13 = vadd.f32 0.014752088, %v4391_v43  ;;  %v4362_v23 = vmul.f32 %v7731_v31, %v4361_v45  ;;  %v4371_v20 = vor.u32 1.1754944e-38, %v4370_v40 }
 0x497   : > { %v4382_v49 = vmul.f32 %v4381_v30, %v12194_v26  ;;  %v4258_v41 = vmul.f32 2.1237322e-06, %v12228_v28  ;;  %v4207_v32 = vsel %vm12224_vm13, %v7729_v17, %v4203_v22  ;;  %v12248_v4 = vmul.f32 0.70710677, %v12221_v16 }
 0x498   : > { %v4237_v3 = vmul.f32 %v4236_v27, %v12170_v24  ;;  %v4393_v15 = vmul.f32 %v4392_v13, %v12194_v26  ;;  %v4212_v40 = vsel %vm12201_vm9, %v4211_v44, %v4207_v32  ;;  %v4363_v39 = vadd.f32 %v7731_v31, %v4362_v23 }
 0x499   : > { %v4226_v34 = vmul.f32 %v4225_v0, %v12170_v24  ;;  %v4383_v17 = vadd.f32 0.05243302, %v4382_v49  ;;  %v4213_v43 = vmul.f32 %v4212_v40, %v4188_v2  ;;  %v4259_v45 = vadd.f32 0.00028619796, %v4258_v41  ;;  %v12266_v41 = vld [vmem:[%s8053_s10 + $0x300] sm:$0xf] }
 0x49a   : > { %v4238_v1 = vadd.f32 1.0, %v4237_v3  ;;  %v4394_v57 = vadd.f32 0.112945676, %v4393_v15  ;;  %v4367_v30 = vsel %vm12241_vm15, %v7731_v31, %v4363_v39  ;;  %v4269_v44 = vmul.f32 3.8918573e-05, %v12228_v28 }
 0x49b   : > { %v4384_v22 = vmul.f32 %v4383_v17, %v12194_v26  ;;  %v6975_v27 = vclamps-f32 %v4213_v43, 1.0  ;;  %v4372_v13 = vsel %vm12231_vm14, %v4371_v20, %v4367_v30  ;;  %v505_v24 = vmul.f32 0.5, %v12056_v8 }
 0x49c   : > { %7732 = vrcp.f32 %v4238_v1  ;;  %v4373_v2 = vmul.f32 %v4372_v13, %v12206_v29  ;;  %v4416_v51 = vmul.f32 %v12248_v4, %v12248_v4  ;;  %v4227_v23 = vadd.f32 1.1283791, %v4226_v34 }
 0x49d   : > { %v4705_v0 = vadd.f32 1.0, %v6975_v27  ;;  %v4395_v31 = vmul.f32 %v4394_v57, %v12194_v26  ;;  %v4260_v49 = vmul.f32 %v4259_v45, %v12228_v28  ;;  %v509_v38 = vmul.f32 0.5, %v12059_v47 }
 0x49e   : > { %v6979_v20 = vclamps-f32 %v4373_v2, 1.0  ;;  %v4248_v32 = vand.u32 2147483647, %v4238_v1  ;;  %v4385_v37 = vadd.f32 0.18741608, %v4384_v22  ;;  %vm4244_vm0 = vweird.f32 %v4238_v1 }
 0x49f   : > { %v4396_v8 = vadd.f32 0.4994258, %v4395_v31  ;;  %v4261_v3 = vadd.f32 0.0036580483, %v4260_v49  ;;  %v4270_v29 = vadd.f32 0.001143296, %v4269_v44  ;;  %v4805_v40 = vmul.f32 %v4705_v0, %v505_v24  ;;  %v5616_v0 = vpop.f32.mrf.mxu1 }
 0x4a0   : > { %v4709_v15 = vadd.f32 1.0, %v6979_v20  ;;  %v12269_v39 = vmin.f32 %v4416_v51, 16.0  ;;  %v12272_v34 = vmul.f32 0.70710677, %v12266_v41  ;;  %v4250_v43 = vand.u32 2147483648, %v4238_v1  ;;  %v5543_v51 = vpop.f32.mrf.mxu0 }
 0x4a1   : > { %v4397_v57 = vmul.f32 %v4396_v8, %v12194_v26  ;;  %v4262_v47 = vmul.f32 %v4261_v3, %v12228_v28  ;;  %v4271_v45 = vmul.f32 %v4270_v29, %v12228_v28  ;;  %v4386_v27 = vmul.f32 %v4385_v37, %v12194_v26 }
 0x4a2   : > { %v7733_v17 = vpop.eup %7732  ;;  %v4809_v30 = vmul.f32 %v4709_v15, %v509_v38  ;;  %v4456_v2 = vmul.f32 %v12272_v34, %v12272_v34  ;;  %v4418_v20 = vmul.f32 2.1237322e-06, %v12269_v39  ;;  %v4429_v38 = vmul.f32 3.8918573e-05, %v12269_v39 }
 0x4a3   : > { %v4240_v22 = vmul.f32 %v7733_v17, %v4238_v1  ;;  %vm4245_vm1 = vweird.f32 %v7733_v17  ;;  %v12278_v13 = vadd.f32 1.0, %v4397_v57  ;;  %v4263_v44 = vadd.f32 0.05243302, %v4262_v47 }
 0x4a4   : > { %v4272_v24 = vadd.f32 0.014752088, %v4271_v45  ;;  %v12282_v31 = vpack.c.bf16 %v4809_v30, %v4805_v40  ;;  %v12286_v8 = vadd.f32 %v5616_v0, %v5543_v51  ;;  %v4228_v26 = vmul.f32 %v4227_v23, %v12135_v7  ;;  %v12297_v40 = vld [vmem:[%s8053_s10 + $0x308] sm:$0xf]  ;;  %vm12301_vm3 = vmor %vm4244_vm0, %vm4245_vm1 }
 0x4a5   : > { %v4241_v49 = vsub.f32 1.0, %v4240_v22  ;;  %7734 = vrcp.f32 %v12278_v13  ;;  %vm12291_vm2 = vcmp.eq.f32.partialorder %v4248_v32, 8.507059e+37  ;;  %v4419_v15 = vadd.f32 0.00028619796, %v4418_v20 }
 0x4a6   : > { %13201 = vst [vmem:[#allocation39_spill] sm:$0xff] %v12282_v31  ;;  %5655 = vmatmul.bf16.gmra.mxu1 %v12282_v31  ;;  %v4273_v29 = vmul.f32 %v4272_v24, %v12228_v28  ;;  %v4251_v7 = vor.u32 1.1754944e-38, %v4250_v43  ;;  %v4387_v23 = vadd.f32 1.1283791, %v4386_v27  ;;  %v4430_v47 = vadd.f32 0.001143296, %v4429_v38 }
 0x4a7   : > { %v4242_v37 = vmul.f32 %v7733_v17, %v4241_v49  ;;  %v12305_v45 = vmin.f32 %v4456_v2, 16.0  ;;  %v4264_v30 = vmul.f32 %v4263_v44, %v12228_v28  ;;  %v4420_v24 = vmul.f32 %v4419_v15, %v12269_v39 }
 0x4a8   : > { %v4274_v22 = vadd.f32 0.112945676, %v4273_v29  ;;  %v4431_v51 = vmul.f32 %v4430_v47, %v12269_v39  ;;  %v12313_v49 = vmul.f32 0.70710677, %v12297_v40  ;;  %vm4404_vm4 = vweird.f32 %v12278_v13 }
 0x4a9   : > { %v4243_v32 = vadd.f32 %v7733_v17, %v4242_v37  ;;  %v4458_v0 = vmul.f32 2.1237322e-06, %v12305_v45  ;;  %v4469_v1 = vmul.f32 3.8918573e-05, %v12305_v45  ;;  %v4421_v44 = vadd.f32 0.0036580483, %v4420_v24 }
 0x4aa   : > { %v4275_v27 = vmul.f32 %v4274_v22, %v12228_v28  ;;  %v4432_v38 = vadd.f32 0.014752088, %v4431_v51  ;;  %v4410_v52 = vand.u32 2147483648, %v12278_v13  ;;  %v4265_v31 = vadd.f32 0.18741608, %v4264_v30 }
 0x4ab   : > { %v4247_v43 = vsel %vm12301_vm3, %v7733_v17, %v4243_v32  ;;  %v7735_v2 = vpop.eup %7734  ;;  %v4459_v37 = vadd.f32 0.00028619796, %v4458_v0  ;;  %v4470_v29 = vadd.f32 0.001143296, %v4469_v1  ;;  %v4422_v17 = vmul.f32 %v4421_v44, %v12269_v39 }
 0x4ac   : > { %v4252_v20 = vsel %vm12291_vm2, %v4251_v7, %v4247_v43  ;;  %v4400_v47 = vmul.f32 %v7735_v2, %v12278_v13  ;;  %v4276_v57 = vadd.f32 0.4994258, %v4275_v27  ;;  %v4433_v32 = vmul.f32 %v4432_v38, %v12269_v39  ;;  %v7410_v38 = vld [vmem:[%s8060_s18 + $0x10c] sm:$0xf] }
 0x4ad   : > { %v4253_v15 = vmul.f32 %v4252_v20, %v4228_v26  ;;  %v4460_v22 = vmul.f32 %v4459_v37, %v12305_v45  ;;  %vm4405_vm5 = vweird.f32 %v7735_v2  ;;  %v4408_v3 = vand.u32 2147483647, %v12278_v13 }
 0x4ae   : > { %v4401_v24 = vsub.f32 1.0, %v4400_v47  ;;  %v4471_v7 = vmul.f32 %v4470_v29, %v12305_v45  ;;  %v4277_v26 = vmul.f32 %v4276_v57, %v12228_v28  ;;  %v4423_v51 = vadd.f32 0.05243302, %v4422_v17  ;;  %vm12333_vm6 = vmor %vm4404_vm4, %vm4405_vm5 }
 0x4af   : > { %v4434_v0 = vadd.f32 0.112945676, %v4433_v32  ;;  %v4496_v30 = vmul.f32 %v12313_v49, %v12313_v49  ;;  %v4411_v43 = vor.u32 1.1754944e-38, %v4410_v52  ;;  %v4461_v27 = vadd.f32 0.0036580483, %v4460_v22 }
 0x4b0   : > { %v4402_v1 = vmul.f32 %v7735_v2, %v4401_v24  ;;  %v4472_v44 = vadd.f32 0.014752088, %v4471_v7  ;;  %v6976_v20 = vclamps-f32 %v4253_v15, 1.0  ;;  %v4266_v37 = vmul.f32 %v4265_v31, %v12228_v28 }
 0x4b1   : > { %v12338_v29 = vadd.f32 1.0, %v4277_v26  ;;  %v4435_v47 = vmul.f32 %v4434_v0, %v12269_v39  ;;  %v4388_v57 = vmul.f32 %v4387_v23, %v12165_v63  ;;  %vm4409_vm7 = vcmp.eq.f32.partialorder %v4408_v3, 8.507059e+37  ;;  %v5762_v0 = vpop.f32.mrf.mxu3 }
 0x4b2   : > { %v4403_v17 = vadd.f32 %v7735_v2, %v4402_v1  ;;  %v4473_v52 = vmul.f32 %v4472_v44, %v12305_v45  ;;  %v506_v15 = vmul.f32 0.5, %v12127_v12  ;;  %v4424_v13 = vmul.f32 %v4423_v51, %v12269_v39  ;;  %v5689_v51 = vpop.f32.mrf.mxu2 }
 0x4b3   : > { %7736 = vrcp.f32 %v12338_v29  ;;  %v12346_v32 = vmin.f32 %v4496_v30, 16.0  ;;  %v510_v28 = vmul.f32 0.5, %v12150_v36  ;;  %v4436_v63 = vadd.f32 0.4994258, %v4435_v47  ;;  %v7124_v30 = vld [vmem:[%s8060_s18 + $0x108] sm:$0xf] }
 0x4b4   : > { %v4407_v31 = vsel %vm12333_vm6, %v7735_v2, %v4403_v17  ;;  %v4462_v23 = vmul.f32 %v4461_v27, %v12305_v45  ;;  %v4706_v12 = vadd.f32 1.0, %v6976_v20  ;;  %v4267_v24 = vadd.f32 1.1283791, %v4266_v37  ;;  %v7412_v36 = vld [vmem:[%s8060_s18 + $0x114] sm:$0xf0] }
 0x4b5   : > { %v4412_v22 = vsel %vm4409_vm7, %v4411_v43, %v4407_v31  ;;  %v4498_v3 = vmul.f32 2.1237322e-06, %v12346_v32  ;;  %v4437_v26 = vmul.f32 %v4436_v63, %v12269_v39  ;;  %v4474_v1 = vadd.f32 0.112945676, %v4473_v52  ;;  %v7126_v43 = vld [vmem:[%s8060_s18 + $0x118] sm:$0xf0] }
 0x4b6   : > { %v4413_v7 = vmul.f32 %v4412_v22, %v4388_v57  ;;  %v4425_v44 = vadd.f32 0.18741608, %v4424_v13  ;;  %v5690_v2 = vadd.f32 %v5689_v51, %v12286_v8  ;;  %v7125_v27 = vor.u32 %v7412_v36, %v7124_v30  ;;  %v4834_v13 = vld [vmem:[#allocation8 + $0x90] sm:$0xff]  ;;  %v7116_v22 = vld [vmem:[%s8060_s18 + $0x100] sm:$0xf]  ;;  %v5618_v36 = vpop.f32.mrf.mxu1 }
 0x4b7   : > { %v4288_v37 = vand.u32 2147483647, %v12338_v29  ;;  %v12360_v47 = vadd.f32 1.0, %v4437_v26  ;;  %v4463_v57 = vadd.f32 0.05243302, %v4462_v23  ;;  %v4806_v31 = vmul.f32 %v4706_v12, %v506_v15  ;;  %v5545_v26 = vpop.f32.mrf.mxu0 }
 0x4b8   : > { %v6980_v20 = vclamps-f32 %v4413_v7, 1.0  ;;  %v12363_v52 = vmul.f32 %v4267_v24, %v12198_v25  ;;  %v5763_v63 = vadd.f32 %v5762_v0, %v5690_v2  ;;  %5964 = vmatpush.bf16.xpose.msrb.mxu2 %v7125_v27  ;;  %v7129_v8 = vor.u32 %v7410_v38, %v7126_v43  ;;  %v7411_v51 = vld [vmem:[%s8060_s18 + $0x10c] sm:$0xf0]  ;;  %v7409_v23 = vld [vmem:[%s8060_s18 + $0x104] sm:$0xf] }
 0x4b9   : > { %v7737_v17 = vpop.eup %7736  ;;  %vm4284_vm8 = vweird.f32 %v12338_v29  ;;  %v4475_v15 = vmul.f32 %v4474_v1, %v12305_v45  ;;  %v4290_v25 = vand.u32 2147483648, %v12338_v29  ;;  %v4426_v12 = vmul.f32 %v4425_v44, %v12269_v39 }
 0x4ba   : > { %v4710_v30 = vadd.f32 1.0, %v6980_v20  ;;  %v4280_v7 = vmul.f32 %v7737_v17, %v12338_v29  ;;  %vm4285_vm9 = vweird.f32 %v7737_v17  ;;  %7738 = vrcp.f32 %v12360_v47  ;;  %6037 = vmatpush.bf16.xpose.msrb.mxu3 %v7129_v8  ;;  %v5691_v44 = vpop.f32.mrf.mxu2 }
 0x4bb   : > { %v6413_v2 = vadd.f32 %v5763_v63, %v4834_v13  ;;  %v7117_v27 = vor.u32 %v7411_v51, %v7116_v22  ;;  %vm12375_vm10 = vcmp.eq.f32.partialorder %v4288_v37, 8.507059e+37  ;;  %v5619_v43 = vadd.f32 %v5618_v36, %v5545_v26  ;;  %vm12388_vm11 = vmor %vm4284_vm8, %vm4285_vm9  ;;  %v4837_v22 = vld [vmem:[#allocation8 + $0xa8] sm:$0xff] }
 0x4bc   : > { %v4810_v24 = vmul.f32 %v4710_v30, %v510_v28  ;;  %v4281_v0 = vsub.f32 1.0, %v4280_v7  ;;  %v7121_v20 = vor.u32 %v7409_v23, %v7118_v21  ;;  %v4464_v1 = vmul.f32 %v4463_v57, %v12305_v45 }
 0x4bd   : > { %6488 = vst [vmem:[#allocation8 + $0x90] sm:$0xff] %v6413_v2  ;;  %5818 = vmatpush.bf16.xpose.msrb.mxu0 %v7117_v27  ;;  %v4476_v28 = vadd.f32 0.4994258, %v4475_v15  ;;  %v4499_v8 = vadd.f32 0.00028619796, %v4498_v3  ;;  %v4291_v21 = vor.u32 1.1754944e-38, %v4290_v25  ;;  %v5692_v57 = vadd.f32 %v5691_v44, %v5619_v43  ;;  %v5764_v3 = vpop.f32.mrf.mxu3 }
 0x4be   : > { %v12383_v59 = vpack.c.bf16 %v4810_v24, %v4806_v31  ;;  %v4282_v39 = vmul.f32 %v7737_v17, %v4281_v0  ;;  %v4427_v13 = vadd.f32 1.1283791, %v4426_v12  ;;  %5891 = vmatpush.bf16.xpose.msrb.mxu1 %v7121_v20  ;;  %v4509_v31 = vmul.f32 3.8918573e-05, %v12346_v32  ;;  %v12410_v20 = vld [vmem:[%s8053_s10 + $0x318] sm:$0xf] }
 0x4bf   : > { %vm4444_vm12 = vweird.f32 %v12360_v47  ;;  %v4477_v29 = vmul.f32 %v4476_v28, %v12305_v45  ;;  %v4500_v51 = vmul.f32 %v4499_v8, %v12346_v32  ;;  %v4448_v7 = vand.u32 2147483647, %v12360_v47 }
 0x4c0   : > { %5728 = vmatmul.bf16.gmra.mxu2 %v12383_v59  ;;  %v4283_v63 = vadd.f32 %v7737_v17, %v4282_v39  ;;  %v7739_v30 = vpop.eup %7738  ;;  %v5765_v26 = vadd.f32 %v5764_v3, %v5692_v57  ;;  %v4465_v36 = vadd.f32 0.18741608, %v4464_v1  ;;  %v4510_v23 = vadd.f32 0.001143296, %v4509_v31 }
 0x4c1   : > { %v4440_v25 = vmul.f32 %v7739_v30, %v12360_v47  ;;  %v12401_v12 = vadd.f32 1.0, %v4477_v29  ;;  %v12404_v24 = vmul.f32 0.70710677, %v12381_v61  ;;  %v4450_v2 = vand.u32 2147483648, %v12360_v47 }
 0x4c2   : > { %v4287_v15 = vsel %vm12388_vm11, %v7737_v17, %v4283_v63  ;;  %v6416_v27 = vadd.f32 %v5765_v26, %v4837_v22  ;;  %v4501_v43 = vadd.f32 0.0036580483, %v4500_v51  ;;  %vm4445_vm13 = vweird.f32 %v7739_v30 }
 0x4c3   : > { %v4292_v0 = vsel %vm12375_vm10, %v4291_v21, %v4287_v15  ;;  %v4441_v39 = vsub.f32 1.0, %v4440_v25  ;;  %7740 = vrcp.f32 %v12401_v12  ;;  %v507_v17 = vmul.f32 0.5, %v12186_v33  ;;  %vm12426_vm14 = vmor %vm4444_vm12, %vm4445_vm13 }
 0x4c4   : > { %v4293_v1 = vmul.f32 %v4292_v0, %v12363_v52  ;;  %6491 = vst [vmem:[#allocation8 + $0xa8] sm:$0xff] %v6416_v27  ;;  %v4466_v44 = vmul.f32 %v4465_v36, %v12305_v45  ;;  %v4511_v38 = vmul.f32 %v4510_v23, %v12346_v32  ;;  %v511_v28 = vmul.f32 0.5, %v12221_v16 }
 0x4c5   : > { %v4442_v8 = vmul.f32 %v7739_v30, %v4441_v39  ;;  %v4536_v37 = vmul.f32 %v12404_v24, %v12404_v24  ;;  %v12421_v21 = vmul.f32 0.70710677, %v12410_v20  ;;  %v4428_v52 = vmul.f32 %v4427_v13, %v12248_v4 }
 0x4c6   : > { %v4451_v45 = vor.u32 1.1754944e-38, %v4450_v2  ;;  %v4502_v57 = vmul.f32 %v4501_v43, %v12346_v32  ;;  %v4512_v31 = vadd.f32 0.014752088, %v4511_v38  ;;  %v6977_v16 = vclamps-f32 %v4293_v1, 1.0 }
 0x4c7   : > { %v4443_v63 = vadd.f32 %v7739_v30, %v4442_v8  ;;  %vm4449_vm15 = vcmp.eq.f32.partialorder %v4448_v7, 8.507059e+37  ;;  %v12431_v22 = vmin.f32 %v4536_v37, 16.0  ;;  %v4467_v3 = vadd.f32 1.1283791, %v4466_v44 }
 0x4c8   : > { %vm4484_vm0 = vweird.f32 %v12401_v12  ;;  %v4513_v4 = vmul.f32 %v4512_v31, %v12346_v32  ;;  %v4576_v47 = vmul.f32 %v12421_v21, %v12421_v21  ;;  %v4488_v51 = vand.u32 2147483647, %v12401_v12 }
 0x4c9   : > { %v7741_v13 = vpop.eup %7740  ;;  %v4447_v29 = vsel %vm12426_vm14, %v7739_v30, %v4443_v63  ;;  %v4538_v26 = vmul.f32 2.1237322e-06, %v12431_v22  ;;  %v4549_v7 = vmul.f32 3.8918573e-05, %v12431_v22  ;;  %v4490_v15 = vand.u32 2147483648, %v12401_v12 }
 0x4ca   : > { %v4452_v36 = vsel %vm4449_vm15, %v4451_v45, %v4447_v29  ;;  %v4480_v23 = vmul.f32 %v7741_v13, %v12401_v12  ;;  %v4503_v25 = vadd.f32 0.05243302, %v4502_v57  ;;  %v4707_v2 = vadd.f32 1.0, %v6977_v16 }
 0x4cb   : > { %v4453_v0 = vmul.f32 %v4452_v36, %v4428_v52  ;;  %v4514_v27 = vadd.f32 0.112945676, %v4513_v4  ;;  %v4539_v43 = vadd.f32 0.00028619796, %v4538_v26  ;;  %vm4485_vm1 = vweird.f32 %v7741_v13 }
 0x4cc   : > { %v4481_v1 = vsub.f32 1.0, %v4480_v23  ;;  %v4550_v39 = vadd.f32 0.001143296, %v4549_v7  ;;  %v12444_v30 = vmin.f32 %v4576_v47, 16.0  ;;  %v4468_v38 = vmul.f32 %v4467_v3, %v12272_v34  ;;  %vm4486_vm2 = vmor %vm4484_vm0, %vm4485_vm1 }
 0x4cd   : > { %v6981_v44 = vclamps-f32 %v4453_v0, 1.0  ;;  %v4515_v8 = vmul.f32 %v4514_v27, %v12346_v32  ;;  %v4540_v37 = vmul.f32 %v4539_v43, %v12431_v22  ;;  %v4491_v45 = vor.u32 1.1754944e-38, %v4490_v15 }
 0x4ce   : > { %v4482_v33 = vmul.f32 %v7741_v13, %v4481_v1  ;;  %v4551_v57 = vmul.f32 %v4550_v39, %v12431_v22  ;;  %v4578_v52 = vmul.f32 2.1237322e-06, %v12444_v30  ;;  %v4807_v16 = vmul.f32 %v4707_v2, %v507_v17 }
 0x4cf   : > { %v4711_v31 = vadd.f32 1.0, %v6981_v44  ;;  %v4516_v63 = vadd.f32 0.4994258, %v4515_v8  ;;  %v4541_v4 = vadd.f32 0.0036580483, %v4540_v37  ;;  %vm4489_vm3 = vcmp.eq.f32.partialorder %v4488_v51, 8.507059e+37 }
 0x4d0   : > { %v4483_v47 = vadd.f32 %v7741_v13, %v4482_v33  ;;  %v4504_v34 = vmul.f32 %v4503_v25, %v12346_v32  ;;  %v4552_v3 = vadd.f32 0.014752088, %v4551_v57  ;;  %v4579_v7 = vadd.f32 0.00028619796, %v4578_v52 }
 0x4d1   : > { %v4811_v29 = vmul.f32 %v4711_v31, %v511_v28  ;;  %v4517_v26 = vmul.f32 %v4516_v63, %v12346_v32  ;;  %v4542_v23 = vmul.f32 %v4541_v4, %v12431_v22  ;;  %v4589_v2 = vmul.f32 3.8918573e-05, %v12444_v30  ;;  %v5621_v4 = vpop.f32.mrf.mxu1 }
 0x4d2   : > { %v4487_v36 = vsel %vm4486_vm2, %v7741_v13, %v4483_v47  ;;  %v4553_v15 = vmul.f32 %v4552_v3, %v12431_v22  ;;  %v4505_v51 = vadd.f32 0.18741608, %v4504_v34  ;;  %v4580_v28 = vmul.f32 %v4579_v7, %v12444_v30 }
 0x4d3   : > { %v12457_v17 = vpack.c.bf16 %v4811_v29, %v4807_v16  ;;  %v4492_v12 = vsel %vm4489_vm3, %v4491_v45, %v4487_v36  ;;  %v4518_v0 = vadd.f32 1.0, %v4517_v26  ;;  %v512_v13 = vmul.f32 0.5, %v12266_v41  ;;  %v5548_v41 = vpop.f32.mrf.mxu0 }
 0x4d4   : > { %v4493_v27 = vmul.f32 %v4492_v12, %v4468_v38  ;;  %v4554_v43 = vadd.f32 0.112945676, %v4553_v15  ;;  %v4543_v1 = vadd.f32 0.05243302, %v4542_v23  ;;  %v4590_v44 = vadd.f32 0.001143296, %v4589_v2 }
 0x4d5   : > { %5801 = vmatmul.bf16.gmra.mxu3 %v12457_v17  ;;  %7742 = vrcp.f32 %v4518_v0  ;;  %v4506_v37 = vmul.f32 %v4505_v51, %v12346_v32  ;;  %v4581_v45 = vadd.f32 0.0036580483, %v4580_v28  ;;  %vm4524_vm4 = vweird.f32 %v4518_v0 }
 0x4d6   : > { %v6982_v25 = vclamps-f32 %v4493_v27, 1.0  ;;  %v4555_v39 = vmul.f32 %v4554_v43, %v12431_v22  ;;  %v4591_v38 = vmul.f32 %v4590_v44, %v12444_v30  ;;  %v4544_v52 = vmul.f32 %v4543_v1, %v12431_v22 }
 0x4d7   : > { %v4507_v34 = vadd.f32 1.1283791, %v4506_v37  ;;  %v4530_v29 = vand.u32 2147483648, %v4518_v0  ;;  %v4582_v26 = vmul.f32 %v4581_v45, %v12444_v30  ;;  %v4528_v23 = vand.u32 2147483647, %v4518_v0  ;;  %v5694_v45 = vpop.f32.mrf.mxu2 }
 0x4d8   : > { %v4712_v8 = vadd.f32 1.0, %v6982_v25  ;;  %v4556_v33 = vadd.f32 0.4994258, %v4555_v39  ;;  %v4592_v63 = vadd.f32 0.014752088, %v4591_v38  ;;  %v5622_v1 = vadd.f32 %v5621_v4, %v5548_v41 }
 0x4d9   : > { %v4545_v15 = vadd.f32 0.18741608, %v4544_v52  ;;  %v4508_v27 = vmul.f32 %v4507_v34, %v12313_v49  ;;  %v4531_v51 = vor.u32 1.1754944e-38, %v4530_v29  ;;  %v4583_v43 = vadd.f32 0.05243302, %v4582_v26  ;;  %v5767_v49 = vpop.f32.mrf.mxu3  ;;  %v4840_v29 = vld [vmem:[#allocation8 + $0xc0] sm:$0xff] }
 0x4da   : > { %v4812_v57 = vmul.f32 %v4712_v8, %v512_v13  ;;  %v4557_v31 = vmul.f32 %v4556_v33, %v12431_v22  ;;  %v4593_v7 = vmul.f32 %v4592_v63, %v12444_v30  ;;  %vm4529_vm7 = vcmp.eq.f32.partialorder %v4528_v23, 8.507059e+37 }
 0x4db   : > { %v7743_v16 = vpop.eup %7742  ;;  %v4546_v13 = vmul.f32 %v4545_v15, %v12431_v22  ;;  %v4584_v33 = vmul.f32 %v4583_v43, %v12444_v30  ;;  %v5550_v63 = vpop.f32.mrf.mxu0 }
 0x4dc   : > { %v12468_v47 = vpack.c.bf16 %v4812_v57, %v4812_v57  ;;  %v4520_v3 = vmul.f32 %v7743_v16, %v4518_v0  ;;  %v4558_v32 = vadd.f32 1.0, %v4557_v31  ;;  %vm4525_vm5 = vweird.f32 %v7743_v16  ;;  %v5623_v22 = vpop.f32.mrf.mxu1 }
 0x4dd   : > { %v4594_v2 = vadd.f32 0.112945676, %v4593_v7  ;;  %vm4526_vm6 = vmor %vm4524_vm4, %vm4525_vm5  ;;  %v513_v0 = vmul.f32 0.5, %v12297_v40  ;;  %v4547_v57 = vadd.f32 1.1283791, %v4546_v13  ;;  %v5624_v43 = vadd.f32 %v5623_v22, %v5550_v63 }
 0x4de   : > { %13214 = vst [vmem:[#allocation40_spill] sm:$0xff] %v12468_v47  ;;  %5587 = vmatmul.bf16.gmra.mxu0 %v12468_v47  ;;  %v4521_v36 = vsub.f32 1.0, %v4520_v3  ;;  %7744 = vrcp.f32 %v4558_v32  ;;  %vm4564_vm8 = vweird.f32 %v4558_v32  ;;  %v4568_v34 = vand.u32 2147483647, %v4558_v32 }
 0x4df   : > { %v4595_v25 = vmul.f32 %v4594_v2, %v12444_v30  ;;  %v4570_v41 = vand.u32 2147483648, %v4558_v32  ;;  %v4548_v23 = vmul.f32 %v4547_v57, %v12404_v24  ;;  %v4585_v2 = vadd.f32 0.18741608, %v4584_v33 }
 0x4e0   : > { %v4522_v12 = vmul.f32 %v7743_v16, %v4521_v36  ;;  %vm4569_vm11 = vcmp.eq.f32.partialorder %v4568_v34, 8.507059e+37 }
 0x4e1   : > { %v4596_v44 = vadd.f32 0.4994258, %v4595_v25  ;;  %v5769_v13 = vpop.f32.mrf.mxu3  ;;  %v4586_v33 = vmul.f32 %v4585_v2, %v12444_v30  ;;  %v7366_v2 = vld [vmem:[%s8060_s18 + $0x2f8] sm:$0xf0] }
 0x4e2   : > { %v4523_v28 = vadd.f32 %v7743_v16, %v4522_v12  ;;  %v4571_v12 = vor.u32 1.1754944e-38, %v4570_v41 }
 0x4e3   : > { %v4597_v31 = vmul.f32 %v4596_v44, %v12444_v30  ;;  %v4587_v30 = vadd.f32 1.1283791, %v4586_v33 }
 0x4e4   : > { %v4527_v39 = vsel %vm4526_vm6, %v7743_v16, %v4523_v28  ;;  %v7745_v8 = vpop.eup %7744  ;;  %v5695_v16 = vadd.f32 %v5694_v45, %v5622_v1  ;;  %v5696_v28 = vpop.f32.mrf.mxu2 }
 0x4e5   : > { %v4532_v37 = vsel %vm4529_vm7, %v4531_v51, %v4527_v39  ;;  %v4560_v52 = vmul.f32 %v7745_v8, %v4558_v32  ;;  %vm4565_vm9 = vweird.f32 %v7745_v8  ;;  %v4598_v40 = vadd.f32 1.0, %v4597_v31  ;;  %v5553_v39 = vpop.f32.mrf.mxu0  ;;  %v5626_v44 = vpop.f32.mrf.mxu1 }
 0x4e6   : > { %v4533_v38 = vmul.f32 %v4532_v37, %v4508_v27  ;;  %v5768_v26 = vadd.f32 %v5767_v49, %v5695_v16  ;;  %vm12480_vm10 = vmor %vm4564_vm8, %vm4565_vm9  ;;  %v5697_v24 = vadd.f32 %v5696_v28, %v5624_v43  ;;  %v5627_v34 = vadd.f32 %v5626_v44, %v5553_v39  ;;  %v7356_v28 = vld [vmem:[%s8060_s18 + $0x2e0] sm:$0xf]  ;;  %v7471_v39 = vld [vmem:[%s8060_s18 + $0x2ec] sm:$0xf0] }
 0x4e7   : > { %v4561_v3 = vsub.f32 1.0, %v4560_v52  ;;  %7746 = vrcp.f32 %v4598_v40  ;;  %v514_v52 = vmul.f32 0.5, %v12381_v61  ;;  %vm4604_vm12 = vweird.f32 %v4598_v40  ;;  %v7469_v44 = vld [vmem:[%s8060_s18 + $0x2e4] sm:$0xf] }
 0x4e8   : > { %v6983_v4 = vclamps-f32 %v4533_v38, 1.0  ;;  %v6419_v27 = vadd.f32 %v5768_v26, %v4840_v29  ;;  %v4608_v38 = vand.u32 2147483647, %v4598_v40  ;;  %v5770_v57 = vadd.f32 %v5769_v13, %v5697_v24  ;;  %v7364_v29 = vld [vmem:[%s8060_s18 + $0x2e8] sm:$0xf] }
 0x4e9   : > { %v4562_v36 = vmul.f32 %v7745_v8, %v4561_v3  ;;  %v4610_v63 = vand.u32 2147483648, %v4598_v40  ;;  %v7472_v26 = vld [vmem:[%s8060_s18 + $0x2f4] sm:$0xf0]  ;;  %v4588_v13 = vmul.f32 %v4587_v30, %v12421_v21  ;;  %v4849_v3 = vld [vmem:[#allocation8 + $0x108] sm:$0xff] }
 0x4ea   : > { %v4713_v7 = vadd.f32 1.0, %v6983_v4  ;;  %6494 = vst [vmem:[#allocation8 + $0xc0] sm:$0xff] %v6419_v27  ;;  %vm12496_vm15 = vcmp.eq.f32.partialorder %v4608_v38, 8.507059e+37 }
 0x4eb   : > { %v4563_v51 = vadd.f32 %v7745_v8, %v4562_v36  ;;  %v5772_v36 = vpop.f32.mrf.mxu3  ;;  %v4611_v15 = vor.u32 1.1754944e-38, %v4610_v63  ;;  %v515_v63 = vmul.f32 0.5, %v12410_v20 }
 0x4ec   : > { %v4813_v32 = vmul.f32 %v4713_v7, %v513_v0  ;;  %v4843_v0 = vld [vmem:[#allocation8 + $0xd8] sm:$0xff]  ;;  %v5699_v7 = vpop.f32.mrf.mxu2 }
 0x4ed   : > { %v4567_v1 = vsel %vm12480_vm10, %v7745_v8, %v4563_v51  ;;  %v7747_v45 = vpop.eup %7746  ;;  %v6422_v22 = vadd.f32 %v5770_v57, %v4843_v0  ;;  %v5700_v27 = vadd.f32 %v5699_v7, %v5627_v34  ;;  %v5555_v51 = vpop.f32.mrf.mxu0 }
 0x4ee   : > { %v12484_v25 = vpack.c.bf16 %v4813_v32, %v4813_v32  ;;  %5819 = vmatmul.bf16.vlgmr.msrb.gmra.mxu0 %v8607_v42  ;;  %v4572_v37 = vsel %vm4569_vm11, %v4571_v12, %v4567_v1  ;;  %v4600_v8 = vmul.f32 %v7747_v45, %v4598_v40  ;;  %vm4605_vm13 = vweird.f32 %v7747_v45  ;;  %v7470_v40 = vld [vmem:[%s8060_s18 + $0x2ec] sm:$0xf]  ;;  %v4846_v32 = vld [vmem:[#allocation8 + $0xf0] sm:$0xff]  ;;  %v5628_v43 = vpop.f32.mrf.mxu1 }
 0x4ef   : > { %v4573_v49 = vmul.f32 %v4572_v37, %v4548_v23  ;;  %vm12492_vm14 = vmor %vm4604_vm12, %vm4605_vm13  ;;  %6497 = vst [vmem:[#allocation8 + $0xd8] sm:$0xff] %v6422_v22  ;;  %v7365_v12 = vor.u32 %v7472_v26, %v7364_v29  ;;  %v7369_v24 = vor.u32 %v7470_v40, %v7366_v2  ;;  %v7358_v37 = vld [vmem:[%s8060_s18 + $0x2f0] sm:$0xf0]  ;;  %v5773_v0 = vadd.f32 %v5772_v36, %v5700_v27  ;;  %v4852_v2 = vld [vmem:[#allocation8 + $0x120] sm:$0xff] }
 0x4f0   : > { %5660 = vmatmul.bf16.gmra.mxu1 %v12484_v25  ;;  %v4601_v41 = vsub.f32 1.0, %v4600_v8  ;;  %v7361_v38 = vor.u32 %v7469_v44, %v7358_v37 }
 0x4f1   : > { %v6984_v31 = vclamps-f32 %v4573_v49, 1.0  ;;  %6249 = vmatpush.bf16.xpose.msra.mxu2 %v7365_v12  ;;  %v7357_v49 = vor.u32 %v7471_v39, %v7356_v28  ;;  %6322 = vmatpush.bf16.xpose.msra.mxu3 %v7369_v24  ;;  %v7350_v28 = vld [vmem:[%s8060_s18 + $0x2d8] sm:$0xf0]  ;;  %v7467_v24 = vld [vmem:[%s8060_s18 + $0x2cc] sm:$0xf0] }
 0x4f2   : > { %v4602_v61 = vmul.f32 %v7747_v45, %v4601_v41  ;;  %6176 = vmatpush.bf16.xpose.msra.mxu1 %v7361_v38  ;;  %v7465_v39 = vld [vmem:[%s8060_s18 + $0x2c4] sm:$0xf] }
 0x4f3   : > { %v4714_v16 = vadd.f32 1.0, %v6984_v31  ;;  %6103 = vmatpush.bf16.xpose.msra.mxu0 %v7357_v49  ;;  %v5629_v31 = vadd.f32 %v5628_v43, %v5555_v51  ;;  %v5774_v30 = vpop.f32.mrf.mxu3  ;;  %v7466_v43 = vld [vmem:[%s8060_s18 + $0x2cc] sm:$0xf] }
 0x4f4   : > { %v4603_v1 = vadd.f32 %v7747_v45, %v4602_v61  ;;  %v5701_v34 = vpop.f32.mrf.mxu2 }
 0x4f5   : > { %v4814_v23 = vmul.f32 %v4714_v16, %v514_v52  ;;  %v6425_v52 = vadd.f32 %v5773_v0, %v4846_v32  ;;  %v5702_v41 = vadd.f32 %v5701_v34, %v5629_v31  ;;  %v7342_v0 = vld [vmem:[%s8060_s18 + $0x2d0] sm:$0xf0] }
 0x4f6   : > { %v4607_v57 = vsel %vm12492_vm14, %v7747_v45, %v4603_v1  ;;  %v5558_v45 = vpop.f32.mrf.mxu0  ;;  %v5631_v16 = vpop.f32.mrf.mxu1  ;;  %v7340_v1 = vld [vmem:[%s8060_s18 + $0x2c0] sm:$0xf]  ;;  %v7345_v49 = vor.u32 %v7465_v39, %v7342_v0  ;;  %v7464_v39 = vld [vmem:[%s8060_s18 + $0x2b4] sm:$0xf0]  ;;  %v7462_v0 = vld [vmem:[%s8060_s18 + $0x2ac] sm:$0xf] }
 0x4f7   : > { %v12509_v33 = vpack.c.bf16 %v4814_v23, %v4814_v23  ;;  %v4612_v21 = vsel %vm12496_vm15, %v4611_v15, %v4607_v57  ;;  %6500 = vst [vmem:[#allocation8 + $0xf0] sm:$0xff] %v6425_v52  ;;  %v5775_v61 = vadd.f32 %v5774_v30, %v5702_v41  ;;  %v5632_v20 = vadd.f32 %v5631_v16, %v5558_v45  ;;  %v7348_v23 = vld [vmem:[%s8060_s18 + $0x2c8] sm:$0xf]  ;;  %v7468_v15 = vld [vmem:[%s8060_s18 + $0x2d4] sm:$0xf0] }
 0x4f8   : > { %v4613_v8 = vmul.f32 %v4612_v21, %v4588_v13  ;;  %v7349_v51 = vor.u32 %v7468_v15, %v7348_v23  ;;  %v7353_v13 = vor.u32 %v7466_v43, %v7350_v28  ;;  %v7341_v37 = vor.u32 %v7467_v24, %v7340_v1  ;;  %v7332_v24 = vld [vmem:[%s8060_s18 + $0x2a8] sm:$0xf] }
 0x4f9   : > { %5733 = vmatmul.bf16.gmra.mxu2 %v12509_v33  ;;  %v6428_v26 = vadd.f32 %v5775_v61, %v4849_v3 }
 0x4fa   : > { %v6985_v22 = vclamps-f32 %v4613_v8, 1.0  ;;  %6250 = vmatpush.bf16.xpose.msra.mxu2 %v7349_v51  ;;  %6323 = vmatpush.bf16.xpose.msra.mxu3 %v7353_v13  ;;  %v4864_v13 = vld [vmem:[#allocation8 + $0x180] sm:$0xff] }
 0x4fb   : > { %6503 = vst [vmem:[#allocation8 + $0x108] sm:$0xff] %v6428_v26  ;;  %v5777_v36 = vpop.f32.mrf.mxu3  ;;  %6104 = vmatpush.bf16.xpose.msra.mxu0 %v7341_v37  ;;  %6177 = vmatpush.bf16.xpose.msra.mxu1 %v7345_v49  ;;  %v7333_v37 = vor.u32 %v7464_v39, %v7332_v24  ;;  %v7334_v49 = vld [vmem:[%s8060_s18 + $0x2b8] sm:$0xf0] }
 0x4fc   : > { %v4715_v4 = vadd.f32 1.0, %v6985_v22  ;;  %v5704_v7 = vpop.f32.mrf.mxu2  ;;  %v4855_v22 = vld [vmem:[#allocation8 + $0x138] sm:$0xff] }
 0x4fd   : > { %v5705_v12 = vadd.f32 %v5704_v7, %v5632_v20 }
 0x4fe   : > { %5824 = vmatmul.bf16.gmra.mxu0 %v8909_v53  ;;  %v4815_v29 = vmul.f32 %v4715_v4, %v515_v63  ;;  %v5560_v27 = vpop.f32.mrf.mxu0  ;;  %v5633_v32 = vpop.f32.mrf.mxu1 }
 0x4ff   : > { %v5778_v44 = vadd.f32 %v5777_v36, %v5705_v12  ;;  %v5634_v57 = vadd.f32 %v5633_v32, %v5560_v27  ;;  %v4861_v27 = vld [vmem:[#allocation8 + $0x168] sm:$0xff] }
 0x500   : > { %5892 = vmatmul.bf16.vlgmr.msrb.gmra.mxu1 %v8649_v50  ;;  %v12519_v40 = vpack.c.bf16 %v4815_v29, %v4815_v29  ;;  %v4858_v29 = vld [vmem:[#allocation8 + $0x150] sm:$0xff] }
 0x501   : > { %v6431_v38 = vadd.f32 %v5778_v44, %v4852_v2 }
 0x502   : > { %5806 = vmatmul.bf16.gmra.mxu3 %v12519_v40  ;;  %6251 = vmatpush.bf16.xpose.msra.mxu2 %v7333_v37 }
 0x503   : > { %6506 = vst [vmem:[#allocation8 + $0x120] sm:$0xff] %v6431_v38  ;;  %v5779_v52 = vpop.f32.mrf.mxu3 }
 0x504   : > { %v5706_v21 = vpop.f32.mrf.mxu2 }
 0x505   : > { %v5707_v8 = vadd.f32 %v5706_v21, %v5634_v57  ;;  %v7324_v21 = vld [vmem:[%s8060_s18 + $0x2a0] sm:$0xf] }
 0x506   : > { %v5563_v31 = vpop.f32.mrf.mxu0  ;;  %v5636_v63 = vpop.f32.mrf.mxu1 }
 0x507   : > { %v5780_v34 = vadd.f32 %v5779_v52, %v5707_v8  ;;  %v5637_v41 = vadd.f32 %v5636_v63, %v5563_v31  ;;  %v7337_v52 = vor.u32 %v7462_v0, %v7334_v49  ;;  %v7463_v8 = vld [vmem:[%s8060_s18 + $0x2ac] sm:$0xf0]  ;;  %v7461_v31 = vld [vmem:[%s8060_s18 + $0x2a4] sm:$0xf]  ;;  %v7326_v63 = vld [vmem:[%s8060_s18 + $0x2b0] sm:$0xf0] }
 0x509   : > { %5965 = vmatmul.bf16.vlgmr.msrb.gmra.mxu2 %v8762_v6  ;;  %v6434_v30 = vadd.f32 %v5780_v34, %v4855_v22  ;;  %v7325_v34 = vor.u32 %v7463_v8, %v7324_v21  ;;  %6324 = vmatpush.bf16.xpose.msra.mxu3 %v7337_v52  ;;  %v4873_v52 = vld [vmem:[#allocation8 + $0x1c8] sm:$0xff] }
 0x50b   : > { %6509 = vst [vmem:[#allocation8 + $0x138] sm:$0xff] %v6434_v30  ;;  %v5782_v16 = vpop.f32.mrf.mxu3  ;;  %v7329_v30 = vor.u32 %v7461_v31, %v7326_v63  ;;  %6105 = vmatpush.bf16.xpose.msra.mxu0 %v7325_v34 }
 0x50c   : > { %v5709_v45 = vpop.f32.mrf.mxu2 }
 0x50d   : > { %v5710_v4 = vadd.f32 %v5709_v45, %v5637_v41  ;;  %6178 = vmatpush.bf16.xpose.msra.mxu1 %v7329_v30 }
 0x50e   : > { %5829 = vmatmul.bf16.gmra.mxu0 %v9252_v46  ;;  %v5565_v3 = vpop.f32.mrf.mxu0  ;;  %v5638_v61 = vpop.f32.mrf.mxu1 }
 0x50f   : > { %v5783_v26 = vadd.f32 %v5782_v16, %v5710_v4  ;;  %v5639_v7 = vadd.f32 %v5638_v61, %v5565_v3 }
 0x510   : > { %5897 = vmatmul.bf16.gmra.mxu1 %v8986_v18 }
 0x511   : > { %v6437_v20 = vadd.f32 %v5783_v26, %v4858_v29  ;;  %v4867_v26 = vld [vmem:[#allocation8 + $0x198] sm:$0xff] }
 0x512   : > { %6038 = vmatmul.bf16.vlgmr.msrb.gmra.mxu3 %v8810_v58 }
 0x513   : > { %6512 = vst [vmem:[#allocation8 + $0x150] sm:$0xff] %v6437_v20  ;;  %v5784_v23 = vpop.f32.mrf.mxu3 }
 0x514   : > { %v5711_v36 = vpop.f32.mrf.mxu2 }
 0x515   : > { %v5712_v15 = vadd.f32 %v5711_v36, %v5639_v7 }
 0x516   : > { %v5568_v12 = vpop.f32.mrf.mxu0  ;;  %v5641_v2 = vpop.f32.mrf.mxu1 }
 0x517   : > { %v5785_v32 = vadd.f32 %v5784_v23, %v5712_v15  ;;  %v5642_v43 = vadd.f32 %v5641_v2, %v5568_v12  ;;  %v7316_v12 = vld [vmem:[%s8060_s18 + $0x288] sm:$0xf] }
 0x519   : > { %5970 = vmatmul.bf16.gmra.mxu2 %v9084_v55  ;;  %v6440_v51 = vadd.f32 %v5785_v32, %v4861_v27 }
 0x51b   : > { %6515 = vst [vmem:[#allocation8 + $0x168] sm:$0xff] %v6440_v51  ;;  %v5787_v1 = vpop.f32.mrf.mxu3  ;;  %v7460_v51 = vld [vmem:[%s8060_s18 + $0x294] sm:$0xf0] }
 0x51c   : > { %v5714_v28 = vpop.f32.mrf.mxu2 }
 0x51d   : > { %v5715_v44 = vadd.f32 %v5714_v28, %v5642_v43  ;;  %v7458_v43 = vld [vmem:[%s8060_s18 + $0x28c] sm:$0xf]  ;;  %v7318_v28 = vld [vmem:[%s8060_s18 + $0x298] sm:$0xf0] }
 0x51e   : > { %5834 = vmatmul.bf16.gmra.mxu0 %v9596_v35  ;;  %v5570_v38 = vpop.f32.mrf.mxu0  ;;  %v5643_v57 = vpop.f32.mrf.mxu1  ;;  %v7321_v24 = vor.u32 %v7458_v43, %v7318_v28  ;;  %v13223_v43 = vld [vmem:[#allocation19_spill] sm:$0xff]  ;;  %v4879_v28 = vld [vmem:[#allocation8 + $0x1f8] sm:$0xff] }
 0x51f   : > { %v5788_v22 = vadd.f32 %v5787_v1, %v5715_v44  ;;  %v5644_v45 = vadd.f32 %v5643_v57, %v5570_v38  ;;  %v7317_v1 = vor.u32 %v7460_v51, %v7316_v12 }
 0x520   : > { %5902 = vmatmul.bf16.gmra.mxu1 %v9324_v48  ;;  %6325 = vmatpush.bf16.xpose.msra.mxu3 %v7321_v24 }
 0x521   : > { %v6443_v41 = vadd.f32 %v5788_v22, %v4864_v13  ;;  %v4870_v13 = vld [vmem:[#allocation8 + $0x1b0] sm:$0xff]  ;;  %6252 = vmatpush.bf16.xpose.msra.mxu2 %v7317_v1  ;;  %v13221_v22 = vld [vmem:[#allocation13_spill] sm:$0xff] }
 0x522   : > { %6043 = vmatmul.bf16.gmra.mxu3 %v9182_v14  ;;  %v13224_v1 = vld [vmem:[#allocation16_spill] sm:$0xff] }
 0x523   : > { %6518 = vst [vmem:[#allocation8 + $0x180] sm:$0xff] %v6443_v41  ;;  %v5789_v4 = vpop.f32.mrf.mxu3  ;;  %v7308_v41 = vld [vmem:[%s8060_s18 + $0x280] sm:$0xf] }
 0x524   : > { %v5716_v16 = vpop.f32.mrf.mxu2 }
 0x525   : > { %v5717_v3 = vadd.f32 %v5716_v16, %v5644_v45  ;;  %v7459_v45 = vld [vmem:[%s8060_s18 + $0x28c] sm:$0xf0] }
 0x526   : > { %v5573_v61 = vpop.f32.mrf.mxu0  ;;  %v5646_v29 = vpop.f32.mrf.mxu1 }
 0x527   : > { %v5790_v20 = vadd.f32 %v5789_v4, %v5717_v3  ;;  %v5647_v36 = vadd.f32 %v5646_v29, %v5573_v61  ;;  %v7309_v4 = vor.u32 %v7459_v45, %v7308_v41  ;;  %v7457_v3 = vld [vmem:[%s8060_s18 + $0x284] sm:$0xf]  ;;  %v7310_v61 = vld [vmem:[%s8060_s18 + $0x290] sm:$0xf0] }
 0x528   : > { %v7453_v41 = vld [vmem:[%s8060_s18 + $0x264] sm:$0xf]  ;;  %v4882_v45 = vld [vmem:[#allocation8 + $0x210] sm:$0xff] }
 0x529   : > { %5975 = vmatmul.bf16.gmra.mxu2 %v9413_v19  ;;  %v6446_v7 = vadd.f32 %v5790_v20, %v4867_v26  ;;  %v4876_v20 = vld [vmem:[#allocation8 + $0x1e0] sm:$0xff]  ;;  %6106 = vmatpush.bf16.xpose.msra.mxu0 %v7309_v4 }
 0x52b   : > { %6521 = vst [vmem:[#allocation8 + $0x198] sm:$0xff] %v6446_v7  ;;  %v5792_v15 = vpop.f32.mrf.mxu3  ;;  %v7313_v7 = vor.u32 %v7457_v3, %v7310_v61  ;;  %v7294_v3 = vld [vmem:[%s8060_s18 + $0x270] sm:$0xf0] }
 0x52c   : > { %v5719_v23 = vpop.f32.mrf.mxu2 }
 0x52d   : > { %v5720_v2 = vadd.f32 %v5719_v23, %v5647_v36  ;;  %6179 = vmatpush.bf16.xpose.msra.mxu1 %v7313_v7  ;;  %v13222_v23 = vld [vmem:[#allocation14_spill] sm:$0xff] }
 0x52e   : > { %5839 = vmatmul.bf16.gmra.mxu0 %v9926_v56  ;;  %v5575_v27 = vpop.f32.mrf.mxu0  ;;  %v5648_v32 = vpop.f32.mrf.mxu1 }
 0x52f   : > { %v5793_v39 = vadd.f32 %v5792_v15, %v5720_v2  ;;  %v5649_v37 = vadd.f32 %v5648_v32, %v5575_v27 }
 0x530   : > { %5907 = vmatmul.bf16.gmra.mxu1 %v9681_v54 }
 0x531   : > { %v6449_v44 = vadd.f32 %v5793_v39, %v4870_v13 }
 0x532   : > { %6048 = vmatmul.bf16.gmra.mxu3 %v9497_v62 }
 0x533   : > { %6524 = vst [vmem:[#allocation8 + $0x1b0] sm:$0xff] %v6449_v44  ;;  %v5794_v49 = vpop.f32.mrf.mxu3 }
 0x534   : > { %v5721_v0 = vpop.f32.mrf.mxu2 }
 0x535   : > { %v5722_v38 = vadd.f32 %v5721_v0, %v5649_v37  ;;  %v13225_v37 = vld [vmem:[#allocation15_spill] sm:$0xff] }
 0x536   : > { %v5578_v57 = vpop.f32.mrf.mxu0  ;;  %v5651_v21 = vpop.f32.mrf.mxu1 }
 0x537   : > { %v5795_v8 = vadd.f32 %v5794_v49, %v5722_v38  ;;  %v5652_v63 = vadd.f32 %v5651_v21, %v5578_v57  ;;  %v7300_v49 = vld [vmem:[%s8060_s18 + $0x268] sm:$0xf]  ;;  %v7456_v38 = vld [vmem:[%s8060_s18 + $0x274] sm:$0xf0] }
 0x539   : > { %5980 = vmatmul.bf16.gmra.mxu2 %v9762_v11  ;;  %v6452_v31 = vadd.f32 %v5795_v8, %v4873_v52  ;;  %v7301_v52 = vor.u32 %v7456_v38, %v7300_v49  ;;  %v7454_v8 = vld [vmem:[%s8060_s18 + $0x26c] sm:$0xf] }
 0x53a   : > { %v13231_v38 = vld [vmem:[#allocation27_spill] sm:$0xff] }
 0x53b   : > { %6527 = vst [vmem:[#allocation8 + $0x1c8] sm:$0xff] %v6452_v31  ;;  %v5797_v30 = vpop.f32.mrf.mxu3  ;;  %v7302_v31 = vld [vmem:[%s8060_s18 + $0x278] sm:$0xf0]  ;;  %6253 = vmatpush.bf16.xpose.msra.mxu2 %v7301_v52  ;;  %v13233_v52 = vld [vmem:[#allocation22_spill] sm:$0xff] }
 0x53c   : > { %v5724_v34 = vpop.f32.mrf.mxu2 }
 0x53d   : > { %v5725_v16 = vadd.f32 %v5724_v34, %v5652_v63  ;;  %v7305_v63 = vor.u32 %v7454_v8, %v7302_v31  ;;  %v7292_v34 = vld [vmem:[%s8060_s18 + $0x260] sm:$0xf]  ;;  %v7284_v31 = vld [vmem:[%s8060_s18 + $0x248] sm:$0xf] }
 0x53e   : > { %5844 = vmatmul.bf16.gmra.mxu0 %v10238_v9  ;;  %v5580_v29 = vpop.f32.mrf.mxu0  ;;  %v5653_v26 = vpop.f32.mrf.mxu1 }
 0x53f   : > { %v5798_v36 = vadd.f32 %v5797_v30, %v5725_v16  ;;  %v5654_v12 = vadd.f32 %v5653_v26, %v5580_v29  ;;  %v7455_v30 = vld [vmem:[%s8060_s18 + $0x26c] sm:$0xf0]  ;;  %6326 = vmatpush.bf16.xpose.msra.mxu3 %v7305_v63  ;;  %v7297_v26 = vor.u32 %v7453_v41, %v7294_v3  ;;  %v7452_v63 = vld [vmem:[%s8060_s18 + $0x254] sm:$0xf0]  ;;  %v7286_v41 = vld [vmem:[%s8060_s18 + $0x258] sm:$0xf0] }
 0x540   : > { %5912 = vmatmul.bf16.gmra.mxu1 %v9980_v10  ;;  %v7293_v4 = vor.u32 %v7455_v30, %v7292_v34  ;;  %v7450_v34 = vld [vmem:[%s8060_s18 + $0x24c] sm:$0xf]  ;;  %v7285_v30 = vor.u32 %v7452_v63, %v7284_v31 }
 0x541   : > { %v6455_v15 = vadd.f32 %v5798_v36, %v4876_v20  ;;  %v13226_v20 = vld [vmem:[#allocation17_spill] sm:$0xff]  ;;  %6180 = vmatpush.bf16.xpose.msra.mxu1 %v7297_v26  ;;  %v7451_v26 = vld [vmem:[%s8060_s18 + $0x24c] sm:$0xf0] }
 0x542   : > { %6053 = vmatmul.bf16.gmra.mxu3 %v13221_v22  ;;  %6107 = vmatpush.bf16.xpose.msra.mxu0 %v7293_v4 }
 0x543   : > { %6530 = vst [vmem:[#allocation8 + $0x1e0] sm:$0xff] %v6455_v15  ;;  %v5799_v32 = vpop.f32.mrf.mxu3  ;;  %6254 = vmatpush.bf16.xpose.msra.mxu2 %v7285_v30 }
 0x544   : > { %v5726_v2 = vpop.f32.mrf.mxu2 }
 0x545   : > { %v5727_v27 = vadd.f32 %v5726_v2, %v5654_v12 }
 0x546   : > { %v5583_v51 = vpop.f32.mrf.mxu0  ;;  %v5656_v13 = vpop.f32.mrf.mxu1 }
 0x547   : > { %v5800_v24 = vadd.f32 %v5799_v32, %v5727_v27  ;;  %v5657_v44 = vadd.f32 %v5656_v13, %v5583_v51  ;;  %v13227_v27 = vld [vmem:[#allocation23_spill] sm:$0xff]  ;;  %v13228_v32 = vld [vmem:[#allocation20_spill] sm:$0xff] }
 0x548   : > { %v4885_v51 = vld [vmem:[#allocation8 + $0x228] sm:$0xff] }
 0x549   : > { %5985 = vmatmul.bf16.gmra.mxu2 %v13222_v23  ;;  %v6458_v39 = vadd.f32 %v5800_v24, %v4879_v28 }
 0x54b   : > { %6533 = vst [vmem:[#allocation8 + $0x1f8] sm:$0xff] %v6458_v39  ;;  %v13229_v39 = vld [vmem:[#allocation18_spill] sm:$0xff] }
 0x54c   : > { %v5729_v0 = vpop.f32.mrf.mxu2 }
 0x54d   : > { %v5730_v57 = vadd.f32 %v5729_v0, %v5657_v44  ;;  %v13230_v0 = vld [vmem:[#allocation21_spill] sm:$0xff] }
 0x54e   : > { %5849 = vmatmul.bf16.gmra.mxu0 %v13223_v43  ;;  %v5585_v21 = vpop.f32.mrf.mxu0  ;;  %v5658_v29 = vpop.f32.mrf.mxu1 }
 0x54f   : > { %v5659_v36 = vadd.f32 %v5658_v29, %v5585_v21  ;;  %v7276_v29 = vld [vmem:[%s8060_s18 + $0x240] sm:$0xf] }
 0x550   : > { %5917 = vmatmul.bf16.gmra.mxu1 %v13224_v1 }
 0x552   : > { %6058 = vmatmul.bf16.gmra.mxu3 %v13225_v37 }
 0x554   : > { %v5731_v15 = vpop.f32.mrf.mxu2 }
 0x555   : > { %v5732_v12 = vadd.f32 %v5731_v15, %v5659_v36  ;;  %v7277_v36 = vor.u32 %v7451_v26, %v7276_v29  ;;  %v7278_v15 = vld [vmem:[%s8060_s18 + $0x250] sm:$0xf0] }
 0x557   : > { %6108 = vmatpush.bf16.xpose.msra.mxu0 %v7277_v36 }
 0x558   : > { %v5802_v16 = vpop.f32.mrf.mxu3 }
 0x559   : > { %v5803_v61 = vadd.f32 %v5802_v16, %v5730_v57  ;;  %5990 = vmatmul.bf16.gmra.mxu2 %v13226_v20  ;;  %v13232_v57 = vld [vmem:[#allocation24_spill] sm:$0xff]  ;;  %v13234_v16 = vld [vmem:[#allocation25_spill] sm:$0xff] }
 0x55b   : > { %v6461_v7 = vadd.f32 %v5803_v61, %v4882_v45  ;;  %v5588_v2 = vpop.f32.mrf.mxu0  ;;  %v7289_v45 = vor.u32 %v7450_v34, %v7286_v41  ;;  %v4888_v34 = vld [vmem:[#allocation8 + $0x240] sm:$0xf] }
 0x55d   : > { %6536 = vst [vmem:[#allocation8 + $0x210] sm:$0xff] %v6461_v7  ;;  %6327 = vmatpush.bf16.xpose.msra.mxu3 %v7289_v45  ;;  %v7449_v7 = vld [vmem:[%s8060_s18 + $0x244] sm:$0xf]  ;;  %v13238_v45 = vld [vmem:[#allocation29_spill] sm:$0xff] }
 0x55e   : > { %5854 = vmatmul.bf16.gmra.mxu0 %v13227_v27 }
 0x560   : > { %5922 = vmatmul.bf16.gmra.mxu1 %v13228_v32  ;;  %v5804_v28 = vpop.f32.mrf.mxu3 }
 0x561   : > { %v5805_v13 = vadd.f32 %v5804_v28, %v5732_v12  ;;  %v13235_v12 = vld [vmem:[#allocation31_spill] sm:$0xff]  ;;  %v13236_v28 = vld [vmem:[#allocation28_spill] sm:$0xff] }
 0x562   : > { %6063 = vmatmul.bf16.gmra.mxu3 %v13229_v39 }
 0x563   : > { %v6464_v24 = vadd.f32 %v5805_v13, %v4885_v51  ;;  %v5590_v44 = vpop.f32.mrf.mxu0  ;;  %v7281_v51 = vor.u32 %v7449_v7, %v7278_v15  ;;  %v13239_v7 = vld [vmem:[#allocation32_spill] sm:$0xff] }
 0x564   : > { %v13237_v44 = vld [vmem:[#allocation26_spill] sm:$0xff] }
 0x565   : > { %6539 = vst [vmem:[#allocation8 + $0x228] sm:$0xff] %v6464_v24  ;;  %6181 = vmatpush.bf16.xpose.msra.mxu1 %v7281_v51  ;;  %v13240_v51 = vld [vmem:[#allocation30_spill] sm:$0xff] }
 0x569   : > { %5995 = vmatmul.bf16.gmra.mxu2 %v13230_v0 }
 0x56b   : > { %v5820_v21 = vpop.f32.mrf.mxu0 }
 0x56d   : > { %v5661_v49 = vpop.f32.mrf.mxu1 }
 0x56e   : > { %5859 = vmatmul.bf16.gmra.mxu0 %v13231_v38  ;;  %v5662_v13 = vadd.f32 %v5661_v49, %v5588_v2 }
 0x570   : > { %5927 = vmatmul.bf16.gmra.mxu1 %v13232_v57 }
 0x572   : > { %6068 = vmatmul.bf16.gmra.mxu3 %v13233_v52 }
 0x573   : > { %v5822_v4 = vpop.f32.mrf.mxu0 }
 0x575   : > { %v5663_v8 = vpop.f32.mrf.mxu1 }
 0x579   : > { %6000 = vmatmul.bf16.gmra.mxu2 %v13234_v16 }
 0x57b   : > { %v5825_v24 = vpop.f32.mrf.mxu0 }
 0x57c   : > { %v5734_v3 = vpop.f32.mrf.mxu2 }
 0x57d   : > { %v5893_v61 = vpop.f32.mrf.mxu1  ;;  %v5735_v8 = vadd.f32 %v5734_v3, %v5662_v13 }
 0x57e   : > { %5864 = vmatmul.bf16.gmra.mxu0 %v13235_v12  ;;  %v5894_v36 = vadd.f32 %v5893_v61, %v5820_v21  ;;  %v7262_v12 = vld [vmem:[%s8060_s18 + $0x230] sm:$0xf0]  ;;  %v4817_v21 = vld [vmem:[#allocation8 + $0x8] sm:$0xff] }
 0x580   : > { %5932 = vmatmul.bf16.gmra.mxu1 %v13236_v28 }
 0x582   : > { %6073 = vmatmul.bf16.gmra.mxu3 %v13237_v44  ;;  %v7260_v44 = vld [vmem:[%s8060_s18 + $0x220] sm:$0xf] }
 0x583   : > { %v5827_v29 = vpop.f32.mrf.mxu0 }
 0x584   : > { %v5736_v31 = vpop.f32.mrf.mxu2 }
 0x585   : > { %v5895_v63 = vpop.f32.mrf.mxu1  ;;  %v5807_v30 = vpop.f32.mrf.mxu3 }
 0x586   : > { %v5808_v41 = vadd.f32 %v5807_v30, %v5735_v8  ;;  %v7448_v30 = vld [vmem:[%s8060_s18 + $0x234] sm:$0xf0] }
 0x588   : > { %v6467_v26 = vadd.f32 %v5808_v41, %v4888_v34  ;;  %v7268_v34 = vld [vmem:[%s8060_s18 + $0x228] sm:$0xf]  ;;  %v7446_v41 = vld [vmem:[%s8060_s18 + $0x22c] sm:$0xf] }
 0x589   : > { %6005 = vmatmul.bf16.gmra.mxu2 %v13238_v45  ;;  %v7270_v45 = vld [vmem:[%s8060_s18 + $0x238] sm:$0xf0] }
 0x58a   : > { %6542 = vst [vmem:[#allocation8 + $0x240] sm:$0xf] %v6467_v26  ;;  %v7269_v26 = vor.u32 %v7448_v30, %v7268_v34  ;;  %v5896_v34 = vadd.f32 %v5895_v63, %v5822_v4 }
 0x58b   : > { %v12597_v15 = vpop.f32.mrf.mxu0 }
 0x58c   : > { %v5966_v2 = vpop.f32.mrf.mxu2  ;;  %6255 = vmatpush.bf16.xpose.msra.mxu2 %v7269_v26  ;;  %v13242_v26 = vld [vmem:[#allocation35_spill] sm:$0xff] }
 0x58d   : > { %v5898_v49 = vpop.f32.mrf.mxu1  ;;  %v5809_v3 = vpop.f32.mrf.mxu3  ;;  %v5967_v13 = vadd.f32 %v5966_v2, %v5894_v36 }
 0x58e   : > { %5869 = vmatmul.bf16.gmra.mxu0 %v11911_v60  ;;  %v7447_v60 = vld [vmem:[%s8060_s18 + $0x22c] sm:$0xf0]  ;;  %v7273_v3 = vor.u32 %v7446_v41, %v7270_v45  ;;  %v4820_v41 = vld [vmem:[#allocation8 + $0x20] sm:$0xff] }
 0x58f   : > { %v7261_v28 = vor.u32 %v7447_v60, %v7260_v44  ;;  %v13241_v44 = vld [vmem:[#allocation38_spill] sm:$0xff] }
 0x590   : > { %5937 = vmatmul.bf16.gmra.mxu1 %v13239_v7  ;;  %v7445_v7 = vld [vmem:[%s8060_s18 + $0x224] sm:$0xf]  ;;  %6328 = vmatpush.bf16.xpose.msra.mxu3 %v7273_v3 }
 0x591   : > { %v7265_v16 = vor.u32 %v7445_v7, %v7262_v12  ;;  %6109 = vmatpush.bf16.xpose.msra.mxu0 %v7261_v28  ;;  %v5899_v7 = vadd.f32 %v5898_v49, %v5825_v24 }
 0x592   : > { %6078 = vmatmul.bf16.gmra.mxu3 %v13240_v51 }
 0x593   : > { %6182 = vmatpush.bf16.xpose.msra.mxu1 %v7265_v16  ;;  %v12609_v2 = vpop.f32.mrf.mxu0  ;;  %v13243_v16 = vld [vmem:[#allocation33_spill] sm:$0xff] }
 0x594   : > { %v5968_v8 = vpop.f32.mrf.mxu2 }
 0x595   : > { %v5900_v31 = vpop.f32.mrf.mxu1  ;;  %v6039_v61 = vpop.f32.mrf.mxu3  ;;  %v5969_v30 = vadd.f32 %v5968_v8, %v5896_v34  ;;  %v4823_v8 = vld [vmem:[#allocation8 + $0x38] sm:$0xff] }
 0x596   : > { %v6040_v52 = vadd.f32 %v6039_v61, %v5967_v13  ;;  %v13244_v61 = vld [vmem:[#allocation36_spill] sm:$0xff]  ;;  %v5901_v49 = vadd.f32 %v5900_v31, %v5827_v29 }
 0x598   : > { %v6396_v36 = vadd.f32 %v6040_v52, %v4817_v21 }
 0x599   : > { %6010 = vmatmul.bf16.gmra.mxu2 %v11736_v5 }
 0x59a   : > { %6471 = vst [vmem:[#allocation8 + $0x8] sm:$0xff] %v6396_v36 }
 0x59b   : > { %v12613_v28 = vpop.f32.mrf.mxu0 }
 0x59c   : > { %v5971_v45 = vpop.f32.mrf.mxu2 }
 0x59d   : > { %v5903_v60 = vpop.f32.mrf.mxu1  ;;  %v6041_v51 = vpop.f32.mrf.mxu3  ;;  %v5972_v52 = vadd.f32 %v5971_v45, %v5899_v7  ;;  %v7442_v7 = vld [vmem:[%s8060_s18 + $0x20c] sm:$0xf] }
 0x59e   : > { %5874 = vmatmul.bf16.gmra.mxu0 %v13241_v44  ;;  %v6042_v12 = vadd.f32 %v6041_v51, %v5969_v30  ;;  %v5904_v31 = vadd.f32 %v5903_v60, %v12597_v15  ;;  %v4829_v44 = vld [vmem:[#allocation8 + $0x68] sm:$0xff] }
 0x5a0   : > { %5942 = vmatmul.bf16.gmra.mxu1 %v13242_v26  ;;  %v6399_v13 = vadd.f32 %v6042_v12, %v4820_v41  ;;  %v7252_v41 = vld [vmem:[%s8060_s18 + $0x208] sm:$0xf]  ;;  %v7444_v12 = vld [vmem:[%s8060_s18 + $0x214] sm:$0xf0]  ;;  %v7246_v26 = vld [vmem:[%s8060_s18 + $0x210] sm:$0xf0] }
 0x5a1   : > { %v7253_v45 = vor.u32 %v7444_v12, %v7252_v41  ;;  %v7244_v12 = vld [vmem:[%s8060_s18 + $0x200] sm:$0xf] }
 0x5a2   : > { %6474 = vst [vmem:[#allocation8 + $0x20] sm:$0xff] %v6399_v13  ;;  %6083 = vmatmul.bf16.gmra.mxu3 %v13243_v16  ;;  %v7254_v13 = vld [vmem:[%s8060_s18 + $0x218] sm:$0xf0] }
 0x5a3   : > { %v12617_v51 = vpop.f32.mrf.mxu0  ;;  %v7257_v16 = vor.u32 %v7442_v7, %v7254_v13  ;;  %6256 = vmatpush.bf16.xpose.msra.mxu2 %v7253_v45  ;;  %v7443_v7 = vld [vmem:[%s8060_s18 + $0x20c] sm:$0xf0] }
 0x5a4   : > { %v5973_v4 = vpop.f32.mrf.mxu2  ;;  %v7245_v13 = vor.u32 %v7443_v7, %v7244_v12 }
 0x5a5   : > { %v5905_v63 = vpop.f32.mrf.mxu1  ;;  %v6044_v3 = vpop.f32.mrf.mxu3  ;;  %v5974_v36 = vadd.f32 %v5973_v4, %v5901_v49  ;;  %6329 = vmatpush.bf16.xpose.msra.mxu3 %v7257_v16 }
 0x5a6   : > { %v6045_v21 = vadd.f32 %v6044_v3, %v5972_v52  ;;  %v4826_v52 = vld [vmem:[#allocation8 + $0x50] sm:$0xff]  ;;  %6110 = vmatpush.bf16.xpose.msra.mxu0 %v7245_v13  ;;  %v5906_v16 = vadd.f32 %v5905_v63, %v12609_v2 }
 0x5a8   : > { %v6402_v24 = vadd.f32 %v6045_v21, %v4823_v8  ;;  %v13246_v21 = vld [vmem:[#allocation37_spill] sm:$0xff] }
 0x5a9   : > { %6015 = vmatmul.bf16.gmra.mxu2 %v13244_v61  ;;  %v13245_v61 = vld [vmem:[#allocation39_spill] sm:$0xff] }
 0x5aa   : > { %6477 = vst [vmem:[#allocation8 + $0x38] sm:$0xff] %v6402_v24 }
 0x5ab   : > { %v5840_v4 = vpop.f32.mrf.mxu0 }
 0x5ac   : > { %v5976_v34 = vpop.f32.mrf.mxu2 }
 0x5ad   : > { %v5908_v30 = vpop.f32.mrf.mxu1  ;;  %v6046_v3 = vpop.f32.mrf.mxu3  ;;  %v5977_v24 = vadd.f32 %v5976_v34, %v5904_v31 }
 0x5ae   : > { %5879 = vmatmul.bf16.gmra.mxu0 %v12468_v47  ;;  %v6047_v29 = vadd.f32 %v6046_v3, %v5974_v36  ;;  %v7441_v47 = vld [vmem:[%s8060_s18 + $0x204] sm:$0xf] }
 0x5b0   : > { %5947 = vmatmul.bf16.gmra.mxu1 %v13245_v61  ;;  %v6405_v8 = vadd.f32 %v6047_v29, %v4826_v52  ;;  %v7249_v61 = vor.u32 %v7441_v47, %v7246_v26  ;;  %v4832_v29 = vld [vmem:[#allocation8 + $0x80] sm:$0xff]  ;;  %v5909_v26 = vadd.f32 %v5908_v30, %v12613_v28 }
 0x5b2   : > { %6480 = vst [vmem:[#allocation8 + $0x50] sm:$0xff] %v6405_v8  ;;  %6088 = vmatmul.bf16.gmra.mxu3 %v13246_v21  ;;  %6183 = vmatpush.bf16.xpose.msra.mxu1 %v7249_v61 }
 0x5b3   : > { %v5842_v15 = vpop.f32.mrf.mxu0 }
 0x5b4   : > { %v5978_v49 = vpop.f32.mrf.mxu2 }
 0x5b5   : > { %v5910_v41 = vpop.f32.mrf.mxu1  ;;  %v6049_v45 = vpop.f32.mrf.mxu3  ;;  %v5979_v34 = vadd.f32 %v5978_v49, %v5906_v16 }
 0x5b6   : > { %v6050_v36 = vadd.f32 %v6049_v45, %v5977_v24  ;;  %v4835_v24 = vld [vmem:[#allocation8 + $0x98] sm:$0xff]  ;;  %v5911_v13 = vadd.f32 %v5910_v41, %v12617_v51  ;;  %v4841_v41 = vld [vmem:[#allocation8 + $0xc8] sm:$0xff] }
 0x5b8   : > { %v6408_v60 = vadd.f32 %v6050_v36, %v4829_v44  ;;  %v4838_v36 = vld [vmem:[#allocation8 + $0xb0] sm:$0xff] }
 0x5b9   : > { %6020 = vmatmul.bf16.gmra.mxu2 %v12383_v59 }
 0x5ba   : > { %6483 = vst [vmem:[#allocation8 + $0x68] sm:$0xff] %v6408_v60 }
 0x5bb   : > { %v5845_v61 = vpop.f32.mrf.mxu0 }
 0x5bc   : > { %v5981_v52 = vpop.f32.mrf.mxu2 }
 0x5bd   : > { %v5913_v3 = vpop.f32.mrf.mxu1  ;;  %v6051_v31 = vpop.f32.mrf.mxu3  ;;  %v5982_v44 = vadd.f32 %v5981_v52, %v5909_v26 }
 0x5be   : > { %6111 = vmatmul.bf16.vlgmr.msra.gmra.mxu0 %v8607_v42  ;;  %v6052_v47 = vadd.f32 %v6051_v31, %v5979_v34  ;;  %v5914_v34 = vadd.f32 %v5913_v3, %v5840_v4  ;;  %v4844_v3 = vld [vmem:[#allocation8 + $0xe0] sm:$0xff] }
 0x5c0   : > { %5952 = vmatmul.bf16.gmra.mxu1 %v12484_v25  ;;  %v6411_v8 = vadd.f32 %v6052_v47, %v4832_v29 }
 0x5c2   : > { %6486 = vst [vmem:[#allocation8 + $0x80] sm:$0xff] %v6411_v8  ;;  %6093 = vmatmul.bf16.gmra.mxu3 %v12457_v17 }
 0x5c3   : > { %v5847_v42 = vpop.f32.mrf.mxu0 }
 0x5c4   : > { %v5983_v2 = vpop.f32.mrf.mxu2 }
 0x5c5   : > { %v5915_v63 = vpop.f32.mrf.mxu1  ;;  %v6054_v49 = vpop.f32.mrf.mxu3  ;;  %v5984_v45 = vadd.f32 %v5983_v2, %v5911_v13 }
 0x5c6   : > { %v6055_v12 = vadd.f32 %v6054_v49, %v5982_v44  ;;  %v5916_v2 = vadd.f32 %v5915_v63, %v5842_v15  ;;  %v4847_v63 = vld [vmem:[#allocation8 + $0xf8] sm:$0xff] }
 0x5c8   : > { %v6414_v7 = vadd.f32 %v6055_v12, %v4835_v24 }
 0x5c9   : > { %6025 = vmatmul.bf16.gmra.mxu2 %v12509_v33 }
 0x5ca   : > { %6489 = vst [vmem:[#allocation8 + $0x98] sm:$0xff] %v6414_v7 }
 0x5cb   : > { %v5850_v52 = vpop.f32.mrf.mxu0 }
 0x5cc   : > { %v5986_v28 = vpop.f32.mrf.mxu2 }
 0x5cd   : > { %v5918_v30 = vpop.f32.mrf.mxu1  ;;  %v6056_v60 = vpop.f32.mrf.mxu3  ;;  %v5987_v31 = vadd.f32 %v5986_v28, %v5914_v34 }
 0x5ce   : > { %6116 = vmatmul.bf16.gmra.mxu0 %v8909_v53  ;;  %v6057_v16 = vadd.f32 %v6056_v60, %v5984_v45  ;;  %v5919_v7 = vadd.f32 %v5918_v30, %v5845_v61  ;;  %v4850_v30 = vld [vmem:[#allocation8 + $0x110] sm:$0xff] }
 0x5d0   : > { %6184 = vmatmul.bf16.vlgmr.msra.gmra.mxu1 %v8649_v50  ;;  %v6417_v29 = vadd.f32 %v6057_v16, %v4838_v36 }
 0x5d2   : > { %6492 = vst [vmem:[#allocation8 + $0xb0] sm:$0xff] %v6417_v29  ;;  %6098 = vmatmul.bf16.gmra.mxu3 %v12519_v40 }
 0x5d3   : > { %v5852_v53 = vpop.f32.mrf.mxu0 }
 0x5d4   : > { %v5988_v47 = vpop.f32.mrf.mxu2 }
 0x5d5   : > { %v5920_v51 = vpop.f32.mrf.mxu1  ;;  %v6059_v26 = vpop.f32.mrf.mxu3  ;;  %v5989_v50 = vadd.f32 %v5988_v47, %v5916_v2 }
 0x5d6   : > { %v6060_v8 = vadd.f32 %v6059_v26, %v5987_v31  ;;  %v5921_v34 = vadd.f32 %v5920_v51, %v5847_v42  ;;  %v4853_v51 = vld [vmem:[#allocation8 + $0x128] sm:$0xff] }
 0x5d8   : > { %v6420_v44 = vadd.f32 %v6060_v8, %v4841_v41 }
 0x5d9   : > { %6257 = vmatmul.bf16.vlgmr.msra.gmra.mxu2 %v8762_v6 }
 0x5da   : > { %6495 = vst [vmem:[#allocation8 + $0xc8] sm:$0xff] %v6420_v44 }
 0x5db   : > { %v5855_v13 = vpop.f32.mrf.mxu0 }
 0x5dc   : > { %v5991_v24 = vpop.f32.mrf.mxu2 }
 0x5dd   : > { %v5923_v4 = vpop.f32.mrf.mxu1  ;;  %v6061_v49 = vpop.f32.mrf.mxu3  ;;  %v5992_v6 = vadd.f32 %v5991_v24, %v5919_v7 }
 0x5de   : > { %6121 = vmatmul.bf16.gmra.mxu0 %v9252_v46  ;;  %v6062_v12 = vadd.f32 %v6061_v49, %v5989_v50  ;;  %v5924_v47 = vadd.f32 %v5923_v4, %v5850_v52  ;;  %v4856_v4 = vld [vmem:[#allocation8 + $0x140] sm:$0xff] }
 0x5e0   : > { %6189 = vmatmul.bf16.gmra.mxu1 %v8986_v18  ;;  %v6423_v45 = vadd.f32 %v6062_v12, %v4844_v3 }
 0x5e2   : > { %6498 = vst [vmem:[#allocation8 + $0xe0] sm:$0xff] %v6423_v45  ;;  %6330 = vmatmul.bf16.vlgmr.msra.gmra.mxu3 %v8810_v58 }
 0x5e3   : > { %v5857_v46 = vpop.f32.mrf.mxu0 }
 0x5e4   : > { %v5993_v28 = vpop.f32.mrf.mxu2 }
 0x5e5   : > { %v5925_v15 = vpop.f32.mrf.mxu1  ;;  %v6064_v36 = vpop.f32.mrf.mxu3  ;;  %v5994_v18 = vadd.f32 %v5993_v28, %v5921_v34  ;;  %v4859_v28 = vld [vmem:[#allocation8 + $0x158] sm:$0xff]  ;;  %v4862_v34 = vld [vmem:[#allocation8 + $0x170] sm:$0xff] }
 0x5e6   : > { %v6065_v60 = vadd.f32 %v6064_v36, %v5992_v6  ;;  %v5926_v24 = vadd.f32 %v5925_v15, %v5852_v53 }
 0x5e8   : > { %v6426_v16 = vadd.f32 %v6065_v60, %v4847_v63 }
 0x5e9   : > { %6262 = vmatmul.bf16.gmra.mxu2 %v9084_v55 }
 0x5ea   : > { %6501 = vst [vmem:[#allocation8 + $0xf8] sm:$0xff] %v6426_v16 }
 0x5eb   : > { %v5860_v41 = vpop.f32.mrf.mxu0 }
 0x5ec   : > { %v5996_v29 = vpop.f32.mrf.mxu2 }
 0x5ed   : > { %v5928_v61 = vpop.f32.mrf.mxu1  ;;  %v6066_v31 = vpop.f32.mrf.mxu3  ;;  %v5997_v55 = vadd.f32 %v5996_v29, %v5924_v47 }
 0x5ee   : > { %6126 = vmatmul.bf16.gmra.mxu0 %v9596_v35  ;;  %v6067_v58 = vadd.f32 %v6066_v31, %v5994_v18  ;;  %v5929_v12 = vadd.f32 %v5928_v61, %v5855_v13 }
 0x5f0   : > { %6194 = vmatmul.bf16.gmra.mxu1 %v9324_v48  ;;  %v6429_v26 = vadd.f32 %v6067_v58, %v4850_v30  ;;  %v4865_v58 = vld [vmem:[#allocation8 + $0x188] sm:$0xff] }
 0x5f2   : > { %6504 = vst [vmem:[#allocation8 + $0x110] sm:$0xff] %v6429_v26  ;;  %6335 = vmatmul.bf16.gmra.mxu3 %v9182_v14 }
 0x5f3   : > { %v5862_v35 = vpop.f32.mrf.mxu0 }
 0x5f4   : > { %v5998_v8 = vpop.f32.mrf.mxu2 }
 0x5f5   : > { %v5930_v42 = vpop.f32.mrf.mxu1  ;;  %v6069_v44 = vpop.f32.mrf.mxu3  ;;  %v5999_v48 = vadd.f32 %v5998_v8, %v5926_v24 }
 0x5f6   : > { %v6070_v2 = vadd.f32 %v6069_v44, %v5997_v55  ;;  %v5931_v60 = vadd.f32 %v5930_v42, %v5857_v46 }
 0x5f8   : > { %v6432_v50 = vadd.f32 %v6070_v2, %v4853_v51  ;;  %v4868_v51 = vld [vmem:[#allocation8 + $0x1a0] sm:$0xff] }
 0x5f9   : > { %6267 = vmatmul.bf16.gmra.mxu2 %v9413_v19 }
 0x5fa   : > { %6507 = vst [vmem:[#allocation8 + $0x128] sm:$0xff] %v6432_v50 }
 0x5fb   : > { %v5865_v7 = vpop.f32.mrf.mxu0 }
 0x5fc   : > { %v6001_v3 = vpop.f32.mrf.mxu2 }
 0x5fd   : > { %v5933_v52 = vpop.f32.mrf.mxu1  ;;  %v6071_v49 = vpop.f32.mrf.mxu3  ;;  %v6002_v19 = vadd.f32 %v6001_v3, %v5929_v12  ;;  %v4871_v3 = vld [vmem:[#allocation8 + $0x1b8] sm:$0xff] }
 0x5fe   : > { %6131 = vmatmul.bf16.gmra.mxu0 %v9926_v56  ;;  %v6072_v14 = vadd.f32 %v6071_v49, %v5999_v48  ;;  %v5934_v29 = vadd.f32 %v5933_v52, %v5860_v41 }
 0x600   : > { %6199 = vmatmul.bf16.gmra.mxu1 %v9681_v54  ;;  %v6435_v45 = vadd.f32 %v6072_v14, %v4856_v4 }
 0x602   : > { %6510 = vst [vmem:[#allocation8 + $0x140] sm:$0xff] %v6435_v45  ;;  %6340 = vmatmul.bf16.gmra.mxu3 %v9497_v62  ;;  %v4874_v45 = vld [vmem:[#allocation8 + $0x1d0] sm:$0xff] }
 0x603   : > { %v5867_v56 = vpop.f32.mrf.mxu0 }
 0x604   : > { %v6003_v6 = vpop.f32.mrf.mxu2 }
 0x605   : > { %v5935_v53 = vpop.f32.mrf.mxu1  ;;  %v6074_v15 = vpop.f32.mrf.mxu3  ;;  %v6004_v54 = vadd.f32 %v6003_v6, %v5931_v60 }
 0x606   : > { %v6075_v63 = vadd.f32 %v6074_v15, %v6002_v19  ;;  %v5936_v8 = vadd.f32 %v5935_v53, %v5862_v35 }
 0x608   : > { %v6438_v36 = vadd.f32 %v6075_v63, %v4859_v28 }
 0x609   : > { %6272 = vmatmul.bf16.gmra.mxu2 %v9762_v11 }
 0x60a   : > { %6513 = vst [vmem:[#allocation8 + $0x158] sm:$0xff] %v6438_v36 }
 0x60b   : > { %v5870_v61 = vpop.f32.mrf.mxu0 }
 0x60c   : > { %v6006_v16 = vpop.f32.mrf.mxu2 }
 0x60d   : > { %v5938_v13 = vpop.f32.mrf.mxu1  ;;  %v6076_v18 = vpop.f32.mrf.mxu3  ;;  %v6007_v11 = vadd.f32 %v6006_v16, %v5934_v29 }
 0x60e   : > { %6136 = vmatmul.bf16.gmra.mxu0 %v10238_v9  ;;  %v6077_v62 = vadd.f32 %v6076_v18, %v6004_v54  ;;  %v5939_v2 = vadd.f32 %v5938_v13, %v5865_v7  ;;  %v4880_v18 = vld [vmem:[#allocation8 + $0x200] sm:$0xff] }
 0x610   : > { %6204 = vmatmul.bf16.gmra.mxu1 %v9980_v10  ;;  %v6441_v30 = vadd.f32 %v6077_v62, %v4862_v34 }
 0x612   : > { %6516 = vst [vmem:[#allocation8 + $0x170] sm:$0xff] %v6441_v30  ;;  %6345 = vmatmul.bf16.gmra.mxu3 %v13221_v22 }
 0x613   : > { %v5872_v9 = vpop.f32.mrf.mxu0 }
 0x614   : > { %v6008_v31 = vpop.f32.mrf.mxu2 }
 0x615   : > { %v5940_v46 = vpop.f32.mrf.mxu1  ;;  %v6079_v47 = vpop.f32.mrf.mxu3  ;;  %v6009_v10 = vadd.f32 %v6008_v31, %v5936_v8 }
 0x616   : > { %v6080_v26 = vadd.f32 %v6079_v47, %v6007_v11  ;;  %v5941_v14 = vadd.f32 %v5940_v46, %v5867_v56  ;;  %v4877_v56 = vld [vmem:[#allocation8 + $0x1e8] sm:$0xff]  ;;  %v13247_v11 = vld [vmem:[#allocation22_spill] sm:$0xff] }
 0x618   : > { %v6444_v55 = vadd.f32 %v6080_v26, %v4865_v58  ;;  %v4883_v58 = vld [vmem:[#allocation8 + $0x218] sm:$0xff] }
 0x619   : > { %6277 = vmatmul.bf16.gmra.mxu2 %v13222_v23 }
 0x61a   : > { %6519 = vst [vmem:[#allocation8 + $0x188] sm:$0xff] %v6444_v55 }
 0x61b   : > { %v5875_v50 = vpop.f32.mrf.mxu0 }
 0x61c   : > { %v6011_v42 = vpop.f32.mrf.mxu2 }
 0x61d   : > { %v5943_v41 = vpop.f32.mrf.mxu1  ;;  %v6081_v44 = vpop.f32.mrf.mxu3  ;;  %v6012_v23 = vadd.f32 %v6011_v42, %v5939_v2 }
 0x61e   : > { %6141 = vmatmul.bf16.gmra.mxu0 %v13223_v43  ;;  %v6082_v22 = vadd.f32 %v6081_v44, %v6009_v10  ;;  %v5944_v6 = vadd.f32 %v5943_v41, %v5870_v61  ;;  %v13249_v41 = vld [vmem:[#allocation31_spill] sm:$0xff] }
 0x620   : > { %6209 = vmatmul.bf16.gmra.mxu1 %v13224_v1  ;;  %v6447_v24 = vadd.f32 %v6082_v22, %v4868_v51  ;;  %v4886_v51 = vld [vmem:[#allocation8 + $0x230] sm:$0xff] }
 0x621   : > { %v13250_v22 = vld [vmem:[#allocation28_spill] sm:$0xff] }
 0x622   : > { %6522 = vst [vmem:[#allocation8 + $0x1a0] sm:$0xff] %v6447_v24  ;;  %6350 = vmatmul.bf16.gmra.mxu3 %v13225_v37 }
 0x623   : > { %v5877_v43 = vpop.f32.mrf.mxu0 }
 0x624   : > { %v6013_v48 = vpop.f32.mrf.mxu2 }
 0x625   : > { %v5945_v35 = vpop.f32.mrf.mxu1  ;;  %v6084_v52 = vpop.f32.mrf.mxu3  ;;  %v6014_v1 = vadd.f32 %v6013_v48, %v5941_v14  ;;  %v13251_v48 = vld [vmem:[#allocation26_spill] sm:$0xff]  ;;  %v13252_v14 = vld [vmem:[#allocation29_spill] sm:$0xff] }
 0x626   : > { %v6085_v4 = vadd.f32 %v6084_v52, %v6012_v23  ;;  %v5946_v16 = vadd.f32 %v5945_v35, %v5872_v9  ;;  %v13248_v9 = vld [vmem:[#allocation25_spill] sm:$0xff] }
 0x628   : > { %v6450_v49 = vadd.f32 %v6085_v4, %v4871_v3  ;;  %v4889_v4 = vld [vmem:[#allocation8 + $0x248] sm:$0xf] }
 0x629   : > { %6282 = vmatmul.bf16.gmra.mxu2 %v13226_v20 }
 0x62a   : > { %6525 = vst [vmem:[#allocation8 + $0x1b8] sm:$0xff] %v6450_v49 }
 0x62b   : > { %v5880_v53 = vpop.f32.mrf.mxu0 }
 0x62c   : > { %v6016_v12 = vpop.f32.mrf.mxu2 }
 0x62d   : > { %v5948_v7 = vpop.f32.mrf.mxu1  ;;  %v6086_v19 = vpop.f32.mrf.mxu3  ;;  %v6017_v20 = vadd.f32 %v6016_v12, %v5944_v6  ;;  %v13254_v6 = vld [vmem:[#allocation32_spill] sm:$0xff] }
 0x62e   : > { %6146 = vmatmul.bf16.gmra.mxu0 %v13227_v27  ;;  %v6087_v37 = vadd.f32 %v6086_v19, %v6014_v1  ;;  %v5949_v29 = vadd.f32 %v5948_v7, %v5875_v50  ;;  %v13253_v19 = vld [vmem:[#allocation34_spill] sm:$0xff] }
 0x630   : > { %6214 = vmatmul.bf16.gmra.mxu1 %v13228_v32  ;;  %v6453_v28 = vadd.f32 %v6087_v37, %v4874_v45 }
 0x632   : > { %6528 = vst [vmem:[#allocation8 + $0x1d0] sm:$0xff] %v6453_v28  ;;  %6355 = vmatmul.bf16.gmra.mxu3 %v13229_v39 }
 0x633   : > { %v5882_v27 = vpop.f32.mrf.mxu0 }
 0x634   : > { %v6018_v15 = vpop.f32.mrf.mxu2 }
 0x635   : > { %v5950_v63 = vpop.f32.mrf.mxu1  ;;  %v6089_v36 = vpop.f32.mrf.mxu3  ;;  %v6019_v32 = vadd.f32 %v6018_v15, %v5946_v16 }
 0x636   : > { %v6090_v60 = vadd.f32 %v6089_v36, %v6017_v20  ;;  %v5951_v8 = vadd.f32 %v5950_v63, %v5877_v43  ;;  %v13255_v20 = vld [vmem:[#allocation30_spill] sm:$0xff]  ;;  %v4818_v36 = vld [vmem:[#allocation8 + $0x10] sm:$0xff] }
 0x638   : > { %v6456_v54 = vadd.f32 %v6090_v60, %v4877_v56 }
 0x639   : > { %6287 = vmatmul.bf16.gmra.mxu2 %v13230_v0 }
 0x63a   : > { %6531 = vst [vmem:[#allocation8 + $0x1e8] sm:$0xff] %v6456_v54 }
 0x63b   : > { %v6112_v61 = vpop.f32.mrf.mxu0 }
 0x63c   : > { %v6021_v13 = vpop.f32.mrf.mxu2 }
 0x63d   : > { %v5953_v34 = vpop.f32.mrf.mxu1  ;;  %v6091_v62 = vpop.f32.mrf.mxu3  ;;  %v6022_v0 = vadd.f32 %v6021_v13, %v5949_v29 }
 0x63e   : > { %6151 = vmatmul.bf16.gmra.mxu0 %v13231_v38  ;;  %v6092_v39 = vadd.f32 %v6091_v62, %v6019_v32  ;;  %v5954_v50 = vadd.f32 %v5953_v34, %v5880_v53  ;;  %v13256_v62 = vld [vmem:[#allocation38_spill] sm:$0xff] }
 0x640   : > { %6219 = vmatmul.bf16.gmra.mxu1 %v13232_v57  ;;  %v6459_v30 = vadd.f32 %v6092_v39, %v4880_v18  ;;  %v4821_v39 = vld [vmem:[#allocation8 + $0x28] sm:$0xff] }
 0x642   : > { %6534 = vst [vmem:[#allocation8 + $0x200] sm:$0xff] %v6459_v30  ;;  %6360 = vmatmul.bf16.gmra.mxu3 %v13247_v11 }
 0x643   : > { %v6114_v38 = vpop.f32.mrf.mxu0 }
 0x644   : > { %v6023_v31 = vpop.f32.mrf.mxu2 }
 0x645   : > { %v5955_v46 = vpop.f32.mrf.mxu1  ;;  %v6094_v47 = vpop.f32.mrf.mxu3  ;;  %v6024_v57 = vadd.f32 %v6023_v31, %v5951_v8 }
 0x646   : > { %v6095_v26 = vadd.f32 %v6094_v47, %v6022_v0  ;;  %v13258_v46 = vld [vmem:[#allocation33_spill] sm:$0xff] }
 0x648   : > { %v6462_v55 = vadd.f32 %v6095_v26, %v4883_v58  ;;  %v4824_v26 = vld [vmem:[#allocation8 + $0x40] sm:$0xff] }
 0x649   : > { %6292 = vmatmul.bf16.gmra.mxu2 %v13248_v9 }
 0x64a   : > { %6537 = vst [vmem:[#allocation8 + $0x218] sm:$0xff] %v6462_v55  ;;  %v13259_v55 = vld [vmem:[#allocation36_spill] sm:$0xff] }
 0x64b   : > { %v6117_v24 = vpop.f32.mrf.mxu0 }
 0x64c   : > { %v6026_v10 = vpop.f32.mrf.mxu2 }
 0x64d   : > { %v6185_v42 = vpop.f32.mrf.mxu1  ;;  %v6096_v44 = vpop.f32.mrf.mxu3  ;;  %v6027_v35 = vadd.f32 %v6026_v10, %v5954_v50  ;;  %v13261_v50 = vld [vmem:[#allocation39_spill] sm:$0xff] }
 0x64e   : > { %6156 = vmatmul.bf16.gmra.mxu0 %v13249_v41  ;;  %v6097_v2 = vadd.f32 %v6096_v44, %v6024_v57  ;;  %v6186_v53 = vadd.f32 %v6185_v42, %v6112_v61  ;;  %v13257_v61 = vld [vmem:[#allocation35_spill] sm:$0xff]  ;;  %v13260_v44 = vld [vmem:[#allocation40_spill] sm:$0xff] }
 0x650   : > { %6224 = vmatmul.bf16.gmra.mxu1 %v13250_v22  ;;  %v6465_v23 = vadd.f32 %v6097_v2, %v4886_v51  ;;  %v4827_v22 = vld [vmem:[#allocation8 + $0x58] sm:$0xff] }
 0x652   : > { %6540 = vst [vmem:[#allocation8 + $0x230] sm:$0xff] %v6465_v23  ;;  %6365 = vmatmul.bf16.gmra.mxu3 %v13251_v48 }
 0x653   : > { %v6119_v1 = vpop.f32.mrf.mxu0 }
 0x654   : > { %v6028_v3 = vpop.f32.mrf.mxu2 }
 0x655   : > { %v6187_v52 = vpop.f32.mrf.mxu1  ;;  %v6099_v43 = vpop.f32.mrf.mxu3 }
 0x656   : > { %v6100_v49 = vadd.f32 %v6099_v43, %v6027_v35  ;;  %v6188_v32 = vadd.f32 %v6187_v52, %v6114_v38  ;;  %v4830_v43 = vld [vmem:[#allocation8 + $0x70] sm:$0xff] }
 0x658   : > { %v6468_v12 = vadd.f32 %v6100_v49, %v4889_v4 }
 0x659   : > { %6297 = vmatmul.bf16.gmra.mxu2 %v13252_v14 }
 0x65a   : > { %6543 = vst [vmem:[#allocation8 + $0x248] sm:$0xf] %v6468_v12 }
 0x65b   : > { %v6122_v28 = vpop.f32.mrf.mxu0 }
 0x65c   : > { %v6258_v7 = vpop.f32.mrf.mxu2 }
 0x65d   : > { %v6190_v45 = vpop.f32.mrf.mxu1  ;;  %v6101_v37 = vpop.f32.mrf.mxu3  ;;  %v6259_v15 = vadd.f32 %v6258_v7, %v6186_v53 }
 0x65e   : > { %6161 = vmatmul.bf16.gmra.mxu0 %v13253_v19  ;;  %v6191_v11 = vadd.f32 %v6190_v45, %v6117_v24 }
 0x660   : > { %6229 = vmatmul.bf16.gmra.mxu1 %v13254_v6  ;;  %v4833_v6 = vld [vmem:[#allocation8 + $0x88] sm:$0xff] }
 0x662   : > { %6370 = vmatmul.bf16.gmra.mxu3 %v13255_v20 }
 0x663   : > { %v6124_v54 = vpop.f32.mrf.mxu0 }
 0x664   : > { %v6260_v63 = vpop.f32.mrf.mxu2 }
 0x665   : > { %v6192_v56 = vpop.f32.mrf.mxu1  ;;  %v6331_v60 = vpop.f32.mrf.mxu3  ;;  %v6261_v13 = vadd.f32 %v6260_v63, %v6188_v32 }
 0x666   : > { %v6332_v27 = vadd.f32 %v6331_v60, %v6259_v15  ;;  %v6193_v10 = vadd.f32 %v6192_v56, %v6119_v1 }
 0x668   : > { %v6397_v16 = vadd.f32 %v6332_v27, %v4818_v36  ;;  %v4836_v36 = vld [vmem:[#allocation8 + $0xa0] sm:$0xff] }
 0x669   : > { %6302 = vmatmul.bf16.gmra.mxu2 %v11736_v5 }
 0x66a   : > { %6472 = vst [vmem:[#allocation8 + $0x10] sm:$0xff] %v6397_v16 }
 0x66b   : > { %v6127_v0 = vpop.f32.mrf.mxu0 }
 0x66c   : > { %v6263_v34 = vpop.f32.mrf.mxu2 }
 0x66d   : > { %v6195_v18 = vpop.f32.mrf.mxu1  ;;  %v6333_v29 = vpop.f32.mrf.mxu3  ;;  %v6264_v5 = vadd.f32 %v6263_v34, %v6191_v11 }
 0x66e   : > { %6166 = vmatmul.bf16.gmra.mxu0 %v13256_v62  ;;  %v6334_v30 = vadd.f32 %v6333_v29, %v6261_v13  ;;  %v6196_v23 = vadd.f32 %v6195_v18, %v6122_v28  ;;  %v4839_v18 = vld [vmem:[#allocation8 + $0xb8] sm:$0xff] }
 0x670   : > { %6234 = vmatmul.bf16.gmra.mxu1 %v13257_v61  ;;  %v6400_v31 = vadd.f32 %v6334_v30, %v4821_v39 }
 0x672   : > { %6475 = vst [vmem:[#allocation8 + $0x28] sm:$0xff] %v6400_v31  ;;  %6375 = vmatmul.bf16.gmra.mxu3 %v13258_v46 }
 0x673   : > { %v6129_v8 = vpop.f32.mrf.mxu0 }
 0x674   : > { %v6265_v58 = vpop.f32.mrf.mxu2 }
 0x675   : > { %v6197_v47 = vpop.f32.mrf.mxu1  ;;  %v6336_v9 = vpop.f32.mrf.mxu3  ;;  %v6266_v42 = vadd.f32 %v6265_v58, %v6193_v10 }
 0x676   : > { %v6337_v38 = vadd.f32 %v6336_v9, %v6264_v5  ;;  %v6198_v7 = vadd.f32 %v6197_v47, %v6124_v54 }
 0x678   : > { %v6403_v57 = vadd.f32 %v6337_v38, %v4824_v26 }
 0x679   : > { %6307 = vmatmul.bf16.gmra.mxu2 %v13259_v55  ;;  %v4845_v55 = vld [vmem:[#allocation8 + $0xe8] sm:$0xff] }
 0x67a   : > { %6478 = vst [vmem:[#allocation8 + $0x40] sm:$0xff] %v6403_v57 }
 0x67b   : > { %v6132_v48 = vpop.f32.mrf.mxu0 }
 0x67c   : > { %v6268_v41 = vpop.f32.mrf.mxu2 }
 0x67d   : > { %v6200_v51 = vpop.f32.mrf.mxu1  ;;  %v6338_v2 = vpop.f32.mrf.mxu3  ;;  %v6269_v3 = vadd.f32 %v6268_v41, %v6196_v23 }
 0x67e   : > { %6171 = vmatmul.bf16.gmra.mxu0 %v13260_v44  ;;  %v6339_v24 = vadd.f32 %v6338_v2, %v6266_v42  ;;  %v6201_v28 = vadd.f32 %v6200_v51, %v6127_v0 }
 0x680   : > { %6239 = vmatmul.bf16.gmra.mxu1 %v13261_v50  ;;  %v6406_v35 = vadd.f32 %v6339_v24, %v4827_v22  ;;  %v4848_v22 = vld [vmem:[#allocation8 + $0x100] sm:$0xff] }
 0x682   : > { %6481 = vst [vmem:[#allocation8 + $0x58] sm:$0xff] %v6406_v35  ;;  %6380 = vmatmul.bf16.gmra.mxu3 %v13246_v21 }
 0x683   : > { %v6134_v1 = vpop.f32.mrf.mxu0 }
 0x684   : > { %v6270_v52 = vpop.f32.mrf.mxu2 }
 0x685   : > { %v6202_v4 = vpop.f32.mrf.mxu1  ;;  %v6341_v49 = vpop.f32.mrf.mxu3  ;;  %v6271_v45 = vadd.f32 %v6270_v52, %v6198_v7 }
 0x686   : > { %v6342_v14 = vadd.f32 %v6341_v49, %v6269_v3  ;;  %v6203_v32 = vadd.f32 %v6202_v4, %v6129_v8  ;;  %v4851_v4 = vld [vmem:[#allocation8 + $0x118] sm:$0xff] }
 0x688   : > { %v6409_v12 = vadd.f32 %v6342_v14, %v4830_v43 }
 0x689   : > { %6312 = vmatmul.bf16.gmra.mxu2 %v12383_v59 }
 0x68a   : > { %6484 = vst [vmem:[#allocation8 + $0x70] sm:$0xff] %v6409_v12 }
 0x68b   : > { %v6137_v20 = vpop.f32.mrf.mxu0 }
 0x68c   : > { %v6273_v19 = vpop.f32.mrf.mxu2 }
 0x68d   : > { %v6205_v37 = vpop.f32.mrf.mxu1  ;;  %v6343_v53 = vpop.f32.mrf.mxu3  ;;  %v6274_v63 = vadd.f32 %v6273_v19, %v6201_v28 }
 0x68e   : > { %v6344_v21 = vadd.f32 %v6343_v53, %v6271_v45  ;;  %v6206_v29 = vadd.f32 %v6205_v37, %v6132_v48  ;;  %v4854_v37 = vld [vmem:[#allocation8 + $0x130] sm:$0xff] }
 0x690   : > { %6244 = vmatmul.bf16.gmra.mxu1 %v12484_v25  ;;  %v6412_v15 = vadd.f32 %v6344_v21, %v4833_v6 }
 0x692   : > { %6487 = vst [vmem:[#allocation8 + $0x88] sm:$0xff] %v6412_v15  ;;  %6385 = vmatmul.bf16.gmra.mxu3 %v12457_v17 }
 0x693   : > { %v6139_v54 = vpop.f32.mrf.mxu0 }
 0x694   : > { %v6275_v59 = vpop.f32.mrf.mxu2 }
 0x695   : > { %v6207_v56 = vpop.f32.mrf.mxu1  ;;  %v6346_v60 = vpop.f32.mrf.mxu3  ;;  %v6276_v25 = vadd.f32 %v6275_v59, %v6203_v32 }
 0x696   : > { %v6347_v27 = vadd.f32 %v6346_v60, %v6274_v63  ;;  %v6208_v47 = vadd.f32 %v6207_v56, %v6134_v1  ;;  %v4857_v56 = vld [vmem:[#allocation8 + $0x148] sm:$0xff] }
 0x698   : > { %v6415_v16 = vadd.f32 %v6347_v27, %v4836_v36 }
 0x699   : > { %6317 = vmatmul.bf16.gmra.mxu2 %v12509_v33  ;;  %v4842_v33 = vld [vmem:[#allocation8 + $0xd0] sm:$0xff] }
 0x69a   : > { %6490 = vst [vmem:[#allocation8 + $0xa0] sm:$0xff] %v6415_v16 }
 0x69b   : > { %v6142_v17 = vpop.f32.mrf.mxu0 }
 0x69c   : > { %v6278_v13 = vpop.f32.mrf.mxu2 }
 0x69d   : > { %v6210_v34 = vpop.f32.mrf.mxu1  ;;  %v6348_v62 = vpop.f32.mrf.mxu3  ;;  %v6279_v30 = vadd.f32 %v6278_v13, %v6206_v29 }
 0x69e   : > { %v6349_v39 = vadd.f32 %v6348_v62, %v6276_v25  ;;  %v6211_v10 = vadd.f32 %v6210_v34, %v6137_v20  ;;  %v4860_v34 = vld [vmem:[#allocation8 + $0x160] sm:$0xff] }
 0x6a0   : > { %v6418_v61 = vadd.f32 %v6349_v39, %v4839_v18 }
 0x6a2   : > { %6493 = vst [vmem:[#allocation8 + $0xb8] sm:$0xff] %v6418_v61  ;;  %6390 = vmatmul.bf16.gmra.mxu3 %v12519_v40 }
 0x6a3   : > { %v6144_v5 = vpop.f32.mrf.mxu0 }
 0x6a4   : > { %v6280_v11 = vpop.f32.mrf.mxu2 }
 0x6a5   : > { %v6212_v0 = vpop.f32.mrf.mxu1  ;;  %v6351_v31 = vpop.f32.mrf.mxu3  ;;  %v6281_v26 = vadd.f32 %v6280_v11, %v6208_v47 }
 0x6a6   : > { %v6352_v46 = vadd.f32 %v6351_v31, %v6279_v30  ;;  %v6213_v48 = vadd.f32 %v6212_v0, %v6139_v54  ;;  %v4863_v0 = vld [vmem:[#allocation8 + $0x178] sm:$0xff] }
 0x6a8   : > { %v6421_v58 = vadd.f32 %v6352_v46, %v4842_v33 }
 0x6aa   : > { %6496 = vst [vmem:[#allocation8 + $0xd0] sm:$0xff] %v6421_v58 }
 0x6ab   : > { %v6147_v42 = vpop.f32.mrf.mxu0 }
 0x6ac   : > { %v6283_v9 = vpop.f32.mrf.mxu2 }
 0x6ad   : > { %v6215_v38 = vpop.f32.mrf.mxu1  ;;  %v6353_v8 = vpop.f32.mrf.mxu3  ;;  %v6284_v40 = vadd.f32 %v6283_v9, %v6211_v10 }
 0x6ae   : > { %v6354_v57 = vadd.f32 %v6353_v8, %v6281_v26  ;;  %v6216_v14 = vadd.f32 %v6215_v38, %v6142_v17  ;;  %v4866_v38 = vld [vmem:[#allocation8 + $0x190] sm:$0xff] }
 0x6b0   : > { %v6424_v41 = vadd.f32 %v6354_v57, %v4845_v55 }
 0x6b2   : > { %6499 = vst [vmem:[#allocation8 + $0xe8] sm:$0xff] %v6424_v41 }
 0x6b3   : > { %v6149_v24 = vpop.f32.mrf.mxu0 }
 0x6b4   : > { %v6285_v51 = vpop.f32.mrf.mxu2 }
 0x6b5   : > { %v6217_v44 = vpop.f32.mrf.mxu1  ;;  %v6356_v2 = vpop.f32.mrf.mxu3  ;;  %v6286_v35 = vadd.f32 %v6285_v51, %v6213_v48 }
 0x6b6   : > { %v6357_v50 = vadd.f32 %v6356_v2, %v6284_v40  ;;  %v6218_v20 = vadd.f32 %v6217_v44, %v6144_v5  ;;  %v4869_v44 = vld [vmem:[#allocation8 + $0x1a8] sm:$0xff] }
 0x6b8   : > { %v6427_v23 = vadd.f32 %v6357_v50, %v4848_v22 }
 0x6ba   : > { %6502 = vst [vmem:[#allocation8 + $0x100] sm:$0xff] %v6427_v23 }
 0x6bb   : > { %v6152_v1 = vpop.f32.mrf.mxu0 }
 0x6bc   : > { %v6288_v3 = vpop.f32.mrf.mxu2 }
 0x6bd   : > { %v6220_v52 = vpop.f32.mrf.mxu1  ;;  %v6358_v43 = vpop.f32.mrf.mxu3  ;;  %v6289_v7 = vadd.f32 %v6288_v3, %v6216_v14 }
 0x6be   : > { %v6359_v49 = vadd.f32 %v6358_v43, %v6286_v35  ;;  %v6221_v27 = vadd.f32 %v6220_v52, %v6147_v42  ;;  %v4872_v52 = vld [vmem:[#allocation8 + $0x1c0] sm:$0xff] }
 0x6c0   : > { %v6430_v12 = vadd.f32 %v6359_v49, %v4851_v4 }
 0x6c2   : > { %6505 = vst [vmem:[#allocation8 + $0x118] sm:$0xff] %v6430_v12 }
 0x6c3   : > { %v6154_v21 = vpop.f32.mrf.mxu0 }
 0x6c4   : > { %v6290_v45 = vpop.f32.mrf.mxu2 }
 0x6c5   : > { %v6222_v19 = vpop.f32.mrf.mxu1  ;;  %v6361_v6 = vpop.f32.mrf.mxu3  ;;  %v6291_v15 = vadd.f32 %v6290_v45, %v6218_v20 }
 0x6c6   : > { %v6362_v53 = vadd.f32 %v6361_v6, %v6289_v7  ;;  %v6223_v17 = vadd.f32 %v6222_v19, %v6149_v24  ;;  %v4875_v19 = vld [vmem:[#allocation8 + $0x1d8] sm:$0xff] }
 0x6c8   : > { %v6433_v28 = vadd.f32 %v6362_v53, %v4854_v37 }
 0x6ca   : > { %6508 = vst [vmem:[#allocation8 + $0x130] sm:$0xff] %v6433_v28 }
 0x6cb   : > { %v6157_v54 = vpop.f32.mrf.mxu0 }
 0x6cc   : > { %v6293_v63 = vpop.f32.mrf.mxu2 }
 0x6cd   : > { %v6225_v59 = vpop.f32.mrf.mxu1  ;;  %v6363_v36 = vpop.f32.mrf.mxu3  ;;  %v6294_v32 = vadd.f32 %v6293_v63, %v6221_v27 }
 0x6ce   : > { %v6364_v60 = vadd.f32 %v6363_v36, %v6291_v15  ;;  %v6226_v46 = vadd.f32 %v6225_v59, %v6152_v1  ;;  %v4878_v59 = vld [vmem:[#allocation8 + $0x1f0] sm:$0xff] }
 0x6d0   : > { %v6436_v16 = vadd.f32 %v6364_v60, %v4857_v56 }
 0x6d2   : > { %6511 = vst [vmem:[#allocation8 + $0x148] sm:$0xff] %v6436_v16 }
 0x6d3   : > { %v6159_v39 = vpop.f32.mrf.mxu0 }
 0x6d4   : > { %v6295_v25 = vpop.f32.mrf.mxu2 }
 0x6d5   : > { %v6227_v13 = vpop.f32.mrf.mxu1  ;;  %v6366_v18 = vpop.f32.mrf.mxu3  ;;  %v6296_v61 = vadd.f32 %v6295_v25, %v6223_v17 }
 0x6d6   : > { %v6367_v62 = vadd.f32 %v6366_v18, %v6294_v32  ;;  %v6228_v42 = vadd.f32 %v6227_v13, %v6154_v21  ;;  %v4881_v13 = vld [vmem:[#allocation8 + $0x208] sm:$0xff] }
 0x6d8   : > { %v6439_v29 = vadd.f32 %v6367_v62, %v4860_v34 }
 0x6da   : > { %6514 = vst [vmem:[#allocation8 + $0x160] sm:$0xff] %v6439_v29 }
 0x6db   : > { %v6162_v5 = vpop.f32.mrf.mxu0 }
 0x6dc   : > { %v6298_v30 = vpop.f32.mrf.mxu2 }
 0x6dd   : > { %v6230_v11 = vpop.f32.mrf.mxu1  ;;  %v6368_v33 = vpop.f32.mrf.mxu3  ;;  %v6299_v47 = vadd.f32 %v6298_v30, %v6226_v46  ;;  %v4884_v30 = vld [vmem:[#allocation8 + $0x220] sm:$0xff] }
 0x6de   : > { %v6369_v31 = vadd.f32 %v6368_v33, %v6296_v61  ;;  %v6231_v50 = vadd.f32 %v6230_v11, %v6157_v54 }
 0x6e0   : > { %v6442_v58 = vadd.f32 %v6369_v31, %v4863_v0 }
 0x6e2   : > { %6517 = vst [vmem:[#allocation8 + $0x178] sm:$0xff] %v6442_v58  ;;  %v4887_v58 = vld [vmem:[#allocation8 + $0x238] sm:$0xff] }
 0x6e3   : > { %v6164_v57 = vpop.f32.mrf.mxu0 }
 0x6e4   : > { %v6300_v26 = vpop.f32.mrf.mxu2 }
 0x6e5   : > { %v6232_v9 = vpop.f32.mrf.mxu1  ;;  %v6371_v55 = vpop.f32.mrf.mxu3  ;;  %v6301_v41 = vadd.f32 %v6300_v26, %v6228_v42 }
 0x6e6   : > { %v6372_v8 = vadd.f32 %v6371_v55, %v6299_v47  ;;  %v6233_v1 = vadd.f32 %v6232_v9, %v6159_v39 }
 0x6e8   : > { %v6445_v10 = vadd.f32 %v6372_v8, %v4866_v38 }
 0x6ea   : > { %6520 = vst [vmem:[#allocation8 + $0x190] sm:$0xff] %v6445_v10 }
 0x6eb   : > { %v6167_v24 = vpop.f32.mrf.mxu0 }
 0x6ec   : > { %v6303_v40 = vpop.f32.mrf.mxu2 }
 0x6ed   : > { %v6235_v51 = vpop.f32.mrf.mxu1  ;;  %v6373_v22 = vpop.f32.mrf.mxu3  ;;  %v6304_v48 = vadd.f32 %v6303_v40, %v6231_v50 }
 0x6ee   : > { %v6374_v2 = vadd.f32 %v6373_v22, %v6301_v41  ;;  %v6236_v53 = vadd.f32 %v6235_v51, %v6162_v5 }
 0x6f0   : > { %v6448_v23 = vadd.f32 %v6374_v2, %v4869_v44 }
 0x6f2   : > { %6523 = vst [vmem:[#allocation8 + $0x1a8] sm:$0xff] %v6448_v23 }
 0x6f3   : > { %v6169_v49 = vpop.f32.mrf.mxu0 }
 0x6f4   : > { %v6305_v35 = vpop.f32.mrf.mxu2 }
 0x6f5   : > { %v6237_v3 = vpop.f32.mrf.mxu1  ;;  %v6376_v4 = vpop.f32.mrf.mxu3  ;;  %v6306_v12 = vadd.f32 %v6305_v35, %v6233_v1 }
 0x6f6   : > { %v6377_v43 = vadd.f32 %v6376_v4, %v6304_v48  ;;  %v6238_v54 = vadd.f32 %v6237_v3, %v6164_v57  ;;  %v4890_v57 = vld [vmem:[#allocation8 + $0x250] sm:$0xf] }
 0x6f8   : > { %v6451_v14 = vadd.f32 %v6377_v43, %v4872_v52 }
 0x6fa   : > { %6526 = vst [vmem:[#allocation8 + $0x1c0] sm:$0xff] %v6451_v14 }
 0x6fb   : > { %v6172_v21 = vpop.f32.mrf.mxu0 }
 0x6fc   : > { %v6308_v7 = vpop.f32.mrf.mxu2 }
 0x6fd   : > { %v6240_v45 = vpop.f32.mrf.mxu1  ;;  %v6378_v37 = vpop.f32.mrf.mxu3  ;;  %v6309_v20 = vadd.f32 %v6308_v7, %v6236_v53 }
 0x6fe   : > { %v6379_v6 = vadd.f32 %v6378_v37, %v6306_v12  ;;  %v6241_v62 = vadd.f32 %v6240_v45, %v6167_v24 }
 0x700   : > { %v6454_v28 = vadd.f32 %v6379_v6, %v4875_v19 }
 0x702   : > { %6529 = vst [vmem:[#allocation8 + $0x1d8] sm:$0xff] %v6454_v28 }
 0x703   : > { %v6174_v60 = vpop.f32.mrf.mxu0 }
 0x704   : > { %v6310_v15 = vpop.f32.mrf.mxu2 }
 0x705   : > { %v6242_v63 = vpop.f32.mrf.mxu1  ;;  %v6381_v56 = vpop.f32.mrf.mxu3  ;;  %v6311_v16 = vadd.f32 %v6310_v15, %v6238_v54 }
 0x706   : > { %v6382_v36 = vadd.f32 %v6381_v56, %v6309_v20  ;;  %v6243_v31 = vadd.f32 %v6242_v63, %v6169_v49 }
 0x708   : > { %v6457_v27 = vadd.f32 %v6382_v36, %v4878_v59 }
 0x70a   : > { %6532 = vst [vmem:[#allocation8 + $0x1f0] sm:$0xff] %v6457_v27 }
 0x70c   : > { %v6313_v32 = vpop.f32.mrf.mxu2 }
 0x70d   : > { %v6245_v25 = vpop.f32.mrf.mxu1  ;;  %v6383_v34 = vpop.f32.mrf.mxu3  ;;  %v6314_v29 = vadd.f32 %v6313_v32, %v6241_v62 }
 0x70e   : > { %v6384_v18 = vadd.f32 %v6383_v34, %v6311_v16  ;;  %v6246_v9 = vadd.f32 %v6245_v25, %v6172_v21 }
 0x710   : > { %v6460_v39 = vadd.f32 %v6384_v18, %v4881_v13 }
 0x712   : > { %6535 = vst [vmem:[#allocation8 + $0x208] sm:$0xff] %v6460_v39 }
 0x714   : > { %v6315_v17 = vpop.f32.mrf.mxu2 }
 0x715   : > { %v6247_v61 = vpop.f32.mrf.mxu1  ;;  %v6386_v11 = vpop.f32.mrf.mxu3  ;;  %v6316_v46 = vadd.f32 %v6315_v17, %v6243_v31 }
 0x716   : > { %v6387_v0 = vadd.f32 %v6386_v11, %v6314_v29 }
 0x718   : > { %v6463_v33 = vadd.f32 %v6387_v0, %v4884_v30 }
 0x71a   : > { %6538 = vst [vmem:[#allocation8 + $0x220] sm:$0xff] %v6463_v33 }
 0x71c   : > { %v6318_v5 = vpop.f32.mrf.mxu2 }
 0x71d   : > { %v6388_v47 = vpop.f32.mrf.mxu3  ;;  %v6319_v55 = vadd.f32 %v6318_v5, %v6246_v9 }
 0x71e   : > { %v6389_v26 = vadd.f32 %v6388_v47, %v6316_v46 }
 0x720   : > { %v6466_v38 = vadd.f32 %v6389_v26, %v4887_v58 }
 0x722   : > { %6541 = vst [vmem:[#allocation8 + $0x238] sm:$0xff] %v6466_v38 }
 0x724   : > { %v6320_v8 = vpop.f32.mrf.mxu2 }
 0x725   : > { %v6391_v10 = vpop.f32.mrf.mxu3 }
 0x726   : > { %v6392_v42 = vadd.f32 %v6391_v10, %v6319_v55 }
 0x728   : > { %v6469_v41 = vadd.f32 %v6392_v42, %v4890_v57 }
 0x729   : > { %6548 = sbr.rel (%p7370_p5) target bundleno = 1918 (0x77e), region = 52 }
 0x72a   : > { %6544 = vst [vmem:[#allocation8 + $0x250] sm:$0xf] %v6469_v41 }
 0x72d   : > { %v6393_v40 = vpop.f32.mrf.mxu3 }
 0x72e   : > { %v6549_v51 = vld [vmem:[#allocation8] sm:$0xff]  ;;  %v6624_v44 = vld [vmem:[#allocation7] sm:$0x7]  ;;  %v6550_v22 = vld [vmem:[#allocation8 + $0x8] sm:$0xff] }
 0x72f   : > { %v12692_v2 = vperm.slane %v6624_v44, 0  ;;  %v12694_v50 = vperm.slane %v6624_v44, 1  ;;  %v6551_v24 = vld [vmem:[#allocation8 + $0x10] sm:$0xff]  ;;  %v12696_v23 = vperm.slane %v6624_v44, 2  ;;  %v6552_v48 = vld [vmem:[#allocation8 + $0x18] sm:$0xff]  ;;  %v6553_v35 = vld [vmem:[#allocation8 + $0x20] sm:$0xff] }
 0x730   : > { %v6554_v43 = vld [vmem:[#allocation8 + $0x28] sm:$0xff]  ;;  %v6555_v14 = vld [vmem:[#allocation8 + $0x30] sm:$0xff]  ;;  %v6556_v12 = vld [vmem:[#allocation8 + $0x38] sm:$0xff] }
 0x731   : > { %v6632_v3 = vadd.f32 %v12692_v2, %v6549_v51  ;;  %v6633_v52 = vadd.f32 %v12694_v50, %v6550_v22  ;;  %v6634_v4 = vadd.f32 %v12696_v23, %v6551_v24  ;;  %v6635_v49 = vadd.f32 %v12692_v2, %v6552_v48  ;;  %v6557_v45 = vld [vmem:[#allocation8 + $0x40] sm:$0xff]  ;;  %v6558_v37 = vld [vmem:[#allocation8 + $0x48] sm:$0xff]  ;;  %v6559_v53 = vld [vmem:[#allocation8 + $0x50] sm:$0xff] }
 0x732   : > { %v6636_v1 = vadd.f32 %v12694_v50, %v6553_v35  ;;  %v6637_v7 = vadd.f32 %v12696_v23, %v6554_v43  ;;  %v6638_v19 = vadd.f32 %v12692_v2, %v6555_v14  ;;  %v6639_v6 = vadd.f32 %v12694_v50, %v6556_v12  ;;  %v6560_v28 = vld [vmem:[#allocation8 + $0x58] sm:$0xff]  ;;  %v6561_v15 = vld [vmem:[#allocation8 + $0x60] sm:$0xff]  ;;  %v6562_v59 = vld [vmem:[#allocation8 + $0x68] sm:$0xff] }
 0x733   : > { %6707 = vst [vmem:[#allocation8] sm:$0xff] %v6632_v3  ;;  %v6640_v21 = vadd.f32 %v12696_v23, %v6557_v45  ;;  %v6641_v20 = vadd.f32 %v12692_v2, %v6558_v37  ;;  %v6642_v63 = vadd.f32 %v12694_v50, %v6559_v53  ;;  %v6643_v56 = vadd.f32 %v12696_v23, %v6560_v28  ;;  %v6563_v36 = vld [vmem:[#allocation8 + $0x70] sm:$0xff]  ;;  %v6564_v27 = vld [vmem:[#allocation8 + $0x78] sm:$0xff]  ;;  %v6565_v16 = vld [vmem:[#allocation8 + $0x80] sm:$0xff] }
 0x734   : > { %6708 = vst [vmem:[#allocation8 + $0x8] sm:$0xff] %v6633_v52  ;;  %v6644_v60 = vadd.f32 %v12692_v2, %v6561_v15  ;;  %v6645_v54 = vadd.f32 %v12694_v50, %v6562_v59  ;;  %v6646_v32 = vadd.f32 %v12696_v23, %v6563_v36  ;;  %v6566_v25 = vld [vmem:[#allocation8 + $0x88] sm:$0xff]  ;;  %v6647_v13 = vadd.f32 %v12692_v2, %v6564_v27  ;;  %v6567_v34 = vld [vmem:[#allocation8 + $0x90] sm:$0xff]  ;;  %v6568_v62 = vld [vmem:[#allocation8 + $0x98] sm:$0xff] }
 0x735   : > { %6709 = vst [vmem:[#allocation8 + $0x10] sm:$0xff] %v6634_v4  ;;  %v6648_v18 = vadd.f32 %v12694_v50, %v6565_v16  ;;  %v6649_v39 = vadd.f32 %v12696_v23, %v6566_v25  ;;  %v6569_v29 = vld [vmem:[#allocation8 + $0xa0] sm:$0xff]  ;;  %v6650_v17 = vadd.f32 %v12692_v2, %v6567_v34  ;;  %v6570_v61 = vld [vmem:[#allocation8 + $0xa8] sm:$0xff]  ;;  %v6651_v30 = vadd.f32 %v12694_v50, %v6568_v62  ;;  %v6571_v11 = vld [vmem:[#allocation8 + $0xb0] sm:$0xff] }
 0x736   : > { %6710 = vst [vmem:[#allocation8 + $0x18] sm:$0xff] %v6635_v49  ;;  %v6652_v0 = vadd.f32 %v12696_v23, %v6569_v29  ;;  %v6572_v33 = vld [vmem:[#allocation8 + $0xb8] sm:$0xff]  ;;  %v6653_v31 = vadd.f32 %v12692_v2, %v6570_v61  ;;  %v6573_v46 = vld [vmem:[#allocation8 + $0xc0] sm:$0xff]  ;;  %v6654_v5 = vadd.f32 %v12694_v50, %v6571_v11  ;;  %v6574_v58 = vld [vmem:[#allocation8 + $0xc8] sm:$0xff] }
 0x737   : > { %6711 = vst [vmem:[#allocation8 + $0x20] sm:$0xff] %v6636_v1  ;;  %v6655_v47 = vadd.f32 %v12696_v23, %v6572_v33  ;;  %v6575_v26 = vld [vmem:[#allocation8 + $0xd0] sm:$0xff]  ;;  %v6656_v9 = vadd.f32 %v12692_v2, %v6573_v46  ;;  %v6576_v38 = vld [vmem:[#allocation8 + $0xd8] sm:$0xff]  ;;  %v6657_v55 = vadd.f32 %v12694_v50, %v6574_v58  ;;  %v6577_v8 = vld [vmem:[#allocation8 + $0xe0] sm:$0xff] }
 0x738   : > { %6712 = vst [vmem:[#allocation8 + $0x28] sm:$0xff] %v6637_v7  ;;  %v6658_v57 = vadd.f32 %v12696_v23, %v6575_v26  ;;  %v6578_v10 = vld [vmem:[#allocation8 + $0xe8] sm:$0xff]  ;;  %v6659_v42 = vadd.f32 %v12692_v2, %v6576_v38  ;;  %v6579_v41 = vld [vmem:[#allocation8 + $0xf0] sm:$0xff]  ;;  %v6660_v40 = vadd.f32 %v12694_v50, %v6577_v8  ;;  %v6580_v51 = vld [vmem:[#allocation8 + $0xf8] sm:$0xff] }
 0x739   : > { %6713 = vst [vmem:[#allocation8 + $0x30] sm:$0xff] %v6638_v19  ;;  %v6661_v44 = vadd.f32 %v12696_v23, %v6578_v10  ;;  %v6581_v22 = vld [vmem:[#allocation8 + $0x100] sm:$0xff]  ;;  %v6662_v24 = vadd.f32 %v12692_v2, %v6579_v41  ;;  %v6582_v48 = vld [vmem:[#allocation8 + $0x108] sm:$0xff]  ;;  %v6663_v35 = vadd.f32 %v12694_v50, %v6580_v51  ;;  %v6583_v3 = vld [vmem:[#allocation8 + $0x110] sm:$0xff] }
 0x73a   : > { %6714 = vst [vmem:[#allocation8 + $0x38] sm:$0xff] %v6639_v6  ;;  %v6664_v52 = vadd.f32 %v12696_v23, %v6581_v22  ;;  %v6584_v4 = vld [vmem:[#allocation8 + $0x118] sm:$0xff]  ;;  %v6665_v43 = vadd.f32 %v12692_v2, %v6582_v48  ;;  %v6585_v49 = vld [vmem:[#allocation8 + $0x120] sm:$0xff]  ;;  %v6666_v14 = vadd.f32 %v12694_v50, %v6583_v3  ;;  %v6586_v1 = vld [vmem:[#allocation8 + $0x128] sm:$0xff] }
 0x73b   : > { %6715 = vst [vmem:[#allocation8 + $0x40] sm:$0xff] %v6640_v21  ;;  %v6667_v12 = vadd.f32 %v12696_v23, %v6584_v4  ;;  %v6587_v7 = vld [vmem:[#allocation8 + $0x130] sm:$0xff]  ;;  %v6668_v45 = vadd.f32 %v12692_v2, %v6585_v49  ;;  %v6588_v19 = vld [vmem:[#allocation8 + $0x138] sm:$0xff]  ;;  %v6669_v37 = vadd.f32 %v12694_v50, %v6586_v1  ;;  %v6589_v6 = vld [vmem:[#allocation8 + $0x140] sm:$0xff] }
 0x73c   : > { %6716 = vst [vmem:[#allocation8 + $0x48] sm:$0xff] %v6641_v20  ;;  %v6670_v53 = vadd.f32 %v12696_v23, %v6587_v7  ;;  %v6590_v21 = vld [vmem:[#allocation8 + $0x148] sm:$0xff]  ;;  %v6671_v28 = vadd.f32 %v12692_v2, %v6588_v19  ;;  %v6591_v20 = vld [vmem:[#allocation8 + $0x150] sm:$0xff]  ;;  %v6672_v15 = vadd.f32 %v12694_v50, %v6589_v6 }
 0x73d   : > { %6717 = vst [vmem:[#allocation8 + $0x50] sm:$0xff] %v6642_v63  ;;  %v6592_v63 = vld [vmem:[#allocation8 + $0x158] sm:$0xff]  ;;  %v6673_v59 = vadd.f32 %v12696_v23, %v6590_v21  ;;  %v6674_v36 = vadd.f32 %v12692_v2, %v6591_v20 }
 0x73e   : > { %6718 = vst [vmem:[#allocation8 + $0x58] sm:$0xff] %v6643_v56  ;;  %v6593_v56 = vld [vmem:[#allocation8 + $0x160] sm:$0xff]  ;;  %v6675_v27 = vadd.f32 %v12694_v50, %v6592_v63 }
 0x73f   : > { %6719 = vst [vmem:[#allocation8 + $0x60] sm:$0xff] %v6644_v60  ;;  %v6594_v60 = vld [vmem:[#allocation8 + $0x168] sm:$0xff]  ;;  %v6676_v16 = vadd.f32 %v12696_v23, %v6593_v56 }
 0x740   : > { %6720 = vst [vmem:[#allocation8 + $0x68] sm:$0xff] %v6645_v54  ;;  %v6595_v54 = vld [vmem:[#allocation8 + $0x170] sm:$0xff]  ;;  %v6677_v25 = vadd.f32 %v12692_v2, %v6594_v60 }
 0x741   : > { %6721 = vst [vmem:[#allocation8 + $0x70] sm:$0xff] %v6646_v32  ;;  %v6596_v32 = vld [vmem:[#allocation8 + $0x178] sm:$0xff]  ;;  %v6678_v34 = vadd.f32 %v12694_v50, %v6595_v54 }
 0x742   : > { %6722 = vst [vmem:[#allocation8 + $0x78] sm:$0xff] %v6647_v13  ;;  %v6597_v13 = vld [vmem:[#allocation8 + $0x180] sm:$0xff]  ;;  %v6679_v62 = vadd.f32 %v12696_v23, %v6596_v32 }
 0x743   : > { %6723 = vst [vmem:[#allocation8 + $0x80] sm:$0xff] %v6648_v18  ;;  %v6598_v18 = vld [vmem:[#allocation8 + $0x188] sm:$0xff]  ;;  %v6680_v29 = vadd.f32 %v12692_v2, %v6597_v13 }
 0x744   : > { %6724 = vst [vmem:[#allocation8 + $0x88] sm:$0xff] %v6649_v39  ;;  %v6599_v39 = vld [vmem:[#allocation8 + $0x190] sm:$0xff]  ;;  %v6681_v61 = vadd.f32 %v12694_v50, %v6598_v18 }
 0x745   : > { %6725 = vst [vmem:[#allocation8 + $0x90] sm:$0xff] %v6650_v17  ;;  %v6600_v17 = vld [vmem:[#allocation8 + $0x198] sm:$0xff]  ;;  %v6682_v11 = vadd.f32 %v12696_v23, %v6599_v39 }
 0x746   : > { %6726 = vst [vmem:[#allocation8 + $0x98] sm:$0xff] %v6651_v30  ;;  %v6601_v30 = vld [vmem:[#allocation8 + $0x1a0] sm:$0xff]  ;;  %v6683_v33 = vadd.f32 %v12692_v2, %v6600_v17 }
 0x747   : > { %6727 = vst [vmem:[#allocation8 + $0xa0] sm:$0xff] %v6652_v0  ;;  %v6602_v0 = vld [vmem:[#allocation8 + $0x1a8] sm:$0xff]  ;;  %v6684_v46 = vadd.f32 %v12694_v50, %v6601_v30 }
 0x748   : > { %6728 = vst [vmem:[#allocation8 + $0xa8] sm:$0xff] %v6653_v31  ;;  %v6603_v31 = vld [vmem:[#allocation8 + $0x1b0] sm:$0xff]  ;;  %v6685_v58 = vadd.f32 %v12696_v23, %v6602_v0 }
 0x749   : > { %6729 = vst [vmem:[#allocation8 + $0xb0] sm:$0xff] %v6654_v5  ;;  %v6604_v5 = vld [vmem:[#allocation8 + $0x1b8] sm:$0xff]  ;;  %v6686_v26 = vadd.f32 %v12692_v2, %v6603_v31 }
 0x74a   : > { %6730 = vst [vmem:[#allocation8 + $0xb8] sm:$0xff] %v6655_v47  ;;  %v6605_v47 = vld [vmem:[#allocation8 + $0x1c0] sm:$0xff]  ;;  %v6687_v38 = vadd.f32 %v12694_v50, %v6604_v5 }
 0x74b   : > { %6731 = vst [vmem:[#allocation8 + $0xc0] sm:$0xff] %v6656_v9  ;;  %v6606_v9 = vld [vmem:[#allocation8 + $0x1c8] sm:$0xff]  ;;  %v6688_v8 = vadd.f32 %v12696_v23, %v6605_v47 }
 0x74c   : > { %6732 = vst [vmem:[#allocation8 + $0xc8] sm:$0xff] %v6657_v55  ;;  %v6607_v55 = vld [vmem:[#allocation8 + $0x1d0] sm:$0xff]  ;;  %v6689_v10 = vadd.f32 %v12692_v2, %v6606_v9 }
 0x74d   : > { %6733 = vst [vmem:[#allocation8 + $0xd0] sm:$0xff] %v6658_v57  ;;  %v6608_v57 = vld [vmem:[#allocation8 + $0x1d8] sm:$0xff]  ;;  %v6690_v41 = vadd.f32 %v12694_v50, %v6607_v55 }
 0x74e   : > { %6734 = vst [vmem:[#allocation8 + $0xd8] sm:$0xff] %v6659_v42  ;;  %v6609_v42 = vld [vmem:[#allocation8 + $0x1e0] sm:$0xff]  ;;  %v6691_v51 = vadd.f32 %v12696_v23, %v6608_v57 }
 0x74f   : > { %6735 = vst [vmem:[#allocation8 + $0xe0] sm:$0xff] %v6660_v40  ;;  %v6610_v40 = vld [vmem:[#allocation8 + $0x1e8] sm:$0xff]  ;;  %v6692_v22 = vadd.f32 %v12692_v2, %v6609_v42 }
 0x750   : > { %6736 = vst [vmem:[#allocation8 + $0xe8] sm:$0xff] %v6661_v44  ;;  %v6611_v44 = vld [vmem:[#allocation8 + $0x1f0] sm:$0xff]  ;;  %v6693_v48 = vadd.f32 %v12694_v50, %v6610_v40 }
 0x751   : > { %6737 = vst [vmem:[#allocation8 + $0xf0] sm:$0xff] %v6662_v24  ;;  %v6612_v24 = vld [vmem:[#allocation8 + $0x1f8] sm:$0xff]  ;;  %v6694_v3 = vadd.f32 %v12696_v23, %v6611_v44 }
 0x752   : > { %6738 = vst [vmem:[#allocation8 + $0xf8] sm:$0xff] %v6663_v35  ;;  %v6613_v35 = vld [vmem:[#allocation8 + $0x200] sm:$0xff]  ;;  %v6695_v4 = vadd.f32 %v12692_v2, %v6612_v24 }
 0x753   : > { %6739 = vst [vmem:[#allocation8 + $0x100] sm:$0xff] %v6664_v52  ;;  %v6614_v52 = vld [vmem:[#allocation8 + $0x208] sm:$0xff]  ;;  %v6696_v49 = vadd.f32 %v12694_v50, %v6613_v35 }
 0x754   : > { %6740 = vst [vmem:[#allocation8 + $0x108] sm:$0xff] %v6665_v43  ;;  %v6615_v43 = vld [vmem:[#allocation8 + $0x210] sm:$0xff]  ;;  %v6697_v1 = vadd.f32 %v12696_v23, %v6614_v52 }
 0x755   : > { %6741 = vst [vmem:[#allocation8 + $0x110] sm:$0xff] %v6666_v14  ;;  %v6616_v14 = vld [vmem:[#allocation8 + $0x218] sm:$0xff]  ;;  %v6698_v7 = vadd.f32 %v12692_v2, %v6615_v43 }
 0x756   : > { %6742 = vst [vmem:[#allocation8 + $0x118] sm:$0xff] %v6667_v12  ;;  %v6617_v12 = vld [vmem:[#allocation8 + $0x220] sm:$0xff]  ;;  %v6699_v19 = vadd.f32 %v12694_v50, %v6616_v14 }
 0x757   : > { %6743 = vst [vmem:[#allocation8 + $0x120] sm:$0xff] %v6668_v45  ;;  %v6618_v45 = vld [vmem:[#allocation8 + $0x228] sm:$0xff]  ;;  %v6700_v6 = vadd.f32 %v12696_v23, %v6617_v12 }
 0x758   : > { %6744 = vst [vmem:[#allocation8 + $0x128] sm:$0xff] %v6669_v37  ;;  %v6619_v37 = vld [vmem:[#allocation8 + $0x230] sm:$0xff]  ;;  %v6701_v21 = vadd.f32 %v12692_v2, %v6618_v45 }
 0x759   : > { %6745 = vst [vmem:[#allocation8 + $0x130] sm:$0xff] %v6670_v53  ;;  %v6620_v53 = vld [vmem:[#allocation8 + $0x238] sm:$0xff]  ;;  %v6702_v20 = vadd.f32 %v12694_v50, %v6619_v37 }
 0x75a   : > { %6746 = vst [vmem:[#allocation8 + $0x138] sm:$0xff] %v6671_v28  ;;  %v6621_v28 = vld [vmem:[#allocation8 + $0x240] sm:$0xf]  ;;  %v6703_v63 = vadd.f32 %v12696_v23, %v6620_v53 }
 0x75b   : > { %6747 = vst [vmem:[#allocation8 + $0x140] sm:$0xff] %v6672_v15  ;;  %v6622_v15 = vld [vmem:[#allocation8 + $0x248] sm:$0xf]  ;;  %v6704_v56 = vadd.f32 %v12692_v2, %v6621_v28 }
 0x75c   : > { %6748 = vst [vmem:[#allocation8 + $0x148] sm:$0xff] %v6673_v59  ;;  %v6623_v59 = vld [vmem:[#allocation8 + $0x250] sm:$0xf] }
 0x75d   : > { %6749 = vst [vmem:[#allocation8 + $0x150] sm:$0xff] %v6674_v36  ;;  %v6705_v36 = vadd.f32 %v12694_v50, %v6622_v15  ;;  %v6706_v60 = vadd.f32 %v12696_v23, %v6623_v59 }
 0x75e   : > { %6750 = vst [vmem:[#allocation8 + $0x158] sm:$0xff] %v6675_v27 }
 0x75f   : > { %6751 = vst [vmem:[#allocation8 + $0x160] sm:$0xff] %v6676_v16 }
 0x760   : > { %6752 = vst [vmem:[#allocation8 + $0x168] sm:$0xff] %v6677_v25 }
 0x761   : > { %6753 = vst [vmem:[#allocation8 + $0x170] sm:$0xff] %v6678_v34 }
 0x762   : > { %6754 = vst [vmem:[#allocation8 + $0x178] sm:$0xff] %v6679_v62 }
 0x763   : > { %6755 = vst [vmem:[#allocation8 + $0x180] sm:$0xff] %v6680_v29 }
 0x764   : > { %6756 = vst [vmem:[#allocation8 + $0x188] sm:$0xff] %v6681_v61 }
 0x765   : > { %6757 = vst [vmem:[#allocation8 + $0x190] sm:$0xff] %v6682_v11 }
 0x766   : > { %6758 = vst [vmem:[#allocation8 + $0x198] sm:$0xff] %v6683_v33 }
 0x767   : > { %6759 = vst [vmem:[#allocation8 + $0x1a0] sm:$0xff] %v6684_v46 }
 0x768   : > { %6760 = vst [vmem:[#allocation8 + $0x1a8] sm:$0xff] %v6685_v58 }
 0x769   : > { %6761 = vst [vmem:[#allocation8 + $0x1b0] sm:$0xff] %v6686_v26 }
 0x76a   : > { %6762 = vst [vmem:[#allocation8 + $0x1b8] sm:$0xff] %v6687_v38 }
 0x76b   : > { %6763 = vst [vmem:[#allocation8 + $0x1c0] sm:$0xff] %v6688_v8 }
 0x76c   : > { %6764 = vst [vmem:[#allocation8 + $0x1c8] sm:$0xff] %v6689_v10 }
 0x76d   : > { %6765 = vst [vmem:[#allocation8 + $0x1d0] sm:$0xff] %v6690_v41 }
 0x76e   : > { %6766 = vst [vmem:[#allocation8 + $0x1d8] sm:$0xff] %v6691_v51 }
 0x76f   : > { %6767 = vst [vmem:[#allocation8 + $0x1e0] sm:$0xff] %v6692_v22 }
 0x770   : > { %6768 = vst [vmem:[#allocation8 + $0x1e8] sm:$0xff] %v6693_v48 }
 0x771   : > { %6769 = vst [vmem:[#allocation8 + $0x1f0] sm:$0xff] %v6694_v3 }
 0x772   : > { %6770 = vst [vmem:[#allocation8 + $0x1f8] sm:$0xff] %v6695_v4 }
 0x773   : > { %6771 = vst [vmem:[#allocation8 + $0x200] sm:$0xff] %v6696_v49 }
 0x774   : > { %6772 = vst [vmem:[#allocation8 + $0x208] sm:$0xff] %v6697_v1 }
 0x775   : > { %6773 = vst [vmem:[#allocation8 + $0x210] sm:$0xff] %v6698_v7 }
 0x776   : > { %6774 = vst [vmem:[#allocation8 + $0x218] sm:$0xff] %v6699_v19 }
 0x777   : > { %6775 = vst [vmem:[#allocation8 + $0x220] sm:$0xff] %v6700_v6 }
 0x778   : > { %6776 = vst [vmem:[#allocation8 + $0x228] sm:$0xff] %v6701_v21 }
 0x779   : > { %6777 = vst [vmem:[#allocation8 + $0x230] sm:$0xff] %v6702_v20 }
 0x77a   : > { %6778 = vst [vmem:[#allocation8 + $0x238] sm:$0xff] %v6703_v63 }
 0x77b   : > { %6779 = vst [vmem:[#allocation8 + $0x240] sm:$0xf] %v6704_v56 }
 0x77c   : > { %6780 = vst [vmem:[#allocation8 + $0x248] sm:$0xf] %v6705_v36 }
 0x77d   : > { %6781 = vst [vmem:[#allocation8 + $0x250] sm:$0xf] %v6706_v60 }
 0x77e PF: > { %p7503_p8 = scmp.eq.s32.totalorder %s7964_s16, 2  ;;  %s7922_s22 = smov [#allocation8]  }
 0x77f   : > { %s6787_s23 = sshll.u32 %s7922_s22, 4  ;;  %s6789_s25 = sshll.u32 %s12793_s3, 4  ;;  %s6788_s23 = int_to_ptr.vmem [resolvable:$true] %s6787_s23  ;;  %s6790_s25 = int_to_ptr.hbm [resolvable:$true] %s6789_s25 }
 0x780   : > { %s7923_s26 = smov 384   ;;  %s7924_s27 = smov 24  }
 0x781   : > { %7486 = dma.vmem_to_hbm [thread:$0]  (%p7503_p8), %s6788_s23, 9600, %s6790_s25, [#allocation4], %s7923_s26, %s7923_s26, %s7924_s27  }
 0x782   : > { %7895 = dma.done.wait (%p7503_p8), [#allocation4], 9600  }
 0x783   : > { %7897 = vsyncadd (%p7503_p8), [#allocation4], 4294957696 }
 0x784 PF: > { %p17_p9 = scmp.ge.s32.totalorder %s7967_s17, 5   ;;  %s13262_s12 = smov %s7904_s13 }
 0x785   : > { %s13263_s13 = smov %s7908_s14  ;;  %s13264_s14 = smov %s7977_s20 }
 0x786   : > { %s13265_s15 = smov %s7967_s17  ;;  %19 = sbr.rel (!%p17_p9) target bundleno = 8 (0x8), region = 94 }
 0x78b   :  { %6806 = vsyncpa [#allocation3], 1 }
 0x78c   :  { %6808 = vsyncpa [#allocation3 + $0x1], 1 }
 0x78d   :  { %6809 = vsyncpa [#allocation6], 1 }
 0x78e   :  { %6811 = vsyncpa [#allocation6 + $0x1], 1 }
 0x78f   :  { %6812 = vsyncpa [#allocation4], 1 }
 0x790   :  { %6814 = vsyncpa [#allocation4 + $0x1], 1 }

</bundles_post_ra>
